<compile_context>
chip_gen: v5e
topology: v5e:2x2
jax: 0.10.0
libtpu: 0.0.40
codegen_flags: <defaults>
</compile_context>

<pallas_src>
import functools

import jax
import jax.numpy as jnp
from jax import lax
from jax.experimental import pallas as pl
from jax.experimental.pallas import tpu as pltpu

# Set to jnp.bfloat16 on v5e/v6e/v7x for ~2x MXU rate and halved operand DMA bytes
# (accumulation stays f32 via preferred_element_type).  Kept f32 for exactness here.
MXU_INPUT_DTYPE = jnp.float32


def _mxu(x):
    return x.astype(MXU_INPUT_DTYPE) if MXU_INPUT_DTYPE != jnp.float32 else x


def _round_up(x, m):
    return (x + m - 1) // m * m


# --------------------------------------------------------------------------------------
# Generic fused linear:  y = act(x @ W^T + b)   (weight pre-transposed to (In, Out))
# --------------------------------------------------------------------------------------
def _linear_kernel(act, x_ref, w_ref, b_ref, o_ref):
    y = jnp.dot(_mxu(x_ref[...]), _mxu(w_ref[...]),
                preferred_element_type=jnp.float32) + b_ref[...]
    if act == "elu":
        y = jnp.where(y > 0, y, jnp.exp(y) - 1.0)
    o_ref[...] = y


def pallas_linear(x, w, b, act="none", row_tile=512):
    """y = act(x @ w.T + b);  x:(N,In)  w:(Out,In)  b:(Out,)  ->  (N,Out).

    Rows tiled over the grid; weight (transposed once to a standard (In,Out) MXU RHS)
    stays VMEM-resident across row tiles.  N is padded with zero rows to a multiple of the
    tile so no garbage ever reaches the ELU branch.
    """
    N, In = x.shape
    Out = w.shape[0]
    tile = min(_round_up(N, 8), row_tile)
    Np = _round_up(N, tile)
    if Np != N:
        x = jnp.pad(x, ((0, Np - N), (0, 0)))
    y = pl.pallas_call(
        functools.partial(_linear_kernel, act),
        grid=(Np // tile,),
        in_specs=[pl.BlockSpec((tile, In), lambda i: (i, 0)),
                  pl.BlockSpec((In, Out), lambda i: (0, 0)),
                  pl.BlockSpec((1, Out), lambda i: (0, 0))],
        out_specs=pl.BlockSpec((tile, Out), lambda i: (i, 0)),
        out_shape=jax.ShapeDtypeStruct((Np, Out), jnp.float32),
        compiler_params=pltpu.CompilerParams(dimension_semantics=("parallel",)),
    )(x, w.T, b.reshape(1, Out))
    return y[:N] if Np != N else y


# --------------------------------------------------------------------------------------
# Fused LSTM recurrence: whole time loop (and both directions) inside ONE kernel.
#   gx     : (T, Bp, ndir*4H)  precomputed x @ W_ih^T + b     (VMEM-resident)
#   w_hh_t : (ndir*H, 4H)      stacked, pre-transposed W_hh   (VMEM-resident)
#   mask   : (T, Bp, 1)        1 = valid token
#   h0/c0  : (ndir, Bp, H)
# Outputs: (T, Bp, ndir*H) sequence ([fwd|bwd] on features), (ndir, Bp, H) final cell.
# Direction 0 runs forward in time, direction 1 (if present) reversed.
# NOTE: for production T/B/H re-budget VMEM (v7x has 64 MiB) and chunk T if needed.
# --------------------------------------------------------------------------------------
def _lstm_seq_kernel(gx_ref, whh_ref, m_ref, h0_ref, c0_ref, out_ref, cfin_ref):
    T = gx_ref.shape[0]
    ndir, _, H = h0_ref.shape
    H4 = 4 * H
    # per-direction recurrent weights, hoisted out of the time loop
    whh = [whh_ref[d * H:(d + 1) * H, :] for d in range(ndir)]

    def step(s, carry):
        new_carry = []
        for d in range(ndir):                       # static python loop over directions
            h, c = carry[2 * d], carry[2 * d + 1]
            tt = s if d == 0 else T - 1 - s         # reverse direction walks backwards
            row = gx_ref[tt]                        # (Bp, ndir*4H)
            gates = row[:, d * H4:(d + 1) * H4] + jnp.dot(
                h, whh[d], preferred_element_type=jnp.float32)
            i = jax.nn.sigmoid(gates[:, 0:H])
            f = jax.nn.sigmoid(gates[:, H:2 * H])
            g = jnp.tanh(gates[:, 2 * H:3 * H])
            o = jax.nn.sigmoid(gates[:, 3 * H:4 * H])
            c_new = f * c + i * g
            h_new = o * jnp.tanh(c_new)
            valid = m_ref[tt] > 0.5                 # (Bp, 1)
            h = jnp.where(valid, h_new, h)          # freeze state past sequence end
            c = jnp.where(valid, c_new, c)
            # pad_packed_sequence pads outputs with zeros past the sequence end
            out_ref[tt, :, d * H:(d + 1) * H] = jnp.where(valid, h_new, 0.0)
            new_carry += [h, c]
        return tuple(new_carry)

    init = []
    for d in range(ndir):
        init += [h0_ref[d], c0_ref[d]]
    final = lax.fori_loop(0, T, step, tuple(init), unroll=(T <= 8))
    for d in range(ndir):
        cfin_ref[d] = final[2 * d + 1]


def pallas_lstm_seq(gx, whh_t, mask, h0, c0):
    T, Bp, G = gx.shape
    ndir, _, H = h0.shape
    return pl.pallas_call(
        _lstm_seq_kernel,
        grid=(1,),
        in_specs=[pl.BlockSpec((T, Bp, G), lambda i: (0, 0, 0)),
                  pl.BlockSpec((ndir * H, 4 * H), lambda i: (0, 0)),
                  pl.BlockSpec((T, Bp, 1), lambda i: (0, 0, 0)),
                  pl.BlockSpec((ndir, Bp, H), lambda i: (0, 0, 0)),
                  pl.BlockSpec((ndir, Bp, H), lambda i: (0, 0, 0))],
        out_specs=(pl.BlockSpec((T, Bp, ndir * H), lambda i: (0, 0, 0)),
                   pl.BlockSpec((ndir, Bp, H), lambda i: (0, 0, 0))),
        out_shape=(jax.ShapeDtypeStruct((T, Bp, ndir * H), jnp.float32),
                   jax.ShapeDtypeStruct((ndir, Bp, H), jnp.float32)),
        compiler_params=pltpu.CompilerParams(dimension_semantics=("arbitrary",)),
    )(gx, whh_t, mask, h0, c0)


def run_bilstm_layer(x_tm, mask_tm, w_ih_f, w_hh_f, b_f, w_ih_r, w_hh_r, b_r):
    """One bidirectional layer.  x_tm: (T, Bp, In) time-major, batch padded to 8.
    One stacked input-projection matmul + one fused recurrence kernel (both directions)."""
    T, Bp, In = x_tm.shape
    H = w_hh_f.shape[1]
    w_stack = jnp.concatenate([w_ih_f, w_ih_r], axis=0)                # (8H, In)
    b_stack = jnp.concatenate([b_f, b_r], axis=0)                      # (8H,)
    gx = pallas_linear(x_tm.reshape(T * Bp, In), w_stack, b_stack)     # (T*Bp, 8H)
    gx = gx.reshape(T, Bp, 8 * H)                                      # free view
    whh_t = jnp.concatenate([w_hh_f.T, w_hh_r.T], axis=0)              # (2H, 4H)
    zeros = jnp.zeros((2, Bp, H), jnp.float32)
    y, c_fin = pallas_lstm_seq(gx, whh_t, mask_tm, zeros, zeros)
    return y, c_fin                                                    # (T,Bp,2H), (2,Bp,H)


def run_lstm_layer(x_tm, mask_tm, w_ih, w_hh, b, h0, c0):
    """One unidirectional layer with (possibly nonzero) initial state.  x_tm: (T, Bp, In)."""
    T, Bp, In = x_tm.shape
    H = w_hh.shape[1]
    gx = pallas_linear(x_tm.reshape(T * Bp, In), w_ih, b).reshape(T, Bp, 4 * H)
    y, _ = pallas_lstm_seq(gx, w_hh.T, mask_tm, h0[None], c0[None])
    return y                                                           # (T, Bp, H)


# --------------------------------------------------------------------------------------
# Biaffine arc attention (num_labels = 1).  d@U / W_d hoisted batch-wide, W_e term hoisted
# to a tiny XLA matmul; the kernel does only the batched score matmul + adds + mask over
# a block of examples per grid step.
# --------------------------------------------------------------------------------------
def _biatt_kernel(du_ref, e_ref, ad_ref, ae_ref, md_ref, me_ref, o_ref):
    s = jnp.einsum('bqa,bka->bqk', _mxu(du_ref[...]), _mxu(e_ref[...]),
                   preferred_element_type=jnp.float32)
    o_ref[...] = (s + ad_ref[...] + ae_ref[...]) * (md_ref[...] * me_ref[...])


def pallas_biattention(du, arc_c, add_d, add_e, mask_d, mask_e, batch_block=8):
    B, Ld, A = du.shape
    Le = arc_c.shape[1]
    bblk = min(batch_block, B)
    Bp = _round_up(B, bblk)

    def bpad(x):
        return jnp.pad(x, ((0, Bp - B),) + ((0, 0),) * (x.ndim - 1)) if Bp != B else x

    md = mask_d.reshape(B, Ld, 1).astype(jnp.float32)
    me = mask_e.reshape(B, 1, Le).astype(jnp.float32)
    du, arc_c, add_d, add_e, md, me = map(bpad, (du, arc_c, add_d, add_e, md, me))
    out = pl.pallas_call(
        _biatt_kernel,
        grid=(Bp // bblk,),
        in_specs=[pl.BlockSpec((bblk, Ld, A), lambda i: (i, 0, 0)),
                  pl.BlockSpec((bblk, Le, A), lambda i: (i, 0, 0)),
                  pl.BlockSpec((bblk, Ld, 1), lambda i: (i, 0, 0)),
                  pl.BlockSpec((bblk, 1, Le), lambda i: (i, 0, 0)),
                  pl.BlockSpec((bblk, Ld, 1), lambda i: (i, 0, 0)),
                  pl.BlockSpec((bblk, 1, Le), lambda i: (i, 0, 0))],
        out_specs=pl.BlockSpec((bblk, Ld, Le), lambda i: (i, 0, 0)),
        out_shape=jax.ShapeDtypeStruct((Bp, Ld, Le), jnp.float32),
        compiler_params=pltpu.CompilerParams(dimension_semantics=("parallel",)),
    )(du, arc_c, add_d, add_e, md, me)
    return out[:B] if Bp != B else out


# --------------------------------------------------------------------------------------
# BiLinear label scorer.  The (N, O*S) outer product never touches HBM; the previous
# R_sel selector matmul is replaced by cheap lane replication (tile-equivalent concat),
# keeping only the 0/1 segmented-reduction matmul.
# --------------------------------------------------------------------------------------
def _bilinear_kernel(nlab, l_ref, r_ref, uft_ref, gsel_ref, wl_ref, wr_ref, b_ref, o_ref):
    left = l_ref[...]                                                   # (N, S)
    right = r_ref[...]                                                  # (N, S)
    # tmp[n, o*S+i] = sum_j U[o,i,j] * right[n,j]
    tmp = jnp.dot(_mxu(right), _mxu(uft_ref[...]), preferred_element_type=jnp.float32)
    # lane replication: lt[n, o*S+i] = left[n, i]   (jnp.tile equivalent, no selector matmul)
    lt = jnp.concatenate([left] * nlab, axis=-1)                        # (N, O*S)
    # segmented reduction over i per output label o (0/1 matmul, kept in f32 for exactness)
    bil = jnp.dot(tmp * lt, gsel_ref[...], preferred_element_type=jnp.float32)   # (N, O)
    y = bil + jnp.dot(_mxu(left), _mxu(wl_ref[...]), preferred_element_type=jnp.float32)
    y = y + jnp.dot(_mxu(right), _mxu(wr_ref[...]), preferred_element_type=jnp.float32)
    o_ref[...] = y + b_ref[...]


def pallas_bilinear(left, right, U, W_l, W_r, bias, row_tile=256):
    """F.bilinear(left, right, U, bias) + left@W_l^T + right@W_r^T."""
    N, S = left.shape
    O = U.shape[0]
    OS = O * S
    tile = min(_round_up(N, 8), row_tile)
    Np = _round_up(N, tile)
    if Np != N:
        left = jnp.pad(left, ((0, Np - N), (0, 0)))
        right = jnp.pad(right, ((0, Np - N), (0, 0)))
    U_flat_t = U.reshape(OS, S).T                                       # (S, OS); col o*S+i = U[o,i,:]
    cols = jnp.arange(OS)
    G_sel = ((cols[:, None] // S) == jnp.arange(O)[None, :]).astype(jnp.float32)  # (OS, O)
    y = pl.pallas_call(
        functools.partial(_bilinear_kernel, O),
        grid=(Np // tile,),
        in_specs=[pl.BlockSpec((tile, S), lambda i: (i, 0)),
                  pl.BlockSpec((tile, S), lambda i: (i, 0)),
                  pl.BlockSpec((S, OS), lambda i: (0, 0)),
                  pl.BlockSpec((OS, O), lambda i: (0, 0)),
                  pl.BlockSpec((S, O), lambda i: (0, 0)),
                  pl.BlockSpec((S, O), lambda i: (0, 0)),
                  pl.BlockSpec((1, O), lambda i: (0, 0))],
        out_specs=pl.BlockSpec((tile, O), lambda i: (i, 0)),
        out_shape=jax.ShapeDtypeStruct((Np, O), jnp.float32),
        compiler_params=pltpu.CompilerParams(dimension_semantics=("parallel",)),
    )(left, right, U_flat_t, G_sel, W_l.T, W_r.T, bias.reshape(1, O))
    return y[:N] if Np != N else y


# --------------------------------------------------------------------------------------
# Parameter init (deterministic, shape-faithful to the PyTorch module)
# --------------------------------------------------------------------------------------
def init_params(key, vocab_size, H, pos_dim, arc_space, type_space,
                enc_layers, dec_layers, n_pos, n_dp):
    keys = iter(jax.random.split(key, 64))

    def nrm(shape, scale=0.1):
        return scale * jax.random.normal(next(keys), shape, jnp.float32)

    p = {}
    p['embedding'] = nrm((vocab_size, H), 1.0)          # pre_embedding copy
    p['root_emb'] = nrm((1, H))
    p['pos_embedding'] = nrm((n_pos + 1, pos_dim), 1.0)

    enc, in_dim = [], H + pos_dim
    for _ in range(enc_layers):
        enc.append({'w_ih': nrm((4 * H, in_dim)), 'w_hh': nrm((4 * H, H)), 'b': nrm((4 * H,)),
                    'w_ih_r': nrm((4 * H, in_dim)), 'w_hh_r': nrm((4 * H, H)),
                    'b_r': nrm((4 * H,))})
        in_dim = 2 * H
    p['encoder'] = enc

    dec, in_dim = [], H
    for _ in range(dec_layers):
        dec.append({'w_ih': nrm((4 * H, in_dim)), 'w_hh': nrm((4 * H, H)), 'b': nrm((4 * H,))})
        in_dim = H
    p['decoder'] = dec

    p['src_dense_w'] = nrm((H, 2 * H)); p['src_dense_b'] = nrm((H,))
    p['hx_dense_w'] = nrm((H, 2 * H)); p['hx_dense_b'] = nrm((H,))
    p['arc_c_w'] = nrm((arc_space, 2 * H)); p['arc_c_b'] = nrm((arc_space,))
    p['type_c_w'] = nrm((type_space, 2 * H)); p['type_c_b'] = nrm((type_space,))
    p['arc_h_w'] = nrm((arc_space, H)); p['arc_h_b'] = nrm((arc_space,))
    p['type_h_w'] = nrm((type_space, H)); p['type_h_b'] = nrm((type_space,))

    # BiAttention(arc_space, arc_space, num_labels=1)
    p['att_W_e'] = nrm((1, arc_space))
    p['att_W_d'] = nrm((1, arc_space))
    p['att_b'] = jnp.zeros((1, 1, 1), jnp.float32)
    p['att_U'] = nrm((1, arc_space, arc_space))

    # BiLinear(type_space, type_space, n_dp_labels)
    p['bil_U'] = nrm((n_dp, type_space, type_space))
    p['bil_W_l'] = nrm((n_dp, type_space))
    p['bil_W_r'] = nrm((n_dp, type_space))
    p['bil_bias'] = jnp.zeros((n_dp,), jnp.float32)
    return p


# --------------------------------------------------------------------------------------
# Forward pass (mirrors DP_LSTM.forward with dropout p = 0.0)
# --------------------------------------------------------------------------------------
def dp_lstm_forward(params, pos_ids, head_ids, mask_e, mask_d, batch_index,
                    sent_len, word, is_training=True):
    B, T = word.shape
    H = params['root_emb'].shape[1]
    Tp1 = T + 1
    Bp = _round_up(B, 8)                 # sublane-pad the batch once, kept through LSTMs

    # ----- embeddings + root token + POS embeddings (XLA gather/concat glue) -----
    emb = params['embedding'][word]                                    # (B, T, H)
    root = jnp.broadcast_to(params['root_emb'][None], (B, 1, H))
    outputs = jnp.concatenate([root, emb], axis=1)                     # (B, T+1, H)
    pos_out = params['pos_embedding'][pos_ids]                         # (B, T+1, pos_dim)
    # TODO(synk): Dropout1d with p > 0 not implemented (p == 0 config -> identity).
    outputs = jnp.concatenate([outputs, pos_out], axis=2)              # (B, T+1, H+pos)

    # time-major + batch-padded layout used by every LSTM / projection kernel below
    x = jnp.pad(jnp.transpose(outputs, (1, 0, 2)), ((0, 0), (0, Bp - B), (0, 0)))
    sl = sent_len.astype(jnp.int32)
    sl_p = jnp.pad(sl, (0, Bp - B), constant_values=-1)                # pad rows fully masked
    enc_mask = (jnp.arange(Tp1)[:, None] < (sl_p + 1)[None, :]).astype(jnp.float32)[..., None]
    dec_mask = (jnp.arange(T)[:, None] < sl_p[None, :]).astype(jnp.float32)[..., None]

    # ----- bidirectional LSTM encoder: one fused recurrence kernel per layer -----
    c_fin = None
    for layer in params['encoder']:
        x, c_fin = run_bilstm_layer(x, enc_mask,
                                    layer['w_ih'], layer['w_hh'], layer['b'],
                                    layer['w_ih_r'], layer['w_hh_r'], layer['b_r'])
    encoder_outputs = x                                                # (T+1, Bp, 2H)

    # ----- _transform_decoder_init_state (tiny -> plain XLA, not a kernel) -----
    c_cat = jnp.concatenate([c_fin[0], c_fin[1]], axis=-1)             # (Bp, 2H)
    cn0 = c_cat @ params['hx_dense_w'].T + params['hx_dense_b']        # (Bp, H)
    n_dec = len(params['decoder'])
    cns = [cn0] + [jnp.zeros((Bp, H), jnp.float32)] * (n_dec - 1)
    hns = [jnp.tanh(c) for c in cns]

    # ----- fused encoder-side projections: [src | arc_c | type_c], all ELU -----
    A = params['arc_c_w'].shape[0]
    S = params['type_c_w'].shape[0]
    enc_w = jnp.concatenate([params['src_dense_w'], params['arc_c_w'], params['type_c_w']], 0)
    enc_b = jnp.concatenate([params['src_dense_b'], params['arc_c_b'], params['type_c_b']], 0)
    enc_proj = pallas_linear(encoder_outputs.reshape(Tp1 * Bp, 2 * H), enc_w, enc_b,
                             act="elu").reshape(Tp1, Bp, H + A + S)
    src = enc_proj[1:, :, :H]                                          # (T, Bp, H) drop root

    # ----- unidirectional LSTM decoder -----
    x = src
    for l, layer in enumerate(params['decoder']):
        x = run_lstm_layer(x, dec_mask, layer['w_ih'], layer['w_hh'], layer['b'],
                           hns[l], cns[l])
    decoder_outputs = x                                                # (T, Bp, H)

    # ----- fused decoder-side projections: [arc_h | type_h], ELU -----
    dec_w = jnp.concatenate([params['arc_h_w'], params['type_h_w']], 0)
    dec_b = jnp.concatenate([params['arc_h_b'], params['type_h_b']], 0)
    dec_proj = pallas_linear(decoder_outputs.reshape(T * Bp, H), dec_w, dec_b,
                             act="elu").reshape(T, Bp, A + S)

    # back to batch-major only for the (small) head tensors
    arc_h = jnp.transpose(dec_proj[:, :B, :A], (1, 0, 2))              # (B, T, A)
    type_h = jnp.transpose(dec_proj[:, :B, A:], (1, 0, 2))             # (B, T, S)
    arc_c = jnp.transpose(enc_proj[:, :B, H:H + A], (1, 0, 2))         # (B, T+1, A)
    type_c = jnp.transpose(enc_proj[:, :B, H + A:], (1, 0, 2))         # (B, T+1, S)

    # ----- biaffine arc attention (num_labels = 1, squeezed) -----
    U0 = params['att_U'][0]                                            # (A, A)
    duo_w = jnp.concatenate([U0.T, params['att_W_d']], axis=0)         # (A+1, A)
    duo = pallas_linear(arc_h.reshape(B * T, A), duo_w, jnp.zeros((A + 1,), jnp.float32))
    du = duo[:, :A].reshape(B, T, A)                                   # arc_h @ U
    add_d = duo[:, A:A + 1].reshape(B, T, 1) + params['att_b'][0, 0, 0]  # W_d term + bias
    add_e = (arc_c @ params['att_W_e'][0]).reshape(B, 1, Tp1)          # W_e term (tiny, XLA)
    out_arc = pallas_biattention(du, arc_c, add_d, add_e, mask_d, mask_e)  # (B, T, T+1)

    if not is_training:
        head_ids = jnp.argmax(out_arc, axis=2)     # faithful to reference (0-masked scores)

    # type_c[batch_index, head_ids.t()].transpose(0,1)  ==  per-token head gather (glue)
    type_c_sel = type_c[batch_index[:, None], head_ids]                # (B, T, S)

    # ----- bilinear label scorer -----
    out_type = pallas_bilinear(type_h.reshape(B * T, S), type_c_sel.reshape(B * T, S),
                               params['bil_U'], params['bil_W_l'], params['bil_W_r'],
                               params['bil_bias']).reshape(B, T, -1)
    return out_arc, out_type


# --------------------------------------------------------------------------------------
if __name__ == "__main__":
    vocab_size, H, pos_dim = 50, 32, 8
    arc_space, type_space = 32, 32
    enc_layers, dec_layers = 2, 2
    n_pos, n_dp = 45, 38             # len(pos_label_list), len(dep_label_list)
    B, T = 2, 6

    key = jax.random.PRNGKey(0)
    kp, kw, kpos, khead = jax.random.split(key, 4)
    params = init_params(kp, vocab_size, H, pos_dim, arc_space, type_space,
                         enc_layers, dec_layers, n_pos, n_dp)

    word = jax.random.randint(kw, (B, T), 1, vocab_size)
    pos_ids = jax.random.randint(kpos, (B, T + 1), 0, n_pos + 1)
    head_ids = jax.random.randint(khead, (B, T), 0, T + 1)
    sent_len = jnp.array([6, 4], dtype=jnp.int32)
    mask_e = (jnp.arange(T + 1)[None, :] < (sent_len + 1)[:, None]).astype(jnp.float32)
    mask_d = (jnp.arange(T)[None, :] < sent_len[:, None]).astype(jnp.float32)
    batch_index = jnp.arange(B)

    fwd = jax.jit(functools.partial(dp_lstm_forward, is_training=True))
    out_arc, out_type = fwd(params, pos_ids, head_ids, mask_e, mask_d,
                            batch_index, sent_len, word)
    jax.block_until_ready((out_arc, out_type))

    assert out_arc.shape == (B, T, T + 1), out_arc.shape
    assert out_type.shape == (B, T, n_dp), out_type.shape
    assert bool(jnp.all(jnp.isfinite(out_arc))) and bool(jnp.all(jnp.isfinite(out_type)))
    print("KERNEL_OK")
</pallas_src>

<mosaic_0001>
module attributes {stable_mosaic.version = 11 : i64} {
  func.func @_linear_kernel(%arg0: i32, %arg1: memref<56x40xf32, #tpu.memory_space<vmem>>, %arg2: memref<40x256xf32, #tpu.memory_space<vmem>>, %arg3: memref<1x256xf32, #tpu.memory_space<vmem>>, %arg4: memref<56x256xf32, #tpu.memory_space<vmem>>) attributes {dimension_semantics = [#tpu.dimension_semantics<parallel>], iteration_bounds = array<i64: 1>, scalar_prefetch = 0 : i64, scratch_operands = 0 : i64, tpu.core_type = #tpu.core_type<tc>, window_params = [{transform_indices = @transform_0, window_bounds = array<i64: 56, 40>}, {pipeline_mode = #tpu.pipeline_mode<synchronous>, transform_indices = @transform_1, window_bounds = array<i64: 40, 256>}, {pipeline_mode = #tpu.pipeline_mode<synchronous>, transform_indices = @transform_2, window_bounds = array<i64: 1, 256>}, {transform_indices = @transform_3, window_bounds = array<i64: 56, 256>}]} {
    %c0 = arith.constant 0 : index
    %c0_0 = arith.constant 0 : index
    %0 = vector.load %arg1[%c0, %c0_0] : memref<56x40xf32, #tpu.memory_space<vmem>>, vector<56x40xf32>
    %c0_1 = arith.constant 0 : index
    %c0_2 = arith.constant 0 : index
    %1 = vector.load %arg2[%c0_1, %c0_2] : memref<40x256xf32, #tpu.memory_space<vmem>>, vector<40x256xf32>
    %cst = arith.constant dense<0.000000e+00> : vector<56x256xf32>
    %2 = tpu.matmul %0, %1, %cst {dimension_numbers = #tpu.dot_dimension_numbers<[1], [0], [0], [1], [0, 0, 1, 1], [], []>} : vector<56x40xf32>, vector<40x256xf32>, vector<56x256xf32> -> vector<56x256xf32>
    %c0_3 = arith.constant 0 : index
    %c0_4 = arith.constant 0 : index
    %3 = vector.load %arg3[%c0_3, %c0_4] : memref<1x256xf32, #tpu.memory_space<vmem>>, vector<1x256xf32>
    %4 = vector.broadcast %3 : vector<1x256xf32> to vector<56x256xf32>
    %5 = arith.addf %2, %4 : vector<56x256xf32>
    %c0_5 = arith.constant 0 : index
    %c0_6 = arith.constant 0 : index
    %6 = vector.load %arg4[%c0_5, %c0_6] : memref<56x256xf32, #tpu.memory_space<vmem>>, vector<56x256xf32>
    tpu.vector_store %arg4[%c0_5, %c0_6], %5 {strides = array<i32>} : memref<56x256xf32, #tpu.memory_space<vmem>>, vector<56x256xf32>,
    return
  }
  func.func @transform_0(%arg0: i32) -> (i32, i32) {
    %c0_i32 = arith.constant 0 : i32
    %c0_i32_0 = arith.constant 0 : i32
    return %arg0, %c0_i32 : i32, i32
  }
  func.func @transform_1(%arg0: i32) -> (i32, i32) {
    %c0_i32 = arith.constant 0 : i32
    %c0_i32_0 = arith.constant 0 : i32
    %c0_i32_1 = arith.constant 0 : i32
    return %c0_i32, %c0_i32_0 : i32, i32
  }
  func.func @transform_2(%arg0: i32) -> (i32, i32) {
    %c0_i32 = arith.constant 0 : i32
    %c0_i32_0 = arith.constant 0 : i32
    %c0_i32_1 = arith.constant 0 : i32
    return %c0_i32, %c0_i32_0 : i32, i32
  }
  func.func @transform_3(%arg0: i32) -> (i32, i32) {
    %c0_i32 = arith.constant 0 : i32
    %c0_i32_0 = arith.constant 0 : i32
    return %arg0, %c0_i32 : i32, i32
  }
}

module attributes {stable_mosaic.version = 11 : i64} {
  func.func @_linear_kernel(%arg0: i32, %arg1: memref<56x64xf32, #tpu.memory_space<vmem>>, %arg2: memref<64x256xf32, #tpu.memory_space<vmem>>, %arg3: memref<1x256xf32, #tpu.memory_space<vmem>>, %arg4: memref<56x256xf32, #tpu.memory_space<vmem>>) attributes {dimension_semantics = [#tpu.dimension_semantics<parallel>], iteration_bounds = array<i64: 1>, scalar_prefetch = 0 : i64, scratch_operands = 0 : i64, tpu.core_type = #tpu.core_type<tc>, window_params = [{transform_indices = @transform_0, window_bounds = array<i64: 56, 64>}, {pipeline_mode = #tpu.pipeline_mode<synchronous>, transform_indices = @transform_1, window_bounds = array<i64: 64, 256>}, {pipeline_mode = #tpu.pipeline_mode<synchronous>, transform_indices = @transform_2, window_bounds = array<i64: 1, 256>}, {transform_indices = @transform_3, window_bounds = array<i64: 56, 256>}]} {
    %c0 = arith.constant 0 : index
    %c0_0 = arith.constant 0 : index
    %0 = vector.load %arg1[%c0, %c0_0] : memref<56x64xf32, #tpu.memory_space<vmem>>, vector<56x64xf32>
    %c0_1 = arith.constant 0 : index
    %c0_2 = arith.constant 0 : index
    %1 = vector.load %arg2[%c0_1, %c0_2] : memref<64x256xf32, #tpu.memory_space<vmem>>, vector<64x256xf32>
    %cst = arith.constant dense<0.000000e+00> : vector<56x256xf32>
    %2 = tpu.matmul %0, %1, %cst {dimension_numbers = #tpu.dot_dimension_numbers<[1], [0], [0], [1], [0, 0, 1, 1], [], []>} : vector<56x64xf32>, vector<64x256xf32>, vector<56x256xf32> -> vector<56x256xf32>
    %c0_3 = arith.constant 0 : index
    %c0_4 = arith.constant 0 : index
    %3 = vector.load %arg3[%c0_3, %c0_4] : memref<1x256xf32, #tpu.memory_space<vmem>>, vector<1x256xf32>
    %4 = vector.broadcast %3 : vector<1x256xf32> to vector<56x256xf32>
    %5 = arith.addf %2, %4 : vector<56x256xf32>
    %c0_5 = arith.constant 0 : index
    %c0_6 = arith.constant 0 : index
    %6 = vector.load %arg4[%c0_5, %c0_6] : memref<56x256xf32, #tpu.memory_space<vmem>>, vector<56x256xf32>
    tpu.vector_store %arg4[%c0_5, %c0_6], %5 {strides = array<i32>} : memref<56x256xf32, #tpu.memory_space<vmem>>, vector<56x256xf32>,
    return
  }
  func.func @transform_0(%arg0: i32) -> (i32, i32) {
    %c0_i32 = arith.constant 0 : i32
    %c0_i32_0 = arith.constant 0 : i32
    return %arg0, %c0_i32 : i32, i32
  }
  func.func @transform_1(%arg0: i32) -> (i32, i32) {
    %c0_i32 = arith.constant 0 : i32
    %c0_i32_0 = arith.constant 0 : i32
    %c0_i32_1 = arith.constant 0 : i32
    return %c0_i32, %c0_i32_0 : i32, i32
  }
  func.func @transform_2(%arg0: i32) -> (i32, i32) {
    %c0_i32 = arith.constant 0 : i32
    %c0_i32_0 = arith.constant 0 : i32
    %c0_i32_1 = arith.constant 0 : i32
    return %c0_i32, %c0_i32_0 : i32, i32
  }
  func.func @transform_3(%arg0: i32) -> (i32, i32) {
    %c0_i32 = arith.constant 0 : i32
    %c0_i32_0 = arith.constant 0 : i32
    return %arg0, %c0_i32 : i32, i32
  }
}

module attributes {stable_mosaic.version = 11 : i64} {
  func.func @_lstm_seq_kernel(%arg0: i32, %arg1: memref<7x8x256xf32, #tpu.memory_space<vmem>>, %arg2: memref<64x128xf32, #tpu.memory_space<vmem>>, %arg3: memref<7x8x1xf32, #tpu.memory_space<vmem>>, %arg4: memref<2x8x32xf32, #tpu.memory_space<vmem>>, %arg5: memref<2x8x32xf32, #tpu.memory_space<vmem>>, %arg6: memref<7x8x64xf32, #tpu.memory_space<vmem>>, %arg7: memref<2x8x32xf32, #tpu.memory_space<vmem>>) attributes {dimension_semantics = [#tpu.dimension_semantics<arbitrary>], iteration_bounds = array<i64: 1>, scalar_prefetch = 0 : i64, scratch_operands = 0 : i64, tpu.core_type = #tpu.core_type<tc>, window_params = [{pipeline_mode = #tpu.pipeline_mode<synchronous>, transform_indices = @transform_0, window_bounds = array<i64: 7, 8, 256>}, {pipeline_mode = #tpu.pipeline_mode<synchronous>, transform_indices = @transform_1, window_bounds = array<i64: 64, 128>}, {pipeline_mode = #tpu.pipeline_mode<synchronous>, transform_indices = @transform_2, window_bounds = array<i64: 7, 8, 1>}, {pipeline_mode = #tpu.pipeline_mode<synchronous>, transform_indices = @transform_3, window_bounds = array<i64: 2, 8, 32>}, {pipeline_mode = #tpu.pipeline_mode<synchronous>, transform_indices = @transform_4, window_bounds = array<i64: 2, 8, 32>}, {pipeline_mode = #tpu.pipeline_mode<synchronous>, transform_indices = @transform_5, window_bounds = array<i64: 7, 8, 64>}, {pipeline_mode = #tpu.pipeline_mode<synchronous>, transform_indices = @transform_6, window_bounds = array<i64: 2, 8, 32>}]} {
    %c0 = arith.constant 0 : index
    %c0_0 = arith.constant 0 : index
    %0 = vector.load %arg2[%c0, %c0_0] : memref<64x128xf32, #tpu.memory_space<vmem>>, vector<32x128xf32>
    %c32 = arith.constant 32 : index
    %c0_1 = arith.constant 0 : index
    %1 = vector.load %arg2[%c32, %c0_1] : memref<64x128xf32, #tpu.memory_space<vmem>>, vector<32x128xf32>
    %c0_2 = arith.constant 0 : index
    %c0_3 = arith.constant 0 : index
    %c0_4 = arith.constant 0 : index
    %2 = vector.load %arg4[%c0_2, %c0_3, %c0_4] : memref<2x8x32xf32, #tpu.memory_space<vmem>>, vector<1x8x32xf32>
    %3 = vector.shape_cast %2 : vector<1x8x32xf32> to vector<8x32xf32>
    %c0_5 = arith.constant 0 : index
    %c0_6 = arith.constant 0 : index
    %c0_7 = arith.constant 0 : index
    %4 = vector.load %arg5[%c0_5, %c0_6, %c0_7] : memref<2x8x32xf32, #tpu.memory_space<vmem>>, vector<1x8x32xf32>
    %5 = vector.shape_cast %4 : vector<1x8x32xf32> to vector<8x32xf32>
    %c1 = arith.constant 1 : index
    %c0_8 = arith.constant 0 : index
    %c0_9 = arith.constant 0 : index
    %6 = vector.load %arg4[%c1, %c0_8, %c0_9] : memref<2x8x32xf32, #tpu.memory_space<vmem>>, vector<1x8x32xf32>
    %7 = vector.shape_cast %6 : vector<1x8x32xf32> to vector<8x32xf32>
    %c1_10 = arith.constant 1 : index
    %c0_11 = arith.constant 0 : index
    %c0_12 = arith.constant 0 : index
    %8 = vector.load %arg5[%c1_10, %c0_11, %c0_12] : memref<2x8x32xf32, #tpu.memory_space<vmem>>, vector<1x8x32xf32>
    %9 = vector.shape_cast %8 : vector<1x8x32xf32> to vector<8x32xf32>
    %c0_i32 = arith.constant 0 : i32
    %10 = arith.index_cast %c0_i32 : i32 to index
    %c0_13 = arith.constant 0 : index
    %c0_14 = arith.constant 0 : index
    %11 = vector.load %arg1[%10, %c0_13, %c0_14] : memref<7x8x256xf32, #tpu.memory_space<vmem>>, vector<1x8x256xf32>
    %12 = vector.shape_cast %11 : vector<1x8x256xf32> to vector<8x256xf32>
    %13 = vector.extract_strided_slice %12 {offsets = [0, 0], sizes = [8, 128], strides = [1, 1]} : vector<8x256xf32> to vector<8x128xf32>
    %cst = arith.constant dense<0.000000e+00> : vector<8x128xf32>
    %14 = tpu.matmul %3, %0, %cst {dimension_numbers = #tpu.dot_dimension_numbers<[1], [0], [0], [1], [0, 0, 1, 1], [], []>} : vector<8x32xf32>, vector<32x128xf32>, vector<8x128xf32> -> vector<8x128xf32>
    %15 = arith.addf %13, %14 : vector<8x128xf32>
    %16 = vector.extract_strided_slice %15 {offsets = [0, 0], sizes = [8, 32], strides = [1, 1]} : vector<8x128xf32> to vector<8x32xf32>
    %17 = arith.negf %16 : vector<8x32xf32>
    %18 = math.exp %17 : vector<8x32xf32>
    %cst_15 = arith.constant 1.000000e+00 : f32
    %19 = vector.broadcast %cst_15 : f32 to vector<8x32xf32>
    %20 = arith.addf %19, %18 : vector<8x32xf32>
    %21 = arith.divf %19, %20 : vector<8x32xf32>
    %22 = vector.extract_strided_slice %15 {offsets = [0, 32], sizes = [8, 32], strides = [1, 1]} : vector<8x128xf32> to vector<8x32xf32>
    %23 = arith.negf %22 : vector<8x32xf32>
    %24 = math.exp %23 : vector<8x32xf32>
    %cst_16 = arith.constant 1.000000e+00 : f32
    %25 = vector.broadcast %cst_16 : f32 to vector<8x32xf32>
    %26 = arith.addf %25, %24 : vector<8x32xf32>
    %27 = arith.divf %25, %26 : vector<8x32xf32>
    %28 = vector.extract_strided_slice %15 {offsets = [0, 64], sizes = [8, 32], strides = [1, 1]} : vector<8x128xf32> to vector<8x32xf32>
    %29 = math.tanh %28 : vector<8x32xf32>
    %30 = vector.extract_strided_slice %15 {offsets = [0, 96], sizes = [8, 32], strides = [1, 1]} : vector<8x128xf32> to vector<8x32xf32>
    %31 = arith.negf %30 : vector<8x32xf32>
    %32 = math.exp %31 : vector<8x32xf32>
    %cst_17 = arith.constant 1.000000e+00 : f32
    %33 = vector.broadcast %cst_17 : f32 to vector<8x32xf32>
    %34 = arith.addf %33, %32 : vector<8x32xf32>
    %35 = arith.divf %33, %34 : vector<8x32xf32>
    %36 = arith.mulf %27, %5 : vector<8x32xf32>
    %37 = arith.mulf %21, %29 : vector<8x32xf32>
    %38 = arith.addf %36, %37 : vector<8x32xf32>
    %39 = math.tanh %38 : vector<8x32xf32>
    %40 = arith.mulf %35, %39 : vector<8x32xf32>
    %41 = arith.index_cast %c0_i32 : i32 to index
    %c0_18 = arith.constant 0 : index
    %c0_19 = arith.constant 0 : index
    %42 = vector.load %arg3[%41, %c0_18, %c0_19] : memref<7x8x1xf32, #tpu.memory_space<vmem>>, vector<1x8x1xf32>
    %43 = vector.shape_cast %42 : vector<1x8x1xf32> to vector<8x1xf32>
    %cst_20 = arith.constant 5.000000e-01 : f32
    %44 = vector.broadcast %cst_20 : f32 to vector<8x1xf32>
    %45 = arith.cmpf ogt, %43, %44 : vector<8x1xf32>
    %46 = vector.shape_cast %45 : vector<8x1xi1> to vector<8x1xi1>
    %47 = vector.broadcast %46 : vector<8x1xi1> to vector<8x32xi1>
    %48 = arith.select %47, %40, %3 : vector<8x32xi1>, vector<8x32xf32>
    %49 = vector.shape_cast %45 : vector<8x1xi1> to vector<8x1xi1>
    %50 = vector.broadcast %49 : vector<8x1xi1> to vector<8x32xi1>
    %51 = arith.select %50, %38, %5 : vector<8x32xi1>, vector<8x32xf32>
    %cst_21 = arith.constant 0.000000e+00 : f32
    %52 = vector.shape_cast %45 : vector<8x1xi1> to vector<8x1xi1>
    %53 = vector.broadcast %52 : vector<8x1xi1> to vector<8x32xi1>
    %54 = vector.broadcast %cst_21 : f32 to vector<8x32xf32>
    %55 = arith.select %53, %40, %54 : vector<8x32xi1>, vector<8x32xf32>
    %56 = arith.index_cast %c0_i32 : i32 to index
    %c0_22 = arith.constant 0 : index
    %c0_23 = arith.constant 0 : index
    %57 = vector.load %arg6[%56, %c0_22, %c0_23] : memref<7x8x64xf32, #tpu.memory_space<vmem>>, vector<1x8x32xf32>
    %58 = vector.shape_cast %57 : vector<1x8x32xf32> to vector<8x32xf32>
    %59 = vector.shape_cast %55 : vector<8x32xf32> to vector<1x8x32xf32>
    tpu.vector_store %arg6[%56, %c0_22, %c0_23], %59 {strides = array<i32>} : memref<7x8x64xf32, #tpu.memory_space<vmem>>, vector<1x8x32xf32>,
    %c6_i32 = arith.constant 6 : i32
    %60 = arith.subi %c6_i32, %c0_i32 : i32
    %61 = arith.index_cast %60 : i32 to index
    %c0_24 = arith.constant 0 : index
    %c0_25 = arith.constant 0 : index
    %62 = vector.load %arg1[%61, %c0_24, %c0_25] : memref<7x8x256xf32, #tpu.memory_space<vmem>>, vector<1x8x256xf32>
    %63 = vector.shape_cast %62 : vector<1x8x256xf32> to vector<8x256xf32>
    %64 = vector.extract_strided_slice %63 {offsets = [0, 128], sizes = [8, 128], strides = [1, 1]} : vector<8x256xf32> to vector<8x128xf32>
    %cst_26 = arith.constant dense<0.000000e+00> : vector<8x128xf32>
    %65 = tpu.matmul %7, %1, %cst_26 {dimension_numbers = #tpu.dot_dimension_numbers<[1], [0], [0], [1], [0, 0, 1, 1], [], []>} : vector<8x32xf32>, vector<32x128xf32>, vector<8x128xf32> -> vector<8x128xf32>
    %66 = arith.addf %64, %65 : vector<8x128xf32>
    %67 = vector.extract_strided_slice %66 {offsets = [0, 0], sizes = [8, 32], strides = [1, 1]} : vector<8x128xf32> to vector<8x32xf32>
    %68 = arith.negf %67 : vector<8x32xf32>
    %69 = math.exp %68 : vector<8x32xf32>
    %cst_27 = arith.constant 1.000000e+00 : f32
    %70 = vector.broadcast %cst_27 : f32 to vector<8x32xf32>
    %71 = arith.addf %70, %69 : vector<8x32xf32>
    %72 = arith.divf %70, %71 : vector<8x32xf32>
    %73 = vector.extract_strided_slice %66 {offsets = [0, 32], sizes = [8, 32], strides = [1, 1]} : vector<8x128xf32> to vector<8x32xf32>
    %74 = arith.negf %73 : vector<8x32xf32>
    %75 = math.exp %74 : vector<8x32xf32>
    %cst_28 = arith.constant 1.000000e+00 : f32
    %76 = vector.broadcast %cst_28 : f32 to vector<8x32xf32>
    %77 = arith.addf %76, %75 : vector<8x32xf32>
    %78 = arith.divf %76, %77 : vector<8x32xf32>
    %79 = vector.extract_strided_slice %66 {offsets = [0, 64], sizes = [8, 32], strides = [1, 1]} : vector<8x128xf32> to vector<8x32xf32>
    %80 = math.tanh %79 : vector<8x32xf32>
    %81 = vector.extract_strided_slice %66 {offsets = [0, 96], sizes = [8, 32], strides = [1, 1]} : vector<8x128xf32> to vector<8x32xf32>
    %82 = arith.negf %81 : vector<8x32xf32>
    %83 = math.exp %82 : vector<8x32xf32>
    %cst_29 = arith.constant 1.000000e+00 : f32
    %84 = vector.broadcast %cst_29 : f32 to vector<8x32xf32>
    %85 = arith.addf %84, %83 : vector<8x32xf32>
    %86 = arith.divf %84, %85 : vector<8x32xf32>
    %87 = arith.mulf %78, %9 : vector<8x32xf32>
    %88 = arith.mulf %72, %80 : vector<8x32xf32>
    %89 = arith.addf %87, %88 : vector<8x32xf32>
    %90 = math.tanh %89 : vector<8x32xf32>
    %91 = arith.mulf %86, %90 : vector<8x32xf32>
    %92 = arith.index_cast %60 : i32 to index
    %c0_30 = arith.constant 0 : index
    %c0_31 = arith.constant 0 : index
    %93 = vector.load %arg3[%92, %c0_30, %c0_31] : memref<7x8x1xf32, #tpu.memory_space<vmem>>, vector<1x8x1xf32>
    %94 = vector.shape_cast %93 : vector<1x8x1xf32> to vector<8x1xf32>
    %cst_32 = arith.constant 5.000000e-01 : f32
    %95 = vector.broadcast %cst_32 : f32 to vector<8x1xf32>
    %96 = arith.cmpf ogt, %94, %95 : vector<8x1xf32>
    %97 = vector.shape_cast %96 : vector<8x1xi1> to vector<8x1xi1>
    %98 = vector.broadcast %97 : vector<8x1xi1> to vector<8x32xi1>
    %99 = arith.select %98, %91, %7 : vector<8x32xi1>, vector<8x32xf32>
    %100 = vector.shape_cast %96 : vector<8x1xi1> to vector<8x1xi1>
    %101 = vector.broadcast %100 : vector<8x1xi1> to vector<8x32xi1>
    %102 = arith.select %101, %89, %9 : vector<8x32xi1>, vector<8x32xf32>
    %cst_33 = arith.constant 0.000000e+00 : f32
    %103 = vector.shape_cast %96 : vector<8x1xi1> to vector<8x1xi1>
    %104 = vector.broadcast %103 : vector<8x1xi1> to vector<8x32xi1>
    %105 = vector.broadcast %cst_33 : f32 to vector<8x32xf32>
    %106 = arith.select %104, %91, %105 : vector<8x32xi1>, vector<8x32xf32>
    %107 = arith.index_cast %60 : i32 to index
    %c0_34 = arith.constant 0 : index
    %c32_35 = arith.constant 32 : index
    %108 = vector.load %arg6[%107, %c0_34, %c32_35] : memref<7x8x64xf32, #tpu.memory_space<vmem>>, vector<1x8x32xf32>
    %109 = vector.shape_cast %108 : vector<1x8x32xf32> to vector<8x32xf32>
    %110 = vector.shape_cast %106 : vector<8x32xf32> to vector<1x8x32xf32>
    tpu.vector_store %arg6[%107, %c0_34, %c32_35], %110 {strides = array<i32>} : memref<7x8x64xf32, #tpu.memory_space<vmem>>, vector<1x8x32xf32>,
    %c1_i32 = arith.constant 1 : i32
    %111 = arith.index_cast %c1_i32 : i32 to index
    %c0_36 = arith.constant 0 : index
    %c0_37 = arith.constant 0 : index
    %112 = vector.load %arg1[%111, %c0_36, %c0_37] : memref<7x8x256xf32, #tpu.memory_space<vmem>>, vector<1x8x256xf32>
    %113 = vector.shape_cast %112 : vector<1x8x256xf32> to vector<8x256xf32>
    %114 = vector.extract_strided_slice %113 {offsets = [0, 0], sizes = [8, 128], strides = [1, 1]} : vector<8x256xf32> to vector<8x128xf32>
    %cst_38 = arith.constant dense<0.000000e+00> : vector<8x128xf32>
    %115 = tpu.matmul %48, %0, %cst_38 {dimension_numbers = #tpu.dot_dimension_numbers<[1], [0], [0], [1], [0, 0, 1, 1], [], []>} : vector<8x32xf32>, vector<32x128xf32>, vector<8x128xf32> -> vector<8x128xf32>
    %116 = arith.addf %114, %115 : vector<8x128xf32>
    %117 = vector.extract_strided_slice %116 {offsets = [0, 0], sizes = [8, 32], strides = [1, 1]} : vector<8x128xf32> to vector<8x32xf32>
    %118 = arith.negf %117 : vector<8x32xf32>
    %119 = math.exp %118 : vector<8x32xf32>
    %cst_39 = arith.constant 1.000000e+00 : f32
    %120 = vector.broadcast %cst_39 : f32 to vector<8x32xf32>
    %121 = arith.addf %120, %119 : vector<8x32xf32>
    %122 = arith.divf %120, %121 : vector<8x32xf32>
    %123 = vector.extract_strided_slice %116 {offsets = [0, 32], sizes = [8, 32], strides = [1, 1]} : vector<8x128xf32> to vector<8x32xf32>
    %124 = arith.negf %123 : vector<8x32xf32>
    %125 = math.exp %124 : vector<8x32xf32>
    %cst_40 = arith.constant 1.000000e+00 : f32
    %126 = vector.broadcast %cst_40 : f32 to vector<8x32xf32>
    %127 = arith.addf %126, %125 : vector<8x32xf32>
    %128 = arith.divf %126, %127 : vector<8x32xf32>
    %129 = vector.extract_strided_slice %116 {offsets = [0, 64], sizes = [8, 32], strides = [1, 1]} : vector<8x128xf32> to vector<8x32xf32>
    %130 = math.tanh %129 : vector<8x32xf32>
    %131 = vector.extract_strided_slice %116 {offsets = [0, 96], sizes = [8, 32], strides = [1, 1]} : vector<8x128xf32> to vector<8x32xf32>
    %132 = arith.negf %131 : vector<8x32xf32>
    %133 = math.exp %132 : vector<8x32xf32>
    %cst_41 = arith.constant 1.000000e+00 : f32
    %134 = vector.broadcast %cst_41 : f32 to vector<8x32xf32>
    %135 = arith.addf %134, %133 : vector<8x32xf32>
    %136 = arith.divf %134, %135 : vector<8x32xf32>
    %137 = arith.mulf %128, %51 : vector<8x32xf32>
    %138 = arith.mulf %122, %130 : vector<8x32xf32>
    %139 = arith.addf %137, %138 : vector<8x32xf32>
    %140 = math.tanh %139 : vector<8x32xf32>
    %141 = arith.mulf %136, %140 : vector<8x32xf32>
    %142 = arith.index_cast %c1_i32 : i32 to index
    %c0_42 = arith.constant 0 : index
    %c0_43 = arith.constant 0 : index
    %143 = vector.load %arg3[%142, %c0_42, %c0_43] : memref<7x8x1xf32, #tpu.memory_space<vmem>>, vector<1x8x1xf32>
    %144 = vector.shape_cast %143 : vector<1x8x1xf32> to vector<8x1xf32>
    %cst_44 = arith.constant 5.000000e-01 : f32
    %145 = vector.broadcast %cst_44 : f32 to vector<8x1xf32>
    %146 = arith.cmpf ogt, %144, %145 : vector<8x1xf32>
    %147 = vector.shape_cast %146 : vector<8x1xi1> to vector<8x1xi1>
    %148 = vector.broadcast %147 : vector<8x1xi1> to vector<8x32xi1>
    %149 = arith.select %148, %141, %48 : vector<8x32xi1>, vector<8x32xf32>
    %150 = vector.shape_cast %146 : vector<8x1xi1> to vector<8x1xi1>
    %151 = vector.broadcast %150 : vector<8x1xi1> to vector<8x32xi1>
    %152 = arith.select %151, %139, %51 : vector<8x32xi1>, vector<8x32xf32>
    %cst_45 = arith.constant 0.000000e+00 : f32
    %153 = vector.shape_cast %146 : vector<8x1xi1> to vector<8x1xi1>
    %154 = vector.broadcast %153 : vector<8x1xi1> to vector<8x32xi1>
    %155 = vector.broadcast %cst_45 : f32 to vector<8x32xf32>
    %156 = arith.select %154, %141, %155 : vector<8x32xi1>, vector<8x32xf32>
    %157 = arith.index_cast %c1_i32 : i32 to index
    %c0_46 = arith.constant 0 : index
    %c0_47 = arith.constant 0 : index
    %158 = vector.load %arg6[%157, %c0_46, %c0_47] : memref<7x8x64xf32, #tpu.memory_space<vmem>>, vector<1x8x32xf32>
    %159 = vector.shape_cast %158 : vector<1x8x32xf32> to vector<8x32xf32>
    %160 = vector.shape_cast %156 : vector<8x32xf32> to vector<1x8x32xf32>
    tpu.vector_store %arg6[%157, %c0_46, %c0_47], %160 {strides = array<i32>} : memref<7x8x64xf32, #tpu.memory_space<vmem>>, vector<1x8x32xf32>,
    %c6_i32_48 = arith.constant 6 : i32
    %161 = arith.subi %c6_i32_48, %c1_i32 : i32
    %162 = arith.index_cast %161 : i32 to index
    %c0_49 = arith.constant 0 : index
    %c0_50 = arith.constant 0 : index
    %163 = vector.load %arg1[%162, %c0_49, %c0_50] : memref<7x8x256xf32, #tpu.memory_space<vmem>>, vector<1x8x256xf32>
    %164 = vector.shape_cast %163 : vector<1x8x256xf32> to vector<8x256xf32>
    %165 = vector.extract_strided_slice %164 {offsets = [0, 128], sizes = [8, 128], strides = [1, 1]} : vector<8x256xf32> to vector<8x128xf32>
    %cst_51 = arith.constant dense<0.000000e+00> : vector<8x128xf32>
    %166 = tpu.matmul %99, %1, %cst_51 {dimension_numbers = #tpu.dot_dimension_numbers<[1], [0], [0], [1], [0, 0, 1, 1], [], []>} : vector<8x32xf32>, vector<32x128xf32>, vector<8x128xf32> -> vector<8x128xf32>
    %167 = arith.addf %165, %166 : vector<8x128xf32>
    %168 = vector.extract_strided_slice %167 {offsets = [0, 0], sizes = [8, 32], strides = [1, 1]} : vector<8x128xf32> to vector<8x32xf32>
    %169 = arith.negf %168 : vector<8x32xf32>
    %170 = math.exp %169 : vector<8x32xf32>
    %cst_52 = arith.constant 1.000000e+00 : f32
    %171 = vector.broadcast %cst_52 : f32 to vector<8x32xf32>
    %172 = arith.addf %171, %170 : vector<8x32xf32>
    %173 = arith.divf %171, %172 : vector<8x32xf32>
    %174 = vector.extract_strided_slice %167 {offsets = [0, 32], sizes = [8, 32], strides = [1, 1]} : vector<8x128xf32> to vector<8x32xf32>
    %175 = arith.negf %174 : vector<8x32xf32>
    %176 = math.exp %175 : vector<8x32xf32>
    %cst_53 = arith.constant 1.000000e+00 : f32
    %177 = vector.broadcast %cst_53 : f32 to vector<8x32xf32>
    %178 = arith.addf %177, %176 : vector<8x32xf32>
    %179 = arith.divf %177, %178 : vector<8x32xf32>
    %180 = vector.extract_strided_slice %167 {offsets = [0, 64], sizes = [8, 32], strides = [1, 1]} : vector<8x128xf32> to vector<8x32xf32>
    %181 = math.tanh %180 : vector<8x32xf32>
    %182 = vector.extract_strided_slice %167 {offsets = [0, 96], sizes = [8, 32], strides = [1, 1]} : vector<8x128xf32> to vector<8x32xf32>
    %183 = arith.negf %182 : vector<8x32xf32>
    %184 = math.exp %183 : vector<8x32xf32>
    %cst_54 = arith.constant 1.000000e+00 : f32
    %185 = vector.broadcast %cst_54 : f32 to vector<8x32xf32>
    %186 = arith.addf %185, %184 : vector<8x32xf32>
    %187 = arith.divf %185, %186 : vector<8x32xf32>
    %188 = arith.mulf %179, %102 : vector<8x32xf32>
    %189 = arith.mulf %173, %181 : vector<8x32xf32>
    %190 = arith.addf %188, %189 : vector<8x32xf32>
    %191 = math.tanh %190 : vector<8x32xf32>
    %192 = arith.mulf %187, %191 : vector<8x32xf32>
    %193 = arith.index_cast %161 : i32 to index
    %c0_55 = arith.constant 0 : index
    %c0_56 = arith.constant 0 : index
    %194 = vector.load %arg3[%193, %c0_55, %c0_56] : memref<7x8x1xf32, #tpu.memory_space<vmem>>, vector<1x8x1xf32>
    %195 = vector.shape_cast %194 : vector<1x8x1xf32> to vector<8x1xf32>
    %cst_57 = arith.constant 5.000000e-01 : f32
    %196 = vector.broadcast %cst_57 : f32 to vector<8x1xf32>
    %197 = arith.cmpf ogt, %195, %196 : vector<8x1xf32>
    %198 = vector.shape_cast %197 : vector<8x1xi1> to vector<8x1xi1>
    %199 = vector.broadcast %198 : vector<8x1xi1> to vector<8x32xi1>
    %200 = arith.select %199, %192, %99 : vector<8x32xi1>, vector<8x32xf32>
    %201 = vector.shape_cast %197 : vector<8x1xi1> to vector<8x1xi1>
    %202 = vector.broadcast %201 : vector<8x1xi1> to vector<8x32xi1>
    %203 = arith.select %202, %190, %102 : vector<8x32xi1>, vector<8x32xf32>
    %cst_58 = arith.constant 0.000000e+00 : f32
    %204 = vector.shape_cast %197 : vector<8x1xi1> to vector<8x1xi1>
    %205 = vector.broadcast %204 : vector<8x1xi1> to vector<8x32xi1>
    %206 = vector.broadcast %cst_58 : f32 to vector<8x32xf32>
    %207 = arith.select %205, %192, %206 : vector<8x32xi1>, vector<8x32xf32>
    %208 = arith.index_cast %161 : i32 to index
    %c0_59 = arith.constant 0 : index
    %c32_60 = arith.constant 32 : index
    %209 = vector.load %arg6[%208, %c0_59, %c32_60] : memref<7x8x64xf32, #tpu.memory_space<vmem>>, vector<1x8x32xf32>
    %210 = vector.shape_cast %209 : vector<1x8x32xf32> to vector<8x32xf32>
    %211 = vector.shape_cast %207 : vector<8x32xf32> to vector<1x8x32xf32>
    tpu.vector_store %arg6[%208, %c0_59, %c32_60], %211 {strides = array<i32>} : memref<7x8x64xf32, #tpu.memory_space<vmem>>, vector<1x8x32xf32>,
    %c2_i32 = arith.constant 2 : i32
    %212 = arith.index_cast %c2_i32 : i32 to index
    %c0_61 = arith.constant 0 : index
    %c0_62 = arith.constant 0 : index
    %213 = vector.load %arg1[%212, %c0_61, %c0_62] : memref<7x8x256xf32, #tpu.memory_space<vmem>>, vector<1x8x256xf32>
    %214 = vector.shape_cast %213 : vector<1x8x256xf32> to vector<8x256xf32>
    %215 = vector.extract_strided_slice %214 {offsets = [0, 0], sizes = [8, 128], strides = [1, 1]} : vector<8x256xf32> to vector<8x128xf32>
    %cst_63 = arith.constant dense<0.000000e+00> : vector<8x128xf32>
    %216 = tpu.matmul %149, %0, %cst_63 {dimension_numbers = #tpu.dot_dimension_numbers<[1], [0], [0], [1], [0, 0, 1, 1], [], []>} : vector<8x32xf32>, vector<32x128xf32>, vector<8x128xf32> -> vector<8x128xf32>
    %217 = arith.addf %215, %216 : vector<8x128xf32>
    %218 = vector.extract_strided_slice %217 {offsets = [0, 0], sizes = [8, 32], strides = [1, 1]} : vector<8x128xf32> to vector<8x32xf32>
    %219 = arith.negf %218 : vector<8x32xf32>
    %220 = math.exp %219 : vector<8x32xf32>
    %cst_64 = arith.constant 1.000000e+00 : f32
    %221 = vector.broadcast %cst_64 : f32 to vector<8x32xf32>
    %222 = arith.addf %221, %220 : vector<8x32xf32>
    %223 = arith.divf %221, %222 : vector<8x32xf32>
    %224 = vector.extract_strided_slice %217 {offsets = [0, 32], sizes = [8, 32], strides = [1, 1]} : vector<8x128xf32> to vector<8x32xf32>
    %225 = arith.negf %224 : vector<8x32xf32>
    %226 = math.exp %225 : vector<8x32xf32>
    %cst_65 = arith.constant 1.000000e+00 : f32
    %227 = vector.broadcast %cst_65 : f32 to vector<8x32xf32>
    %228 = arith.addf %227, %226 : vector<8x32xf32>
    %229 = arith.divf %227, %228 : vector<8x32xf32>
    %230 = vector.extract_strided_slice %217 {offsets = [0, 64], sizes = [8, 32], strides = [1, 1]} : vector<8x128xf32> to vector<8x32xf32>
    %231 = math.tanh %230 : vector<8x32xf32>
    %232 = vector.extract_strided_slice %217 {offsets = [0, 96], sizes = [8, 32], strides = [1, 1]} : vector<8x128xf32> to vector<8x32xf32>
    %233 = arith.negf %232 : vector<8x32xf32>
    %234 = math.exp %233 : vector<8x32xf32>
    %cst_66 = arith.constant 1.000000e+00 : f32
    %235 = vector.broadcast %cst_66 : f32 to vector<8x32xf32>
    %236 = arith.addf %235, %234 : vector<8x32xf32>
    %237 = arith.divf %235, %236 : vector<8x32xf32>
    %238 = arith.mulf %229, %152 : vector<8x32xf32>
    %239 = arith.mulf %223, %231 : vector<8x32xf32>
    %240 = arith.addf %238, %239 : vector<8x32xf32>
    %241 = math.tanh %240 : vector<8x32xf32>
    %242 = arith.mulf %237, %241 : vector<8x32xf32>
    %243 = arith.index_cast %c2_i32 : i32 to index
    %c0_67 = arith.constant 0 : index
    %c0_68 = arith.constant 0 : index
    %244 = vector.load %arg3[%243, %c0_67, %c0_68] : memref<7x8x1xf32, #tpu.memory_space<vmem>>, vector<1x8x1xf32>
    %245 = vector.shape_cast %244 : vector<1x8x1xf32> to vector<8x1xf32>
    %cst_69 = arith.constant 5.000000e-01 : f32
    %246 = vector.broadcast %cst_69 : f32 to vector<8x1xf32>
    %247 = arith.cmpf ogt, %245, %246 : vector<8x1xf32>
    %248 = vector.shape_cast %247 : vector<8x1xi1> to vector<8x1xi1>
    %249 = vector.broadcast %248 : vector<8x1xi1> to vector<8x32xi1>
    %250 = arith.select %249, %242, %149 : vector<8x32xi1>, vector<8x32xf32>
    %251 = vector.shape_cast %247 : vector<8x1xi1> to vector<8x1xi1>
    %252 = vector.broadcast %251 : vector<8x1xi1> to vector<8x32xi1>
    %253 = arith.select %252, %240, %152 : vector<8x32xi1>, vector<8x32xf32>
    %cst_70 = arith.constant 0.000000e+00 : f32
    %254 = vector.shape_cast %247 : vector<8x1xi1> to vector<8x1xi1>
    %255 = vector.broadcast %254 : vector<8x1xi1> to vector<8x32xi1>
    %256 = vector.broadcast %cst_70 : f32 to vector<8x32xf32>
    %257 = arith.select %255, %242, %256 : vector<8x32xi1>, vector<8x32xf32>
    %258 = arith.index_cast %c2_i32 : i32 to index
    %c0_71 = arith.constant 0 : index
    %c0_72 = arith.constant 0 : index
    %259 = vector.load %arg6[%258, %c0_71, %c0_72] : memref<7x8x64xf32, #tpu.memory_space<vmem>>, vector<1x8x32xf32>
    %260 = vector.shape_cast %259 : vector<1x8x32xf32> to vector<8x32xf32>
    %261 = vector.shape_cast %257 : vector<8x32xf32> to vector<1x8x32xf32>
    tpu.vector_store %arg6[%258, %c0_71, %c0_72], %261 {strides = array<i32>} : memref<7x8x64xf32, #tpu.memory_space<vmem>>, vector<1x8x32xf32>,
    %c6_i32_73 = arith.constant 6 : i32
    %262 = arith.subi %c6_i32_73, %c2_i32 : i32
    %263 = arith.index_cast %262 : i32 to index
    %c0_74 = arith.constant 0 : index
    %c0_75 = arith.constant 0 : index
    %264 = vector.load %arg1[%263, %c0_74, %c0_75] : memref<7x8x256xf32, #tpu.memory_space<vmem>>, vector<1x8x256xf32>
    %265 = vector.shape_cast %264 : vector<1x8x256xf32> to vector<8x256xf32>
    %266 = vector.extract_strided_slice %265 {offsets = [0, 128], sizes = [8, 128], strides = [1, 1]} : vector<8x256xf32> to vector<8x128xf32>
    %cst_76 = arith.constant dense<0.000000e+00> : vector<8x128xf32>
    %267 = tpu.matmul %200, %1, %cst_76 {dimension_numbers = #tpu.dot_dimension_numbers<[1], [0], [0], [1], [0, 0, 1, 1], [], []>} : vector<8x32xf32>, vector<32x128xf32>, vector<8x128xf32> -> vector<8x128xf32>
    %268 = arith.addf %266, %267 : vector<8x128xf32>
    %269 = vector.extract_strided_slice %268 {offsets = [0, 0], sizes = [8, 32], strides = [1, 1]} : vector<8x128xf32> to vector<8x32xf32>
    %270 = arith.negf %269 : vector<8x32xf32>
    %271 = math.exp %270 : vector<8x32xf32>
    %cst_77 = arith.constant 1.000000e+00 : f32
    %272 = vector.broadcast %cst_77 : f32 to vector<8x32xf32>
    %273 = arith.addf %272, %271 : vector<8x32xf32>
    %274 = arith.divf %272, %273 : vector<8x32xf32>
    %275 = vector.extract_strided_slice %268 {offsets = [0, 32], sizes = [8, 32], strides = [1, 1]} : vector<8x128xf32> to vector<8x32xf32>
    %276 = arith.negf %275 : vector<8x32xf32>
    %277 = math.exp %276 : vector<8x32xf32>
    %cst_78 = arith.constant 1.000000e+00 : f32
    %278 = vector.broadcast %cst_78 : f32 to vector<8x32xf32>
    %279 = arith.addf %278, %277 : vector<8x32xf32>
    %280 = arith.divf %278, %279 : vector<8x32xf32>
    %281 = vector.extract_strided_slice %268 {offsets = [0, 64], sizes = [8, 32], strides = [1, 1]} : vector<8x128xf32> to vector<8x32xf32>
    %282 = math.tanh %281 : vector<8x32xf32>
    %283 = vector.extract_strided_slice %268 {offsets = [0, 96], sizes = [8, 32], strides = [1, 1]} : vector<8x128xf32> to vector<8x32xf32>
    %284 = arith.negf %283 : vector<8x32xf32>
    %285 = math.exp %284 : vector<8x32xf32>
    %cst_79 = arith.constant 1.000000e+00 : f32
    %286 = vector.broadcast %cst_79 : f32 to vector<8x32xf32>
    %287 = arith.addf %286, %285 : vector<8x32xf32>
    %288 = arith.divf %286, %287 : vector<8x32xf32>
    %289 = arith.mulf %280, %203 : vector<8x32xf32>
    %290 = arith.mulf %274, %282 : vector<8x32xf32>
    %291 = arith.addf %289, %290 : vector<8x32xf32>
    %292 = math.tanh %291 : vector<8x32xf32>
    %293 = arith.mulf %288, %292 : vector<8x32xf32>
    %294 = arith.index_cast %262 : i32 to index
    %c0_80 = arith.constant 0 : index
    %c0_81 = arith.constant 0 : index
    %295 = vector.load %arg3[%294, %c0_80, %c0_81] : memref<7x8x1xf32, #tpu.memory_space<vmem>>, vector<1x8x1xf32>
    %296 = vector.shape_cast %295 : vector<1x8x1xf32> to vector<8x1xf32>
    %cst_82 = arith.constant 5.000000e-01 : f32
    %297 = vector.broadcast %cst_82 : f32 to vector<8x1xf32>
    %298 = arith.cmpf ogt, %296, %297 : vector<8x1xf32>
    %299 = vector.shape_cast %298 : vector<8x1xi1> to vector<8x1xi1>
    %300 = vector.broadcast %299 : vector<8x1xi1> to vector<8x32xi1>
    %301 = arith.select %300, %293, %200 : vector<8x32xi1>, vector<8x32xf32>
    %302 = vector.shape_cast %298 : vector<8x1xi1> to vector<8x1xi1>
    %303 = vector.broadcast %302 : vector<8x1xi1> to vector<8x32xi1>
    %304 = arith.select %303, %291, %203 : vector<8x32xi1>, vector<8x32xf32>
    %cst_83 = arith.constant 0.000000e+00 : f32
    %305 = vector.shape_cast %298 : vector<8x1xi1> to vector<8x1xi1>
    %306 = vector.broadcast %305 : vector<8x1xi1> to vector<8x32xi1>
    %307 = vector.broadcast %cst_83 : f32 to vector<8x32xf32>
    %308 = arith.select %306, %293, %307 : vector<8x32xi1>, vector<8x32xf32>
    %309 = arith.index_cast %262 : i32 to index
    %c0_84 = arith.constant 0 : index
    %c32_85 = arith.constant 32 : index
    %310 = vector.load %arg6[%309, %c0_84, %c32_85] : memref<7x8x64xf32, #tpu.memory_space<vmem>>, vector<1x8x32xf32>
    %311 = vector.shape_cast %310 : vector<1x8x32xf32> to vector<8x32xf32>
    %312 = vector.shape_cast %308 : vector<8x32xf32> to vector<1x8x32xf32>
    tpu.vector_store %arg6[%309, %c0_84, %c32_85], %312 {strides = array<i32>} : memref<7x8x64xf32, #tpu.memory_space<vmem>>, vector<1x8x32xf32>,
    %c3_i32 = arith.constant 3 : i32
    %313 = arith.index_cast %c3_i32 : i32 to index
    %c0_86 = arith.constant 0 : index
    %c0_87 = arith.constant 0 : index
    %314 = vector.load %arg1[%313, %c0_86, %c0_87] : memref<7x8x256xf32, #tpu.memory_space<vmem>>, vector<1x8x256xf32>
    %315 = vector.shape_cast %314 : vector<1x8x256xf32> to vector<8x256xf32>
    %316 = vector.extract_strided_slice %315 {offsets = [0, 0], sizes = [8, 128], strides = [1, 1]} : vector<8x256xf32> to vector<8x128xf32>
    %cst_88 = arith.constant dense<0.000000e+00> : vector<8x128xf32>
    %317 = tpu.matmul %250, %0, %cst_88 {dimension_numbers = #tpu.dot_dimension_numbers<[1], [0], [0], [1], [0, 0, 1, 1], [], []>} : vector<8x32xf32>, vector<32x128xf32>, vector<8x128xf32> -> vector<8x128xf32>
    %318 = arith.addf %316, %317 : vector<8x128xf32>
    %319 = vector.extract_strided_slice %318 {offsets = [0, 0], sizes = [8, 32], strides = [1, 1]} : vector<8x128xf32> to vector<8x32xf32>
    %320 = arith.negf %319 : vector<8x32xf32>
    %321 = math.exp %320 : vector<8x32xf32>
    %cst_89 = arith.constant 1.000000e+00 : f32
    %322 = vector.broadcast %cst_89 : f32 to vector<8x32xf32>
    %323 = arith.addf %322, %321 : vector<8x32xf32>
    %324 = arith.divf %322, %323 : vector<8x32xf32>
    %325 = vector.extract_strided_slice %318 {offsets = [0, 32], sizes = [8, 32], strides = [1, 1]} : vector<8x128xf32> to vector<8x32xf32>
    %326 = arith.negf %325 : vector<8x32xf32>
    %327 = math.exp %326 : vector<8x32xf32>
    %cst_90 = arith.constant 1.000000e+00 : f32
    %328 = vector.broadcast %cst_90 : f32 to vector<8x32xf32>
    %329 = arith.addf %328, %327 : vector<8x32xf32>
    %330 = arith.divf %328, %329 : vector<8x32xf32>
    %331 = vector.extract_strided_slice %318 {offsets = [0, 64], sizes = [8, 32], strides = [1, 1]} : vector<8x128xf32> to vector<8x32xf32>
    %332 = math.tanh %331 : vector<8x32xf32>
    %333 = vector.extract_strided_slice %318 {offsets = [0, 96], sizes = [8, 32], strides = [1, 1]} : vector<8x128xf32> to vector<8x32xf32>
    %334 = arith.negf %333 : vector<8x32xf32>
    %335 = math.exp %334 : vector<8x32xf32>
    %cst_91 = arith.constant 1.000000e+00 : f32
    %336 = vector.broadcast %cst_91 : f32 to vector<8x32xf32>
    %337 = arith.addf %336, %335 : vector<8x32xf32>
    %338 = arith.divf %336, %337 : vector<8x32xf32>
    %339 = arith.mulf %330, %253 : vector<8x32xf32>
    %340 = arith.mulf %324, %332 : vector<8x32xf32>
    %341 = arith.addf %339, %340 : vector<8x32xf32>
    %342 = math.tanh %341 : vector<8x32xf32>
    %343 = arith.mulf %338, %342 : vector<8x32xf32>
    %344 = arith.index_cast %c3_i32 : i32 to index
    %c0_92 = arith.constant 0 : index
    %c0_93 = arith.constant 0 : index
    %345 = vector.load %arg3[%344, %c0_92, %c0_93] : memref<7x8x1xf32, #tpu.memory_space<vmem>>, vector<1x8x1xf32>
    %346 = vector.shape_cast %345 : vector<1x8x1xf32> to vector<8x1xf32>
    %cst_94 = arith.constant 5.000000e-01 : f32
    %347 = vector.broadcast %cst_94 : f32 to vector<8x1xf32>
    %348 = arith.cmpf ogt, %346, %347 : vector<8x1xf32>
    %349 = vector.shape_cast %348 : vector<8x1xi1> to vector<8x1xi1>
    %350 = vector.broadcast %349 : vector<8x1xi1> to vector<8x32xi1>
    %351 = arith.select %350, %343, %250 : vector<8x32xi1>, vector<8x32xf32>
    %352 = vector.shape_cast %348 : vector<8x1xi1> to vector<8x1xi1>
    %353 = vector.broadcast %352 : vector<8x1xi1> to vector<8x32xi1>
    %354 = arith.select %353, %341, %253 : vector<8x32xi1>, vector<8x32xf32>
    %cst_95 = arith.constant 0.000000e+00 : f32
    %355 = vector.shape_cast %348 : vector<8x1xi1> to vector<8x1xi1>
    %356 = vector.broadcast %355 : vector<8x1xi1> to vector<8x32xi1>
    %357 = vector.broadcast %cst_95 : f32 to vector<8x32xf32>
    %358 = arith.select %356, %343, %357 : vector<8x32xi1>, vector<8x32xf32>
    %359 = arith.index_cast %c3_i32 : i32 to index
    %c0_96 = arith.constant 0 : index
    %c0_97 = arith.constant 0 : index
    %360 = vector.load %arg6[%359, %c0_96, %c0_97] : memref<7x8x64xf32, #tpu.memory_space<vmem>>, vector<1x8x32xf32>
    %361 = vector.shape_cast %360 : vector<1x8x32xf32> to vector<8x32xf32>
    %362 = vector.shape_cast %358 : vector<8x32xf32> to vector<1x8x32xf32>
    tpu.vector_store %arg6[%359, %c0_96, %c0_97], %362 {strides = array<i32>} : memref<7x8x64xf32, #tpu.memory_space<vmem>>, vector<1x8x32xf32>,
    %c6_i32_98 = arith.constant 6 : i32
    %363 = arith.subi %c6_i32_98, %c3_i32 : i32
    %364 = arith.index_cast %363 : i32 to index
    %c0_99 = arith.constant 0 : index
    %c0_100 = arith.constant 0 : index
    %365 = vector.load %arg1[%364, %c0_99, %c0_100] : memref<7x8x256xf32, #tpu.memory_space<vmem>>, vector<1x8x256xf32>
    %366 = vector.shape_cast %365 : vector<1x8x256xf32> to vector<8x256xf32>
    %367 = vector.extract_strided_slice %366 {offsets = [0, 128], sizes = [8, 128], strides = [1, 1]} : vector<8x256xf32> to vector<8x128xf32>
    %cst_101 = arith.constant dense<0.000000e+00> : vector<8x128xf32>
    %368 = tpu.matmul %301, %1, %cst_101 {dimension_numbers = #tpu.dot_dimension_numbers<[1], [0], [0], [1], [0, 0, 1, 1], [], []>} : vector<8x32xf32>, vector<32x128xf32>, vector<8x128xf32> -> vector<8x128xf32>
    %369 = arith.addf %367, %368 : vector<8x128xf32>
    %370 = vector.extract_strided_slice %369 {offsets = [0, 0], sizes = [8, 32], strides = [1, 1]} : vector<8x128xf32> to vector<8x32xf32>
    %371 = arith.negf %370 : vector<8x32xf32>
    %372 = math.exp %371 : vector<8x32xf32>
    %cst_102 = arith.constant 1.000000e+00 : f32
    %373 = vector.broadcast %cst_102 : f32 to vector<8x32xf32>
    %374 = arith.addf %373, %372 : vector<8x32xf32>
    %375 = arith.divf %373, %374 : vector<8x32xf32>
    %376 = vector.extract_strided_slice %369 {offsets = [0, 32], sizes = [8, 32], strides = [1, 1]} : vector<8x128xf32> to vector<8x32xf32>
    %377 = arith.negf %376 : vector<8x32xf32>
    %378 = math.exp %377 : vector<8x32xf32>
    %cst_103 = arith.constant 1.000000e+00 : f32
    %379 = vector.broadcast %cst_103 : f32 to vector<8x32xf32>
    %380 = arith.addf %379, %378 : vector<8x32xf32>
    %381 = arith.divf %379, %380 : vector<8x32xf32>
    %382 = vector.extract_strided_slice %369 {offsets = [0, 64], sizes = [8, 32], strides = [1, 1]} : vector<8x128xf32> to vector<8x32xf32>
    %383 = math.tanh %382 : vector<8x32xf32>
    %384 = vector.extract_strided_slice %369 {offsets = [0, 96], sizes = [8, 32], strides = [1, 1]} : vector<8x128xf32> to vector<8x32xf32>
    %385 = arith.negf %384 : vector<8x32xf32>
    %386 = math.exp %385 : vector<8x32xf32>
    %cst_104 = arith.constant 1.000000e+00 : f32
    %387 = vector.broadcast %cst_104 : f32 to vector<8x32xf32>
    %388 = arith.addf %387, %386 : vector<8x32xf32>
    %389 = arith.divf %387, %388 : vector<8x32xf32>
    %390 = arith.mulf %381, %304 : vector<8x32xf32>
    %391 = arith.mulf %375, %383 : vector<8x32xf32>
    %392 = arith.addf %390, %391 : vector<8x32xf32>
    %393 = math.tanh %392 : vector<8x32xf32>
    %394 = arith.mulf %389, %393 : vector<8x32xf32>
    %395 = arith.index_cast %363 : i32 to index
    %c0_105 = arith.constant 0 : index
    %c0_106 = arith.constant 0 : index
    %396 = vector.load %arg3[%395, %c0_105, %c0_106] : memref<7x8x1xf32, #tpu.memory_space<vmem>>, vector<1x8x1xf32>
    %397 = vector.shape_cast %396 : vector<1x8x1xf32> to vector<8x1xf32>
    %cst_107 = arith.constant 5.000000e-01 : f32
    %398 = vector.broadcast %cst_107 : f32 to vector<8x1xf32>
    %399 = arith.cmpf ogt, %397, %398 : vector<8x1xf32>
    %400 = vector.shape_cast %399 : vector<8x1xi1> to vector<8x1xi1>
    %401 = vector.broadcast %400 : vector<8x1xi1> to vector<8x32xi1>
    %402 = arith.select %401, %394, %301 : vector<8x32xi1>, vector<8x32xf32>
    %403 = vector.shape_cast %399 : vector<8x1xi1> to vector<8x1xi1>
    %404 = vector.broadcast %403 : vector<8x1xi1> to vector<8x32xi1>
    %405 = arith.select %404, %392, %304 : vector<8x32xi1>, vector<8x32xf32>
    %cst_108 = arith.constant 0.000000e+00 : f32
    %406 = vector.shape_cast %399 : vector<8x1xi1> to vector<8x1xi1>
    %407 = vector.broadcast %406 : vector<8x1xi1> to vector<8x32xi1>
    %408 = vector.broadcast %cst_108 : f32 to vector<8x32xf32>
    %409 = arith.select %407, %394, %408 : vector<8x32xi1>, vector<8x32xf32>
    %410 = arith.index_cast %363 : i32 to index
    %c0_109 = arith.constant 0 : index
    %c32_110 = arith.constant 32 : index
    %411 = vector.load %arg6[%410, %c0_109, %c32_110] : memref<7x8x64xf32, #tpu.memory_space<vmem>>, vector<1x8x32xf32>
    %412 = vector.shape_cast %411 : vector<1x8x32xf32> to vector<8x32xf32>
    %413 = vector.shape_cast %409 : vector<8x32xf32> to vector<1x8x32xf32>
    tpu.vector_store %arg6[%410, %c0_109, %c32_110], %413 {strides = array<i32>} : memref<7x8x64xf32, #tpu.memory_space<vmem>>, vector<1x8x32xf32>,
    %c4_i32 = arith.constant 4 : i32
    %414 = arith.index_cast %c4_i32 : i32 to index
    %c0_111 = arith.constant 0 : index
    %c0_112 = arith.constant 0 : index
    %415 = vector.load %arg1[%414, %c0_111, %c0_112] : memref<7x8x256xf32, #tpu.memory_space<vmem>>, vector<1x8x256xf32>
    %416 = vector.shape_cast %415 : vector<1x8x256xf32> to vector<8x256xf32>
    %417 = vector.extract_strided_slice %416 {offsets = [0, 0], sizes = [8, 128], strides = [1, 1]} : vector<8x256xf32> to vector<8x128xf32>
    %cst_113 = arith.constant dense<0.000000e+00> : vector<8x128xf32>
    %418 = tpu.matmul %351, %0, %cst_113 {dimension_numbers = #tpu.dot_dimension_numbers<[1], [0], [0], [1], [0, 0, 1, 1], [], []>} : vector<8x32xf32>, vector<32x128xf32>, vector<8x128xf32> -> vector<8x128xf32>
    %419 = arith.addf %417, %418 : vector<8x128xf32>
    %420 = vector.extract_strided_slice %419 {offsets = [0, 0], sizes = [8, 32], strides = [1, 1]} : vector<8x128xf32> to vector<8x32xf32>
    %421 = arith.negf %420 : vector<8x32xf32>
    %422 = math.exp %421 : vector<8x32xf32>
    %cst_114 = arith.constant 1.000000e+00 : f32
    %423 = vector.broadcast %cst_114 : f32 to vector<8x32xf32>
    %424 = arith.addf %423, %422 : vector<8x32xf32>
    %425 = arith.divf %423, %424 : vector<8x32xf32>
    %426 = vector.extract_strided_slice %419 {offsets = [0, 32], sizes = [8, 32], strides = [1, 1]} : vector<8x128xf32> to vector<8x32xf32>
    %427 = arith.negf %426 : vector<8x32xf32>
    %428 = math.exp %427 : vector<8x32xf32>
    %cst_115 = arith.constant 1.000000e+00 : f32
    %429 = vector.broadcast %cst_115 : f32 to vector<8x32xf32>
    %430 = arith.addf %429, %428 : vector<8x32xf32>
    %431 = arith.divf %429, %430 : vector<8x32xf32>
    %432 = vector.extract_strided_slice %419 {offsets = [0, 64], sizes = [8, 32], strides = [1, 1]} : vector<8x128xf32> to vector<8x32xf32>
    %433 = math.tanh %432 : vector<8x32xf32>
    %434 = vector.extract_strided_slice %419 {offsets = [0, 96], sizes = [8, 32], strides = [1, 1]} : vector<8x128xf32> to vector<8x32xf32>
    %435 = arith.negf %434 : vector<8x32xf32>
    %436 = math.exp %435 : vector<8x32xf32>
    %cst_116 = arith.constant 1.000000e+00 : f32
    %437 = vector.broadcast %cst_116 : f32 to vector<8x32xf32>
    %438 = arith.addf %437, %436 : vector<8x32xf32>
    %439 = arith.divf %437, %438 : vector<8x32xf32>
    %440 = arith.mulf %431, %354 : vector<8x32xf32>
    %441 = arith.mulf %425, %433 : vector<8x32xf32>
    %442 = arith.addf %440, %441 : vector<8x32xf32>
    %443 = math.tanh %442 : vector<8x32xf32>
    %444 = arith.mulf %439, %443 : vector<8x32xf32>
    %445 = arith.index_cast %c4_i32 : i32 to index
    %c0_117 = arith.constant 0 : index
    %c0_118 = arith.constant 0 : index
    %446 = vector.load %arg3[%445, %c0_117, %c0_118] : memref<7x8x1xf32, #tpu.memory_space<vmem>>, vector<1x8x1xf32>
    %447 = vector.shape_cast %446 : vector<1x8x1xf32> to vector<8x1xf32>
    %cst_119 = arith.constant 5.000000e-01 : f32
    %448 = vector.broadcast %cst_119 : f32 to vector<8x1xf32>
    %449 = arith.cmpf ogt, %447, %448 : vector<8x1xf32>
    %450 = vector.shape_cast %449 : vector<8x1xi1> to vector<8x1xi1>
    %451 = vector.broadcast %450 : vector<8x1xi1> to vector<8x32xi1>
    %452 = arith.select %451, %444, %351 : vector<8x32xi1>, vector<8x32xf32>
    %453 = vector.shape_cast %449 : vector<8x1xi1> to vector<8x1xi1>
    %454 = vector.broadcast %453 : vector<8x1xi1> to vector<8x32xi1>
    %455 = arith.select %454, %442, %354 : vector<8x32xi1>, vector<8x32xf32>
    %cst_120 = arith.constant 0.000000e+00 : f32
    %456 = vector.shape_cast %449 : vector<8x1xi1> to vector<8x1xi1>
    %457 = vector.broadcast %456 : vector<8x1xi1> to vector<8x32xi1>
    %458 = vector.broadcast %cst_120 : f32 to vector<8x32xf32>
    %459 = arith.select %457, %444, %458 : vector<8x32xi1>, vector<8x32xf32>
    %460 = arith.index_cast %c4_i32 : i32 to index
    %c0_121 = arith.constant 0 : index
    %c0_122 = arith.constant 0 : index
    %461 = vector.load %arg6[%460, %c0_121, %c0_122] : memref<7x8x64xf32, #tpu.memory_space<vmem>>, vector<1x8x32xf32>
    %462 = vector.shape_cast %461 : vector<1x8x32xf32> to vector<8x32xf32>
    %463 = vector.shape_cast %459 : vector<8x32xf32> to vector<1x8x32xf32>
    tpu.vector_store %arg6[%460, %c0_121, %c0_122], %463 {strides = array<i32>} : memref<7x8x64xf32, #tpu.memory_space<vmem>>, vector<1x8x32xf32>,
    %c6_i32_123 = arith.constant 6 : i32
    %464 = arith.subi %c6_i32_123, %c4_i32 : i32
    %465 = arith.index_cast %464 : i32 to index
    %c0_124 = arith.constant 0 : index
    %c0_125 = arith.constant 0 : index
    %466 = vector.load %arg1[%465, %c0_124, %c0_125] : memref<7x8x256xf32, #tpu.memory_space<vmem>>, vector<1x8x256xf32>
    %467 = vector.shape_cast %466 : vector<1x8x256xf32> to vector<8x256xf32>
    %468 = vector.extract_strided_slice %467 {offsets = [0, 128], sizes = [8, 128], strides = [1, 1]} : vector<8x256xf32> to vector<8x128xf32>
    %cst_126 = arith.constant dense<0.000000e+00> : vector<8x128xf32>
    %469 = tpu.matmul %402, %1, %cst_126 {dimension_numbers = #tpu.dot_dimension_numbers<[1], [0], [0], [1], [0, 0, 1, 1], [], []>} : vector<8x32xf32>, vector<32x128xf32>, vector<8x128xf32> -> vector<8x128xf32>
    %470 = arith.addf %468, %469 : vector<8x128xf32>
    %471 = vector.extract_strided_slice %470 {offsets = [0, 0], sizes = [8, 32], strides = [1, 1]} : vector<8x128xf32> to vector<8x32xf32>
    %472 = arith.negf %471 : vector<8x32xf32>
    %473 = math.exp %472 : vector<8x32xf32>
    %cst_127 = arith.constant 1.000000e+00 : f32
    %474 = vector.broadcast %cst_127 : f32 to vector<8x32xf32>
    %475 = arith.addf %474, %473 : vector<8x32xf32>
    %476 = arith.divf %474, %475 : vector<8x32xf32>
    %477 = vector.extract_strided_slice %470 {offsets = [0, 32], sizes = [8, 32], strides = [1, 1]} : vector<8x128xf32> to vector<8x32xf32>
    %478 = arith.negf %477 : vector<8x32xf32>
    %479 = math.exp %478 : vector<8x32xf32>
    %cst_128 = arith.constant 1.000000e+00 : f32
    %480 = vector.broadcast %cst_128 : f32 to vector<8x32xf32>
    %481 = arith.addf %480, %479 : vector<8x32xf32>
    %482 = arith.divf %480, %481 : vector<8x32xf32>
    %483 = vector.extract_strided_slice %470 {offsets = [0, 64], sizes = [8, 32], strides = [1, 1]} : vector<8x128xf32> to vector<8x32xf32>
    %484 = math.tanh %483 : vector<8x32xf32>
    %485 = vector.extract_strided_slice %470 {offsets = [0, 96], sizes = [8, 32], strides = [1, 1]} : vector<8x128xf32> to vector<8x32xf32>
    %486 = arith.negf %485 : vector<8x32xf32>
    %487 = math.exp %486 : vector<8x32xf32>
    %cst_129 = arith.constant 1.000000e+00 : f32
    %488 = vector.broadcast %cst_129 : f32 to vector<8x32xf32>
    %489 = arith.addf %488, %487 : vector<8x32xf32>
    %490 = arith.divf %488, %489 : vector<8x32xf32>
    %491 = arith.mulf %482, %405 : vector<8x32xf32>
    %492 = arith.mulf %476, %484 : vector<8x32xf32>
    %493 = arith.addf %491, %492 : vector<8x32xf32>
    %494 = math.tanh %493 : vector<8x32xf32>
    %495 = arith.mulf %490, %494 : vector<8x32xf32>
    %496 = arith.index_cast %464 : i32 to index
    %c0_130 = arith.constant 0 : index
    %c0_131 = arith.constant 0 : index
    %497 = vector.load %arg3[%496, %c0_130, %c0_131] : memref<7x8x1xf32, #tpu.memory_space<vmem>>, vector<1x8x1xf32>
    %498 = vector.shape_cast %497 : vector<1x8x1xf32> to vector<8x1xf32>
    %cst_132 = arith.constant 5.000000e-01 : f32
    %499 = vector.broadcast %cst_132 : f32 to vector<8x1xf32>
    %500 = arith.cmpf ogt, %498, %499 : vector<8x1xf32>
    %501 = vector.shape_cast %500 : vector<8x1xi1> to vector<8x1xi1>
    %502 = vector.broadcast %501 : vector<8x1xi1> to vector<8x32xi1>
    %503 = arith.select %502, %495, %402 : vector<8x32xi1>, vector<8x32xf32>
    %504 = vector.shape_cast %500 : vector<8x1xi1> to vector<8x1xi1>
    %505 = vector.broadcast %504 : vector<8x1xi1> to vector<8x32xi1>
    %506 = arith.select %505, %493, %405 : vector<8x32xi1>, vector<8x32xf32>
    %cst_133 = arith.constant 0.000000e+00 : f32
    %507 = vector.shape_cast %500 : vector<8x1xi1> to vector<8x1xi1>
    %508 = vector.broadcast %507 : vector<8x1xi1> to vector<8x32xi1>
    %509 = vector.broadcast %cst_133 : f32 to vector<8x32xf32>
    %510 = arith.select %508, %495, %509 : vector<8x32xi1>, vector<8x32xf32>
    %511 = arith.index_cast %464 : i32 to index
    %c0_134 = arith.constant 0 : index
    %c32_135 = arith.constant 32 : index
    %512 = vector.load %arg6[%511, %c0_134, %c32_135] : memref<7x8x64xf32, #tpu.memory_space<vmem>>, vector<1x8x32xf32>
    %513 = vector.shape_cast %512 : vector<1x8x32xf32> to vector<8x32xf32>
    %514 = vector.shape_cast %510 : vector<8x32xf32> to vector<1x8x32xf32>
    tpu.vector_store %arg6[%511, %c0_134, %c32_135], %514 {strides = array<i32>} : memref<7x8x64xf32, #tpu.memory_space<vmem>>, vector<1x8x32xf32>,
    %c5_i32 = arith.constant 5 : i32
    %515 = arith.index_cast %c5_i32 : i32 to index
    %c0_136 = arith.constant 0 : index
    %c0_137 = arith.constant 0 : index
    %516 = vector.load %arg1[%515, %c0_136, %c0_137] : memref<7x8x256xf32, #tpu.memory_space<vmem>>, vector<1x8x256xf32>
    %517 = vector.shape_cast %516 : vector<1x8x256xf32> to vector<8x256xf32>
    %518 = vector.extract_strided_slice %517 {offsets = [0, 0], sizes = [8, 128], strides = [1, 1]} : vector<8x256xf32> to vector<8x128xf32>
    %cst_138 = arith.constant dense<0.000000e+00> : vector<8x128xf32>
    %519 = tpu.matmul %452, %0, %cst_138 {dimension_numbers = #tpu.dot_dimension_numbers<[1], [0], [0], [1], [0, 0, 1, 1], [], []>} : vector<8x32xf32>, vector<32x128xf32>, vector<8x128xf32> -> vector<8x128xf32>
    %520 = arith.addf %518, %519 : vector<8x128xf32>
    %521 = vector.extract_strided_slice %520 {offsets = [0, 0], sizes = [8, 32], strides = [1, 1]} : vector<8x128xf32> to vector<8x32xf32>
    %522 = arith.negf %521 : vector<8x32xf32>
    %523 = math.exp %522 : vector<8x32xf32>
    %cst_139 = arith.constant 1.000000e+00 : f32
    %524 = vector.broadcast %cst_139 : f32 to vector<8x32xf32>
    %525 = arith.addf %524, %523 : vector<8x32xf32>
    %526 = arith.divf %524, %525 : vector<8x32xf32>
    %527 = vector.extract_strided_slice %520 {offsets = [0, 32], sizes = [8, 32], strides = [1, 1]} : vector<8x128xf32> to vector<8x32xf32>
    %528 = arith.negf %527 : vector<8x32xf32>
    %529 = math.exp %528 : vector<8x32xf32>
    %cst_140 = arith.constant 1.000000e+00 : f32
    %530 = vector.broadcast %cst_140 : f32 to vector<8x32xf32>
    %531 = arith.addf %530, %529 : vector<8x32xf32>
    %532 = arith.divf %530, %531 : vector<8x32xf32>
    %533 = vector.extract_strided_slice %520 {offsets = [0, 64], sizes = [8, 32], strides = [1, 1]} : vector<8x128xf32> to vector<8x32xf32>
    %534 = math.tanh %533 : vector<8x32xf32>
    %535 = vector.extract_strided_slice %520 {offsets = [0, 96], sizes = [8, 32], strides = [1, 1]} : vector<8x128xf32> to vector<8x32xf32>
    %536 = arith.negf %535 : vector<8x32xf32>
    %537 = math.exp %536 : vector<8x32xf32>
    %cst_141 = arith.constant 1.000000e+00 : f32
    %538 = vector.broadcast %cst_141 : f32 to vector<8x32xf32>
    %539 = arith.addf %538, %537 : vector<8x32xf32>
    %540 = arith.divf %538, %539 : vector<8x32xf32>
    %541 = arith.mulf %532, %455 : vector<8x32xf32>
    %542 = arith.mulf %526, %534 : vector<8x32xf32>
    %543 = arith.addf %541, %542 : vector<8x32xf32>
    %544 = math.tanh %543 : vector<8x32xf32>
    %545 = arith.mulf %540, %544 : vector<8x32xf32>
    %546 = arith.index_cast %c5_i32 : i32 to index
    %c0_142 = arith.constant 0 : index
    %c0_143 = arith.constant 0 : index
    %547 = vector.load %arg3[%546, %c0_142, %c0_143] : memref<7x8x1xf32, #tpu.memory_space<vmem>>, vector<1x8x1xf32>
    %548 = vector.shape_cast %547 : vector<1x8x1xf32> to vector<8x1xf32>
    %cst_144 = arith.constant 5.000000e-01 : f32
    %549 = vector.broadcast %cst_144 : f32 to vector<8x1xf32>
    %550 = arith.cmpf ogt, %548, %549 : vector<8x1xf32>
    %551 = vector.shape_cast %550 : vector<8x1xi1> to vector<8x1xi1>
    %552 = vector.broadcast %551 : vector<8x1xi1> to vector<8x32xi1>
    %553 = arith.select %552, %545, %452 : vector<8x32xi1>, vector<8x32xf32>
    %554 = vector.shape_cast %550 : vector<8x1xi1> to vector<8x1xi1>
    %555 = vector.broadcast %554 : vector<8x1xi1> to vector<8x32xi1>
    %556 = arith.select %555, %543, %455 : vector<8x32xi1>, vector<8x32xf32>
    %cst_145 = arith.constant 0.000000e+00 : f32
    %557 = vector.shape_cast %550 : vector<8x1xi1> to vector<8x1xi1>
    %558 = vector.broadcast %557 : vector<8x1xi1> to vector<8x32xi1>
    %559 = vector.broadcast %cst_145 : f32 to vector<8x32xf32>
    %560 = arith.select %558, %545, %559 : vector<8x32xi1>, vector<8x32xf32>
    %561 = arith.index_cast %c5_i32 : i32 to index
    %c0_146 = arith.constant 0 : index
    %c0_147 = arith.constant 0 : index
    %562 = vector.load %arg6[%561, %c0_146, %c0_147] : memref<7x8x64xf32, #tpu.memory_space<vmem>>, vector<1x8x32xf32>
    %563 = vector.shape_cast %562 : vector<1x8x32xf32> to vector<8x32xf32>
    %564 = vector.shape_cast %560 : vector<8x32xf32> to vector<1x8x32xf32>
    tpu.vector_store %arg6[%561, %c0_146, %c0_147], %564 {strides = array<i32>} : memref<7x8x64xf32, #tpu.memory_space<vmem>>, vector<1x8x32xf32>,
    %c6_i32_148 = arith.constant 6 : i32
    %565 = arith.subi %c6_i32_148, %c5_i32 : i32
    %566 = arith.index_cast %565 : i32 to index
    %c0_149 = arith.constant 0 : index
    %c0_150 = arith.constant 0 : index
    %567 = vector.load %arg1[%566, %c0_149, %c0_150] : memref<7x8x256xf32, #tpu.memory_space<vmem>>, vector<1x8x256xf32>
    %568 = vector.shape_cast %567 : vector<1x8x256xf32> to vector<8x256xf32>
    %569 = vector.extract_strided_slice %568 {offsets = [0, 128], sizes = [8, 128], strides = [1, 1]} : vector<8x256xf32> to vector<8x128xf32>
    %cst_151 = arith.constant dense<0.000000e+00> : vector<8x128xf32>
    %570 = tpu.matmul %503, %1, %cst_151 {dimension_numbers = #tpu.dot_dimension_numbers<[1], [0], [0], [1], [0, 0, 1, 1], [], []>} : vector<8x32xf32>, vector<32x128xf32>, vector<8x128xf32> -> vector<8x128xf32>
    %571 = arith.addf %569, %570 : vector<8x128xf32>
    %572 = vector.extract_strided_slice %571 {offsets = [0, 0], sizes = [8, 32], strides = [1, 1]} : vector<8x128xf32> to vector<8x32xf32>
    %573 = arith.negf %572 : vector<8x32xf32>
    %574 = math.exp %573 : vector<8x32xf32>
    %cst_152 = arith.constant 1.000000e+00 : f32
    %575 = vector.broadcast %cst_152 : f32 to vector<8x32xf32>
    %576 = arith.addf %575, %574 : vector<8x32xf32>
    %577 = arith.divf %575, %576 : vector<8x32xf32>
    %578 = vector.extract_strided_slice %571 {offsets = [0, 32], sizes = [8, 32], strides = [1, 1]} : vector<8x128xf32> to vector<8x32xf32>
    %579 = arith.negf %578 : vector<8x32xf32>
    %580 = math.exp %579 : vector<8x32xf32>
    %cst_153 = arith.constant 1.000000e+00 : f32
    %581 = vector.broadcast %cst_153 : f32 to vector<8x32xf32>
    %582 = arith.addf %581, %580 : vector<8x32xf32>
    %583 = arith.divf %581, %582 : vector<8x32xf32>
    %584 = vector.extract_strided_slice %571 {offsets = [0, 64], sizes = [8, 32], strides = [1, 1]} : vector<8x128xf32> to vector<8x32xf32>
    %585 = math.tanh %584 : vector<8x32xf32>
    %586 = vector.extract_strided_slice %571 {offsets = [0, 96], sizes = [8, 32], strides = [1, 1]} : vector<8x128xf32> to vector<8x32xf32>
    %587 = arith.negf %586 : vector<8x32xf32>
    %588 = math.exp %587 : vector<8x32xf32>
    %cst_154 = arith.constant 1.000000e+00 : f32
    %589 = vector.broadcast %cst_154 : f32 to vector<8x32xf32>
    %590 = arith.addf %589, %588 : vector<8x32xf32>
    %591 = arith.divf %589, %590 : vector<8x32xf32>
    %592 = arith.mulf %583, %506 : vector<8x32xf32>
    %593 = arith.mulf %577, %585 : vector<8x32xf32>
    %594 = arith.addf %592, %593 : vector<8x32xf32>
    %595 = math.tanh %594 : vector<8x32xf32>
    %596 = arith.mulf %591, %595 : vector<8x32xf32>
    %597 = arith.index_cast %565 : i32 to index
    %c0_155 = arith.constant 0 : index
    %c0_156 = arith.constant 0 : index
    %598 = vector.load %arg3[%597, %c0_155, %c0_156] : memref<7x8x1xf32, #tpu.memory_space<vmem>>, vector<1x8x1xf32>
    %599 = vector.shape_cast %598 : vector<1x8x1xf32> to vector<8x1xf32>
    %cst_157 = arith.constant 5.000000e-01 : f32
    %600 = vector.broadcast %cst_157 : f32 to vector<8x1xf32>
    %601 = arith.cmpf ogt, %599, %600 : vector<8x1xf32>
    %602 = vector.shape_cast %601 : vector<8x1xi1> to vector<8x1xi1>
    %603 = vector.broadcast %602 : vector<8x1xi1> to vector<8x32xi1>
    %604 = arith.select %603, %596, %503 : vector<8x32xi1>, vector<8x32xf32>
    %605 = vector.shape_cast %601 : vector<8x1xi1> to vector<8x1xi1>
    %606 = vector.broadcast %605 : vector<8x1xi1> to vector<8x32xi1>
    %607 = arith.select %606, %594, %506 : vector<8x32xi1>, vector<8x32xf32>
    %cst_158 = arith.constant 0.000000e+00 : f32
    %608 = vector.shape_cast %601 : vector<8x1xi1> to vector<8x1xi1>
    %609 = vector.broadcast %608 : vector<8x1xi1> to vector<8x32xi1>
    %610 = vector.broadcast %cst_158 : f32 to vector<8x32xf32>
    %611 = arith.select %609, %596, %610 : vector<8x32xi1>, vector<8x32xf32>
    %612 = arith.index_cast %565 : i32 to index
    %c0_159 = arith.constant 0 : index
    %c32_160 = arith.constant 32 : index
    %613 = vector.load %arg6[%612, %c0_159, %c32_160] : memref<7x8x64xf32, #tpu.memory_space<vmem>>, vector<1x8x32xf32>
    %614 = vector.shape_cast %613 : vector<1x8x32xf32> to vector<8x32xf32>
    %615 = vector.shape_cast %611 : vector<8x32xf32> to vector<1x8x32xf32>
    tpu.vector_store %arg6[%612, %c0_159, %c32_160], %615 {strides = array<i32>} : memref<7x8x64xf32, #tpu.memory_space<vmem>>, vector<1x8x32xf32>,
    %c6_i32_161 = arith.constant 6 : i32
    %616 = arith.index_cast %c6_i32_161 : i32 to index
    %c0_162 = arith.constant 0 : index
    %c0_163 = arith.constant 0 : index
    %617 = vector.load %arg1[%616, %c0_162, %c0_163] : memref<7x8x256xf32, #tpu.memory_space<vmem>>, vector<1x8x256xf32>
    %618 = vector.shape_cast %617 : vector<1x8x256xf32> to vector<8x256xf32>
    %619 = vector.extract_strided_slice %618 {offsets = [0, 0], sizes = [8, 128], strides = [1, 1]} : vector<8x256xf32> to vector<8x128xf32>
    %cst_164 = arith.constant dense<0.000000e+00> : vector<8x128xf32>
    %620 = tpu.matmul %553, %0, %cst_164 {dimension_numbers = #tpu.dot_dimension_numbers<[1], [0], [0], [1], [0, 0, 1, 1], [], []>} : vector<8x32xf32>, vector<32x128xf32>, vector<8x128xf32> -> vector<8x128xf32>
    %621 = arith.addf %619, %620 : vector<8x128xf32>
    %622 = vector.extract_strided_slice %621 {offsets = [0, 0], sizes = [8, 32], strides = [1, 1]} : vector<8x128xf32> to vector<8x32xf32>
    %623 = arith.negf %622 : vector<8x32xf32>
    %624 = math.exp %623 : vector<8x32xf32>
    %cst_165 = arith.constant 1.000000e+00 : f32
    %625 = vector.broadcast %cst_165 : f32 to vector<8x32xf32>
    %626 = arith.addf %625, %624 : vector<8x32xf32>
    %627 = arith.divf %625, %626 : vector<8x32xf32>
    %628 = vector.extract_strided_slice %621 {offsets = [0, 32], sizes = [8, 32], strides = [1, 1]} : vector<8x128xf32> to vector<8x32xf32>
    %629 = arith.negf %628 : vector<8x32xf32>
    %630 = math.exp %629 : vector<8x32xf32>
    %cst_166 = arith.constant 1.000000e+00 : f32
    %631 = vector.broadcast %cst_166 : f32 to vector<8x32xf32>
    %632 = arith.addf %631, %630 : vector<8x32xf32>
    %633 = arith.divf %631, %632 : vector<8x32xf32>
    %634 = vector.extract_strided_slice %621 {offsets = [0, 64], sizes = [8, 32], strides = [1, 1]} : vector<8x128xf32> to vector<8x32xf32>
    %635 = math.tanh %634 : vector<8x32xf32>
    %636 = vector.extract_strided_slice %621 {offsets = [0, 96], sizes = [8, 32], strides = [1, 1]} : vector<8x128xf32> to vector<8x32xf32>
    %637 = arith.negf %636 : vector<8x32xf32>
    %638 = math.exp %637 : vector<8x32xf32>
    %cst_167 = arith.constant 1.000000e+00 : f32
    %639 = vector.broadcast %cst_167 : f32 to vector<8x32xf32>
    %640 = arith.addf %639, %638 : vector<8x32xf32>
    %641 = arith.divf %639, %640 : vector<8x32xf32>
    %642 = arith.mulf %633, %556 : vector<8x32xf32>
    %643 = arith.mulf %627, %635 : vector<8x32xf32>
    %644 = arith.addf %642, %643 : vector<8x32xf32>
    %645 = math.tanh %644 : vector<8x32xf32>
    %646 = arith.mulf %641, %645 : vector<8x32xf32>
    %647 = arith.index_cast %c6_i32_161 : i32 to index
    %c0_168 = arith.constant 0 : index
    %c0_169 = arith.constant 0 : index
    %648 = vector.load %arg3[%647, %c0_168, %c0_169] : memref<7x8x1xf32, #tpu.memory_space<vmem>>, vector<1x8x1xf32>
    %649 = vector.shape_cast %648 : vector<1x8x1xf32> to vector<8x1xf32>
    %cst_170 = arith.constant 5.000000e-01 : f32
    %650 = vector.broadcast %cst_170 : f32 to vector<8x1xf32>
    %651 = arith.cmpf ogt, %649, %650 : vector<8x1xf32>
    %652 = vector.shape_cast %651 : vector<8x1xi1> to vector<8x1xi1>
    %653 = vector.broadcast %652 : vector<8x1xi1> to vector<8x32xi1>
    %654 = arith.select %653, %646, %553 : vector<8x32xi1>, vector<8x32xf32>
    %655 = vector.shape_cast %651 : vector<8x1xi1> to vector<8x1xi1>
    %656 = vector.broadcast %655 : vector<8x1xi1> to vector<8x32xi1>
    %657 = arith.select %656, %644, %556 : vector<8x32xi1>, vector<8x32xf32>
    %cst_171 = arith.constant 0.000000e+00 : f32
    %658 = vector.shape_cast %651 : vector<8x1xi1> to vector<8x1xi1>
    %659 = vector.broadcast %658 : vector<8x1xi1> to vector<8x32xi1>
    %660 = vector.broadcast %cst_171 : f32 to vector<8x32xf32>
    %661 = arith.select %659, %646, %660 : vector<8x32xi1>, vector<8x32xf32>
    %662 = arith.index_cast %c6_i32_161 : i32 to index
    %c0_172 = arith.constant 0 : index
    %c0_173 = arith.constant 0 : index
    %663 = vector.load %arg6[%662, %c0_172, %c0_173] : memref<7x8x64xf32, #tpu.memory_space<vmem>>, vector<1x8x32xf32>
    %664 = vector.shape_cast %663 : vector<1x8x32xf32> to vector<8x32xf32>
    %665 = vector.shape_cast %661 : vector<8x32xf32> to vector<1x8x32xf32>
    tpu.vector_store %arg6[%662, %c0_172, %c0_173], %665 {strides = array<i32>} : memref<7x8x64xf32, #tpu.memory_space<vmem>>, vector<1x8x32xf32>,
    %c6_i32_174 = arith.constant 6 : i32
    %666 = arith.subi %c6_i32_174, %c6_i32_161 : i32
    %667 = arith.index_cast %666 : i32 to index
    %c0_175 = arith.constant 0 : index
    %c0_176 = arith.constant 0 : index
    %668 = vector.load %arg1[%667, %c0_175, %c0_176] : memref<7x8x256xf32, #tpu.memory_space<vmem>>, vector<1x8x256xf32>
    %669 = vector.shape_cast %668 : vector<1x8x256xf32> to vector<8x256xf32>
    %670 = vector.extract_strided_slice %669 {offsets = [0, 128], sizes = [8, 128], strides = [1, 1]} : vector<8x256xf32> to vector<8x128xf32>
    %cst_177 = arith.constant dense<0.000000e+00> : vector<8x128xf32>
    %671 = tpu.matmul %604, %1, %cst_177 {dimension_numbers = #tpu.dot_dimension_numbers<[1], [0], [0], [1], [0, 0, 1, 1], [], []>} : vector<8x32xf32>, vector<32x128xf32>, vector<8x128xf32> -> vector<8x128xf32>
    %672 = arith.addf %670, %671 : vector<8x128xf32>
    %673 = vector.extract_strided_slice %672 {offsets = [0, 0], sizes = [8, 32], strides = [1, 1]} : vector<8x128xf32> to vector<8x32xf32>
    %674 = arith.negf %673 : vector<8x32xf32>
    %675 = math.exp %674 : vector<8x32xf32>
    %cst_178 = arith.constant 1.000000e+00 : f32
    %676 = vector.broadcast %cst_178 : f32 to vector<8x32xf32>
    %677 = arith.addf %676, %675 : vector<8x32xf32>
    %678 = arith.divf %676, %677 : vector<8x32xf32>
    %679 = vector.extract_strided_slice %672 {offsets = [0, 32], sizes = [8, 32], strides = [1, 1]} : vector<8x128xf32> to vector<8x32xf32>
    %680 = arith.negf %679 : vector<8x32xf32>
    %681 = math.exp %680 : vector<8x32xf32>
    %cst_179 = arith.constant 1.000000e+00 : f32
    %682 = vector.broadcast %cst_179 : f32 to vector<8x32xf32>
    %683 = arith.addf %682, %681 : vector<8x32xf32>
    %684 = arith.divf %682, %683 : vector<8x32xf32>
    %685 = vector.extract_strided_slice %672 {offsets = [0, 64], sizes = [8, 32], strides = [1, 1]} : vector<8x128xf32> to vector<8x32xf32>
    %686 = math.tanh %685 : vector<8x32xf32>
    %687 = vector.extract_strided_slice %672 {offsets = [0, 96], sizes = [8, 32], strides = [1, 1]} : vector<8x128xf32> to vector<8x32xf32>
    %688 = arith.negf %687 : vector<8x32xf32>
    %689 = math.exp %688 : vector<8x32xf32>
    %cst_180 = arith.constant 1.000000e+00 : f32
    %690 = vector.broadcast %cst_180 : f32 to vector<8x32xf32>
    %691 = arith.addf %690, %689 : vector<8x32xf32>
    %692 = arith.divf %690, %691 : vector<8x32xf32>
    %693 = arith.mulf %684, %607 : vector<8x32xf32>
    %694 = arith.mulf %678, %686 : vector<8x32xf32>
    %695 = arith.addf %693, %694 : vector<8x32xf32>
    %696 = math.tanh %695 : vector<8x32xf32>
    %697 = arith.mulf %692, %696 : vector<8x32xf32>
    %698 = arith.index_cast %666 : i32 to index
    %c0_181 = arith.constant 0 : index
    %c0_182 = arith.constant 0 : index
    %699 = vector.load %arg3[%698, %c0_181, %c0_182] : memref<7x8x1xf32, #tpu.memory_space<vmem>>, vector<1x8x1xf32>
    %700 = vector.shape_cast %699 : vector<1x8x1xf32> to vector<8x1xf32>
    %cst_183 = arith.constant 5.000000e-01 : f32
    %701 = vector.broadcast %cst_183 : f32 to vector<8x1xf32>
    %702 = arith.cmpf ogt, %700, %701 : vector<8x1xf32>
    %703 = vector.shape_cast %702 : vector<8x1xi1> to vector<8x1xi1>
    %704 = vector.broadcast %703 : vector<8x1xi1> to vector<8x32xi1>
    %705 = arith.select %704, %697, %604 : vector<8x32xi1>, vector<8x32xf32>
    %706 = vector.shape_cast %702 : vector<8x1xi1> to vector<8x1xi1>
    %707 = vector.broadcast %706 : vector<8x1xi1> to vector<8x32xi1>
    %708 = arith.select %707, %695, %607 : vector<8x32xi1>, vector<8x32xf32>
    %cst_184 = arith.constant 0.000000e+00 : f32
    %709 = vector.shape_cast %702 : vector<8x1xi1> to vector<8x1xi1>
    %710 = vector.broadcast %709 : vector<8x1xi1> to vector<8x32xi1>
    %711 = vector.broadcast %cst_184 : f32 to vector<8x32xf32>
    %712 = arith.select %710, %697, %711 : vector<8x32xi1>, vector<8x32xf32>
    %713 = arith.index_cast %666 : i32 to index
    %c0_185 = arith.constant 0 : index
    %c32_186 = arith.constant 32 : index
    %714 = vector.load %arg6[%713, %c0_185, %c32_186] : memref<7x8x64xf32, #tpu.memory_space<vmem>>, vector<1x8x32xf32>
    %715 = vector.shape_cast %714 : vector<1x8x32xf32> to vector<8x32xf32>
    %716 = vector.shape_cast %712 : vector<8x32xf32> to vector<1x8x32xf32>
    tpu.vector_store %arg6[%713, %c0_185, %c32_186], %716 {strides = array<i32>} : memref<7x8x64xf32, #tpu.memory_space<vmem>>, vector<1x8x32xf32>,
    %c7_i32 = arith.constant 7 : i32
    %c0_187 = arith.constant 0 : index
    %c0_188 = arith.constant 0 : index
    %c0_189 = arith.constant 0 : index
    %717 = vector.load %arg7[%c0_187, %c0_188, %c0_189] : memref<2x8x32xf32, #tpu.memory_space<vmem>>, vector<1x8x32xf32>
    %718 = vector.shape_cast %717 : vector<1x8x32xf32> to vector<8x32xf32>
    %719 = vector.shape_cast %657 : vector<8x32xf32> to vector<1x8x32xf32>
    tpu.vector_store %arg7[%c0_187, %c0_188, %c0_189], %719 {strides = array<i32>} : memref<2x8x32xf32, #tpu.memory_space<vmem>>, vector<1x8x32xf32>,
    %c1_190 = arith.constant 1 : index
    %c0_191 = arith.constant 0 : index
    %c0_192 = arith.constant 0 : index
    %720 = vector.load %arg7[%c1_190, %c0_191, %c0_192] : memref<2x8x32xf32, #tpu.memory_space<vmem>>, vector<1x8x32xf32>
    %721 = vector.shape_cast %720 : vector<1x8x32xf32> to vector<8x32xf32>
    %722 = vector.shape_cast %708 : vector<8x32xf32> to vector<1x8x32xf32>
    tpu.vector_store %arg7[%c1_190, %c0_191, %c0_192], %722 {strides = array<i32>} : memref<2x8x32xf32, #tpu.memory_space<vmem>>, vector<1x8x32xf32>,
    return
  }
  func.func @transform_0(%arg0: i32) -> (i32, i32, i32) {
    %c0_i32 = arith.constant 0 : i32
    %c0_i32_0 = arith.constant 0 : i32
    %c0_i32_1 = arith.constant 0 : i32
    %c0_i32_2 = arith.constant 0 : i32
    return %c0_i32, %c0_i32_0, %c0_i32_1 : i32, i32, i32
  }
  func.func @transform_1(%arg0: i32) -> (i32, i32) {
    %c0_i32 = arith.constant 0 : i32
    %c0_i32_0 = arith.constant 0 : i32
    %c0_i32_1 = arith.constant 0 : i32
    return %c0_i32, %c0_i32_0 : i32, i32
  }
  func.func @transform_2(%arg0: i32) -> (i32, i32, i32) {
    %c0_i32 = arith.constant 0 : i32
    %c0_i32_0 = arith.constant 0 : i32
    %c0_i32_1 = arith.constant 0 : i32
    %c0_i32_2 = arith.constant 0 : i32
    return %c0_i32, %c0_i32_0, %c0_i32_1 : i32, i32, i32
  }
  func.func @transform_3(%arg0: i32) -> (i32, i32, i32) {
    %c0_i32 = arith.constant 0 : i32
    %c0_i32_0 = arith.constant 0 : i32
    %c0_i32_1 = arith.constant 0 : i32
    %c0_i32_2 = arith.constant 0 : i32
    return %c0_i32, %c0_i32_0, %c0_i32_1 : i32, i32, i32
  }
  func.func @transform_4(%arg0: i32) -> (i32, i32, i32) {
    %c0_i32 = arith.constant 0 : i32
    %c0_i32_0 = arith.constant 0 : i32
    %c0_i32_1 = arith.constant 0 : i32
    %c0_i32_2 = arith.constant 0 : i32
    return %c0_i32, %c0_i32_0, %c0_i32_1 : i32, i32, i32
  }
  func.func @transform_5(%arg0: i32) -> (i32, i32, i32) {
    %c0_i32 = arith.constant 0 : i32
    %c0_i32_0 = arith.constant 0 : i32
    %c0_i32_1 = arith.constant 0 : i32
    %c0_i32_2 = arith.constant 0 : i32
    return %c0_i32, %c0_i32_0, %c0_i32_1 : i32, i32, i32
  }
  func.func @transform_6(%arg0: i32) -> (i32, i32, i32) {
    %c0_i32 = arith.constant 0 : i32
    %c0_i32_0 = arith.constant 0 : i32
    %c0_i32_1 = arith.constant 0 : i32
    %c0_i32_2 = arith.constant 0 : i32
    return %c0_i32, %c0_i32_0, %c0_i32_1 : i32, i32, i32
  }
}

module attributes {stable_mosaic.version = 11 : i64} {
  func.func @_lstm_seq_kernel(%arg0: i32, %arg1: memref<7x8x256xf32, #tpu.memory_space<vmem>>, %arg2: memref<64x128xf32, #tpu.memory_space<vmem>>, %arg3: memref<7x8x1xf32, #tpu.memory_space<vmem>>, %arg4: memref<2x8x32xf32, #tpu.memory_space<vmem>>, %arg5: memref<2x8x32xf32, #tpu.memory_space<vmem>>, %arg6: memref<7x8x64xf32, #tpu.memory_space<vmem>>, %arg7: memref<2x8x32xf32, #tpu.memory_space<vmem>>) attributes {dimension_semantics = [#tpu.dimension_semantics<arbitrary>], iteration_bounds = array<i64: 1>, scalar_prefetch = 0 : i64, scratch_operands = 0 : i64, tpu.core_type = #tpu.core_type<tc>, window_params = [{pipeline_mode = #tpu.pipeline_mode<synchronous>, transform_indices = @transform_0, window_bounds = array<i64: 7, 8, 256>}, {pipeline_mode = #tpu.pipeline_mode<synchronous>, transform_indices = @transform_1, window_bounds = array<i64: 64, 128>}, {pipeline_mode = #tpu.pipeline_mode<synchronous>, transform_indices = @transform_2, window_bounds = array<i64: 7, 8, 1>}, {pipeline_mode = #tpu.pipeline_mode<synchronous>, transform_indices = @transform_3, window_bounds = array<i64: 2, 8, 32>}, {pipeline_mode = #tpu.pipeline_mode<synchronous>, transform_indices = @transform_4, window_bounds = array<i64: 2, 8, 32>}, {pipeline_mode = #tpu.pipeline_mode<synchronous>, transform_indices = @transform_5, window_bounds = array<i64: 7, 8, 64>}, {pipeline_mode = #tpu.pipeline_mode<synchronous>, transform_indices = @transform_6, window_bounds = array<i64: 2, 8, 32>}]} {
    %c0 = arith.constant 0 : index
    %c0_0 = arith.constant 0 : index
    %0 = vector.load %arg2[%c0, %c0_0] : memref<64x128xf32, #tpu.memory_space<vmem>>, vector<32x128xf32>
    %c32 = arith.constant 32 : index
    %c0_1 = arith.constant 0 : index
    %1 = vector.load %arg2[%c32, %c0_1] : memref<64x128xf32, #tpu.memory_space<vmem>>, vector<32x128xf32>
    %c0_2 = arith.constant 0 : index
    %c0_3 = arith.constant 0 : index
    %c0_4 = arith.constant 0 : index
    %2 = vector.load %arg4[%c0_2, %c0_3, %c0_4] : memref<2x8x32xf32, #tpu.memory_space<vmem>>, vector<1x8x32xf32>
    %3 = vector.shape_cast %2 : vector<1x8x32xf32> to vector<8x32xf32>
    %c0_5 = arith.constant 0 : index
    %c0_6 = arith.constant 0 : index
    %c0_7 = arith.constant 0 : index
    %4 = vector.load %arg5[%c0_5, %c0_6, %c0_7] : memref<2x8x32xf32, #tpu.memory_space<vmem>>, vector<1x8x32xf32>
    %5 = vector.shape_cast %4 : vector<1x8x32xf32> to vector<8x32xf32>
    %c1 = arith.constant 1 : index
    %c0_8 = arith.constant 0 : index
    %c0_9 = arith.constant 0 : index
    %6 = vector.load %arg4[%c1, %c0_8, %c0_9] : memref<2x8x32xf32, #tpu.memory_space<vmem>>, vector<1x8x32xf32>
    %7 = vector.shape_cast %6 : vector<1x8x32xf32> to vector<8x32xf32>
    %c1_10 = arith.constant 1 : index
    %c0_11 = arith.constant 0 : index
    %c0_12 = arith.constant 0 : index
    %8 = vector.load %arg5[%c1_10, %c0_11, %c0_12] : memref<2x8x32xf32, #tpu.memory_space<vmem>>, vector<1x8x32xf32>
    %9 = vector.shape_cast %8 : vector<1x8x32xf32> to vector<8x32xf32>
    %c0_i32 = arith.constant 0 : i32
    %10 = arith.index_cast %c0_i32 : i32 to index
    %c0_13 = arith.constant 0 : index
    %c0_14 = arith.constant 0 : index
    %11 = vector.load %arg1[%10, %c0_13, %c0_14] : memref<7x8x256xf32, #tpu.memory_space<vmem>>, vector<1x8x256xf32>
    %12 = vector.shape_cast %11 : vector<1x8x256xf32> to vector<8x256xf32>
    %13 = vector.extract_strided_slice %12 {offsets = [0, 0], sizes = [8, 128], strides = [1, 1]} : vector<8x256xf32> to vector<8x128xf32>
    %cst = arith.constant dense<0.000000e+00> : vector<8x128xf32>
    %14 = tpu.matmul %3, %0, %cst {dimension_numbers = #tpu.dot_dimension_numbers<[1], [0], [0], [1], [0, 0, 1, 1], [], []>} : vector<8x32xf32>, vector<32x128xf32>, vector<8x128xf32> -> vector<8x128xf32>
    %15 = arith.addf %13, %14 : vector<8x128xf32>
    %16 = vector.extract_strided_slice %15 {offsets = [0, 0], sizes = [8, 32], strides = [1, 1]} : vector<8x128xf32> to vector<8x32xf32>
    %17 = arith.negf %16 : vector<8x32xf32>
    %18 = math.exp %17 : vector<8x32xf32>
    %cst_15 = arith.constant 1.000000e+00 : f32
    %19 = vector.broadcast %cst_15 : f32 to vector<8x32xf32>
    %20 = arith.addf %19, %18 : vector<8x32xf32>
    %21 = arith.divf %19, %20 : vector<8x32xf32>
    %22 = vector.extract_strided_slice %15 {offsets = [0, 32], sizes = [8, 32], strides = [1, 1]} : vector<8x128xf32> to vector<8x32xf32>
    %23 = arith.negf %22 : vector<8x32xf32>
    %24 = math.exp %23 : vector<8x32xf32>
    %cst_16 = arith.constant 1.000000e+00 : f32
    %25 = vector.broadcast %cst_16 : f32 to vector<8x32xf32>
    %26 = arith.addf %25, %24 : vector<8x32xf32>
    %27 = arith.divf %25, %26 : vector<8x32xf32>
    %28 = vector.extract_strided_slice %15 {offsets = [0, 64], sizes = [8, 32], strides = [1, 1]} : vector<8x128xf32> to vector<8x32xf32>
    %29 = math.tanh %28 : vector<8x32xf32>
    %30 = vector.extract_strided_slice %15 {offsets = [0, 96], sizes = [8, 32], strides = [1, 1]} : vector<8x128xf32> to vector<8x32xf32>
    %31 = arith.negf %30 : vector<8x32xf32>
    %32 = math.exp %31 : vector<8x32xf32>
    %cst_17 = arith.constant 1.000000e+00 : f32
    %33 = vector.broadcast %cst_17 : f32 to vector<8x32xf32>
    %34 = arith.addf %33, %32 : vector<8x32xf32>
    %35 = arith.divf %33, %34 : vector<8x32xf32>
    %36 = arith.mulf %27, %5 : vector<8x32xf32>
    %37 = arith.mulf %21, %29 : vector<8x32xf32>
    %38 = arith.addf %36, %37 : vector<8x32xf32>
    %39 = math.tanh %38 : vector<8x32xf32>
    %40 = arith.mulf %35, %39 : vector<8x32xf32>
    %41 = arith.index_cast %c0_i32 : i32 to index
    %c0_18 = arith.constant 0 : index
    %c0_19 = arith.constant 0 : index
    %42 = vector.load %arg3[%41, %c0_18, %c0_19] : memref<7x8x1xf32, #tpu.memory_space<vmem>>, vector<1x8x1xf32>
    %43 = vector.shape_cast %42 : vector<1x8x1xf32> to vector<8x1xf32>
    %cst_20 = arith.constant 5.000000e-01 : f32
    %44 = vector.broadcast %cst_20 : f32 to vector<8x1xf32>
    %45 = arith.cmpf ogt, %43, %44 : vector<8x1xf32>
    %46 = vector.shape_cast %45 : vector<8x1xi1> to vector<8x1xi1>
    %47 = vector.broadcast %46 : vector<8x1xi1> to vector<8x32xi1>
    %48 = arith.select %47, %40, %3 : vector<8x32xi1>, vector<8x32xf32>
    %49 = vector.shape_cast %45 : vector<8x1xi1> to vector<8x1xi1>
    %50 = vector.broadcast %49 : vector<8x1xi1> to vector<8x32xi1>
    %51 = arith.select %50, %38, %5 : vector<8x32xi1>, vector<8x32xf32>
    %cst_21 = arith.constant 0.000000e+00 : f32
    %52 = vector.shape_cast %45 : vector<8x1xi1> to vector<8x1xi1>
    %53 = vector.broadcast %52 : vector<8x1xi1> to vector<8x32xi1>
    %54 = vector.broadcast %cst_21 : f32 to vector<8x32xf32>
    %55 = arith.select %53, %40, %54 : vector<8x32xi1>, vector<8x32xf32>
    %56 = arith.index_cast %c0_i32 : i32 to index
    %c0_22 = arith.constant 0 : index
    %c0_23 = arith.constant 0 : index
    %57 = vector.load %arg6[%56, %c0_22, %c0_23] : memref<7x8x64xf32, #tpu.memory_space<vmem>>, vector<1x8x32xf32>
    %58 = vector.shape_cast %57 : vector<1x8x32xf32> to vector<8x32xf32>
    %59 = vector.shape_cast %55 : vector<8x32xf32> to vector<1x8x32xf32>
    tpu.vector_store %arg6[%56, %c0_22, %c0_23], %59 {strides = array<i32>} : memref<7x8x64xf32, #tpu.memory_space<vmem>>, vector<1x8x32xf32>,
    %c6_i32 = arith.constant 6 : i32
    %60 = arith.subi %c6_i32, %c0_i32 : i32
    %61 = arith.index_cast %60 : i32 to index
    %c0_24 = arith.constant 0 : index
    %c0_25 = arith.constant 0 : index
    %62 = vector.load %arg1[%61, %c0_24, %c0_25] : memref<7x8x256xf32, #tpu.memory_space<vmem>>, vector<1x8x256xf32>
    %63 = vector.shape_cast %62 : vector<1x8x256xf32> to vector<8x256xf32>
    %64 = vector.extract_strided_slice %63 {offsets = [0, 128], sizes = [8, 128], strides = [1, 1]} : vector<8x256xf32> to vector<8x128xf32>
    %cst_26 = arith.constant dense<0.000000e+00> : vector<8x128xf32>
    %65 = tpu.matmul %7, %1, %cst_26 {dimension_numbers = #tpu.dot_dimension_numbers<[1], [0], [0], [1], [0, 0, 1, 1], [], []>} : vector<8x32xf32>, vector<32x128xf32>, vector<8x128xf32> -> vector<8x128xf32>
    %66 = arith.addf %64, %65 : vector<8x128xf32>
    %67 = vector.extract_strided_slice %66 {offsets = [0, 0], sizes = [8, 32], strides = [1, 1]} : vector<8x128xf32> to vector<8x32xf32>
    %68 = arith.negf %67 : vector<8x32xf32>
    %69 = math.exp %68 : vector<8x32xf32>
    %cst_27 = arith.constant 1.000000e+00 : f32
    %70 = vector.broadcast %cst_27 : f32 to vector<8x32xf32>
    %71 = arith.addf %70, %69 : vector<8x32xf32>
    %72 = arith.divf %70, %71 : vector<8x32xf32>
    %73 = vector.extract_strided_slice %66 {offsets = [0, 32], sizes = [8, 32], strides = [1, 1]} : vector<8x128xf32> to vector<8x32xf32>
    %74 = arith.negf %73 : vector<8x32xf32>
    %75 = math.exp %74 : vector<8x32xf32>
    %cst_28 = arith.constant 1.000000e+00 : f32
    %76 = vector.broadcast %cst_28 : f32 to vector<8x32xf32>
    %77 = arith.addf %76, %75 : vector<8x32xf32>
    %78 = arith.divf %76, %77 : vector<8x32xf32>
    %79 = vector.extract_strided_slice %66 {offsets = [0, 64], sizes = [8, 32], strides = [1, 1]} : vector<8x128xf32> to vector<8x32xf32>
    %80 = math.tanh %79 : vector<8x32xf32>
    %81 = vector.extract_strided_slice %66 {offsets = [0, 96], sizes = [8, 32], strides = [1, 1]} : vector<8x128xf32> to vector<8x32xf32>
    %82 = arith.negf %81 : vector<8x32xf32>
    %83 = math.exp %82 : vector<8x32xf32>
    %cst_29 = arith.constant 1.000000e+00 : f32
    %84 = vector.broadcast %cst_29 : f32 to vector<8x32xf32>
    %85 = arith.addf %84, %83 : vector<8x32xf32>
    %86 = arith.divf %84, %85 : vector<8x32xf32>
    %87 = arith.mulf %78, %9 : vector<8x32xf32>
    %88 = arith.mulf %72, %80 : vector<8x32xf32>
    %89 = arith.addf %87, %88 : vector<8x32xf32>
    %90 = math.tanh %89 : vector<8x32xf32>
    %91 = arith.mulf %86, %90 : vector<8x32xf32>
    %92 = arith.index_cast %60 : i32 to index
    %c0_30 = arith.constant 0 : index
    %c0_31 = arith.constant 0 : index
    %93 = vector.load %arg3[%92, %c0_30, %c0_31] : memref<7x8x1xf32, #tpu.memory_space<vmem>>, vector<1x8x1xf32>
    %94 = vector.shape_cast %93 : vector<1x8x1xf32> to vector<8x1xf32>
    %cst_32 = arith.constant 5.000000e-01 : f32
    %95 = vector.broadcast %cst_32 : f32 to vector<8x1xf32>
    %96 = arith.cmpf ogt, %94, %95 : vector<8x1xf32>
    %97 = vector.shape_cast %96 : vector<8x1xi1> to vector<8x1xi1>
    %98 = vector.broadcast %97 : vector<8x1xi1> to vector<8x32xi1>
    %99 = arith.select %98, %91, %7 : vector<8x32xi1>, vector<8x32xf32>
    %100 = vector.shape_cast %96 : vector<8x1xi1> to vector<8x1xi1>
    %101 = vector.broadcast %100 : vector<8x1xi1> to vector<8x32xi1>
    %102 = arith.select %101, %89, %9 : vector<8x32xi1>, vector<8x32xf32>
    %cst_33 = arith.constant 0.000000e+00 : f32
    %103 = vector.shape_cast %96 : vector<8x1xi1> to vector<8x1xi1>
    %104 = vector.broadcast %103 : vector<8x1xi1> to vector<8x32xi1>
    %105 = vector.broadcast %cst_33 : f32 to vector<8x32xf32>
    %106 = arith.select %104, %91, %105 : vector<8x32xi1>, vector<8x32xf32>
    %107 = arith.index_cast %60 : i32 to index
    %c0_34 = arith.constant 0 : index
    %c32_35 = arith.constant 32 : index
    %108 = vector.load %arg6[%107, %c0_34, %c32_35] : memref<7x8x64xf32, #tpu.memory_space<vmem>>, vector<1x8x32xf32>
    %109 = vector.shape_cast %108 : vector<1x8x32xf32> to vector<8x32xf32>
    %110 = vector.shape_cast %106 : vector<8x32xf32> to vector<1x8x32xf32>
    tpu.vector_store %arg6[%107, %c0_34, %c32_35], %110 {strides = array<i32>} : memref<7x8x64xf32, #tpu.memory_space<vmem>>, vector<1x8x32xf32>,
    %c1_i32 = arith.constant 1 : i32
    %111 = arith.index_cast %c1_i32 : i32 to index
    %c0_36 = arith.constant 0 : index
    %c0_37 = arith.constant 0 : index
    %112 = vector.load %arg1[%111, %c0_36, %c0_37] : memref<7x8x256xf32, #tpu.memory_space<vmem>>, vector<1x8x256xf32>
    %113 = vector.shape_cast %112 : vector<1x8x256xf32> to vector<8x256xf32>
    %114 = vector.extract_strided_slice %113 {offsets = [0, 0], sizes = [8, 128], strides = [1, 1]} : vector<8x256xf32> to vector<8x128xf32>
    %cst_38 = arith.constant dense<0.000000e+00> : vector<8x128xf32>
    %115 = tpu.matmul %48, %0, %cst_38 {dimension_numbers = #tpu.dot_dimension_numbers<[1], [0], [0], [1], [0, 0, 1, 1], [], []>} : vector<8x32xf32>, vector<32x128xf32>, vector<8x128xf32> -> vector<8x128xf32>
    %116 = arith.addf %114, %115 : vector<8x128xf32>
    %117 = vector.extract_strided_slice %116 {offsets = [0, 0], sizes = [8, 32], strides = [1, 1]} : vector<8x128xf32> to vector<8x32xf32>
    %118 = arith.negf %117 : vector<8x32xf32>
    %119 = math.exp %118 : vector<8x32xf32>
    %cst_39 = arith.constant 1.000000e+00 : f32
    %120 = vector.broadcast %cst_39 : f32 to vector<8x32xf32>
    %121 = arith.addf %120, %119 : vector<8x32xf32>
    %122 = arith.divf %120, %121 : vector<8x32xf32>
    %123 = vector.extract_strided_slice %116 {offsets = [0, 32], sizes = [8, 32], strides = [1, 1]} : vector<8x128xf32> to vector<8x32xf32>
    %124 = arith.negf %123 : vector<8x32xf32>
    %125 = math.exp %124 : vector<8x32xf32>
    %cst_40 = arith.constant 1.000000e+00 : f32
    %126 = vector.broadcast %cst_40 : f32 to vector<8x32xf32>
    %127 = arith.addf %126, %125 : vector<8x32xf32>
    %128 = arith.divf %126, %127 : vector<8x32xf32>
    %129 = vector.extract_strided_slice %116 {offsets = [0, 64], sizes = [8, 32], strides = [1, 1]} : vector<8x128xf32> to vector<8x32xf32>
    %130 = math.tanh %129 : vector<8x32xf32>
    %131 = vector.extract_strided_slice %116 {offsets = [0, 96], sizes = [8, 32], strides = [1, 1]} : vector<8x128xf32> to vector<8x32xf32>
    %132 = arith.negf %131 : vector<8x32xf32>
    %133 = math.exp %132 : vector<8x32xf32>
    %cst_41 = arith.constant 1.000000e+00 : f32
    %134 = vector.broadcast %cst_41 : f32 to vector<8x32xf32>
    %135 = arith.addf %134, %133 : vector<8x32xf32>
    %136 = arith.divf %134, %135 : vector<8x32xf32>
    %137 = arith.mulf %128, %51 : vector<8x32xf32>
    %138 = arith.mulf %122, %130 : vector<8x32xf32>
    %139 = arith.addf %137, %138 : vector<8x32xf32>
    %140 = math.tanh %139 : vector<8x32xf32>
    %141 = arith.mulf %136, %140 : vector<8x32xf32>
    %142 = arith.index_cast %c1_i32 : i32 to index
    %c0_42 = arith.constant 0 : index
    %c0_43 = arith.constant 0 : index
    %143 = vector.load %arg3[%142, %c0_42, %c0_43] : memref<7x8x1xf32, #tpu.memory_space<vmem>>, vector<1x8x1xf32>
    %144 = vector.shape_cast %143 : vector<1x8x1xf32> to vector<8x1xf32>
    %cst_44 = arith.constant 5.000000e-01 : f32
    %145 = vector.broadcast %cst_44 : f32 to vector<8x1xf32>
    %146 = arith.cmpf ogt, %144, %145 : vector<8x1xf32>
    %147 = vector.shape_cast %146 : vector<8x1xi1> to vector<8x1xi1>
    %148 = vector.broadcast %147 : vector<8x1xi1> to vector<8x32xi1>
    %149 = arith.select %148, %141, %48 : vector<8x32xi1>, vector<8x32xf32>
    %150 = vector.shape_cast %146 : vector<8x1xi1> to vector<8x1xi1>
    %151 = vector.broadcast %150 : vector<8x1xi1> to vector<8x32xi1>
    %152 = arith.select %151, %139, %51 : vector<8x32xi1>, vector<8x32xf32>
    %cst_45 = arith.constant 0.000000e+00 : f32
    %153 = vector.shape_cast %146 : vector<8x1xi1> to vector<8x1xi1>
    %154 = vector.broadcast %153 : vector<8x1xi1> to vector<8x32xi1>
    %155 = vector.broadcast %cst_45 : f32 to vector<8x32xf32>
    %156 = arith.select %154, %141, %155 : vector<8x32xi1>, vector<8x32xf32>
    %157 = arith.index_cast %c1_i32 : i32 to index
    %c0_46 = arith.constant 0 : index
    %c0_47 = arith.constant 0 : index
    %158 = vector.load %arg6[%157, %c0_46, %c0_47] : memref<7x8x64xf32, #tpu.memory_space<vmem>>, vector<1x8x32xf32>
    %159 = vector.shape_cast %158 : vector<1x8x32xf32> to vector<8x32xf32>
    %160 = vector.shape_cast %156 : vector<8x32xf32> to vector<1x8x32xf32>
    tpu.vector_store %arg6[%157, %c0_46, %c0_47], %160 {strides = array<i32>} : memref<7x8x64xf32, #tpu.memory_space<vmem>>, vector<1x8x32xf32>,
    %c6_i32_48 = arith.constant 6 : i32
    %161 = arith.subi %c6_i32_48, %c1_i32 : i32
    %162 = arith.index_cast %161 : i32 to index
    %c0_49 = arith.constant 0 : index
    %c0_50 = arith.constant 0 : index
    %163 = vector.load %arg1[%162, %c0_49, %c0_50] : memref<7x8x256xf32, #tpu.memory_space<vmem>>, vector<1x8x256xf32>
    %164 = vector.shape_cast %163 : vector<1x8x256xf32> to vector<8x256xf32>
    %165 = vector.extract_strided_slice %164 {offsets = [0, 128], sizes = [8, 128], strides = [1, 1]} : vector<8x256xf32> to vector<8x128xf32>
    %cst_51 = arith.constant dense<0.000000e+00> : vector<8x128xf32>
    %166 = tpu.matmul %99, %1, %cst_51 {dimension_numbers = #tpu.dot_dimension_numbers<[1], [0], [0], [1], [0, 0, 1, 1], [], []>} : vector<8x32xf32>, vector<32x128xf32>, vector<8x128xf32> -> vector<8x128xf32>
    %167 = arith.addf %165, %166 : vector<8x128xf32>
    %168 = vector.extract_strided_slice %167 {offsets = [0, 0], sizes = [8, 32], strides = [1, 1]} : vector<8x128xf32> to vector<8x32xf32>
    %169 = arith.negf %168 : vector<8x32xf32>
    %170 = math.exp %169 : vector<8x32xf32>
    %cst_52 = arith.constant 1.000000e+00 : f32
    %171 = vector.broadcast %cst_52 : f32 to vector<8x32xf32>
    %172 = arith.addf %171, %170 : vector<8x32xf32>
    %173 = arith.divf %171, %172 : vector<8x32xf32>
    %174 = vector.extract_strided_slice %167 {offsets = [0, 32], sizes = [8, 32], strides = [1, 1]} : vector<8x128xf32> to vector<8x32xf32>
    %175 = arith.negf %174 : vector<8x32xf32>
    %176 = math.exp %175 : vector<8x32xf32>
    %cst_53 = arith.constant 1.000000e+00 : f32
    %177 = vector.broadcast %cst_53 : f32 to vector<8x32xf32>
    %178 = arith.addf %177, %176 : vector<8x32xf32>
    %179 = arith.divf %177, %178 : vector<8x32xf32>
    %180 = vector.extract_strided_slice %167 {offsets = [0, 64], sizes = [8, 32], strides = [1, 1]} : vector<8x128xf32> to vector<8x32xf32>
    %181 = math.tanh %180 : vector<8x32xf32>
    %182 = vector.extract_strided_slice %167 {offsets = [0, 96], sizes = [8, 32], strides = [1, 1]} : vector<8x128xf32> to vector<8x32xf32>
    %183 = arith.negf %182 : vector<8x32xf32>
    %184 = math.exp %183 : vector<8x32xf32>
    %cst_54 = arith.constant 1.000000e+00 : f32
    %185 = vector.broadcast %cst_54 : f32 to vector<8x32xf32>
    %186 = arith.addf %185, %184 : vector<8x32xf32>
    %187 = arith.divf %185, %186 : vector<8x32xf32>
    %188 = arith.mulf %179, %102 : vector<8x32xf32>
    %189 = arith.mulf %173, %181 : vector<8x32xf32>
    %190 = arith.addf %188, %189 : vector<8x32xf32>
    %191 = math.tanh %190 : vector<8x32xf32>
    %192 = arith.mulf %187, %191 : vector<8x32xf32>
    %193 = arith.index_cast %161 : i32 to index
    %c0_55 = arith.constant 0 : index
    %c0_56 = arith.constant 0 : index
    %194 = vector.load %arg3[%193, %c0_55, %c0_56] : memref<7x8x1xf32, #tpu.memory_space<vmem>>, vector<1x8x1xf32>
    %195 = vector.shape_cast %194 : vector<1x8x1xf32> to vector<8x1xf32>
    %cst_57 = arith.constant 5.000000e-01 : f32
    %196 = vector.broadcast %cst_57 : f32 to vector<8x1xf32>
    %197 = arith.cmpf ogt, %195, %196 : vector<8x1xf32>
    %198 = vector.shape_cast %197 : vector<8x1xi1> to vector<8x1xi1>
    %199 = vector.broadcast %198 : vector<8x1xi1> to vector<8x32xi1>
    %200 = arith.select %199, %192, %99 : vector<8x32xi1>, vector<8x32xf32>
    %201 = vector.shape_cast %197 : vector<8x1xi1> to vector<8x1xi1>
    %202 = vector.broadcast %201 : vector<8x1xi1> to vector<8x32xi1>
    %203 = arith.select %202, %190, %102 : vector<8x32xi1>, vector<8x32xf32>
    %cst_58 = arith.constant 0.000000e+00 : f32
    %204 = vector.shape_cast %197 : vector<8x1xi1> to vector<8x1xi1>
    %205 = vector.broadcast %204 : vector<8x1xi1> to vector<8x32xi1>
    %206 = vector.broadcast %cst_58 : f32 to vector<8x32xf32>
    %207 = arith.select %205, %192, %206 : vector<8x32xi1>, vector<8x32xf32>
    %208 = arith.index_cast %161 : i32 to index
    %c0_59 = arith.constant 0 : index
    %c32_60 = arith.constant 32 : index
    %209 = vector.load %arg6[%208, %c0_59, %c32_60] : memref<7x8x64xf32, #tpu.memory_space<vmem>>, vector<1x8x32xf32>
    %210 = vector.shape_cast %209 : vector<1x8x32xf32> to vector<8x32xf32>
    %211 = vector.shape_cast %207 : vector<8x32xf32> to vector<1x8x32xf32>
    tpu.vector_store %arg6[%208, %c0_59, %c32_60], %211 {strides = array<i32>} : memref<7x8x64xf32, #tpu.memory_space<vmem>>, vector<1x8x32xf32>,
    %c2_i32 = arith.constant 2 : i32
    %212 = arith.index_cast %c2_i32 : i32 to index
    %c0_61 = arith.constant 0 : index
    %c0_62 = arith.constant 0 : index
    %213 = vector.load %arg1[%212, %c0_61, %c0_62] : memref<7x8x256xf32, #tpu.memory_space<vmem>>, vector<1x8x256xf32>
    %214 = vector.shape_cast %213 : vector<1x8x256xf32> to vector<8x256xf32>
    %215 = vector.extract_strided_slice %214 {offsets = [0, 0], sizes = [8, 128], strides = [1, 1]} : vector<8x256xf32> to vector<8x128xf32>
    %cst_63 = arith.constant dense<0.000000e+00> : vector<8x128xf32>
    %216 = tpu.matmul %149, %0, %cst_63 {dimension_numbers = #tpu.dot_dimension_numbers<[1], [0], [0], [1], [0, 0, 1, 1], [], []>} : vector<8x32xf32>, vector<32x128xf32>, vector<8x128xf32> -> vector<8x128xf32>
    %217 = arith.addf %215, %216 : vector<8x128xf32>
    %218 = vector.extract_strided_slice %217 {offsets = [0, 0], sizes = [8, 32], strides = [1, 1]} : vector<8x128xf32> to vector<8x32xf32>
    %219 = arith.negf %218 : vector<8x32xf32>
    %220 = math.exp %219 : vector<8x32xf32>
    %cst_64 = arith.constant 1.000000e+00 : f32
    %221 = vector.broadcast %cst_64 : f32 to vector<8x32xf32>
    %222 = arith.addf %221, %220 : vector<8x32xf32>
    %223 = arith.divf %221, %222 : vector<8x32xf32>
    %224 = vector.extract_strided_slice %217 {offsets = [0, 32], sizes = [8, 32], strides = [1, 1]} : vector<8x128xf32> to vector<8x32xf32>
    %225 = arith.negf %224 : vector<8x32xf32>
    %226 = math.exp %225 : vector<8x32xf32>
    %cst_65 = arith.constant 1.000000e+00 : f32
    %227 = vector.broadcast %cst_65 : f32 to vector<8x32xf32>
    %228 = arith.addf %227, %226 : vector<8x32xf32>
    %229 = arith.divf %227, %228 : vector<8x32xf32>
    %230 = vector.extract_strided_slice %217 {offsets = [0, 64], sizes = [8, 32], strides = [1, 1]} : vector<8x128xf32> to vector<8x32xf32>
    %231 = math.tanh %230 : vector<8x32xf32>
    %232 = vector.extract_strided_slice %217 {offsets = [0, 96], sizes = [8, 32], strides = [1, 1]} : vector<8x128xf32> to vector<8x32xf32>
    %233 = arith.negf %232 : vector<8x32xf32>
    %234 = math.exp %233 : vector<8x32xf32>
    %cst_66 = arith.constant 1.000000e+00 : f32
    %235 = vector.broadcast %cst_66 : f32 to vector<8x32xf32>
    %236 = arith.addf %235, %234 : vector<8x32xf32>
    %237 = arith.divf %235, %236 : vector<8x32xf32>
    %238 = arith.mulf %229, %152 : vector<8x32xf32>
    %239 = arith.mulf %223, %231 : vector<8x32xf32>
    %240 = arith.addf %238, %239 : vector<8x32xf32>
    %241 = math.tanh %240 : vector<8x32xf32>
    %242 = arith.mulf %237, %241 : vector<8x32xf32>
    %243 = arith.index_cast %c2_i32 : i32 to index
    %c0_67 = arith.constant 0 : index
    %c0_68 = arith.constant 0 : index
    %244 = vector.load %arg3[%243, %c0_67, %c0_68] : memref<7x8x1xf32, #tpu.memory_space<vmem>>, vector<1x8x1xf32>
    %245 = vector.shape_cast %244 : vector<1x8x1xf32> to vector<8x1xf32>
    %cst_69 = arith.constant 5.000000e-01 : f32
    %246 = vector.broadcast %cst_69 : f32 to vector<8x1xf32>
    %247 = arith.cmpf ogt, %245, %246 : vector<8x1xf32>
    %248 = vector.shape_cast %247 : vector<8x1xi1> to vector<8x1xi1>
    %249 = vector.broadcast %248 : vector<8x1xi1> to vector<8x32xi1>
    %250 = arith.select %249, %242, %149 : vector<8x32xi1>, vector<8x32xf32>
    %251 = vector.shape_cast %247 : vector<8x1xi1> to vector<8x1xi1>
    %252 = vector.broadcast %251 : vector<8x1xi1> to vector<8x32xi1>
    %253 = arith.select %252, %240, %152 : vector<8x32xi1>, vector<8x32xf32>
    %cst_70 = arith.constant 0.000000e+00 : f32
    %254 = vector.shape_cast %247 : vector<8x1xi1> to vector<8x1xi1>
    %255 = vector.broadcast %254 : vector<8x1xi1> to vector<8x32xi1>
    %256 = vector.broadcast %cst_70 : f32 to vector<8x32xf32>
    %257 = arith.select %255, %242, %256 : vector<8x32xi1>, vector<8x32xf32>
    %258 = arith.index_cast %c2_i32 : i32 to index
    %c0_71 = arith.constant 0 : index
    %c0_72 = arith.constant 0 : index
    %259 = vector.load %arg6[%258, %c0_71, %c0_72] : memref<7x8x64xf32, #tpu.memory_space<vmem>>, vector<1x8x32xf32>
    %260 = vector.shape_cast %259 : vector<1x8x32xf32> to vector<8x32xf32>
    %261 = vector.shape_cast %257 : vector<8x32xf32> to vector<1x8x32xf32>
    tpu.vector_store %arg6[%258, %c0_71, %c0_72], %261 {strides = array<i32>} : memref<7x8x64xf32, #tpu.memory_space<vmem>>, vector<1x8x32xf32>,
    %c6_i32_73 = arith.constant 6 : i32
    %262 = arith.subi %c6_i32_73, %c2_i32 : i32
    %263 = arith.index_cast %262 : i32 to index
    %c0_74 = arith.constant 0 : index
    %c0_75 = arith.constant 0 : index
    %264 = vector.load %arg1[%263, %c0_74, %c0_75] : memref<7x8x256xf32, #tpu.memory_space<vmem>>, vector<1x8x256xf32>
    %265 = vector.shape_cast %264 : vector<1x8x256xf32> to vector<8x256xf32>
    %266 = vector.extract_strided_slice %265 {offsets = [0, 128], sizes = [8, 128], strides = [1, 1]} : vector<8x256xf32> to vector<8x128xf32>
    %cst_76 = arith.constant dense<0.000000e+00> : vector<8x128xf32>
    %267 = tpu.matmul %200, %1, %cst_76 {dimension_numbers = #tpu.dot_dimension_numbers<[1], [0], [0], [1], [0, 0, 1, 1], [], []>} : vector<8x32xf32>, vector<32x128xf32>, vector<8x128xf32> -> vector<8x128xf32>
    %268 = arith.addf %266, %267 : vector<8x128xf32>
    %269 = vector.extract_strided_slice %268 {offsets = [0, 0], sizes = [8, 32], strides = [1, 1]} : vector<8x128xf32> to vector<8x32xf32>
    %270 = arith.negf %269 : vector<8x32xf32>
    %271 = math.exp %270 : vector<8x32xf32>
    %cst_77 = arith.constant 1.000000e+00 : f32
    %272 = vector.broadcast %cst_77 : f32 to vector<8x32xf32>
    %273 = arith.addf %272, %271 : vector<8x32xf32>
    %274 = arith.divf %272, %273 : vector<8x32xf32>
    %275 = vector.extract_strided_slice %268 {offsets = [0, 32], sizes = [8, 32], strides = [1, 1]} : vector<8x128xf32> to vector<8x32xf32>
    %276 = arith.negf %275 : vector<8x32xf32>
    %277 = math.exp %276 : vector<8x32xf32>
    %cst_78 = arith.constant 1.000000e+00 : f32
    %278 = vector.broadcast %cst_78 : f32 to vector<8x32xf32>
    %279 = arith.addf %278, %277 : vector<8x32xf32>
    %280 = arith.divf %278, %279 : vector<8x32xf32>
    %281 = vector.extract_strided_slice %268 {offsets = [0, 64], sizes = [8, 32], strides = [1, 1]} : vector<8x128xf32> to vector<8x32xf32>
    %282 = math.tanh %281 : vector<8x32xf32>
    %283 = vector.extract_strided_slice %268 {offsets = [0, 96], sizes = [8, 32], strides = [1, 1]} : vector<8x128xf32> to vector<8x32xf32>
    %284 = arith.negf %283 : vector<8x32xf32>
    %285 = math.exp %284 : vector<8x32xf32>
    %cst_79 = arith.constant 1.000000e+00 : f32
    %286 = vector.broadcast %cst_79 : f32 to vector<8x32xf32>
    %287 = arith.addf %286, %285 : vector<8x32xf32>
    %288 = arith.divf %286, %287 : vector<8x32xf32>
    %289 = arith.mulf %280, %203 : vector<8x32xf32>
    %290 = arith.mulf %274, %282 : vector<8x32xf32>
    %291 = arith.addf %289, %290 : vector<8x32xf32>
    %292 = math.tanh %291 : vector<8x32xf32>
    %293 = arith.mulf %288, %292 : vector<8x32xf32>
    %294 = arith.index_cast %262 : i32 to index
    %c0_80 = arith.constant 0 : index
    %c0_81 = arith.constant 0 : index
    %295 = vector.load %arg3[%294, %c0_80, %c0_81] : memref<7x8x1xf32, #tpu.memory_space<vmem>>, vector<1x8x1xf32>
    %296 = vector.shape_cast %295 : vector<1x8x1xf32> to vector<8x1xf32>
    %cst_82 = arith.constant 5.000000e-01 : f32
    %297 = vector.broadcast %cst_82 : f32 to vector<8x1xf32>
    %298 = arith.cmpf ogt, %296, %297 : vector<8x1xf32>
    %299 = vector.shape_cast %298 : vector<8x1xi1> to vector<8x1xi1>
    %300 = vector.broadcast %299 : vector<8x1xi1> to vector<8x32xi1>
    %301 = arith.select %300, %293, %200 : vector<8x32xi1>, vector<8x32xf32>
    %302 = vector.shape_cast %298 : vector<8x1xi1> to vector<8x1xi1>
    %303 = vector.broadcast %302 : vector<8x1xi1> to vector<8x32xi1>
    %304 = arith.select %303, %291, %203 : vector<8x32xi1>, vector<8x32xf32>
    %cst_83 = arith.constant 0.000000e+00 : f32
    %305 = vector.shape_cast %298 : vector<8x1xi1> to vector<8x1xi1>
    %306 = vector.broadcast %305 : vector<8x1xi1> to vector<8x32xi1>
    %307 = vector.broadcast %cst_83 : f32 to vector<8x32xf32>
    %308 = arith.select %306, %293, %307 : vector<8x32xi1>, vector<8x32xf32>
    %309 = arith.index_cast %262 : i32 to index
    %c0_84 = arith.constant 0 : index
    %c32_85 = arith.constant 32 : index
    %310 = vector.load %arg6[%309, %c0_84, %c32_85] : memref<7x8x64xf32, #tpu.memory_space<vmem>>, vector<1x8x32xf32>
    %311 = vector.shape_cast %310 : vector<1x8x32xf32> to vector<8x32xf32>
    %312 = vector.shape_cast %308 : vector<8x32xf32> to vector<1x8x32xf32>
    tpu.vector_store %arg6[%309, %c0_84, %c32_85], %312 {strides = array<i32>} : memref<7x8x64xf32, #tpu.memory_space<vmem>>, vector<1x8x32xf32>,
    %c3_i32 = arith.constant 3 : i32
    %313 = arith.index_cast %c3_i32 : i32 to index
    %c0_86 = arith.constant 0 : index
    %c0_87 = arith.constant 0 : index
    %314 = vector.load %arg1[%313, %c0_86, %c0_87] : memref<7x8x256xf32, #tpu.memory_space<vmem>>, vector<1x8x256xf32>
    %315 = vector.shape_cast %314 : vector<1x8x256xf32> to vector<8x256xf32>
    %316 = vector.extract_strided_slice %315 {offsets = [0, 0], sizes = [8, 128], strides = [1, 1]} : vector<8x256xf32> to vector<8x128xf32>
    %cst_88 = arith.constant dense<0.000000e+00> : vector<8x128xf32>
    %317 = tpu.matmul %250, %0, %cst_88 {dimension_numbers = #tpu.dot_dimension_numbers<[1], [0], [0], [1], [0, 0, 1, 1], [], []>} : vector<8x32xf32>, vector<32x128xf32>, vector<8x128xf32> -> vector<8x128xf32>
    %318 = arith.addf %316, %317 : vector<8x128xf32>
    %319 = vector.extract_strided_slice %318 {offsets = [0, 0], sizes = [8, 32], strides = [1, 1]} : vector<8x128xf32> to vector<8x32xf32>
    %320 = arith.negf %319 : vector<8x32xf32>
    %321 = math.exp %320 : vector<8x32xf32>
    %cst_89 = arith.constant 1.000000e+00 : f32
    %322 = vector.broadcast %cst_89 : f32 to vector<8x32xf32>
    %323 = arith.addf %322, %321 : vector<8x32xf32>
    %324 = arith.divf %322, %323 : vector<8x32xf32>
    %325 = vector.extract_strided_slice %318 {offsets = [0, 32], sizes = [8, 32], strides = [1, 1]} : vector<8x128xf32> to vector<8x32xf32>
    %326 = arith.negf %325 : vector<8x32xf32>
    %327 = math.exp %326 : vector<8x32xf32>
    %cst_90 = arith.constant 1.000000e+00 : f32
    %328 = vector.broadcast %cst_90 : f32 to vector<8x32xf32>
    %329 = arith.addf %328, %327 : vector<8x32xf32>
    %330 = arith.divf %328, %329 : vector<8x32xf32>
    %331 = vector.extract_strided_slice %318 {offsets = [0, 64], sizes = [8, 32], strides = [1, 1]} : vector<8x128xf32> to vector<8x32xf32>
    %332 = math.tanh %331 : vector<8x32xf32>
    %333 = vector.extract_strided_slice %318 {offsets = [0, 96], sizes = [8, 32], strides = [1, 1]} : vector<8x128xf32> to vector<8x32xf32>
    %334 = arith.negf %333 : vector<8x32xf32>
    %335 = math.exp %334 : vector<8x32xf32>
    %cst_91 = arith.constant 1.000000e+00 : f32
    %336 = vector.broadcast %cst_91 : f32 to vector<8x32xf32>
    %337 = arith.addf %336, %335 : vector<8x32xf32>
    %338 = arith.divf %336, %337 : vector<8x32xf32>
    %339 = arith.mulf %330, %253 : vector<8x32xf32>
    %340 = arith.mulf %324, %332 : vector<8x32xf32>
    %341 = arith.addf %339, %340 : vector<8x32xf32>
    %342 = math.tanh %341 : vector<8x32xf32>
    %343 = arith.mulf %338, %342 : vector<8x32xf32>
    %344 = arith.index_cast %c3_i32 : i32 to index
    %c0_92 = arith.constant 0 : index
    %c0_93 = arith.constant 0 : index
    %345 = vector.load %arg3[%344, %c0_92, %c0_93] : memref<7x8x1xf32, #tpu.memory_space<vmem>>, vector<1x8x1xf32>
    %346 = vector.shape_cast %345 : vector<1x8x1xf32> to vector<8x1xf32>
    %cst_94 = arith.constant 5.000000e-01 : f32
    %347 = vector.broadcast %cst_94 : f32 to vector<8x1xf32>
    %348 = arith.cmpf ogt, %346, %347 : vector<8x1xf32>
    %349 = vector.shape_cast %348 : vector<8x1xi1> to vector<8x1xi1>
    %350 = vector.broadcast %349 : vector<8x1xi1> to vector<8x32xi1>
    %351 = arith.select %350, %343, %250 : vector<8x32xi1>, vector<8x32xf32>
    %352 = vector.shape_cast %348 : vector<8x1xi1> to vector<8x1xi1>
    %353 = vector.broadcast %352 : vector<8x1xi1> to vector<8x32xi1>
    %354 = arith.select %353, %341, %253 : vector<8x32xi1>, vector<8x32xf32>
    %cst_95 = arith.constant 0.000000e+00 : f32
    %355 = vector.shape_cast %348 : vector<8x1xi1> to vector<8x1xi1>
    %356 = vector.broadcast %355 : vector<8x1xi1> to vector<8x32xi1>
    %357 = vector.broadcast %cst_95 : f32 to vector<8x32xf32>
    %358 = arith.select %356, %343, %357 : vector<8x32xi1>, vector<8x32xf32>
    %359 = arith.index_cast %c3_i32 : i32 to index
    %c0_96 = arith.constant 0 : index
    %c0_97 = arith.constant 0 : index
    %360 = vector.load %arg6[%359, %c0_96, %c0_97] : memref<7x8x64xf32, #tpu.memory_space<vmem>>, vector<1x8x32xf32>
    %361 = vector.shape_cast %360 : vector<1x8x32xf32> to vector<8x32xf32>
    %362 = vector.shape_cast %358 : vector<8x32xf32> to vector<1x8x32xf32>
    tpu.vector_store %arg6[%359, %c0_96, %c0_97], %362 {strides = array<i32>} : memref<7x8x64xf32, #tpu.memory_space<vmem>>, vector<1x8x32xf32>,
    %c6_i32_98 = arith.constant 6 : i32
    %363 = arith.subi %c6_i32_98, %c3_i32 : i32
    %364 = arith.index_cast %363 : i32 to index
    %c0_99 = arith.constant 0 : index
    %c0_100 = arith.constant 0 : index
    %365 = vector.load %arg1[%364, %c0_99, %c0_100] : memref<7x8x256xf32, #tpu.memory_space<vmem>>, vector<1x8x256xf32>
    %366 = vector.shape_cast %365 : vector<1x8x256xf32> to vector<8x256xf32>
    %367 = vector.extract_strided_slice %366 {offsets = [0, 128], sizes = [8, 128], strides = [1, 1]} : vector<8x256xf32> to vector<8x128xf32>
    %cst_101 = arith.constant dense<0.000000e+00> : vector<8x128xf32>
    %368 = tpu.matmul %301, %1, %cst_101 {dimension_numbers = #tpu.dot_dimension_numbers<[1], [0], [0], [1], [0, 0, 1, 1], [], []>} : vector<8x32xf32>, vector<32x128xf32>, vector<8x128xf32> -> vector<8x128xf32>
    %369 = arith.addf %367, %368 : vector<8x128xf32>
    %370 = vector.extract_strided_slice %369 {offsets = [0, 0], sizes = [8, 32], strides = [1, 1]} : vector<8x128xf32> to vector<8x32xf32>
    %371 = arith.negf %370 : vector<8x32xf32>
    %372 = math.exp %371 : vector<8x32xf32>
    %cst_102 = arith.constant 1.000000e+00 : f32
    %373 = vector.broadcast %cst_102 : f32 to vector<8x32xf32>
    %374 = arith.addf %373, %372 : vector<8x32xf32>
    %375 = arith.divf %373, %374 : vector<8x32xf32>
    %376 = vector.extract_strided_slice %369 {offsets = [0, 32], sizes = [8, 32], strides = [1, 1]} : vector<8x128xf32> to vector<8x32xf32>
    %377 = arith.negf %376 : vector<8x32xf32>
    %378 = math.exp %377 : vector<8x32xf32>
    %cst_103 = arith.constant 1.000000e+00 : f32
    %379 = vector.broadcast %cst_103 : f32 to vector<8x32xf32>
    %380 = arith.addf %379, %378 : vector<8x32xf32>
    %381 = arith.divf %379, %380 : vector<8x32xf32>
    %382 = vector.extract_strided_slice %369 {offsets = [0, 64], sizes = [8, 32], strides = [1, 1]} : vector<8x128xf32> to vector<8x32xf32>
    %383 = math.tanh %382 : vector<8x32xf32>
    %384 = vector.extract_strided_slice %369 {offsets = [0, 96], sizes = [8, 32], strides = [1, 1]} : vector<8x128xf32> to vector<8x32xf32>
    %385 = arith.negf %384 : vector<8x32xf32>
    %386 = math.exp %385 : vector<8x32xf32>
    %cst_104 = arith.constant 1.000000e+00 : f32
    %387 = vector.broadcast %cst_104 : f32 to vector<8x32xf32>
    %388 = arith.addf %387, %386 : vector<8x32xf32>
    %389 = arith.divf %387, %388 : vector<8x32xf32>
    %390 = arith.mulf %381, %304 : vector<8x32xf32>
    %391 = arith.mulf %375, %383 : vector<8x32xf32>
    %392 = arith.addf %390, %391 : vector<8x32xf32>
    %393 = math.tanh %392 : vector<8x32xf32>
    %394 = arith.mulf %389, %393 : vector<8x32xf32>
    %395 = arith.index_cast %363 : i32 to index
    %c0_105 = arith.constant 0 : index
    %c0_106 = arith.constant 0 : index
    %396 = vector.load %arg3[%395, %c0_105, %c0_106] : memref<7x8x1xf32, #tpu.memory_space<vmem>>, vector<1x8x1xf32>
    %397 = vector.shape_cast %396 : vector<1x8x1xf32> to vector<8x1xf32>
    %cst_107 = arith.constant 5.000000e-01 : f32
    %398 = vector.broadcast %cst_107 : f32 to vector<8x1xf32>
    %399 = arith.cmpf ogt, %397, %398 : vector<8x1xf32>
    %400 = vector.shape_cast %399 : vector<8x1xi1> to vector<8x1xi1>
    %401 = vector.broadcast %400 : vector<8x1xi1> to vector<8x32xi1>
    %402 = arith.select %401, %394, %301 : vector<8x32xi1>, vector<8x32xf32>
    %403 = vector.shape_cast %399 : vector<8x1xi1> to vector<8x1xi1>
    %404 = vector.broadcast %403 : vector<8x1xi1> to vector<8x32xi1>
    %405 = arith.select %404, %392, %304 : vector<8x32xi1>, vector<8x32xf32>
    %cst_108 = arith.constant 0.000000e+00 : f32
    %406 = vector.shape_cast %399 : vector<8x1xi1> to vector<8x1xi1>
    %407 = vector.broadcast %406 : vector<8x1xi1> to vector<8x32xi1>
    %408 = vector.broadcast %cst_108 : f32 to vector<8x32xf32>
    %409 = arith.select %407, %394, %408 : vector<8x32xi1>, vector<8x32xf32>
    %410 = arith.index_cast %363 : i32 to index
    %c0_109 = arith.constant 0 : index
    %c32_110 = arith.constant 32 : index
    %411 = vector.load %arg6[%410, %c0_109, %c32_110] : memref<7x8x64xf32, #tpu.memory_space<vmem>>, vector<1x8x32xf32>
    %412 = vector.shape_cast %411 : vector<1x8x32xf32> to vector<8x32xf32>
    %413 = vector.shape_cast %409 : vector<8x32xf32> to vector<1x8x32xf32>
    tpu.vector_store %arg6[%410, %c0_109, %c32_110], %413 {strides = array<i32>} : memref<7x8x64xf32, #tpu.memory_space<vmem>>, vector<1x8x32xf32>,
    %c4_i32 = arith.constant 4 : i32
    %414 = arith.index_cast %c4_i32 : i32 to index
    %c0_111 = arith.constant 0 : index
    %c0_112 = arith.constant 0 : index
    %415 = vector.load %arg1[%414, %c0_111, %c0_112] : memref<7x8x256xf32, #tpu.memory_space<vmem>>, vector<1x8x256xf32>
    %416 = vector.shape_cast %415 : vector<1x8x256xf32> to vector<8x256xf32>
    %417 = vector.extract_strided_slice %416 {offsets = [0, 0], sizes = [8, 128], strides = [1, 1]} : vector<8x256xf32> to vector<8x128xf32>
    %cst_113 = arith.constant dense<0.000000e+00> : vector<8x128xf32>
    %418 = tpu.matmul %351, %0, %cst_113 {dimension_numbers = #tpu.dot_dimension_numbers<[1], [0], [0], [1], [0, 0, 1, 1], [], []>} : vector<8x32xf32>, vector<32x128xf32>, vector<8x128xf32> -> vector<8x128xf32>
    %419 = arith.addf %417, %418 : vector<8x128xf32>
    %420 = vector.extract_strided_slice %419 {offsets = [0, 0], sizes = [8, 32], strides = [1, 1]} : vector<8x128xf32> to vector<8x32xf32>
    %421 = arith.negf %420 : vector<8x32xf32>
    %422 = math.exp %421 : vector<8x32xf32>
    %cst_114 = arith.constant 1.000000e+00 : f32
    %423 = vector.broadcast %cst_114 : f32 to vector<8x32xf32>
    %424 = arith.addf %423, %422 : vector<8x32xf32>
    %425 = arith.divf %423, %424 : vector<8x32xf32>
    %426 = vector.extract_strided_slice %419 {offsets = [0, 32], sizes = [8, 32], strides = [1, 1]} : vector<8x128xf32> to vector<8x32xf32>
    %427 = arith.negf %426 : vector<8x32xf32>
    %428 = math.exp %427 : vector<8x32xf32>
    %cst_115 = arith.constant 1.000000e+00 : f32
    %429 = vector.broadcast %cst_115 : f32 to vector<8x32xf32>
    %430 = arith.addf %429, %428 : vector<8x32xf32>
    %431 = arith.divf %429, %430 : vector<8x32xf32>
    %432 = vector.extract_strided_slice %419 {offsets = [0, 64], sizes = [8, 32], strides = [1, 1]} : vector<8x128xf32> to vector<8x32xf32>
    %433 = math.tanh %432 : vector<8x32xf32>
    %434 = vector.extract_strided_slice %419 {offsets = [0, 96], sizes = [8, 32], strides = [1, 1]} : vector<8x128xf32> to vector<8x32xf32>
    %435 = arith.negf %434 : vector<8x32xf32>
    %436 = math.exp %435 : vector<8x32xf32>
    %cst_116 = arith.constant 1.000000e+00 : f32
    %437 = vector.broadcast %cst_116 : f32 to vector<8x32xf32>
    %438 = arith.addf %437, %436 : vector<8x32xf32>
    %439 = arith.divf %437, %438 : vector<8x32xf32>
    %440 = arith.mulf %431, %354 : vector<8x32xf32>
    %441 = arith.mulf %425, %433 : vector<8x32xf32>
    %442 = arith.addf %440, %441 : vector<8x32xf32>
    %443 = math.tanh %442 : vector<8x32xf32>
    %444 = arith.mulf %439, %443 : vector<8x32xf32>
    %445 = arith.index_cast %c4_i32 : i32 to index
    %c0_117 = arith.constant 0 : index
    %c0_118 = arith.constant 0 : index
    %446 = vector.load %arg3[%445, %c0_117, %c0_118] : memref<7x8x1xf32, #tpu.memory_space<vmem>>, vector<1x8x1xf32>
    %447 = vector.shape_cast %446 : vector<1x8x1xf32> to vector<8x1xf32>
    %cst_119 = arith.constant 5.000000e-01 : f32
    %448 = vector.broadcast %cst_119 : f32 to vector<8x1xf32>
    %449 = arith.cmpf ogt, %447, %448 : vector<8x1xf32>
    %450 = vector.shape_cast %449 : vector<8x1xi1> to vector<8x1xi1>
    %451 = vector.broadcast %450 : vector<8x1xi1> to vector<8x32xi1>
    %452 = arith.select %451, %444, %351 : vector<8x32xi1>, vector<8x32xf32>
    %453 = vector.shape_cast %449 : vector<8x1xi1> to vector<8x1xi1>
    %454 = vector.broadcast %453 : vector<8x1xi1> to vector<8x32xi1>
    %455 = arith.select %454, %442, %354 : vector<8x32xi1>, vector<8x32xf32>
    %cst_120 = arith.constant 0.000000e+00 : f32
    %456 = vector.shape_cast %449 : vector<8x1xi1> to vector<8x1xi1>
    %457 = vector.broadcast %456 : vector<8x1xi1> to vector<8x32xi1>
    %458 = vector.broadcast %cst_120 : f32 to vector<8x32xf32>
    %459 = arith.select %457, %444, %458 : vector<8x32xi1>, vector<8x32xf32>
    %460 = arith.index_cast %c4_i32 : i32 to index
    %c0_121 = arith.constant 0 : index
    %c0_122 = arith.constant 0 : index
    %461 = vector.load %arg6[%460, %c0_121, %c0_122] : memref<7x8x64xf32, #tpu.memory_space<vmem>>, vector<1x8x32xf32>
    %462 = vector.shape_cast %461 : vector<1x8x32xf32> to vector<8x32xf32>
    %463 = vector.shape_cast %459 : vector<8x32xf32> to vector<1x8x32xf32>
    tpu.vector_store %arg6[%460, %c0_121, %c0_122], %463 {strides = array<i32>} : memref<7x8x64xf32, #tpu.memory_space<vmem>>, vector<1x8x32xf32>,
    %c6_i32_123 = arith.constant 6 : i32
    %464 = arith.subi %c6_i32_123, %c4_i32 : i32
    %465 = arith.index_cast %464 : i32 to index
    %c0_124 = arith.constant 0 : index
    %c0_125 = arith.constant 0 : index
    %466 = vector.load %arg1[%465, %c0_124, %c0_125] : memref<7x8x256xf32, #tpu.memory_space<vmem>>, vector<1x8x256xf32>
    %467 = vector.shape_cast %466 : vector<1x8x256xf32> to vector<8x256xf32>
    %468 = vector.extract_strided_slice %467 {offsets = [0, 128], sizes = [8, 128], strides = [1, 1]} : vector<8x256xf32> to vector<8x128xf32>
    %cst_126 = arith.constant dense<0.000000e+00> : vector<8x128xf32>
    %469 = tpu.matmul %402, %1, %cst_126 {dimension_numbers = #tpu.dot_dimension_numbers<[1], [0], [0], [1], [0, 0, 1, 1], [], []>} : vector<8x32xf32>, vector<32x128xf32>, vector<8x128xf32> -> vector<8x128xf32>
    %470 = arith.addf %468, %469 : vector<8x128xf32>
    %471 = vector.extract_strided_slice %470 {offsets = [0, 0], sizes = [8, 32], strides = [1, 1]} : vector<8x128xf32> to vector<8x32xf32>
    %472 = arith.negf %471 : vector<8x32xf32>
    %473 = math.exp %472 : vector<8x32xf32>
    %cst_127 = arith.constant 1.000000e+00 : f32
    %474 = vector.broadcast %cst_127 : f32 to vector<8x32xf32>
    %475 = arith.addf %474, %473 : vector<8x32xf32>
    %476 = arith.divf %474, %475 : vector<8x32xf32>
    %477 = vector.extract_strided_slice %470 {offsets = [0, 32], sizes = [8, 32], strides = [1, 1]} : vector<8x128xf32> to vector<8x32xf32>
    %478 = arith.negf %477 : vector<8x32xf32>
    %479 = math.exp %478 : vector<8x32xf32>
    %cst_128 = arith.constant 1.000000e+00 : f32
    %480 = vector.broadcast %cst_128 : f32 to vector<8x32xf32>
    %481 = arith.addf %480, %479 : vector<8x32xf32>
    %482 = arith.divf %480, %481 : vector<8x32xf32>
    %483 = vector.extract_strided_slice %470 {offsets = [0, 64], sizes = [8, 32], strides = [1, 1]} : vector<8x128xf32> to vector<8x32xf32>
    %484 = math.tanh %483 : vector<8x32xf32>
    %485 = vector.extract_strided_slice %470 {offsets = [0, 96], sizes = [8, 32], strides = [1, 1]} : vector<8x128xf32> to vector<8x32xf32>
    %486 = arith.negf %485 : vector<8x32xf32>
    %487 = math.exp %486 : vector<8x32xf32>
    %cst_129 = arith.constant 1.000000e+00 : f32
    %488 = vector.broadcast %cst_129 : f32 to vector<8x32xf32>
    %489 = arith.addf %488, %487 : vector<8x32xf32>
    %490 = arith.divf %488, %489 : vector<8x32xf32>
    %491 = arith.mulf %482, %405 : vector<8x32xf32>
    %492 = arith.mulf %476, %484 : vector<8x32xf32>
    %493 = arith.addf %491, %492 : vector<8x32xf32>
    %494 = math.tanh %493 : vector<8x32xf32>
    %495 = arith.mulf %490, %494 : vector<8x32xf32>
    %496 = arith.index_cast %464 : i32 to index
    %c0_130 = arith.constant 0 : index
    %c0_131 = arith.constant 0 : index
    %497 = vector.load %arg3[%496, %c0_130, %c0_131] : memref<7x8x1xf32, #tpu.memory_space<vmem>>, vector<1x8x1xf32>
    %498 = vector.shape_cast %497 : vector<1x8x1xf32> to vector<8x1xf32>
    %cst_132 = arith.constant 5.000000e-01 : f32
    %499 = vector.broadcast %cst_132 : f32 to vector<8x1xf32>
    %500 = arith.cmpf ogt, %498, %499 : vector<8x1xf32>
    %501 = vector.shape_cast %500 : vector<8x1xi1> to vector<8x1xi1>
    %502 = vector.broadcast %501 : vector<8x1xi1> to vector<8x32xi1>
    %503 = arith.select %502, %495, %402 : vector<8x32xi1>, vector<8x32xf32>
    %504 = vector.shape_cast %500 : vector<8x1xi1> to vector<8x1xi1>
    %505 = vector.broadcast %504 : vector<8x1xi1> to vector<8x32xi1>
    %506 = arith.select %505, %493, %405 : vector<8x32xi1>, vector<8x32xf32>
    %cst_133 = arith.constant 0.000000e+00 : f32
    %507 = vector.shape_cast %500 : vector<8x1xi1> to vector<8x1xi1>
    %508 = vector.broadcast %507 : vector<8x1xi1> to vector<8x32xi1>
    %509 = vector.broadcast %cst_133 : f32 to vector<8x32xf32>
    %510 = arith.select %508, %495, %509 : vector<8x32xi1>, vector<8x32xf32>
    %511 = arith.index_cast %464 : i32 to index
    %c0_134 = arith.constant 0 : index
    %c32_135 = arith.constant 32 : index
    %512 = vector.load %arg6[%511, %c0_134, %c32_135] : memref<7x8x64xf32, #tpu.memory_space<vmem>>, vector<1x8x32xf32>
    %513 = vector.shape_cast %512 : vector<1x8x32xf32> to vector<8x32xf32>
    %514 = vector.shape_cast %510 : vector<8x32xf32> to vector<1x8x32xf32>
    tpu.vector_store %arg6[%511, %c0_134, %c32_135], %514 {strides = array<i32>} : memref<7x8x64xf32, #tpu.memory_space<vmem>>, vector<1x8x32xf32>,
    %c5_i32 = arith.constant 5 : i32
    %515 = arith.index_cast %c5_i32 : i32 to index
    %c0_136 = arith.constant 0 : index
    %c0_137 = arith.constant 0 : index
    %516 = vector.load %arg1[%515, %c0_136, %c0_137] : memref<7x8x256xf32, #tpu.memory_space<vmem>>, vector<1x8x256xf32>
    %517 = vector.shape_cast %516 : vector<1x8x256xf32> to vector<8x256xf32>
    %518 = vector.extract_strided_slice %517 {offsets = [0, 0], sizes = [8, 128], strides = [1, 1]} : vector<8x256xf32> to vector<8x128xf32>
    %cst_138 = arith.constant dense<0.000000e+00> : vector<8x128xf32>
    %519 = tpu.matmul %452, %0, %cst_138 {dimension_numbers = #tpu.dot_dimension_numbers<[1], [0], [0], [1], [0, 0, 1, 1], [], []>} : vector<8x32xf32>, vector<32x128xf32>, vector<8x128xf32> -> vector<8x128xf32>
    %520 = arith.addf %518, %519 : vector<8x128xf32>
    %521 = vector.extract_strided_slice %520 {offsets = [0, 0], sizes = [8, 32], strides = [1, 1]} : vector<8x128xf32> to vector<8x32xf32>
    %522 = arith.negf %521 : vector<8x32xf32>
    %523 = math.exp %522 : vector<8x32xf32>
    %cst_139 = arith.constant 1.000000e+00 : f32
    %524 = vector.broadcast %cst_139 : f32 to vector<8x32xf32>
    %525 = arith.addf %524, %523 : vector<8x32xf32>
    %526 = arith.divf %524, %525 : vector<8x32xf32>
    %527 = vector.extract_strided_slice %520 {offsets = [0, 32], sizes = [8, 32], strides = [1, 1]} : vector<8x128xf32> to vector<8x32xf32>
    %528 = arith.negf %527 : vector<8x32xf32>
    %529 = math.exp %528 : vector<8x32xf32>
    %cst_140 = arith.constant 1.000000e+00 : f32
    %530 = vector.broadcast %cst_140 : f32 to vector<8x32xf32>
    %531 = arith.addf %530, %529 : vector<8x32xf32>
    %532 = arith.divf %530, %531 : vector<8x32xf32>
    %533 = vector.extract_strided_slice %520 {offsets = [0, 64], sizes = [8, 32], strides = [1, 1]} : vector<8x128xf32> to vector<8x32xf32>
    %534 = math.tanh %533 : vector<8x32xf32>
    %535 = vector.extract_strided_slice %520 {offsets = [0, 96], sizes = [8, 32], strides = [1, 1]} : vector<8x128xf32> to vector<8x32xf32>
    %536 = arith.negf %535 : vector<8x32xf32>
    %537 = math.exp %536 : vector<8x32xf32>
    %cst_141 = arith.constant 1.000000e+00 : f32
    %538 = vector.broadcast %cst_141 : f32 to vector<8x32xf32>
    %539 = arith.addf %538, %537 : vector<8x32xf32>
    %540 = arith.divf %538, %539 : vector<8x32xf32>
    %541 = arith.mulf %532, %455 : vector<8x32xf32>
    %542 = arith.mulf %526, %534 : vector<8x32xf32>
    %543 = arith.addf %541, %542 : vector<8x32xf32>
    %544 = math.tanh %543 : vector<8x32xf32>
    %545 = arith.mulf %540, %544 : vector<8x32xf32>
    %546 = arith.index_cast %c5_i32 : i32 to index
    %c0_142 = arith.constant 0 : index
    %c0_143 = arith.constant 0 : index
    %547 = vector.load %arg3[%546, %c0_142, %c0_143] : memref<7x8x1xf32, #tpu.memory_space<vmem>>, vector<1x8x1xf32>
    %548 = vector.shape_cast %547 : vector<1x8x1xf32> to vector<8x1xf32>
    %cst_144 = arith.constant 5.000000e-01 : f32
    %549 = vector.broadcast %cst_144 : f32 to vector<8x1xf32>
    %550 = arith.cmpf ogt, %548, %549 : vector<8x1xf32>
    %551 = vector.shape_cast %550 : vector<8x1xi1> to vector<8x1xi1>
    %552 = vector.broadcast %551 : vector<8x1xi1> to vector<8x32xi1>
    %553 = arith.select %552, %545, %452 : vector<8x32xi1>, vector<8x32xf32>
    %554 = vector.shape_cast %550 : vector<8x1xi1> to vector<8x1xi1>
    %555 = vector.broadcast %554 : vector<8x1xi1> to vector<8x32xi1>
    %556 = arith.select %555, %543, %455 : vector<8x32xi1>, vector<8x32xf32>
    %cst_145 = arith.constant 0.000000e+00 : f32
    %557 = vector.shape_cast %550 : vector<8x1xi1> to vector<8x1xi1>
    %558 = vector.broadcast %557 : vector<8x1xi1> to vector<8x32xi1>
    %559 = vector.broadcast %cst_145 : f32 to vector<8x32xf32>
    %560 = arith.select %558, %545, %559 : vector<8x32xi1>, vector<8x32xf32>
    %561 = arith.index_cast %c5_i32 : i32 to index
    %c0_146 = arith.constant 0 : index
    %c0_147 = arith.constant 0 : index
    %562 = vector.load %arg6[%561, %c0_146, %c0_147] : memref<7x8x64xf32, #tpu.memory_space<vmem>>, vector<1x8x32xf32>
    %563 = vector.shape_cast %562 : vector<1x8x32xf32> to vector<8x32xf32>
    %564 = vector.shape_cast %560 : vector<8x32xf32> to vector<1x8x32xf32>
    tpu.vector_store %arg6[%561, %c0_146, %c0_147], %564 {strides = array<i32>} : memref<7x8x64xf32, #tpu.memory_space<vmem>>, vector<1x8x32xf32>,
    %c6_i32_148 = arith.constant 6 : i32
    %565 = arith.subi %c6_i32_148, %c5_i32 : i32
    %566 = arith.index_cast %565 : i32 to index
    %c0_149 = arith.constant 0 : index
    %c0_150 = arith.constant 0 : index
    %567 = vector.load %arg1[%566, %c0_149, %c0_150] : memref<7x8x256xf32, #tpu.memory_space<vmem>>, vector<1x8x256xf32>
    %568 = vector.shape_cast %567 : vector<1x8x256xf32> to vector<8x256xf32>
    %569 = vector.extract_strided_slice %568 {offsets = [0, 128], sizes = [8, 128], strides = [1, 1]} : vector<8x256xf32> to vector<8x128xf32>
    %cst_151 = arith.constant dense<0.000000e+00> : vector<8x128xf32>
    %570 = tpu.matmul %503, %1, %cst_151 {dimension_numbers = #tpu.dot_dimension_numbers<[1], [0], [0], [1], [0, 0, 1, 1], [], []>} : vector<8x32xf32>, vector<32x128xf32>, vector<8x128xf32> -> vector<8x128xf32>
    %571 = arith.addf %569, %570 : vector<8x128xf32>
    %572 = vector.extract_strided_slice %571 {offsets = [0, 0], sizes = [8, 32], strides = [1, 1]} : vector<8x128xf32> to vector<8x32xf32>
    %573 = arith.negf %572 : vector<8x32xf32>
    %574 = math.exp %573 : vector<8x32xf32>
    %cst_152 = arith.constant 1.000000e+00 : f32
    %575 = vector.broadcast %cst_152 : f32 to vector<8x32xf32>
    %576 = arith.addf %575, %574 : vector<8x32xf32>
    %577 = arith.divf %575, %576 : vector<8x32xf32>
    %578 = vector.extract_strided_slice %571 {offsets = [0, 32], sizes = [8, 32], strides = [1, 1]} : vector<8x128xf32> to vector<8x32xf32>
    %579 = arith.negf %578 : vector<8x32xf32>
    %580 = math.exp %579 : vector<8x32xf32>
    %cst_153 = arith.constant 1.000000e+00 : f32
    %581 = vector.broadcast %cst_153 : f32 to vector<8x32xf32>
    %582 = arith.addf %581, %580 : vector<8x32xf32>
    %583 = arith.divf %581, %582 : vector<8x32xf32>
    %584 = vector.extract_strided_slice %571 {offsets = [0, 64], sizes = [8, 32], strides = [1, 1]} : vector<8x128xf32> to vector<8x32xf32>
    %585 = math.tanh %584 : vector<8x32xf32>
    %586 = vector.extract_strided_slice %571 {offsets = [0, 96], sizes = [8, 32], strides = [1, 1]} : vector<8x128xf32> to vector<8x32xf32>
    %587 = arith.negf %586 : vector<8x32xf32>
    %588 = math.exp %587 : vector<8x32xf32>
    %cst_154 = arith.constant 1.000000e+00 : f32
    %589 = vector.broadcast %cst_154 : f32 to vector<8x32xf32>
    %590 = arith.addf %589, %588 : vector<8x32xf32>
    %591 = arith.divf %589, %590 : vector<8x32xf32>
    %592 = arith.mulf %583, %506 : vector<8x32xf32>
    %593 = arith.mulf %577, %585 : vector<8x32xf32>
    %594 = arith.addf %592, %593 : vector<8x32xf32>
    %595 = math.tanh %594 : vector<8x32xf32>
    %596 = arith.mulf %591, %595 : vector<8x32xf32>
    %597 = arith.index_cast %565 : i32 to index
    %c0_155 = arith.constant 0 : index
    %c0_156 = arith.constant 0 : index
    %598 = vector.load %arg3[%597, %c0_155, %c0_156] : memref<7x8x1xf32, #tpu.memory_space<vmem>>, vector<1x8x1xf32>
    %599 = vector.shape_cast %598 : vector<1x8x1xf32> to vector<8x1xf32>
    %cst_157 = arith.constant 5.000000e-01 : f32
    %600 = vector.broadcast %cst_157 : f32 to vector<8x1xf32>
    %601 = arith.cmpf ogt, %599, %600 : vector<8x1xf32>
    %602 = vector.shape_cast %601 : vector<8x1xi1> to vector<8x1xi1>
    %603 = vector.broadcast %602 : vector<8x1xi1> to vector<8x32xi1>
    %604 = arith.select %603, %596, %503 : vector<8x32xi1>, vector<8x32xf32>
    %605 = vector.shape_cast %601 : vector<8x1xi1> to vector<8x1xi1>
    %606 = vector.broadcast %605 : vector<8x1xi1> to vector<8x32xi1>
    %607 = arith.select %606, %594, %506 : vector<8x32xi1>, vector<8x32xf32>
    %cst_158 = arith.constant 0.000000e+00 : f32
    %608 = vector.shape_cast %601 : vector<8x1xi1> to vector<8x1xi1>
    %609 = vector.broadcast %608 : vector<8x1xi1> to vector<8x32xi1>
    %610 = vector.broadcast %cst_158 : f32 to vector<8x32xf32>
    %611 = arith.select %609, %596, %610 : vector<8x32xi1>, vector<8x32xf32>
    %612 = arith.index_cast %565 : i32 to index
    %c0_159 = arith.constant 0 : index
    %c32_160 = arith.constant 32 : index
    %613 = vector.load %arg6[%612, %c0_159, %c32_160] : memref<7x8x64xf32, #tpu.memory_space<vmem>>, vector<1x8x32xf32>
    %614 = vector.shape_cast %613 : vector<1x8x32xf32> to vector<8x32xf32>
    %615 = vector.shape_cast %611 : vector<8x32xf32> to vector<1x8x32xf32>
    tpu.vector_store %arg6[%612, %c0_159, %c32_160], %615 {strides = array<i32>} : memref<7x8x64xf32, #tpu.memory_space<vmem>>, vector<1x8x32xf32>,
    %c6_i32_161 = arith.constant 6 : i32
    %616 = arith.index_cast %c6_i32_161 : i32 to index
    %c0_162 = arith.constant 0 : index
    %c0_163 = arith.constant 0 : index
    %617 = vector.load %arg1[%616, %c0_162, %c0_163] : memref<7x8x256xf32, #tpu.memory_space<vmem>>, vector<1x8x256xf32>
    %618 = vector.shape_cast %617 : vector<1x8x256xf32> to vector<8x256xf32>
    %619 = vector.extract_strided_slice %618 {offsets = [0, 0], sizes = [8, 128], strides = [1, 1]} : vector<8x256xf32> to vector<8x128xf32>
    %cst_164 = arith.constant dense<0.000000e+00> : vector<8x128xf32>
    %620 = tpu.matmul %553, %0, %cst_164 {dimension_numbers = #tpu.dot_dimension_numbers<[1], [0], [0], [1], [0, 0, 1, 1], [], []>} : vector<8x32xf32>, vector<32x128xf32>, vector<8x128xf32> -> vector<8x128xf32>
    %621 = arith.addf %619, %620 : vector<8x128xf32>
    %622 = vector.extract_strided_slice %621 {offsets = [0, 0], sizes = [8, 32], strides = [1, 1]} : vector<8x128xf32> to vector<8x32xf32>
    %623 = arith.negf %622 : vector<8x32xf32>
    %624 = math.exp %623 : vector<8x32xf32>
    %cst_165 = arith.constant 1.000000e+00 : f32
    %625 = vector.broadcast %cst_165 : f32 to vector<8x32xf32>
    %626 = arith.addf %625, %624 : vector<8x32xf32>
    %627 = arith.divf %625, %626 : vector<8x32xf32>
    %628 = vector.extract_strided_slice %621 {offsets = [0, 32], sizes = [8, 32], strides = [1, 1]} : vector<8x128xf32> to vector<8x32xf32>
    %629 = arith.negf %628 : vector<8x32xf32>
    %630 = math.exp %629 : vector<8x32xf32>
    %cst_166 = arith.constant 1.000000e+00 : f32
    %631 = vector.broadcast %cst_166 : f32 to vector<8x32xf32>
    %632 = arith.addf %631, %630 : vector<8x32xf32>
    %633 = arith.divf %631, %632 : vector<8x32xf32>
    %634 = vector.extract_strided_slice %621 {offsets = [0, 64], sizes = [8, 32], strides = [1, 1]} : vector<8x128xf32> to vector<8x32xf32>
    %635 = math.tanh %634 : vector<8x32xf32>
    %636 = vector.extract_strided_slice %621 {offsets = [0, 96], sizes = [8, 32], strides = [1, 1]} : vector<8x128xf32> to vector<8x32xf32>
    %637 = arith.negf %636 : vector<8x32xf32>
    %638 = math.exp %637 : vector<8x32xf32>
    %cst_167 = arith.constant 1.000000e+00 : f32
    %639 = vector.broadcast %cst_167 : f32 to vector<8x32xf32>
    %640 = arith.addf %639, %638 : vector<8x32xf32>
    %641 = arith.divf %639, %640 : vector<8x32xf32>
    %642 = arith.mulf %633, %556 : vector<8x32xf32>
    %643 = arith.mulf %627, %635 : vector<8x32xf32>
    %644 = arith.addf %642, %643 : vector<8x32xf32>
    %645 = math.tanh %644 : vector<8x32xf32>
    %646 = arith.mulf %641, %645 : vector<8x32xf32>
    %647 = arith.index_cast %c6_i32_161 : i32 to index
    %c0_168 = arith.constant 0 : index
    %c0_169 = arith.constant 0 : index
    %648 = vector.load %arg3[%647, %c0_168, %c0_169] : memref<7x8x1xf32, #tpu.memory_space<vmem>>, vector<1x8x1xf32>
    %649 = vector.shape_cast %648 : vector<1x8x1xf32> to vector<8x1xf32>
    %cst_170 = arith.constant 5.000000e-01 : f32
    %650 = vector.broadcast %cst_170 : f32 to vector<8x1xf32>
    %651 = arith.cmpf ogt, %649, %650 : vector<8x1xf32>
    %652 = vector.shape_cast %651 : vector<8x1xi1> to vector<8x1xi1>
    %653 = vector.broadcast %652 : vector<8x1xi1> to vector<8x32xi1>
    %654 = arith.select %653, %646, %553 : vector<8x32xi1>, vector<8x32xf32>
    %655 = vector.shape_cast %651 : vector<8x1xi1> to vector<8x1xi1>
    %656 = vector.broadcast %655 : vector<8x1xi1> to vector<8x32xi1>
    %657 = arith.select %656, %644, %556 : vector<8x32xi1>, vector<8x32xf32>
    %cst_171 = arith.constant 0.000000e+00 : f32
    %658 = vector.shape_cast %651 : vector<8x1xi1> to vector<8x1xi1>
    %659 = vector.broadcast %658 : vector<8x1xi1> to vector<8x32xi1>
    %660 = vector.broadcast %cst_171 : f32 to vector<8x32xf32>
    %661 = arith.select %659, %646, %660 : vector<8x32xi1>, vector<8x32xf32>
    %662 = arith.index_cast %c6_i32_161 : i32 to index
    %c0_172 = arith.constant 0 : index
    %c0_173 = arith.constant 0 : index
    %663 = vector.load %arg6[%662, %c0_172, %c0_173] : memref<7x8x64xf32, #tpu.memory_space<vmem>>, vector<1x8x32xf32>
    %664 = vector.shape_cast %663 : vector<1x8x32xf32> to vector<8x32xf32>
    %665 = vector.shape_cast %661 : vector<8x32xf32> to vector<1x8x32xf32>
    tpu.vector_store %arg6[%662, %c0_172, %c0_173], %665 {strides = array<i32>} : memref<7x8x64xf32, #tpu.memory_space<vmem>>, vector<1x8x32xf32>,
    %c6_i32_174 = arith.constant 6 : i32
    %666 = arith.subi %c6_i32_174, %c6_i32_161 : i32
    %667 = arith.index_cast %666 : i32 to index
    %c0_175 = arith.constant 0 : index
    %c0_176 = arith.constant 0 : index
    %668 = vector.load %arg1[%667, %c0_175, %c0_176] : memref<7x8x256xf32, #tpu.memory_space<vmem>>, vector<1x8x256xf32>
    %669 = vector.shape_cast %668 : vector<1x8x256xf32> to vector<8x256xf32>
    %670 = vector.extract_strided_slice %669 {offsets = [0, 128], sizes = [8, 128], strides = [1, 1]} : vector<8x256xf32> to vector<8x128xf32>
    %cst_177 = arith.constant dense<0.000000e+00> : vector<8x128xf32>
    %671 = tpu.matmul %604, %1, %cst_177 {dimension_numbers = #tpu.dot_dimension_numbers<[1], [0], [0], [1], [0, 0, 1, 1], [], []>} : vector<8x32xf32>, vector<32x128xf32>, vector<8x128xf32> -> vector<8x128xf32>
    %672 = arith.addf %670, %671 : vector<8x128xf32>
    %673 = vector.extract_strided_slice %672 {offsets = [0, 0], sizes = [8, 32], strides = [1, 1]} : vector<8x128xf32> to vector<8x32xf32>
    %674 = arith.negf %673 : vector<8x32xf32>
    %675 = math.exp %674 : vector<8x32xf32>
    %cst_178 = arith.constant 1.000000e+00 : f32
    %676 = vector.broadcast %cst_178 : f32 to vector<8x32xf32>
    %677 = arith.addf %676, %675 : vector<8x32xf32>
    %678 = arith.divf %676, %677 : vector<8x32xf32>
    %679 = vector.extract_strided_slice %672 {offsets = [0, 32], sizes = [8, 32], strides = [1, 1]} : vector<8x128xf32> to vector<8x32xf32>
    %680 = arith.negf %679 : vector<8x32xf32>
    %681 = math.exp %680 : vector<8x32xf32>
    %cst_179 = arith.constant 1.000000e+00 : f32
    %682 = vector.broadcast %cst_179 : f32 to vector<8x32xf32>
    %683 = arith.addf %682, %681 : vector<8x32xf32>
    %684 = arith.divf %682, %683 : vector<8x32xf32>
    %685 = vector.extract_strided_slice %672 {offsets = [0, 64], sizes = [8, 32], strides = [1, 1]} : vector<8x128xf32> to vector<8x32xf32>
    %686 = math.tanh %685 : vector<8x32xf32>
    %687 = vector.extract_strided_slice %672 {offsets = [0, 96], sizes = [8, 32], strides = [1, 1]} : vector<8x128xf32> to vector<8x32xf32>
    %688 = arith.negf %687 : vector<8x32xf32>
    %689 = math.exp %688 : vector<8x32xf32>
    %cst_180 = arith.constant 1.000000e+00 : f32
    %690 = vector.broadcast %cst_180 : f32 to vector<8x32xf32>
    %691 = arith.addf %690, %689 : vector<8x32xf32>
    %692 = arith.divf %690, %691 : vector<8x32xf32>
    %693 = arith.mulf %684, %607 : vector<8x32xf32>
    %694 = arith.mulf %678, %686 : vector<8x32xf32>
    %695 = arith.addf %693, %694 : vector<8x32xf32>
    %696 = math.tanh %695 : vector<8x32xf32>
    %697 = arith.mulf %692, %696 : vector<8x32xf32>
    %698 = arith.index_cast %666 : i32 to index
    %c0_181 = arith.constant 0 : index
    %c0_182 = arith.constant 0 : index
    %699 = vector.load %arg3[%698, %c0_181, %c0_182] : memref<7x8x1xf32, #tpu.memory_space<vmem>>, vector<1x8x1xf32>
    %700 = vector.shape_cast %699 : vector<1x8x1xf32> to vector<8x1xf32>
    %cst_183 = arith.constant 5.000000e-01 : f32
    %701 = vector.broadcast %cst_183 : f32 to vector<8x1xf32>
    %702 = arith.cmpf ogt, %700, %701 : vector<8x1xf32>
    %703 = vector.shape_cast %702 : vector<8x1xi1> to vector<8x1xi1>
    %704 = vector.broadcast %703 : vector<8x1xi1> to vector<8x32xi1>
    %705 = arith.select %704, %697, %604 : vector<8x32xi1>, vector<8x32xf32>
    %706 = vector.shape_cast %702 : vector<8x1xi1> to vector<8x1xi1>
    %707 = vector.broadcast %706 : vector<8x1xi1> to vector<8x32xi1>
    %708 = arith.select %707, %695, %607 : vector<8x32xi1>, vector<8x32xf32>
    %cst_184 = arith.constant 0.000000e+00 : f32
    %709 = vector.shape_cast %702 : vector<8x1xi1> to vector<8x1xi1>
    %710 = vector.broadcast %709 : vector<8x1xi1> to vector<8x32xi1>
    %711 = vector.broadcast %cst_184 : f32 to vector<8x32xf32>
    %712 = arith.select %710, %697, %711 : vector<8x32xi1>, vector<8x32xf32>
    %713 = arith.index_cast %666 : i32 to index
    %c0_185 = arith.constant 0 : index
    %c32_186 = arith.constant 32 : index
    %714 = vector.load %arg6[%713, %c0_185, %c32_186] : memref<7x8x64xf32, #tpu.memory_space<vmem>>, vector<1x8x32xf32>
    %715 = vector.shape_cast %714 : vector<1x8x32xf32> to vector<8x32xf32>
    %716 = vector.shape_cast %712 : vector<8x32xf32> to vector<1x8x32xf32>
    tpu.vector_store %arg6[%713, %c0_185, %c32_186], %716 {strides = array<i32>} : memref<7x8x64xf32, #tpu.memory_space<vmem>>, vector<1x8x32xf32>,
    %c7_i32 = arith.constant 7 : i32
    %c0_187 = arith.constant 0 : index
    %c0_188 = arith.constant 0 : index
    %c0_189 = arith.constant 0 : index
    %717 = vector.load %arg7[%c0_187, %c0_188, %c0_189] : memref<2x8x32xf32, #tpu.memory_space<vmem>>, vector<1x8x32xf32>
    %718 = vector.shape_cast %717 : vector<1x8x32xf32> to vector<8x32xf32>
    %719 = vector.shape_cast %657 : vector<8x32xf32> to vector<1x8x32xf32>
    tpu.vector_store %arg7[%c0_187, %c0_188, %c0_189], %719 {strides = array<i32>} : memref<2x8x32xf32, #tpu.memory_space<vmem>>, vector<1x8x32xf32>,
    %c1_190 = arith.constant 1 : index
    %c0_191 = arith.constant 0 : index
    %c0_192 = arith.constant 0 : index
    %720 = vector.load %arg7[%c1_190, %c0_191, %c0_192] : memref<2x8x32xf32, #tpu.memory_space<vmem>>, vector<1x8x32xf32>
    %721 = vector.shape_cast %720 : vector<1x8x32xf32> to vector<8x32xf32>
    %722 = vector.shape_cast %708 : vector<8x32xf32> to vector<1x8x32xf32>
    tpu.vector_store %arg7[%c1_190, %c0_191, %c0_192], %722 {strides = array<i32>} : memref<2x8x32xf32, #tpu.memory_space<vmem>>, vector<1x8x32xf32>,
    return
  }
  func.func @transform_0(%arg0: i32) -> (i32, i32, i32) {
    %c0_i32 = arith.constant 0 : i32
    %c0_i32_0 = arith.constant 0 : i32
    %c0_i32_1 = arith.constant 0 : i32
    %c0_i32_2 = arith.constant 0 : i32
    return %c0_i32, %c0_i32_0, %c0_i32_1 : i32, i32, i32
  }
  func.func @transform_1(%arg0: i32) -> (i32, i32) {
    %c0_i32 = arith.constant 0 : i32
    %c0_i32_0 = arith.constant 0 : i32
    %c0_i32_1 = arith.constant 0 : i32
    return %c0_i32, %c0_i32_0 : i32, i32
  }
  func.func @transform_2(%arg0: i32) -> (i32, i32, i32) {
    %c0_i32 = arith.constant 0 : i32
    %c0_i32_0 = arith.constant 0 : i32
    %c0_i32_1 = arith.constant 0 : i32
    %c0_i32_2 = arith.constant 0 : i32
    return %c0_i32, %c0_i32_0, %c0_i32_1 : i32, i32, i32
  }
  func.func @transform_3(%arg0: i32) -> (i32, i32, i32) {
    %c0_i32 = arith.constant 0 : i32
    %c0_i32_0 = arith.constant 0 : i32
    %c0_i32_1 = arith.constant 0 : i32
    %c0_i32_2 = arith.constant 0 : i32
    return %c0_i32, %c0_i32_0, %c0_i32_1 : i32, i32, i32
  }
  func.func @transform_4(%arg0: i32) -> (i32, i32, i32) {
    %c0_i32 = arith.constant 0 : i32
    %c0_i32_0 = arith.constant 0 : i32
    %c0_i32_1 = arith.constant 0 : i32
    %c0_i32_2 = arith.constant 0 : i32
    return %c0_i32, %c0_i32_0, %c0_i32_1 : i32, i32, i32
  }
  func.func @transform_5(%arg0: i32) -> (i32, i32, i32) {
    %c0_i32 = arith.constant 0 : i32
    %c0_i32_0 = arith.constant 0 : i32
    %c0_i32_1 = arith.constant 0 : i32
    %c0_i32_2 = arith.constant 0 : i32
    return %c0_i32, %c0_i32_0, %c0_i32_1 : i32, i32, i32
  }
  func.func @transform_6(%arg0: i32) -> (i32, i32, i32) {
    %c0_i32 = arith.constant 0 : i32
    %c0_i32_0 = arith.constant 0 : i32
    %c0_i32_1 = arith.constant 0 : i32
    %c0_i32_2 = arith.constant 0 : i32
    return %c0_i32, %c0_i32_0, %c0_i32_1 : i32, i32, i32
  }
}

module attributes {stable_mosaic.version = 11 : i64} {
  func.func @_linear_kernel(%arg0: i32, %arg1: memref<56x64xf32, #tpu.memory_space<vmem>>, %arg2: memref<64x96xf32, #tpu.memory_space<vmem>>, %arg3: memref<1x96xf32, #tpu.memory_space<vmem>>, %arg4: memref<56x96xf32, #tpu.memory_space<vmem>>) attributes {dimension_semantics = [#tpu.dimension_semantics<parallel>], iteration_bounds = array<i64: 1>, scalar_prefetch = 0 : i64, scratch_operands = 0 : i64, tpu.core_type = #tpu.core_type<tc>, window_params = [{transform_indices = @transform_0, window_bounds = array<i64: 56, 64>}, {pipeline_mode = #tpu.pipeline_mode<synchronous>, transform_indices = @transform_1, window_bounds = array<i64: 64, 96>}, {pipeline_mode = #tpu.pipeline_mode<synchronous>, transform_indices = @transform_2, window_bounds = array<i64: 1, 96>}, {transform_indices = @transform_3, window_bounds = array<i64: 56, 96>}]} {
    %c0 = arith.constant 0 : index
    %c0_0 = arith.constant 0 : index
    %0 = vector.load %arg1[%c0, %c0_0] : memref<56x64xf32, #tpu.memory_space<vmem>>, vector<56x64xf32>
    %c0_1 = arith.constant 0 : index
    %c0_2 = arith.constant 0 : index
    %1 = vector.load %arg2[%c0_1, %c0_2] : memref<64x96xf32, #tpu.memory_space<vmem>>, vector<64x96xf32>
    %cst = arith.constant dense<0.000000e+00> : vector<56x96xf32>
    %2 = tpu.matmul %0, %1, %cst {dimension_numbers = #tpu.dot_dimension_numbers<[1], [0], [0], [1], [0, 0, 1, 1], [], []>} : vector<56x64xf32>, vector<64x96xf32>, vector<56x96xf32> -> vector<56x96xf32>
    %c0_3 = arith.constant 0 : index
    %c0_4 = arith.constant 0 : index
    %3 = vector.load %arg3[%c0_3, %c0_4] : memref<1x96xf32, #tpu.memory_space<vmem>>, vector<1x96xf32>
    %4 = vector.broadcast %3 : vector<1x96xf32> to vector<56x96xf32>
    %5 = arith.addf %2, %4 : vector<56x96xf32>
    %cst_5 = arith.constant 0.000000e+00 : f32
    %6 = vector.broadcast %cst_5 : f32 to vector<56x96xf32>
    %7 = arith.cmpf ogt, %5, %6 : vector<56x96xf32>
    %8 = math.exp %5 : vector<56x96xf32>
    %cst_6 = arith.constant 1.000000e+00 : f32
    %9 = vector.broadcast %cst_6 : f32 to vector<56x96xf32>
    %10 = arith.subf %8, %9 : vector<56x96xf32>
    %11 = arith.select %7, %5, %10 : vector<56x96xi1>, vector<56x96xf32>
    %c0_7 = arith.constant 0 : index
    %c0_8 = arith.constant 0 : index
    %12 = vector.load %arg4[%c0_7, %c0_8] : memref<56x96xf32, #tpu.memory_space<vmem>>, vector<56x96xf32>
    tpu.vector_store %arg4[%c0_7, %c0_8], %11 {strides = array<i32>} : memref<56x96xf32, #tpu.memory_space<vmem>>, vector<56x96xf32>,
    return
  }
  func.func @transform_0(%arg0: i32) -> (i32, i32) {
    %c0_i32 = arith.constant 0 : i32
    %c0_i32_0 = arith.constant 0 : i32
    return %arg0, %c0_i32 : i32, i32
  }
  func.func @transform_1(%arg0: i32) -> (i32, i32) {
    %c0_i32 = arith.constant 0 : i32
    %c0_i32_0 = arith.constant 0 : i32
    %c0_i32_1 = arith.constant 0 : i32
    return %c0_i32, %c0_i32_0 : i32, i32
  }
  func.func @transform_2(%arg0: i32) -> (i32, i32) {
    %c0_i32 = arith.constant 0 : i32
    %c0_i32_0 = arith.constant 0 : i32
    %c0_i32_1 = arith.constant 0 : i32
    return %c0_i32, %c0_i32_0 : i32, i32
  }
  func.func @transform_3(%arg0: i32) -> (i32, i32) {
    %c0_i32 = arith.constant 0 : i32
    %c0_i32_0 = arith.constant 0 : i32
    return %arg0, %c0_i32 : i32, i32
  }
}

module attributes {stable_mosaic.version = 11 : i64} {
  func.func @_linear_kernel(%arg0: i32, %arg1: memref<48x32xf32, #tpu.memory_space<vmem>>, %arg2: memref<32x128xf32, #tpu.memory_space<vmem>>, %arg3: memref<1x128xf32, #tpu.memory_space<vmem>>, %arg4: memref<48x128xf32, #tpu.memory_space<vmem>>) attributes {dimension_semantics = [#tpu.dimension_semantics<parallel>], iteration_bounds = array<i64: 1>, scalar_prefetch = 0 : i64, scratch_operands = 0 : i64, tpu.core_type = #tpu.core_type<tc>, window_params = [{transform_indices = @transform_0, window_bounds = array<i64: 48, 32>}, {pipeline_mode = #tpu.pipeline_mode<synchronous>, transform_indices = @transform_1, window_bounds = array<i64: 32, 128>}, {pipeline_mode = #tpu.pipeline_mode<synchronous>, transform_indices = @transform_2, window_bounds = array<i64: 1, 128>}, {transform_indices = @transform_3, window_bounds = array<i64: 48, 128>}]} {
    %c0 = arith.constant 0 : index
    %c0_0 = arith.constant 0 : index
    %0 = vector.load %arg1[%c0, %c0_0] : memref<48x32xf32, #tpu.memory_space<vmem>>, vector<48x32xf32>
    %c0_1 = arith.constant 0 : index
    %c0_2 = arith.constant 0 : index
    %1 = vector.load %arg2[%c0_1, %c0_2] : memref<32x128xf32, #tpu.memory_space<vmem>>, vector<32x128xf32>
    %cst = arith.constant dense<0.000000e+00> : vector<48x128xf32>
    %2 = tpu.matmul %0, %1, %cst {dimension_numbers = #tpu.dot_dimension_numbers<[1], [0], [0], [1], [0, 0, 1, 1], [], []>} : vector<48x32xf32>, vector<32x128xf32>, vector<48x128xf32> -> vector<48x128xf32>
    %c0_3 = arith.constant 0 : index
    %c0_4 = arith.constant 0 : index
    %3 = vector.load %arg3[%c0_3, %c0_4] : memref<1x128xf32, #tpu.memory_space<vmem>>, vector<1x128xf32>
    %4 = vector.broadcast %3 : vector<1x128xf32> to vector<48x128xf32>
    %5 = arith.addf %2, %4 : vector<48x128xf32>
    %c0_5 = arith.constant 0 : index
    %c0_6 = arith.constant 0 : index
    %6 = vector.load %arg4[%c0_5, %c0_6] : memref<48x128xf32, #tpu.memory_space<vmem>>, vector<48x128xf32>
    tpu.vector_store %arg4[%c0_5, %c0_6], %5 {strides = array<i32>} : memref<48x128xf32, #tpu.memory_space<vmem>>, vector<48x128xf32>,
    return
  }
  func.func @transform_0(%arg0: i32) -> (i32, i32) {
    %c0_i32 = arith.constant 0 : i32
    %c0_i32_0 = arith.constant 0 : i32
    return %arg0, %c0_i32 : i32, i32
  }
  func.func @transform_1(%arg0: i32) -> (i32, i32) {
    %c0_i32 = arith.constant 0 : i32
    %c0_i32_0 = arith.constant 0 : i32
    %c0_i32_1 = arith.constant 0 : i32
    return %c0_i32, %c0_i32_0 : i32, i32
  }
  func.func @transform_2(%arg0: i32) -> (i32, i32) {
    %c0_i32 = arith.constant 0 : i32
    %c0_i32_0 = arith.constant 0 : i32
    %c0_i32_1 = arith.constant 0 : i32
    return %c0_i32, %c0_i32_0 : i32, i32
  }
  func.func @transform_3(%arg0: i32) -> (i32, i32) {
    %c0_i32 = arith.constant 0 : i32
    %c0_i32_0 = arith.constant 0 : i32
    return %arg0, %c0_i32 : i32, i32
  }
}

module attributes {stable_mosaic.version = 11 : i64} {
  func.func @_linear_kernel(%arg0: i32, %arg1: memref<48x32xf32, #tpu.memory_space<vmem>>, %arg2: memref<32x64xf32, #tpu.memory_space<vmem>>, %arg3: memref<1x64xf32, #tpu.memory_space<vmem>>, %arg4: memref<48x64xf32, #tpu.memory_space<vmem>>) attributes {dimension_semantics = [#tpu.dimension_semantics<parallel>], iteration_bounds = array<i64: 1>, scalar_prefetch = 0 : i64, scratch_operands = 0 : i64, tpu.core_type = #tpu.core_type<tc>, window_params = [{transform_indices = @transform_0, window_bounds = array<i64: 48, 32>}, {pipeline_mode = #tpu.pipeline_mode<synchronous>, transform_indices = @transform_1, window_bounds = array<i64: 32, 64>}, {pipeline_mode = #tpu.pipeline_mode<synchronous>, transform_indices = @transform_2, window_bounds = array<i64: 1, 64>}, {transform_indices = @transform_3, window_bounds = array<i64: 48, 64>}]} {
    %c0 = arith.constant 0 : index
    %c0_0 = arith.constant 0 : index
    %0 = vector.load %arg1[%c0, %c0_0] : memref<48x32xf32, #tpu.memory_space<vmem>>, vector<48x32xf32>
    %c0_1 = arith.constant 0 : index
    %c0_2 = arith.constant 0 : index
    %1 = vector.load %arg2[%c0_1, %c0_2] : memref<32x64xf32, #tpu.memory_space<vmem>>, vector<32x64xf32>
    %cst = arith.constant dense<0.000000e+00> : vector<48x64xf32>
    %2 = tpu.matmul %0, %1, %cst {dimension_numbers = #tpu.dot_dimension_numbers<[1], [0], [0], [1], [0, 0, 1, 1], [], []>} : vector<48x32xf32>, vector<32x64xf32>, vector<48x64xf32> -> vector<48x64xf32>
    %c0_3 = arith.constant 0 : index
    %c0_4 = arith.constant 0 : index
    %3 = vector.load %arg3[%c0_3, %c0_4] : memref<1x64xf32, #tpu.memory_space<vmem>>, vector<1x64xf32>
    %4 = vector.broadcast %3 : vector<1x64xf32> to vector<48x64xf32>
    %5 = arith.addf %2, %4 : vector<48x64xf32>
    %cst_5 = arith.constant 0.000000e+00 : f32
    %6 = vector.broadcast %cst_5 : f32 to vector<48x64xf32>
    %7 = arith.cmpf ogt, %5, %6 : vector<48x64xf32>
    %8 = math.exp %5 : vector<48x64xf32>
    %cst_6 = arith.constant 1.000000e+00 : f32
    %9 = vector.broadcast %cst_6 : f32 to vector<48x64xf32>
    %10 = arith.subf %8, %9 : vector<48x64xf32>
    %11 = arith.select %7, %5, %10 : vector<48x64xi1>, vector<48x64xf32>
    %c0_7 = arith.constant 0 : index
    %c0_8 = arith.constant 0 : index
    %12 = vector.load %arg4[%c0_7, %c0_8] : memref<48x64xf32, #tpu.memory_space<vmem>>, vector<48x64xf32>
    tpu.vector_store %arg4[%c0_7, %c0_8], %11 {strides = array<i32>} : memref<48x64xf32, #tpu.memory_space<vmem>>, vector<48x64xf32>,
    return
  }
  func.func @transform_0(%arg0: i32) -> (i32, i32) {
    %c0_i32 = arith.constant 0 : i32
    %c0_i32_0 = arith.constant 0 : i32
    return %arg0, %c0_i32 : i32, i32
  }
  func.func @transform_1(%arg0: i32) -> (i32, i32) {
    %c0_i32 = arith.constant 0 : i32
    %c0_i32_0 = arith.constant 0 : i32
    %c0_i32_1 = arith.constant 0 : i32
    return %c0_i32, %c0_i32_0 : i32, i32
  }
  func.func @transform_2(%arg0: i32) -> (i32, i32) {
    %c0_i32 = arith.constant 0 : i32
    %c0_i32_0 = arith.constant 0 : i32
    %c0_i32_1 = arith.constant 0 : i32
    return %c0_i32, %c0_i32_0 : i32, i32
  }
  func.func @transform_3(%arg0: i32) -> (i32, i32) {
    %c0_i32 = arith.constant 0 : i32
    %c0_i32_0 = arith.constant 0 : i32
    return %arg0, %c0_i32 : i32, i32
  }
}

module attributes {stable_mosaic.version = 11 : i64} {
  func.func @_lstm_seq_kernel(%arg0: i32, %arg1: memref<6x8x128xf32, #tpu.memory_space<vmem>>, %arg2: memref<32x128xf32, #tpu.memory_space<vmem>>, %arg3: memref<6x8x1xf32, #tpu.memory_space<vmem>>, %arg4: memref<1x8x32xf32, #tpu.memory_space<vmem>>, %arg5: memref<1x8x32xf32, #tpu.memory_space<vmem>>, %arg6: memref<6x8x32xf32, #tpu.memory_space<vmem>>, %arg7: memref<1x8x32xf32, #tpu.memory_space<vmem>>) attributes {dimension_semantics = [#tpu.dimension_semantics<arbitrary>], iteration_bounds = array<i64: 1>, scalar_prefetch = 0 : i64, scratch_operands = 0 : i64, tpu.core_type = #tpu.core_type<tc>, window_params = [{pipeline_mode = #tpu.pipeline_mode<synchronous>, transform_indices = @transform_0, window_bounds = array<i64: 6, 8, 128>}, {pipeline_mode = #tpu.pipeline_mode<synchronous>, transform_indices = @transform_1, window_bounds = array<i64: 32, 128>}, {pipeline_mode = #tpu.pipeline_mode<synchronous>, transform_indices = @transform_2, window_bounds = array<i64: 6, 8, 1>}, {pipeline_mode = #tpu.pipeline_mode<synchronous>, transform_indices = @transform_3, window_bounds = array<i64: 1, 8, 32>}, {pipeline_mode = #tpu.pipeline_mode<synchronous>, transform_indices = @transform_4, window_bounds = array<i64: 1, 8, 32>}, {pipeline_mode = #tpu.pipeline_mode<synchronous>, transform_indices = @transform_5, window_bounds = array<i64: 6, 8, 32>}, {pipeline_mode = #tpu.pipeline_mode<synchronous>, transform_indices = @transform_6, window_bounds = array<i64: 1, 8, 32>}]} {
    %c0 = arith.constant 0 : index
    %c0_0 = arith.constant 0 : index
    %0 = vector.load %arg2[%c0, %c0_0] : memref<32x128xf32, #tpu.memory_space<vmem>>, vector<32x128xf32>
    %c0_1 = arith.constant 0 : index
    %c0_2 = arith.constant 0 : index
    %c0_3 = arith.constant 0 : index
    %1 = vector.load %arg4[%c0_1, %c0_2, %c0_3] : memref<1x8x32xf32, #tpu.memory_space<vmem>>, vector<1x8x32xf32>
    %2 = vector.shape_cast %1 : vector<1x8x32xf32> to vector<8x32xf32>
    %c0_4 = arith.constant 0 : index
    %c0_5 = arith.constant 0 : index
    %c0_6 = arith.constant 0 : index
    %3 = vector.load %arg5[%c0_4, %c0_5, %c0_6] : memref<1x8x32xf32, #tpu.memory_space<vmem>>, vector<1x8x32xf32>
    %4 = vector.shape_cast %3 : vector<1x8x32xf32> to vector<8x32xf32>
    %c0_i32 = arith.constant 0 : i32
    %5 = arith.index_cast %c0_i32 : i32 to index
    %c0_7 = arith.constant 0 : index
    %c0_8 = arith.constant 0 : index
    %6 = vector.load %arg1[%5, %c0_7, %c0_8] : memref<6x8x128xf32, #tpu.memory_space<vmem>>, vector<1x8x128xf32>
    %7 = vector.shape_cast %6 : vector<1x8x128xf32> to vector<8x128xf32>
    %cst = arith.constant dense<0.000000e+00> : vector<8x128xf32>
    %8 = tpu.matmul %2, %0, %cst {dimension_numbers = #tpu.dot_dimension_numbers<[1], [0], [0], [1], [0, 0, 1, 1], [], []>} : vector<8x32xf32>, vector<32x128xf32>, vector<8x128xf32> -> vector<8x128xf32>
    %9 = arith.addf %7, %8 : vector<8x128xf32>
    %10 = vector.extract_strided_slice %9 {offsets = [0, 0], sizes = [8, 32], strides = [1, 1]} : vector<8x128xf32> to vector<8x32xf32>
    %11 = arith.negf %10 : vector<8x32xf32>
    %12 = math.exp %11 : vector<8x32xf32>
    %cst_9 = arith.constant 1.000000e+00 : f32
    %13 = vector.broadcast %cst_9 : f32 to vector<8x32xf32>
    %14 = arith.addf %13, %12 : vector<8x32xf32>
    %15 = arith.divf %13, %14 : vector<8x32xf32>
    %16 = vector.extract_strided_slice %9 {offsets = [0, 32], sizes = [8, 32], strides = [1, 1]} : vector<8x128xf32> to vector<8x32xf32>
    %17 = arith.negf %16 : vector<8x32xf32>
    %18 = math.exp %17 : vector<8x32xf32>
    %cst_10 = arith.constant 1.000000e+00 : f32
    %19 = vector.broadcast %cst_10 : f32 to vector<8x32xf32>
    %20 = arith.addf %19, %18 : vector<8x32xf32>
    %21 = arith.divf %19, %20 : vector<8x32xf32>
    %22 = vector.extract_strided_slice %9 {offsets = [0, 64], sizes = [8, 32], strides = [1, 1]} : vector<8x128xf32> to vector<8x32xf32>
    %23 = math.tanh %22 : vector<8x32xf32>
    %24 = vector.extract_strided_slice %9 {offsets = [0, 96], sizes = [8, 32], strides = [1, 1]} : vector<8x128xf32> to vector<8x32xf32>
    %25 = arith.negf %24 : vector<8x32xf32>
    %26 = math.exp %25 : vector<8x32xf32>
    %cst_11 = arith.constant 1.000000e+00 : f32
    %27 = vector.broadcast %cst_11 : f32 to vector<8x32xf32>
    %28 = arith.addf %27, %26 : vector<8x32xf32>
    %29 = arith.divf %27, %28 : vector<8x32xf32>
    %30 = arith.mulf %21, %4 : vector<8x32xf32>
    %31 = arith.mulf %15, %23 : vector<8x32xf32>
    %32 = arith.addf %30, %31 : vector<8x32xf32>
    %33 = math.tanh %32 : vector<8x32xf32>
    %34 = arith.mulf %29, %33 : vector<8x32xf32>
    %35 = arith.index_cast %c0_i32 : i32 to index
    %c0_12 = arith.constant 0 : index
    %c0_13 = arith.constant 0 : index
    %36 = vector.load %arg3[%35, %c0_12, %c0_13] : memref<6x8x1xf32, #tpu.memory_space<vmem>>, vector<1x8x1xf32>
    %37 = vector.shape_cast %36 : vector<1x8x1xf32> to vector<8x1xf32>
    %cst_14 = arith.constant 5.000000e-01 : f32
    %38 = vector.broadcast %cst_14 : f32 to vector<8x1xf32>
    %39 = arith.cmpf ogt, %37, %38 : vector<8x1xf32>
    %40 = vector.shape_cast %39 : vector<8x1xi1> to vector<8x1xi1>
    %41 = vector.broadcast %40 : vector<8x1xi1> to vector<8x32xi1>
    %42 = arith.select %41, %34, %2 : vector<8x32xi1>, vector<8x32xf32>
    %43 = vector.shape_cast %39 : vector<8x1xi1> to vector<8x1xi1>
    %44 = vector.broadcast %43 : vector<8x1xi1> to vector<8x32xi1>
    %45 = arith.select %44, %32, %4 : vector<8x32xi1>, vector<8x32xf32>
    %cst_15 = arith.constant 0.000000e+00 : f32
    %46 = vector.shape_cast %39 : vector<8x1xi1> to vector<8x1xi1>
    %47 = vector.broadcast %46 : vector<8x1xi1> to vector<8x32xi1>
    %48 = vector.broadcast %cst_15 : f32 to vector<8x32xf32>
    %49 = arith.select %47, %34, %48 : vector<8x32xi1>, vector<8x32xf32>
    %50 = arith.index_cast %c0_i32 : i32 to index
    %c0_16 = arith.constant 0 : index
    %c0_17 = arith.constant 0 : index
    %51 = vector.load %arg6[%50, %c0_16, %c0_17] : memref<6x8x32xf32, #tpu.memory_space<vmem>>, vector<1x8x32xf32>
    %52 = vector.shape_cast %51 : vector<1x8x32xf32> to vector<8x32xf32>
    %53 = vector.shape_cast %49 : vector<8x32xf32> to vector<1x8x32xf32>
    tpu.vector_store %arg6[%50, %c0_16, %c0_17], %53 {strides = array<i32>} : memref<6x8x32xf32, #tpu.memory_space<vmem>>, vector<1x8x32xf32>,
    %c1_i32 = arith.constant 1 : i32
    %54 = arith.index_cast %c1_i32 : i32 to index
    %c0_18 = arith.constant 0 : index
    %c0_19 = arith.constant 0 : index
    %55 = vector.load %arg1[%54, %c0_18, %c0_19] : memref<6x8x128xf32, #tpu.memory_space<vmem>>, vector<1x8x128xf32>
    %56 = vector.shape_cast %55 : vector<1x8x128xf32> to vector<8x128xf32>
    %cst_20 = arith.constant dense<0.000000e+00> : vector<8x128xf32>
    %57 = tpu.matmul %42, %0, %cst_20 {dimension_numbers = #tpu.dot_dimension_numbers<[1], [0], [0], [1], [0, 0, 1, 1], [], []>} : vector<8x32xf32>, vector<32x128xf32>, vector<8x128xf32> -> vector<8x128xf32>
    %58 = arith.addf %56, %57 : vector<8x128xf32>
    %59 = vector.extract_strided_slice %58 {offsets = [0, 0], sizes = [8, 32], strides = [1, 1]} : vector<8x128xf32> to vector<8x32xf32>
    %60 = arith.negf %59 : vector<8x32xf32>
    %61 = math.exp %60 : vector<8x32xf32>
    %cst_21 = arith.constant 1.000000e+00 : f32
    %62 = vector.broadcast %cst_21 : f32 to vector<8x32xf32>
    %63 = arith.addf %62, %61 : vector<8x32xf32>
    %64 = arith.divf %62, %63 : vector<8x32xf32>
    %65 = vector.extract_strided_slice %58 {offsets = [0, 32], sizes = [8, 32], strides = [1, 1]} : vector<8x128xf32> to vector<8x32xf32>
    %66 = arith.negf %65 : vector<8x32xf32>
    %67 = math.exp %66 : vector<8x32xf32>
    %cst_22 = arith.constant 1.000000e+00 : f32
    %68 = vector.broadcast %cst_22 : f32 to vector<8x32xf32>
    %69 = arith.addf %68, %67 : vector<8x32xf32>
    %70 = arith.divf %68, %69 : vector<8x32xf32>
    %71 = vector.extract_strided_slice %58 {offsets = [0, 64], sizes = [8, 32], strides = [1, 1]} : vector<8x128xf32> to vector<8x32xf32>
    %72 = math.tanh %71 : vector<8x32xf32>
    %73 = vector.extract_strided_slice %58 {offsets = [0, 96], sizes = [8, 32], strides = [1, 1]} : vector<8x128xf32> to vector<8x32xf32>
    %74 = arith.negf %73 : vector<8x32xf32>
    %75 = math.exp %74 : vector<8x32xf32>
    %cst_23 = arith.constant 1.000000e+00 : f32
    %76 = vector.broadcast %cst_23 : f32 to vector<8x32xf32>
    %77 = arith.addf %76, %75 : vector<8x32xf32>
    %78 = arith.divf %76, %77 : vector<8x32xf32>
    %79 = arith.mulf %70, %45 : vector<8x32xf32>
    %80 = arith.mulf %64, %72 : vector<8x32xf32>
    %81 = arith.addf %79, %80 : vector<8x32xf32>
    %82 = math.tanh %81 : vector<8x32xf32>
    %83 = arith.mulf %78, %82 : vector<8x32xf32>
    %84 = arith.index_cast %c1_i32 : i32 to index
    %c0_24 = arith.constant 0 : index
    %c0_25 = arith.constant 0 : index
    %85 = vector.load %arg3[%84, %c0_24, %c0_25] : memref<6x8x1xf32, #tpu.memory_space<vmem>>, vector<1x8x1xf32>
    %86 = vector.shape_cast %85 : vector<1x8x1xf32> to vector<8x1xf32>
    %cst_26 = arith.constant 5.000000e-01 : f32
    %87 = vector.broadcast %cst_26 : f32 to vector<8x1xf32>
    %88 = arith.cmpf ogt, %86, %87 : vector<8x1xf32>
    %89 = vector.shape_cast %88 : vector<8x1xi1> to vector<8x1xi1>
    %90 = vector.broadcast %89 : vector<8x1xi1> to vector<8x32xi1>
    %91 = arith.select %90, %83, %42 : vector<8x32xi1>, vector<8x32xf32>
    %92 = vector.shape_cast %88 : vector<8x1xi1> to vector<8x1xi1>
    %93 = vector.broadcast %92 : vector<8x1xi1> to vector<8x32xi1>
    %94 = arith.select %93, %81, %45 : vector<8x32xi1>, vector<8x32xf32>
    %cst_27 = arith.constant 0.000000e+00 : f32
    %95 = vector.shape_cast %88 : vector<8x1xi1> to vector<8x1xi1>
    %96 = vector.broadcast %95 : vector<8x1xi1> to vector<8x32xi1>
    %97 = vector.broadcast %cst_27 : f32 to vector<8x32xf32>
    %98 = arith.select %96, %83, %97 : vector<8x32xi1>, vector<8x32xf32>
    %99 = arith.index_cast %c1_i32 : i32 to index
    %c0_28 = arith.constant 0 : index
    %c0_29 = arith.constant 0 : index
    %100 = vector.load %arg6[%99, %c0_28, %c0_29] : memref<6x8x32xf32, #tpu.memory_space<vmem>>, vector<1x8x32xf32>
    %101 = vector.shape_cast %100 : vector<1x8x32xf32> to vector<8x32xf32>
    %102 = vector.shape_cast %98 : vector<8x32xf32> to vector<1x8x32xf32>
    tpu.vector_store %arg6[%99, %c0_28, %c0_29], %102 {strides = array<i32>} : memref<6x8x32xf32, #tpu.memory_space<vmem>>, vector<1x8x32xf32>,
    %c2_i32 = arith.constant 2 : i32
    %103 = arith.index_cast %c2_i32 : i32 to index
    %c0_30 = arith.constant 0 : index
    %c0_31 = arith.constant 0 : index
    %104 = vector.load %arg1[%103, %c0_30, %c0_31] : memref<6x8x128xf32, #tpu.memory_space<vmem>>, vector<1x8x128xf32>
    %105 = vector.shape_cast %104 : vector<1x8x128xf32> to vector<8x128xf32>
    %cst_32 = arith.constant dense<0.000000e+00> : vector<8x128xf32>
    %106 = tpu.matmul %91, %0, %cst_32 {dimension_numbers = #tpu.dot_dimension_numbers<[1], [0], [0], [1], [0, 0, 1, 1], [], []>} : vector<8x32xf32>, vector<32x128xf32>, vector<8x128xf32> -> vector<8x128xf32>
    %107 = arith.addf %105, %106 : vector<8x128xf32>
    %108 = vector.extract_strided_slice %107 {offsets = [0, 0], sizes = [8, 32], strides = [1, 1]} : vector<8x128xf32> to vector<8x32xf32>
    %109 = arith.negf %108 : vector<8x32xf32>
    %110 = math.exp %109 : vector<8x32xf32>
    %cst_33 = arith.constant 1.000000e+00 : f32
    %111 = vector.broadcast %cst_33 : f32 to vector<8x32xf32>
    %112 = arith.addf %111, %110 : vector<8x32xf32>
    %113 = arith.divf %111, %112 : vector<8x32xf32>
    %114 = vector.extract_strided_slice %107 {offsets = [0, 32], sizes = [8, 32], strides = [1, 1]} : vector<8x128xf32> to vector<8x32xf32>
    %115 = arith.negf %114 : vector<8x32xf32>
    %116 = math.exp %115 : vector<8x32xf32>
    %cst_34 = arith.constant 1.000000e+00 : f32
    %117 = vector.broadcast %cst_34 : f32 to vector<8x32xf32>
    %118 = arith.addf %117, %116 : vector<8x32xf32>
    %119 = arith.divf %117, %118 : vector<8x32xf32>
    %120 = vector.extract_strided_slice %107 {offsets = [0, 64], sizes = [8, 32], strides = [1, 1]} : vector<8x128xf32> to vector<8x32xf32>
    %121 = math.tanh %120 : vector<8x32xf32>
    %122 = vector.extract_strided_slice %107 {offsets = [0, 96], sizes = [8, 32], strides = [1, 1]} : vector<8x128xf32> to vector<8x32xf32>
    %123 = arith.negf %122 : vector<8x32xf32>
    %124 = math.exp %123 : vector<8x32xf32>
    %cst_35 = arith.constant 1.000000e+00 : f32
    %125 = vector.broadcast %cst_35 : f32 to vector<8x32xf32>
    %126 = arith.addf %125, %124 : vector<8x32xf32>
    %127 = arith.divf %125, %126 : vector<8x32xf32>
    %128 = arith.mulf %119, %94 : vector<8x32xf32>
    %129 = arith.mulf %113, %121 : vector<8x32xf32>
    %130 = arith.addf %128, %129 : vector<8x32xf32>
    %131 = math.tanh %130 : vector<8x32xf32>
    %132 = arith.mulf %127, %131 : vector<8x32xf32>
    %133 = arith.index_cast %c2_i32 : i32 to index
    %c0_36 = arith.constant 0 : index
    %c0_37 = arith.constant 0 : index
    %134 = vector.load %arg3[%133, %c0_36, %c0_37] : memref<6x8x1xf32, #tpu.memory_space<vmem>>, vector<1x8x1xf32>
    %135 = vector.shape_cast %134 : vector<1x8x1xf32> to vector<8x1xf32>
    %cst_38 = arith.constant 5.000000e-01 : f32
    %136 = vector.broadcast %cst_38 : f32 to vector<8x1xf32>
    %137 = arith.cmpf ogt, %135, %136 : vector<8x1xf32>
    %138 = vector.shape_cast %137 : vector<8x1xi1> to vector<8x1xi1>
    %139 = vector.broadcast %138 : vector<8x1xi1> to vector<8x32xi1>
    %140 = arith.select %139, %132, %91 : vector<8x32xi1>, vector<8x32xf32>
    %141 = vector.shape_cast %137 : vector<8x1xi1> to vector<8x1xi1>
    %142 = vector.broadcast %141 : vector<8x1xi1> to vector<8x32xi1>
    %143 = arith.select %142, %130, %94 : vector<8x32xi1>, vector<8x32xf32>
    %cst_39 = arith.constant 0.000000e+00 : f32
    %144 = vector.shape_cast %137 : vector<8x1xi1> to vector<8x1xi1>
    %145 = vector.broadcast %144 : vector<8x1xi1> to vector<8x32xi1>
    %146 = vector.broadcast %cst_39 : f32 to vector<8x32xf32>
    %147 = arith.select %145, %132, %146 : vector<8x32xi1>, vector<8x32xf32>
    %148 = arith.index_cast %c2_i32 : i32 to index
    %c0_40 = arith.constant 0 : index
    %c0_41 = arith.constant 0 : index
    %149 = vector.load %arg6[%148, %c0_40, %c0_41] : memref<6x8x32xf32, #tpu.memory_space<vmem>>, vector<1x8x32xf32>
    %150 = vector.shape_cast %149 : vector<1x8x32xf32> to vector<8x32xf32>
    %151 = vector.shape_cast %147 : vector<8x32xf32> to vector<1x8x32xf32>
    tpu.vector_store %arg6[%148, %c0_40, %c0_41], %151 {strides = array<i32>} : memref<6x8x32xf32, #tpu.memory_space<vmem>>, vector<1x8x32xf32>,
    %c3_i32 = arith.constant 3 : i32
    %152 = arith.index_cast %c3_i32 : i32 to index
    %c0_42 = arith.constant 0 : index
    %c0_43 = arith.constant 0 : index
    %153 = vector.load %arg1[%152, %c0_42, %c0_43] : memref<6x8x128xf32, #tpu.memory_space<vmem>>, vector<1x8x128xf32>
    %154 = vector.shape_cast %153 : vector<1x8x128xf32> to vector<8x128xf32>
    %cst_44 = arith.constant dense<0.000000e+00> : vector<8x128xf32>
    %155 = tpu.matmul %140, %0, %cst_44 {dimension_numbers = #tpu.dot_dimension_numbers<[1], [0], [0], [1], [0, 0, 1, 1], [], []>} : vector<8x32xf32>, vector<32x128xf32>, vector<8x128xf32> -> vector<8x128xf32>
    %156 = arith.addf %154, %155 : vector<8x128xf32>
    %157 = vector.extract_strided_slice %156 {offsets = [0, 0], sizes = [8, 32], strides = [1, 1]} : vector<8x128xf32> to vector<8x32xf32>
    %158 = arith.negf %157 : vector<8x32xf32>
    %159 = math.exp %158 : vector<8x32xf32>
    %cst_45 = arith.constant 1.000000e+00 : f32
    %160 = vector.broadcast %cst_45 : f32 to vector<8x32xf32>
    %161 = arith.addf %160, %159 : vector<8x32xf32>
    %162 = arith.divf %160, %161 : vector<8x32xf32>
    %163 = vector.extract_strided_slice %156 {offsets = [0, 32], sizes = [8, 32], strides = [1, 1]} : vector<8x128xf32> to vector<8x32xf32>
    %164 = arith.negf %163 : vector<8x32xf32>
    %165 = math.exp %164 : vector<8x32xf32>
    %cst_46 = arith.constant 1.000000e+00 : f32
    %166 = vector.broadcast %cst_46 : f32 to vector<8x32xf32>
    %167 = arith.addf %166, %165 : vector<8x32xf32>
    %168 = arith.divf %166, %167 : vector<8x32xf32>
    %169 = vector.extract_strided_slice %156 {offsets = [0, 64], sizes = [8, 32], strides = [1, 1]} : vector<8x128xf32> to vector<8x32xf32>
    %170 = math.tanh %169 : vector<8x32xf32>
    %171 = vector.extract_strided_slice %156 {offsets = [0, 96], sizes = [8, 32], strides = [1, 1]} : vector<8x128xf32> to vector<8x32xf32>
    %172 = arith.negf %171 : vector<8x32xf32>
    %173 = math.exp %172 : vector<8x32xf32>
    %cst_47 = arith.constant 1.000000e+00 : f32
    %174 = vector.broadcast %cst_47 : f32 to vector<8x32xf32>
    %175 = arith.addf %174, %173 : vector<8x32xf32>
    %176 = arith.divf %174, %175 : vector<8x32xf32>
    %177 = arith.mulf %168, %143 : vector<8x32xf32>
    %178 = arith.mulf %162, %170 : vector<8x32xf32>
    %179 = arith.addf %177, %178 : vector<8x32xf32>
    %180 = math.tanh %179 : vector<8x32xf32>
    %181 = arith.mulf %176, %180 : vector<8x32xf32>
    %182 = arith.index_cast %c3_i32 : i32 to index
    %c0_48 = arith.constant 0 : index
    %c0_49 = arith.constant 0 : index
    %183 = vector.load %arg3[%182, %c0_48, %c0_49] : memref<6x8x1xf32, #tpu.memory_space<vmem>>, vector<1x8x1xf32>
    %184 = vector.shape_cast %183 : vector<1x8x1xf32> to vector<8x1xf32>
    %cst_50 = arith.constant 5.000000e-01 : f32
    %185 = vector.broadcast %cst_50 : f32 to vector<8x1xf32>
    %186 = arith.cmpf ogt, %184, %185 : vector<8x1xf32>
    %187 = vector.shape_cast %186 : vector<8x1xi1> to vector<8x1xi1>
    %188 = vector.broadcast %187 : vector<8x1xi1> to vector<8x32xi1>
    %189 = arith.select %188, %181, %140 : vector<8x32xi1>, vector<8x32xf32>
    %190 = vector.shape_cast %186 : vector<8x1xi1> to vector<8x1xi1>
    %191 = vector.broadcast %190 : vector<8x1xi1> to vector<8x32xi1>
    %192 = arith.select %191, %179, %143 : vector<8x32xi1>, vector<8x32xf32>
    %cst_51 = arith.constant 0.000000e+00 : f32
    %193 = vector.shape_cast %186 : vector<8x1xi1> to vector<8x1xi1>
    %194 = vector.broadcast %193 : vector<8x1xi1> to vector<8x32xi1>
    %195 = vector.broadcast %cst_51 : f32 to vector<8x32xf32>
    %196 = arith.select %194, %181, %195 : vector<8x32xi1>, vector<8x32xf32>
    %197 = arith.index_cast %c3_i32 : i32 to index
    %c0_52 = arith.constant 0 : index
    %c0_53 = arith.constant 0 : index
    %198 = vector.load %arg6[%197, %c0_52, %c0_53] : memref<6x8x32xf32, #tpu.memory_space<vmem>>, vector<1x8x32xf32>
    %199 = vector.shape_cast %198 : vector<1x8x32xf32> to vector<8x32xf32>
    %200 = vector.shape_cast %196 : vector<8x32xf32> to vector<1x8x32xf32>
    tpu.vector_store %arg6[%197, %c0_52, %c0_53], %200 {strides = array<i32>} : memref<6x8x32xf32, #tpu.memory_space<vmem>>, vector<1x8x32xf32>,
    %c4_i32 = arith.constant 4 : i32
    %201 = arith.index_cast %c4_i32 : i32 to index
    %c0_54 = arith.constant 0 : index
    %c0_55 = arith.constant 0 : index
    %202 = vector.load %arg1[%201, %c0_54, %c0_55] : memref<6x8x128xf32, #tpu.memory_space<vmem>>, vector<1x8x128xf32>
    %203 = vector.shape_cast %202 : vector<1x8x128xf32> to vector<8x128xf32>
    %cst_56 = arith.constant dense<0.000000e+00> : vector<8x128xf32>
    %204 = tpu.matmul %189, %0, %cst_56 {dimension_numbers = #tpu.dot_dimension_numbers<[1], [0], [0], [1], [0, 0, 1, 1], [], []>} : vector<8x32xf32>, vector<32x128xf32>, vector<8x128xf32> -> vector<8x128xf32>
    %205 = arith.addf %203, %204 : vector<8x128xf32>
    %206 = vector.extract_strided_slice %205 {offsets = [0, 0], sizes = [8, 32], strides = [1, 1]} : vector<8x128xf32> to vector<8x32xf32>
    %207 = arith.negf %206 : vector<8x32xf32>
    %208 = math.exp %207 : vector<8x32xf32>
    %cst_57 = arith.constant 1.000000e+00 : f32
    %209 = vector.broadcast %cst_57 : f32 to vector<8x32xf32>
    %210 = arith.addf %209, %208 : vector<8x32xf32>
    %211 = arith.divf %209, %210 : vector<8x32xf32>
    %212 = vector.extract_strided_slice %205 {offsets = [0, 32], sizes = [8, 32], strides = [1, 1]} : vector<8x128xf32> to vector<8x32xf32>
    %213 = arith.negf %212 : vector<8x32xf32>
    %214 = math.exp %213 : vector<8x32xf32>
    %cst_58 = arith.constant 1.000000e+00 : f32
    %215 = vector.broadcast %cst_58 : f32 to vector<8x32xf32>
    %216 = arith.addf %215, %214 : vector<8x32xf32>
    %217 = arith.divf %215, %216 : vector<8x32xf32>
    %218 = vector.extract_strided_slice %205 {offsets = [0, 64], sizes = [8, 32], strides = [1, 1]} : vector<8x128xf32> to vector<8x32xf32>
    %219 = math.tanh %218 : vector<8x32xf32>
    %220 = vector.extract_strided_slice %205 {offsets = [0, 96], sizes = [8, 32], strides = [1, 1]} : vector<8x128xf32> to vector<8x32xf32>
    %221 = arith.negf %220 : vector<8x32xf32>
    %222 = math.exp %221 : vector<8x32xf32>
    %cst_59 = arith.constant 1.000000e+00 : f32
    %223 = vector.broadcast %cst_59 : f32 to vector<8x32xf32>
    %224 = arith.addf %223, %222 : vector<8x32xf32>
    %225 = arith.divf %223, %224 : vector<8x32xf32>
    %226 = arith.mulf %217, %192 : vector<8x32xf32>
    %227 = arith.mulf %211, %219 : vector<8x32xf32>
    %228 = arith.addf %226, %227 : vector<8x32xf32>
    %229 = math.tanh %228 : vector<8x32xf32>
    %230 = arith.mulf %225, %229 : vector<8x32xf32>
    %231 = arith.index_cast %c4_i32 : i32 to index
    %c0_60 = arith.constant 0 : index
    %c0_61 = arith.constant 0 : index
    %232 = vector.load %arg3[%231, %c0_60, %c0_61] : memref<6x8x1xf32, #tpu.memory_space<vmem>>, vector<1x8x1xf32>
    %233 = vector.shape_cast %232 : vector<1x8x1xf32> to vector<8x1xf32>
    %cst_62 = arith.constant 5.000000e-01 : f32
    %234 = vector.broadcast %cst_62 : f32 to vector<8x1xf32>
    %235 = arith.cmpf ogt, %233, %234 : vector<8x1xf32>
    %236 = vector.shape_cast %235 : vector<8x1xi1> to vector<8x1xi1>
    %237 = vector.broadcast %236 : vector<8x1xi1> to vector<8x32xi1>
    %238 = arith.select %237, %230, %189 : vector<8x32xi1>, vector<8x32xf32>
    %239 = vector.shape_cast %235 : vector<8x1xi1> to vector<8x1xi1>
    %240 = vector.broadcast %239 : vector<8x1xi1> to vector<8x32xi1>
    %241 = arith.select %240, %228, %192 : vector<8x32xi1>, vector<8x32xf32>
    %cst_63 = arith.constant 0.000000e+00 : f32
    %242 = vector.shape_cast %235 : vector<8x1xi1> to vector<8x1xi1>
    %243 = vector.broadcast %242 : vector<8x1xi1> to vector<8x32xi1>
    %244 = vector.broadcast %cst_63 : f32 to vector<8x32xf32>
    %245 = arith.select %243, %230, %244 : vector<8x32xi1>, vector<8x32xf32>
    %246 = arith.index_cast %c4_i32 : i32 to index
    %c0_64 = arith.constant 0 : index
    %c0_65 = arith.constant 0 : index
    %247 = vector.load %arg6[%246, %c0_64, %c0_65] : memref<6x8x32xf32, #tpu.memory_space<vmem>>, vector<1x8x32xf32>
    %248 = vector.shape_cast %247 : vector<1x8x32xf32> to vector<8x32xf32>
    %249 = vector.shape_cast %245 : vector<8x32xf32> to vector<1x8x32xf32>
    tpu.vector_store %arg6[%246, %c0_64, %c0_65], %249 {strides = array<i32>} : memref<6x8x32xf32, #tpu.memory_space<vmem>>, vector<1x8x32xf32>,
    %c5_i32 = arith.constant 5 : i32
    %250 = arith.index_cast %c5_i32 : i32 to index
    %c0_66 = arith.constant 0 : index
    %c0_67 = arith.constant 0 : index
    %251 = vector.load %arg1[%250, %c0_66, %c0_67] : memref<6x8x128xf32, #tpu.memory_space<vmem>>, vector<1x8x128xf32>
    %252 = vector.shape_cast %251 : vector<1x8x128xf32> to vector<8x128xf32>
    %cst_68 = arith.constant dense<0.000000e+00> : vector<8x128xf32>
    %253 = tpu.matmul %238, %0, %cst_68 {dimension_numbers = #tpu.dot_dimension_numbers<[1], [0], [0], [1], [0, 0, 1, 1], [], []>} : vector<8x32xf32>, vector<32x128xf32>, vector<8x128xf32> -> vector<8x128xf32>
    %254 = arith.addf %252, %253 : vector<8x128xf32>
    %255 = vector.extract_strided_slice %254 {offsets = [0, 0], sizes = [8, 32], strides = [1, 1]} : vector<8x128xf32> to vector<8x32xf32>
    %256 = arith.negf %255 : vector<8x32xf32>
    %257 = math.exp %256 : vector<8x32xf32>
    %cst_69 = arith.constant 1.000000e+00 : f32
    %258 = vector.broadcast %cst_69 : f32 to vector<8x32xf32>
    %259 = arith.addf %258, %257 : vector<8x32xf32>
    %260 = arith.divf %258, %259 : vector<8x32xf32>
    %261 = vector.extract_strided_slice %254 {offsets = [0, 32], sizes = [8, 32], strides = [1, 1]} : vector<8x128xf32> to vector<8x32xf32>
    %262 = arith.negf %261 : vector<8x32xf32>
    %263 = math.exp %262 : vector<8x32xf32>
    %cst_70 = arith.constant 1.000000e+00 : f32
    %264 = vector.broadcast %cst_70 : f32 to vector<8x32xf32>
    %265 = arith.addf %264, %263 : vector<8x32xf32>
    %266 = arith.divf %264, %265 : vector<8x32xf32>
    %267 = vector.extract_strided_slice %254 {offsets = [0, 64], sizes = [8, 32], strides = [1, 1]} : vector<8x128xf32> to vector<8x32xf32>
    %268 = math.tanh %267 : vector<8x32xf32>
    %269 = vector.extract_strided_slice %254 {offsets = [0, 96], sizes = [8, 32], strides = [1, 1]} : vector<8x128xf32> to vector<8x32xf32>
    %270 = arith.negf %269 : vector<8x32xf32>
    %271 = math.exp %270 : vector<8x32xf32>
    %cst_71 = arith.constant 1.000000e+00 : f32
    %272 = vector.broadcast %cst_71 : f32 to vector<8x32xf32>
    %273 = arith.addf %272, %271 : vector<8x32xf32>
    %274 = arith.divf %272, %273 : vector<8x32xf32>
    %275 = arith.mulf %266, %241 : vector<8x32xf32>
    %276 = arith.mulf %260, %268 : vector<8x32xf32>
    %277 = arith.addf %275, %276 : vector<8x32xf32>
    %278 = math.tanh %277 : vector<8x32xf32>
    %279 = arith.mulf %274, %278 : vector<8x32xf32>
    %280 = arith.index_cast %c5_i32 : i32 to index
    %c0_72 = arith.constant 0 : index
    %c0_73 = arith.constant 0 : index
    %281 = vector.load %arg3[%280, %c0_72, %c0_73] : memref<6x8x1xf32, #tpu.memory_space<vmem>>, vector<1x8x1xf32>
    %282 = vector.shape_cast %281 : vector<1x8x1xf32> to vector<8x1xf32>
    %cst_74 = arith.constant 5.000000e-01 : f32
    %283 = vector.broadcast %cst_74 : f32 to vector<8x1xf32>
    %284 = arith.cmpf ogt, %282, %283 : vector<8x1xf32>
    %285 = vector.shape_cast %284 : vector<8x1xi1> to vector<8x1xi1>
    %286 = vector.broadcast %285 : vector<8x1xi1> to vector<8x32xi1>
    %287 = arith.select %286, %279, %238 : vector<8x32xi1>, vector<8x32xf32>
    %288 = vector.shape_cast %284 : vector<8x1xi1> to vector<8x1xi1>
    %289 = vector.broadcast %288 : vector<8x1xi1> to vector<8x32xi1>
    %290 = arith.select %289, %277, %241 : vector<8x32xi1>, vector<8x32xf32>
    %cst_75 = arith.constant 0.000000e+00 : f32
    %291 = vector.shape_cast %284 : vector<8x1xi1> to vector<8x1xi1>
    %292 = vector.broadcast %291 : vector<8x1xi1> to vector<8x32xi1>
    %293 = vector.broadcast %cst_75 : f32 to vector<8x32xf32>
    %294 = arith.select %292, %279, %293 : vector<8x32xi1>, vector<8x32xf32>
    %295 = arith.index_cast %c5_i32 : i32 to index
    %c0_76 = arith.constant 0 : index
    %c0_77 = arith.constant 0 : index
    %296 = vector.load %arg6[%295, %c0_76, %c0_77] : memref<6x8x32xf32, #tpu.memory_space<vmem>>, vector<1x8x32xf32>
    %297 = vector.shape_cast %296 : vector<1x8x32xf32> to vector<8x32xf32>
    %298 = vector.shape_cast %294 : vector<8x32xf32> to vector<1x8x32xf32>
    tpu.vector_store %arg6[%295, %c0_76, %c0_77], %298 {strides = array<i32>} : memref<6x8x32xf32, #tpu.memory_space<vmem>>, vector<1x8x32xf32>,
    %c6_i32 = arith.constant 6 : i32
    %c0_78 = arith.constant 0 : index
    %c0_79 = arith.constant 0 : index
    %c0_80 = arith.constant 0 : index
    %299 = vector.load %arg7[%c0_78, %c0_79, %c0_80] : memref<1x8x32xf32, #tpu.memory_space<vmem>>, vector<1x8x32xf32>
    %300 = vector.shape_cast %299 : vector<1x8x32xf32> to vector<8x32xf32>
    %301 = vector.shape_cast %290 : vector<8x32xf32> to vector<1x8x32xf32>
    tpu.vector_store %arg7[%c0_78, %c0_79, %c0_80], %301 {strides = array<i32>} : memref<1x8x32xf32, #tpu.memory_space<vmem>>, vector<1x8x32xf32>,
    return
  }
  func.func @transform_0(%arg0: i32) -> (i32, i32, i32) {
    %c0_i32 = arith.constant 0 : i32
    %c0_i32_0 = arith.constant 0 : i32
    %c0_i32_1 = arith.constant 0 : i32
    %c0_i32_2 = arith.constant 0 : i32
    return %c0_i32, %c0_i32_0, %c0_i32_1 : i32, i32, i32
  }
  func.func @transform_1(%arg0: i32) -> (i32, i32) {
    %c0_i32 = arith.constant 0 : i32
    %c0_i32_0 = arith.constant 0 : i32
    %c0_i32_1 = arith.constant 0 : i32
    return %c0_i32, %c0_i32_0 : i32, i32
  }
  func.func @transform_2(%arg0: i32) -> (i32, i32, i32) {
    %c0_i32 = arith.constant 0 : i32
    %c0_i32_0 = arith.constant 0 : i32
    %c0_i32_1 = arith.constant 0 : i32
    %c0_i32_2 = arith.constant 0 : i32
    return %c0_i32, %c0_i32_0, %c0_i32_1 : i32, i32, i32
  }
  func.func @transform_3(%arg0: i32) -> (i32, i32, i32) {
    %c0_i32 = arith.constant 0 : i32
    %c0_i32_0 = arith.constant 0 : i32
    %c0_i32_1 = arith.constant 0 : i32
    %c0_i32_2 = arith.constant 0 : i32
    return %c0_i32, %c0_i32_0, %c0_i32_1 : i32, i32, i32
  }
  func.func @transform_4(%arg0: i32) -> (i32, i32, i32) {
    %c0_i32 = arith.constant 0 : i32
    %c0_i32_0 = arith.constant 0 : i32
    %c0_i32_1 = arith.constant 0 : i32
    %c0_i32_2 = arith.constant 0 : i32
    return %c0_i32, %c0_i32_0, %c0_i32_1 : i32, i32, i32
  }
  func.func @transform_5(%arg0: i32) -> (i32, i32, i32) {
    %c0_i32 = arith.constant 0 : i32
    %c0_i32_0 = arith.constant 0 : i32
    %c0_i32_1 = arith.constant 0 : i32
    %c0_i32_2 = arith.constant 0 : i32
    return %c0_i32, %c0_i32_0, %c0_i32_1 : i32, i32, i32
  }
  func.func @transform_6(%arg0: i32) -> (i32, i32, i32) {
    %c0_i32 = arith.constant 0 : i32
    %c0_i32_0 = arith.constant 0 : i32
    %c0_i32_1 = arith.constant 0 : i32
    %c0_i32_2 = arith.constant 0 : i32
    return %c0_i32, %c0_i32_0, %c0_i32_1 : i32, i32, i32
  }
}

module attributes {stable_mosaic.version = 11 : i64} {
  func.func @_linear_kernel(%arg0: i32, %arg1: memref<16x32xf32, #tpu.memory_space<vmem>>, %arg2: memref<32x33xf32, #tpu.memory_space<vmem>>, %arg3: memref<1x33xf32, #tpu.memory_space<vmem>>, %arg4: memref<16x33xf32, #tpu.memory_space<vmem>>) attributes {dimension_semantics = [#tpu.dimension_semantics<parallel>], iteration_bounds = array<i64: 1>, scalar_prefetch = 0 : i64, scratch_operands = 0 : i64, tpu.core_type = #tpu.core_type<tc>, window_params = [{transform_indices = @transform_0, window_bounds = array<i64: 16, 32>}, {pipeline_mode = #tpu.pipeline_mode<synchronous>, transform_indices = @transform_1, window_bounds = array<i64: 32, 33>}, {pipeline_mode = #tpu.pipeline_mode<synchronous>, transform_indices = @transform_2, window_bounds = array<i64: 1, 33>}, {transform_indices = @transform_3, window_bounds = array<i64: 16, 33>}]} {
    %c0 = arith.constant 0 : index
    %c0_0 = arith.constant 0 : index
    %0 = vector.load %arg1[%c0, %c0_0] : memref<16x32xf32, #tpu.memory_space<vmem>>, vector<16x32xf32>
    %c0_1 = arith.constant 0 : index
    %c0_2 = arith.constant 0 : index
    %1 = vector.load %arg2[%c0_1, %c0_2] : memref<32x33xf32, #tpu.memory_space<vmem>>, vector<32x33xf32>
    %cst = arith.constant dense<0.000000e+00> : vector<16x33xf32>
    %2 = tpu.matmul %0, %1, %cst {dimension_numbers = #tpu.dot_dimension_numbers<[1], [0], [0], [1], [0, 0, 1, 1], [], []>} : vector<16x32xf32>, vector<32x33xf32>, vector<16x33xf32> -> vector<16x33xf32>
    %c0_3 = arith.constant 0 : index
    %c0_4 = arith.constant 0 : index
    %3 = vector.load %arg3[%c0_3, %c0_4] : memref<1x33xf32, #tpu.memory_space<vmem>>, vector<1x33xf32>
    %4 = vector.broadcast %3 : vector<1x33xf32> to vector<16x33xf32>
    %5 = arith.addf %2, %4 : vector<16x33xf32>
    %c0_5 = arith.constant 0 : index
    %c0_6 = arith.constant 0 : index
    %6 = vector.load %arg4[%c0_5, %c0_6] : memref<16x33xf32, #tpu.memory_space<vmem>>, vector<16x33xf32>
    tpu.vector_store %arg4[%c0_5, %c0_6], %5 {strides = array<i32>} : memref<16x33xf32, #tpu.memory_space<vmem>>, vector<16x33xf32>,
    return
  }
  func.func @transform_0(%arg0: i32) -> (i32, i32) {
    %c0_i32 = arith.constant 0 : i32
    %c0_i32_0 = arith.constant 0 : i32
    return %arg0, %c0_i32 : i32, i32
  }
  func.func @transform_1(%arg0: i32) -> (i32, i32) {
    %c0_i32 = arith.constant 0 : i32
    %c0_i32_0 = arith.constant 0 : i32
    %c0_i32_1 = arith.constant 0 : i32
    return %c0_i32, %c0_i32_0 : i32, i32
  }
  func.func @transform_2(%arg0: i32) -> (i32, i32) {
    %c0_i32 = arith.constant 0 : i32
    %c0_i32_0 = arith.constant 0 : i32
    %c0_i32_1 = arith.constant 0 : i32
    return %c0_i32, %c0_i32_0 : i32, i32
  }
  func.func @transform_3(%arg0: i32) -> (i32, i32) {
    %c0_i32 = arith.constant 0 : i32
    %c0_i32_0 = arith.constant 0 : i32
    return %arg0, %c0_i32 : i32, i32
  }
}

module attributes {stable_mosaic.version = 11 : i64} {
  func.func @_biatt_kernel(%arg0: i32, %arg1: memref<2x6x32xf32, #tpu.memory_space<vmem>>, %arg2: memref<2x7x32xf32, #tpu.memory_space<vmem>>, %arg3: memref<2x6x1xf32, #tpu.memory_space<vmem>>, %arg4: memref<2x1x7xf32, #tpu.memory_space<vmem>>, %arg5: memref<2x6x1xf32, #tpu.memory_space<vmem>>, %arg6: memref<2x1x7xf32, #tpu.memory_space<vmem>>, %arg7: memref<2x6x7xf32, #tpu.memory_space<vmem>>) attributes {dimension_semantics = [#tpu.dimension_semantics<parallel>], iteration_bounds = array<i64: 1>, scalar_prefetch = 0 : i64, scratch_operands = 0 : i64, tpu.core_type = #tpu.core_type<tc>, window_params = [{transform_indices = @transform_0, window_bounds = array<i64: 2, 6, 32>}, {transform_indices = @transform_1, window_bounds = array<i64: 2, 7, 32>}, {transform_indices = @transform_2, window_bounds = array<i64: 2, 6, 1>}, {transform_indices = @transform_3, window_bounds = array<i64: 2, 1, 7>}, {transform_indices = @transform_4, window_bounds = array<i64: 2, 6, 1>}, {transform_indices = @transform_5, window_bounds = array<i64: 2, 1, 7>}, {transform_indices = @transform_6, window_bounds = array<i64: 2, 6, 7>}]} {
    %c0 = arith.constant 0 : index
    %c0_0 = arith.constant 0 : index
    %c0_1 = arith.constant 0 : index
    %0 = vector.load %arg1[%c0, %c0_0, %c0_1] : memref<2x6x32xf32, #tpu.memory_space<vmem>>, vector<2x6x32xf32>
    %c0_2 = arith.constant 0 : index
    %c0_3 = arith.constant 0 : index
    %c0_4 = arith.constant 0 : index
    %1 = vector.load %arg2[%c0_2, %c0_3, %c0_4] : memref<2x7x32xf32, #tpu.memory_space<vmem>>, vector<2x7x32xf32>
    "tpu.trace_start"() <{level = 10 : i32, message = "bqa,bka->bqk"}> : () -> ()
    %cst = arith.constant dense<0.000000e+00> : vector<2x6x7xf32>
    %2 = tpu.matmul %0, %1, %cst {dimension_numbers = #tpu.dot_dimension_numbers<[2], [2], [1], [1], [0, 0, 0, 1, 1, 1], [0], [0]>} : vector<2x6x32xf32>, vector<2x7x32xf32>, vector<2x6x7xf32> -> vector<2x6x7xf32>
    "tpu.trace_stop"() : () -> ()
    %c0_5 = arith.constant 0 : index
    %c0_6 = arith.constant 0 : index
    %c0_7 = arith.constant 0 : index
    %3 = vector.load %arg3[%c0_5, %c0_6, %c0_7] : memref<2x6x1xf32, #tpu.memory_space<vmem>>, vector<2x6x1xf32>
    %4 = vector.broadcast %3 : vector<2x6x1xf32> to vector<2x6x7xf32>
    %5 = arith.addf %2, %4 : vector<2x6x7xf32>
    %c0_8 = arith.constant 0 : index
    %c0_9 = arith.constant 0 : index
    %c0_10 = arith.constant 0 : index
    %6 = vector.load %arg4[%c0_8, %c0_9, %c0_10] : memref<2x1x7xf32, #tpu.memory_space<vmem>>, vector<2x1x7xf32>
    %7 = vector.broadcast %6 : vector<2x1x7xf32> to vector<2x6x7xf32>
    %8 = arith.addf %5, %7 : vector<2x6x7xf32>
    %c0_11 = arith.constant 0 : index
    %c0_12 = arith.constant 0 : index
    %c0_13 = arith.constant 0 : index
    %9 = vector.load %arg5[%c0_11, %c0_12, %c0_13] : memref<2x6x1xf32, #tpu.memory_space<vmem>>, vector<2x6x1xf32>
    %c0_14 = arith.constant 0 : index
    %c0_15 = arith.constant 0 : index
    %c0_16 = arith.constant 0 : index
    %10 = vector.load %arg6[%c0_14, %c0_15, %c0_16] : memref<2x1x7xf32, #tpu.memory_space<vmem>>, vector<2x1x7xf32>
    %11 = vector.broadcast %9 : vector<2x6x1xf32> to vector<2x6x7xf32>
    %12 = vector.broadcast %10 : vector<2x1x7xf32> to vector<2x6x7xf32>
    %13 = arith.mulf %11, %12 : vector<2x6x7xf32>
    %14 = arith.mulf %8, %13 : vector<2x6x7xf32>
    %c0_17 = arith.constant 0 : index
    %c0_18 = arith.constant 0 : index
    %c0_19 = arith.constant 0 : index
    %15 = vector.load %arg7[%c0_17, %c0_18, %c0_19] : memref<2x6x7xf32, #tpu.memory_space<vmem>>, vector<2x6x7xf32>
    tpu.vector_store %arg7[%c0_17, %c0_18, %c0_19], %14 {strides = array<i32>} : memref<2x6x7xf32, #tpu.memory_space<vmem>>, vector<2x6x7xf32>,
    return
  }
  func.func @transform_0(%arg0: i32) -> (i32, i32, i32) {
    %c0_i32 = arith.constant 0 : i32
    %c0_i32_0 = arith.constant 0 : i32
    %c0_i32_1 = arith.constant 0 : i32
    return %arg0, %c0_i32, %c0_i32_0 : i32, i32, i32
  }
  func.func @transform_1(%arg0: i32) -> (i32, i32, i32) {
    %c0_i32 = arith.constant 0 : i32
    %c0_i32_0 = arith.constant 0 : i32
    %c0_i32_1 = arith.constant 0 : i32
    return %arg0, %c0_i32, %c0_i32_0 : i32, i32, i32
  }
  func.func @transform_2(%arg0: i32) -> (i32, i32, i32) {
    %c0_i32 = arith.constant 0 : i32
    %c0_i32_0 = arith.constant 0 : i32
    %c0_i32_1 = arith.constant 0 : i32
    return %arg0, %c0_i32, %c0_i32_0 : i32, i32, i32
  }
  func.func @transform_3(%arg0: i32) -> (i32, i32, i32) {
    %c0_i32 = arith.constant 0 : i32
    %c0_i32_0 = arith.constant 0 : i32
    %c0_i32_1 = arith.constant 0 : i32
    return %arg0, %c0_i32, %c0_i32_0 : i32, i32, i32
  }
  func.func @transform_4(%arg0: i32) -> (i32, i32, i32) {
    %c0_i32 = arith.constant 0 : i32
    %c0_i32_0 = arith.constant 0 : i32
    %c0_i32_1 = arith.constant 0 : i32
    return %arg0, %c0_i32, %c0_i32_0 : i32, i32, i32
  }
  func.func @transform_5(%arg0: i32) -> (i32, i32, i32) {
    %c0_i32 = arith.constant 0 : i32
    %c0_i32_0 = arith.constant 0 : i32
    %c0_i32_1 = arith.constant 0 : i32
    return %arg0, %c0_i32, %c0_i32_0 : i32, i32, i32
  }
  func.func @transform_6(%arg0: i32) -> (i32, i32, i32) {
    %c0_i32 = arith.constant 0 : i32
    %c0_i32_0 = arith.constant 0 : i32
    %c0_i32_1 = arith.constant 0 : i32
    return %arg0, %c0_i32, %c0_i32_0 : i32, i32, i32
  }
}

module attributes {stable_mosaic.version = 11 : i64} {
  func.func @_bilinear_kernel(%arg0: i32, %arg1: memref<16x32xf32, #tpu.memory_space<vmem>>, %arg2: memref<16x32xf32, #tpu.memory_space<vmem>>, %arg3: memref<32x1216xf32, #tpu.memory_space<vmem>>, %arg4: memref<1216x38xf32, #tpu.memory_space<vmem>>, %arg5: memref<32x38xf32, #tpu.memory_space<vmem>>, %arg6: memref<32x38xf32, #tpu.memory_space<vmem>>, %arg7: memref<1x38xf32, #tpu.memory_space<vmem>>, %arg8: memref<16x38xf32, #tpu.memory_space<vmem>>) attributes {dimension_semantics = [#tpu.dimension_semantics<parallel>], iteration_bounds = array<i64: 1>, scalar_prefetch = 0 : i64, scratch_operands = 0 : i64, tpu.core_type = #tpu.core_type<tc>, window_params = [{transform_indices = @transform_0, window_bounds = array<i64: 16, 32>}, {transform_indices = @transform_1, window_bounds = array<i64: 16, 32>}, {pipeline_mode = #tpu.pipeline_mode<synchronous>, transform_indices = @transform_2, window_bounds = array<i64: 32, 1216>}, {pipeline_mode = #tpu.pipeline_mode<synchronous>, transform_indices = @transform_3, window_bounds = array<i64: 1216, 38>}, {pipeline_mode = #tpu.pipeline_mode<synchronous>, transform_indices = @transform_4, window_bounds = array<i64: 32, 38>}, {pipeline_mode = #tpu.pipeline_mode<synchronous>, transform_indices = @transform_5, window_bounds = array<i64: 32, 38>}, {pipeline_mode = #tpu.pipeline_mode<synchronous>, transform_indices = @transform_6, window_bounds = array<i64: 1, 38>}, {transform_indices = @transform_7, window_bounds = array<i64: 16, 38>}]} {
    %c0 = arith.constant 0 : index
    %c0_0 = arith.constant 0 : index
    %0 = vector.load %arg1[%c0, %c0_0] : memref<16x32xf32, #tpu.memory_space<vmem>>, vector<16x32xf32>
    %c0_1 = arith.constant 0 : index
    %c0_2 = arith.constant 0 : index
    %1 = vector.load %arg2[%c0_1, %c0_2] : memref<16x32xf32, #tpu.memory_space<vmem>>, vector<16x32xf32>
    %c0_3 = arith.constant 0 : index
    %c0_4 = arith.constant 0 : index
    %2 = vector.load %arg3[%c0_3, %c0_4] : memref<32x1216xf32, #tpu.memory_space<vmem>>, vector<32x1216xf32>
    %cst = arith.constant dense<0.000000e+00> : vector<16x1216xf32>
    %3 = tpu.matmul %1, %2, %cst {dimension_numbers = #tpu.dot_dimension_numbers<[1], [0], [0], [1], [0, 0, 1, 1], [], []>} : vector<16x32xf32>, vector<32x1216xf32>, vector<16x1216xf32> -> vector<16x1216xf32>
    %4 = tpu.concatenate %0, %0, %0, %0, %0, %0, %0, %0, %0, %0, %0, %0, %0, %0, %0, %0 in 1 : vector<16x32xf32>, vector<16x32xf32>, vector<16x32xf32>, vector<16x32xf32>, vector<16x32xf32>, vector<16x32xf32>, vector<16x32xf32>, vector<16x32xf32>, vector<16x32xf32>, vector<16x32xf32>, vector<16x32xf32>, vector<16x32xf32>, vector<16x32xf32>, vector<16x32xf32>, vector<16x32xf32>, vector<16x32xf32> -> vector<16x512xf32>
    %5 = tpu.concatenate %0, %0, %0, %0, %0, %0, %0, %0, %0, %0, %0, %0, %0, %0, %0, %0 in 1 : vector<16x32xf32>, vector<16x32xf32>, vector<16x32xf32>, vector<16x32xf32>, vector<16x32xf32>, vector<16x32xf32>, vector<16x32xf32>, vector<16x32xf32>, vector<16x32xf32>, vector<16x32xf32>, vector<16x32xf32>, vector<16x32xf32>, vector<16x32xf32>, vector<16x32xf32>, vector<16x32xf32>, vector<16x32xf32> -> vector<16x512xf32>
    %6 = tpu.concatenate %0, %0, %0, %0, %0, %0 in 1 : vector<16x32xf32>, vector<16x32xf32>, vector<16x32xf32>, vector<16x32xf32>, vector<16x32xf32>, vector<16x32xf32> -> vector<16x192xf32>
    %7 = tpu.concatenate %4, %5, %6 in 1 : vector<16x512xf32>, vector<16x512xf32>, vector<16x192xf32> -> vector<16x1216xf32>
    %8 = arith.mulf %3, %7 : vector<16x1216xf32>
    %c0_5 = arith.constant 0 : index
    %c0_6 = arith.constant 0 : index
    %9 = vector.load %arg4[%c0_5, %c0_6] : memref<1216x38xf32, #tpu.memory_space<vmem>>, vector<1216x38xf32>
    %cst_7 = arith.constant dense<0.000000e+00> : vector<16x38xf32>
    %10 = tpu.matmul %8, %9, %cst_7 {dimension_numbers = #tpu.dot_dimension_numbers<[1], [0], [0], [1], [0, 0, 1, 1], [], []>} : vector<16x1216xf32>, vector<1216x38xf32>, vector<16x38xf32> -> vector<16x38xf32>
    %c0_8 = arith.constant 0 : index
    %c0_9 = arith.constant 0 : index
    %11 = vector.load %arg5[%c0_8, %c0_9] : memref<32x38xf32, #tpu.memory_space<vmem>>, vector<32x38xf32>
    %cst_10 = arith.constant dense<0.000000e+00> : vector<16x38xf32>
    %12 = tpu.matmul %0, %11, %cst_10 {dimension_numbers = #tpu.dot_dimension_numbers<[1], [0], [0], [1], [0, 0, 1, 1], [], []>} : vector<16x32xf32>, vector<32x38xf32>, vector<16x38xf32> -> vector<16x38xf32>
    %13 = arith.addf %10, %12 : vector<16x38xf32>
    %c0_11 = arith.constant 0 : index
    %c0_12 = arith.constant 0 : index
    %14 = vector.load %arg6[%c0_11, %c0_12] : memref<32x38xf32, #tpu.memory_space<vmem>>, vector<32x38xf32>
    %cst_13 = arith.constant dense<0.000000e+00> : vector<16x38xf32>
    %15 = tpu.matmul %1, %14, %cst_13 {dimension_numbers = #tpu.dot_dimension_numbers<[1], [0], [0], [1], [0, 0, 1, 1], [], []>} : vector<16x32xf32>, vector<32x38xf32>, vector<16x38xf32> -> vector<16x38xf32>
    %16 = arith.addf %13, %15 : vector<16x38xf32>
    %c0_14 = arith.constant 0 : index
    %c0_15 = arith.constant 0 : index
    %17 = vector.load %arg7[%c0_14, %c0_15] : memref<1x38xf32, #tpu.memory_space<vmem>>, vector<1x38xf32>
    %18 = vector.broadcast %17 : vector<1x38xf32> to vector<16x38xf32>
    %19 = arith.addf %16, %18 : vector<16x38xf32>
    %c0_16 = arith.constant 0 : index
    %c0_17 = arith.constant 0 : index
    %20 = vector.load %arg8[%c0_16, %c0_17] : memref<16x38xf32, #tpu.memory_space<vmem>>, vector<16x38xf32>
    tpu.vector_store %arg8[%c0_16, %c0_17], %19 {strides = array<i32>} : memref<16x38xf32, #tpu.memory_space<vmem>>, vector<16x38xf32>,
    return
  }
  func.func @transform_0(%arg0: i32) -> (i32, i32) {
    %c0_i32 = arith.constant 0 : i32
    %c0_i32_0 = arith.constant 0 : i32
    return %arg0, %c0_i32 : i32, i32
  }
  func.func @transform_1(%arg0: i32) -> (i32, i32) {
    %c0_i32 = arith.constant 0 : i32
    %c0_i32_0 = arith.constant 0 : i32
    return %arg0, %c0_i32 : i32, i32
  }
  func.func @transform_2(%arg0: i32) -> (i32, i32) {
    %c0_i32 = arith.constant 0 : i32
    %c0_i32_0 = arith.constant 0 : i32
    %c0_i32_1 = arith.constant 0 : i32
    return %c0_i32, %c0_i32_0 : i32, i32
  }
  func.func @transform_3(%arg0: i32) -> (i32, i32) {
    %c0_i32 = arith.constant 0 : i32
    %c0_i32_0 = arith.constant 0 : i32
    %c0_i32_1 = arith.constant 0 : i32
    return %c0_i32, %c0_i32_0 : i32, i32
  }
  func.func @transform_4(%arg0: i32) -> (i32, i32) {
    %c0_i32 = arith.constant 0 : i32
    %c0_i32_0 = arith.constant 0 : i32
    %c0_i32_1 = arith.constant 0 : i32
    return %c0_i32, %c0_i32_0 : i32, i32
  }
  func.func @transform_5(%arg0: i32) -> (i32, i32) {
    %c0_i32 = arith.constant 0 : i32
    %c0_i32_0 = arith.constant 0 : i32
    %c0_i32_1 = arith.constant 0 : i32
    return %c0_i32, %c0_i32_0 : i32, i32
  }
  func.func @transform_6(%arg0: i32) -> (i32, i32) {
    %c0_i32 = arith.constant 0 : i32
    %c0_i32_0 = arith.constant 0 : i32
    %c0_i32_1 = arith.constant 0 : i32
    return %c0_i32, %c0_i32_0 : i32, i32
  }
  func.func @transform_7(%arg0: i32) -> (i32, i32) {
    %c0_i32 = arith.constant 0 : i32
    %c0_i32_0 = arith.constant 0 : i32
    return %arg0, %c0_i32 : i32, i32
  }
}

</mosaic_0001>

<bundles_post_ra>
// kernel: dp_lstm_forward.15
= control target key start
LH: loop header
LB: loop body
LE: loop exit
PB: predicated region body
PF: predicated region fallthrough
CT: control target
= control target key end

     0   :  { %vm43_vm0 = vcmask 523264   ;;  %s337_s1 = inlined_call_operand.vmem [shape: f32[64,256], index: 1, kind: input, shape index: {}]   ;;  %s338_s0 = inlined_call_operand.vmem [shape: f32[56,64], index: 0, kind: input, shape index: {}]   ;;  %s339_s2 = inlined_call_operand.vmem [shape: f32[1,256], index: 2, kind: input, shape index: {}]   ;;  %s340_s3 = inlined_call_operand.vmem [shape: f32[56,256], index: 3, kind: output, shape index: {}]  }
   0x1   :  { %v35_v0 = vld [vmem:[%s337_s1 + $0x70] sm:$0xff]  ;;  %v33_v1 = vld [vmem:[%s337_s1 + $0x60] sm:$0xff]  ;;  %v36_v2 = vld [vmem:[%s337_s1 + $0x78] sm:$0xff] }
   0x2   :  { %173 = vmatpush.msra.mxu2 %v35_v0  ;;  %73 = vmatpush.msra.mxu0 %v35_v0  ;;  %v31_v3 = vld [vmem:[%s337_s1 + $0x50] sm:$0xff]  ;;  %v34_v4 = vld [vmem:[%s337_s1 + $0x68] sm:$0xff]  ;;  %v32_v5 = vld [vmem:[%s337_s1 + $0x58] sm:$0xff] }
   0x3   :  { %111 = vmatpush.msra.mxu1 %v36_v2  ;;  %181 = vmatpush.msra.mxu3 %v36_v2  ;;  %v29_v6 = vld [vmem:[%s337_s1 + $0x40] sm:$0xff]  ;;  %v30_v7 = vld [vmem:[%s337_s1 + $0x48] sm:$0xff]  ;;  %v27_v8 = vld [vmem:[%s337_s1 + $0x30] sm:$0xff] }
   0x4   :  { %174 = vmatpush.msra.mxu2 %v33_v1  ;;  %74 = vmatpush.msra.mxu0 %v33_v1  ;;  %v28_v9 = vld [vmem:[%s337_s1 + $0x38] sm:$0xff]  ;;  %v25_v10 = vld [vmem:[%s337_s1 + $0x20] sm:$0xff]  ;;  %v26_v11 = vld [vmem:[%s337_s1 + $0x28] sm:$0xff] }
   0x5   :  { %112 = vmatpush.msra.mxu1 %v34_v4  ;;  %182 = vmatpush.msra.mxu3 %v34_v4  ;;  %v23_v12 = vld [vmem:[%s337_s1 + $0x10] sm:$0xff]  ;;  %v24_v13 = vld [vmem:[%s337_s1 + $0x18] sm:$0xff]  ;;  %v21_v14 = vld [vmem:[%s337_s1] sm:$0xff] }
   0x6   :  { %175 = vmatpush.msra.mxu2 %v31_v3  ;;  %75 = vmatpush.msra.mxu0 %v31_v3  ;;  %v17_v15 = vld [vmem:[%s338_s0 + $0x18] sm:$0xff]  ;;  %v22_v16 = vld [vmem:[%s337_s1 + $0x8] sm:$0xff]  ;;  %v14_v17 = vld [vmem:[%s338_s0] sm:$0xff] }
   0x7   :  { %113 = vmatpush.msra.mxu1 %v32_v5  ;;  %183 = vmatpush.msra.mxu3 %v32_v5  ;;  %v18_v18 = vld [vmem:[%s338_s0 + $0x20] sm:$0xff]  ;;  %v15_v19 = vld [vmem:[%s338_s0 + $0x8] sm:$0xff]  ;;  %v16_v21 = vld [vmem:[%s338_s0 + $0x10] sm:$0xff] }
   0x8   :  { %176 = vmatpush.msra.mxu2 %v29_v6  ;;  %76 = vmatpush.msra.mxu0 %v29_v6  ;;  %v19_v20 = vld [vmem:[%s338_s0 + $0x28] sm:$0xff]  ;;  %v20_v22 = vld [vmem:[%s338_s0 + $0x30] sm:$0xff]  ;;  %v37_v23 = vld [vmem:[%s339_s2] sm:$0x3] }
   0x9   :  { %114 = vmatpush.msra.mxu1 %v30_v7  ;;  %184 = vmatpush.msra.mxu3 %v30_v7  ;;  %v40_v24 = vperm.slane %v37_v23, 1  ;;  %v39_v25 = vperm.slane %v37_v23, 0 }
   0xa   :  { %177 = vmatpush.msra.mxu2 %v27_v8  ;;  %77 = vmatpush.msra.mxu0 %v27_v8 }
   0xb   :  { %115 = vmatpush.msra.mxu1 %v28_v9  ;;  %185 = vmatpush.msra.mxu3 %v28_v9 }
   0xc   :  { %178 = vmatpush.msra.mxu2 %v25_v10  ;;  %78 = vmatpush.msra.mxu0 %v25_v10 }
   0xd   :  { %116 = vmatpush.msra.mxu1 %v26_v11  ;;  %186 = vmatpush.msra.mxu3 %v26_v11 }
   0xe   :  { %179 = vmatpush.msra.mxu2 %v23_v12  ;;  %79 = vmatpush.msra.mxu0 %v23_v12 }
   0xf   :  { %117 = vmatpush.msra.mxu1 %v24_v13  ;;  %187 = vmatpush.msra.mxu3 %v24_v13 }
  0x10   :  { %180 = vmatpush.msra.mxu2 %v21_v14  ;;  %80 = vmatpush.msra.mxu0 %v21_v14 }
  0x11   :  { %162 = vmatmul.msk.f32.vlgmr.msra.gmra.mxu2 %vm43_vm0, %v17_v15  ;;  %118 = vmatpush.msra.mxu1 %v22_v16 }
  0x12   :  { %166 = vmatmul.msk.f32.vlgmr.msra.gmra.mxu1 %vm43_vm0, %v14_v17  ;;  %188 = vmatpush.msra.mxu3 %v22_v16 }
  0x13   :  { %170 = vmatmul.msk.f32.vlgmr.msra.gmra.mxu3 %vm43_vm0, %v18_v18  ;;  %159 = vmatmul.msk.f32.vlgmr.msra.gmra.mxu0 %vm43_vm0, %v14_v17 }
  0x19   :  { %163 = vmatmul.msk.f32.gmra.mxu2 %vm43_vm0, %v18_v18 }
  0x1a   :  { %167 = vmatmul.msk.f32.gmra.mxu1 %vm43_vm0, %v15_v19 }
  0x1b   :  { %171 = vmatmul.msk.f32.gmra.mxu3 %vm43_vm0, %v19_v20  ;;  %160 = vmatmul.msk.f32.gmra.mxu0 %vm43_vm0, %v15_v19 }
  0x21   :  { %164 = vmatmul.msk.f32.gmra.mxu2 %vm43_vm0, %v19_v20 }
  0x22   :  { %168 = vmatmul.msk.f32.gmra.mxu1 %vm43_vm0, %v16_v21 }
  0x23   :  { %172 = vmatmul.msk.f32.gmra.mxu3 %vm43_vm0, %v20_v22  ;;  %161 = vmatmul.msk.f32.gmra.mxu0 %vm43_vm0, %v16_v21 }
  0x29   :  { %165 = vmatmul.msk.f32.gmra.mxu2 %vm43_vm0, %v20_v22 }
  0x2a   :  { %169 = vmatmul.msk.f32.gmra.mxu1 %vm43_vm0, %v17_v15 }
  0x8f   :  { %v120_v26 = vpop.f32.mrf.mxu1 }
  0x90   :  { %v121_v27 = vadd.f32 %v120_v26, %v40_v24  ;;  %v82_v28 = vpop.f32.mrf.mxu0 }
  0x91   :  { %v83_v29 = vadd.f32 %v82_v28, %v39_v25 }
  0x92   :  { %142 = vst [vmem:[%s340_s3 + $0x8] sm:$0xff] %v121_v27 }
  0x93   :  { %141 = vst [vmem:[%s340_s3] sm:$0xff] %v83_v29 }
  0x94   :  { %v91_v30 = vpop.f32.mrf.mxu2 }
  0x95   :  { %v92_v31 = vadd.f32 %v91_v30, %v39_v25 }
  0x96   :  { %v132_v32 = vpop.f32.mrf.mxu3 }
  0x97   :  { %147 = vst [vmem:[%s340_s3 + $0x30] sm:$0xff] %v92_v31  ;;  %v123_v33 = vpop.f32.mrf.mxu1  ;;  %v133_v34 = vadd.f32 %v132_v32, %v40_v24 }
  0x98   :  { %v124_v35 = vadd.f32 %v123_v33, %v40_v24  ;;  %v85_v36 = vpop.f32.mrf.mxu0 }
  0x99   :  { %150 = vst [vmem:[%s340_s3 + $0x48] sm:$0xff] %v133_v34  ;;  %v86_v37 = vadd.f32 %v85_v36, %v39_v25 }
  0x9a   :  { %144 = vst [vmem:[%s340_s3 + $0x18] sm:$0xff] %v124_v35 }
  0x9b   :  { %143 = vst [vmem:[%s340_s3 + $0x10] sm:$0xff] %v86_v37 }
  0x9c   :  { %v94_v38 = vpop.f32.mrf.mxu2 }
  0x9d   :  { %v95_v39 = vadd.f32 %v94_v38, %v39_v25 }
  0x9e   :  { %v135_v40 = vpop.f32.mrf.mxu3 }
  0x9f   :  { %149 = vst [vmem:[%s340_s3 + $0x40] sm:$0xff] %v95_v39  ;;  %v126_v41 = vpop.f32.mrf.mxu1  ;;  %v136_v42 = vadd.f32 %v135_v40, %v40_v24 }
  0xa0   :  { %v127_v43 = vadd.f32 %v126_v41, %v40_v24  ;;  %v88_v44 = vpop.f32.mrf.mxu0 }
  0xa1   :  { %152 = vst [vmem:[%s340_s3 + $0x58] sm:$0xff] %v136_v42  ;;  %v89_v45 = vadd.f32 %v88_v44, %v39_v25 }
  0xa2   :  { %146 = vst [vmem:[%s340_s3 + $0x28] sm:$0xff] %v127_v43 }
  0xa3   :  { %145 = vst [vmem:[%s340_s3 + $0x20] sm:$0xff] %v89_v45 }
  0xa4   :  { %v97_v46 = vpop.f32.mrf.mxu2 }
  0xa5   :  { %v98_v47 = vadd.f32 %v97_v46, %v39_v25 }
  0xa6   :  { %v138_v48 = vpop.f32.mrf.mxu3 }
  0xa7   :  { %151 = vst [vmem:[%s340_s3 + $0x50] sm:$0xff] %v98_v47  ;;  %v129_v49 = vpop.f32.mrf.mxu1  ;;  %v139_v50 = vadd.f32 %v138_v48, %v40_v24 }
  0xa8   :  { %v130_v51 = vadd.f32 %v129_v49, %v40_v24 }
  0xa9   :  { %154 = vst [vmem:[%s340_s3 + $0x68] sm:$0xff] %v139_v50 }
  0xaa   :  { %148 = vst [vmem:[%s340_s3 + $0x38] sm:$0xff] %v130_v51 }
  0xac   :  { %v100_v52 = vpop.f32.mrf.mxu2 }
  0xad   :  { %v101_v53 = vadd.f32 %v100_v52, %v39_v25 }
  0xaf   :  { %153 = vst [vmem:[%s340_s3 + $0x60] sm:$0xff] %v101_v53 }

// kernel: dp_lstm_forward.13
= control target key start
LH: loop header
LB: loop body
LE: loop exit
PB: predicated region body
PF: predicated region fallthrough
CT: control target
= control target key end

     0   :  { %vm37_vm0 = vcmask 326656   ;;  %s307_s1 = inlined_call_operand.vmem [shape: f32[40,256], index: 1, kind: input, shape index: {}]   ;;  %s308_s0 = inlined_call_operand.vmem [shape: f32[56,40], index: 0, kind: input, shape index: {}]   ;;  %s309_s2 = inlined_call_operand.vmem [shape: f32[1,256], index: 2, kind: input, shape index: {}]   ;;  %s310_s3 = inlined_call_operand.vmem [shape: f32[56,256], index: 3, kind: output, shape index: {}]  }
   0x1   :  { %v29_v0 = vld [vmem:[%s307_s1 + $0x40] sm:$0xff]  ;;  %v30_v1 = vld [vmem:[%s307_s1 + $0x48] sm:$0xff]  ;;  %v27_v2 = vld [vmem:[%s307_s1 + $0x30] sm:$0xff] }
   0x2   :  { %70 = vmatpush.msra.mxu0 %v29_v0  ;;  %108 = vmatpush.msra.mxu1 %v30_v1  ;;  %v28_v3 = vld [vmem:[%s307_s1 + $0x38] sm:$0xff]  ;;  %v25_v4 = vld [vmem:[%s307_s1 + $0x20] sm:$0xff]  ;;  %v26_v5 = vld [vmem:[%s307_s1 + $0x28] sm:$0xff] }
   0x3   :  { %167 = vmatpush.msra.mxu2 %v29_v0  ;;  %172 = vmatpush.msra.mxu3 %v30_v1  ;;  %v23_v6 = vld [vmem:[%s307_s1 + $0x10] sm:$0xff]  ;;  %v24_v7 = vld [vmem:[%s307_s1 + $0x18] sm:$0xff]  ;;  %v21_v8 = vld [vmem:[%s307_s1] sm:$0xff] }
   0x4   :  { %71 = vmatpush.msra.mxu0 %v27_v2  ;;  %109 = vmatpush.msra.mxu1 %v28_v3  ;;  %v22_v9 = vld [vmem:[%s307_s1 + $0x8] sm:$0xff]  ;;  %v14_v10 = vld [vmem:[%s308_s0] sm:$0xff]  ;;  %v16_v14 = vld [vmem:[%s308_s0 + $0x10] sm:$0xff] }
   0x5   :  { %168 = vmatpush.msra.mxu2 %v27_v2  ;;  %173 = vmatpush.msra.mxu3 %v28_v3  ;;  %v18_v11 = vld [vmem:[%s308_s0 + $0x20] sm:$0xff]  ;;  %v15_v12 = vld [vmem:[%s308_s0 + $0x8] sm:$0xff]  ;;  %v20_v15 = vld [vmem:[%s308_s0 + $0x30] sm:$0xff] }
   0x6   :  { %72 = vmatpush.msra.mxu0 %v25_v4  ;;  %110 = vmatpush.msra.mxu1 %v26_v5  ;;  %v19_v13 = vld [vmem:[%s308_s0 + $0x28] sm:$0xff]  ;;  %v17_v16 = vld [vmem:[%s308_s0 + $0x18] sm:$0xff]  ;;  %v31_v17 = vld [vmem:[%s309_s2] sm:$0x3] }
   0x7   :  { %169 = vmatpush.msra.mxu2 %v25_v4  ;;  %174 = vmatpush.msra.mxu3 %v26_v5  ;;  %v33_v18 = vperm.slane %v31_v17, 0  ;;  %v34_v19 = vperm.slane %v31_v17, 1 }
   0x8   :  { %73 = vmatpush.msra.mxu0 %v23_v6  ;;  %111 = vmatpush.msra.mxu1 %v24_v7 }
   0x9   :  { %170 = vmatpush.msra.mxu2 %v23_v6  ;;  %175 = vmatpush.msra.mxu3 %v24_v7 }
   0xa   :  { %74 = vmatpush.msra.mxu0 %v21_v8  ;;  %112 = vmatpush.msra.mxu1 %v22_v9 }
   0xb   :  { %153 = vmatmul.msk.f32.vlgmr.msra.gmra.mxu0 %vm37_vm0, %v14_v10  ;;  %160 = vmatmul.msk.f32.vlgmr.msra.gmra.mxu1 %vm37_vm0, %v14_v10 }
   0xc   :  { %171 = vmatpush.msra.mxu2 %v21_v8  ;;  %176 = vmatpush.msra.mxu3 %v22_v9 }
   0xd   :  { %157 = vmatmul.msk.f32.vlgmr.msra.gmra.mxu2 %vm37_vm0, %v18_v11  ;;  %164 = vmatmul.msk.f32.vlgmr.msra.gmra.mxu3 %vm37_vm0, %v18_v11 }
  0x13   :  { %154 = vmatmul.msk.f32.gmra.mxu0 %vm37_vm0, %v15_v12  ;;  %161 = vmatmul.msk.f32.gmra.mxu1 %vm37_vm0, %v15_v12 }
  0x15   :  { %158 = vmatmul.msk.f32.gmra.mxu2 %vm37_vm0, %v19_v13  ;;  %165 = vmatmul.msk.f32.gmra.mxu3 %vm37_vm0, %v19_v13 }
  0x1b   :  { %155 = vmatmul.msk.f32.gmra.mxu0 %vm37_vm0, %v16_v14  ;;  %162 = vmatmul.msk.f32.gmra.mxu1 %vm37_vm0, %v16_v14 }
  0x1d   :  { %159 = vmatmul.msk.f32.gmra.mxu2 %vm37_vm0, %v20_v15  ;;  %166 = vmatmul.msk.f32.gmra.mxu3 %vm37_vm0, %v20_v15 }
  0x23   :  { %156 = vmatmul.msk.f32.gmra.mxu0 %vm37_vm0, %v17_v16  ;;  %163 = vmatmul.msk.f32.gmra.mxu1 %vm37_vm0, %v17_v16 }
  0x88   :  { %v76_v20 = vpop.f32.mrf.mxu0  ;;  %v114_v21 = vpop.f32.mrf.mxu1 }
  0x89   :  { %v77_v22 = vadd.f32 %v76_v20, %v33_v18  ;;  %v115_v23 = vadd.f32 %v114_v21, %v34_v19 }
  0x8b   :  { %135 = vst [vmem:[%s310_s3] sm:$0xff] %v77_v22 }
  0x8c   :  { %136 = vst [vmem:[%s310_s3 + $0x8] sm:$0xff] %v115_v23 }
  0x90   :  { %v79_v24 = vpop.f32.mrf.mxu0  ;;  %v88_v25 = vpop.f32.mrf.mxu2 }
  0x91   :  { %v80_v26 = vadd.f32 %v79_v24, %v33_v18  ;;  %v89_v27 = vadd.f32 %v88_v25, %v33_v18  ;;  %v117_v28 = vpop.f32.mrf.mxu1  ;;  %v126_v29 = vpop.f32.mrf.mxu3 }
  0x92   :  { %v118_v30 = vadd.f32 %v117_v28, %v34_v19  ;;  %v127_v31 = vadd.f32 %v126_v29, %v34_v19 }
  0x93   :  { %137 = vst [vmem:[%s310_s3 + $0x10] sm:$0xff] %v80_v26 }
  0x94   :  { %143 = vst [vmem:[%s310_s3 + $0x40] sm:$0xff] %v89_v27 }
  0x95   :  { %138 = vst [vmem:[%s310_s3 + $0x18] sm:$0xff] %v118_v30 }
  0x96   :  { %144 = vst [vmem:[%s310_s3 + $0x48] sm:$0xff] %v127_v31 }
  0x98   :  { %v82_v32 = vpop.f32.mrf.mxu0  ;;  %v91_v33 = vpop.f32.mrf.mxu2 }
  0x99   :  { %v83_v34 = vadd.f32 %v82_v32, %v33_v18  ;;  %v92_v35 = vadd.f32 %v91_v33, %v33_v18  ;;  %v120_v36 = vpop.f32.mrf.mxu1  ;;  %v129_v37 = vpop.f32.mrf.mxu3 }
  0x9a   :  { %v121_v38 = vadd.f32 %v120_v36, %v34_v19  ;;  %v130_v39 = vadd.f32 %v129_v37, %v34_v19 }
  0x9b   :  { %139 = vst [vmem:[%s310_s3 + $0x20] sm:$0xff] %v83_v34 }
  0x9c   :  { %145 = vst [vmem:[%s310_s3 + $0x50] sm:$0xff] %v92_v35 }
  0x9d   :  { %140 = vst [vmem:[%s310_s3 + $0x28] sm:$0xff] %v121_v38 }
  0x9e   :  { %146 = vst [vmem:[%s310_s3 + $0x58] sm:$0xff] %v130_v39 }
  0xa0   :  { %v85_v40 = vpop.f32.mrf.mxu0  ;;  %v94_v41 = vpop.f32.mrf.mxu2 }
  0xa1   :  { %v86_v42 = vadd.f32 %v85_v40, %v33_v18  ;;  %v95_v43 = vadd.f32 %v94_v41, %v33_v18  ;;  %v123_v44 = vpop.f32.mrf.mxu1  ;;  %v132_v45 = vpop.f32.mrf.mxu3 }
  0xa2   :  { %v124_v46 = vadd.f32 %v123_v44, %v34_v19  ;;  %v133_v47 = vadd.f32 %v132_v45, %v34_v19 }
  0xa3   :  { %141 = vst [vmem:[%s310_s3 + $0x30] sm:$0xff] %v86_v42 }
  0xa4   :  { %147 = vst [vmem:[%s310_s3 + $0x60] sm:$0xff] %v95_v43 }
  0xa5   :  { %142 = vst [vmem:[%s310_s3 + $0x38] sm:$0xff] %v124_v46 }
  0xa6   :  { %148 = vst [vmem:[%s310_s3 + $0x68] sm:$0xff] %v133_v47 }

// kernel: dp_lstm_forward.16
= control target key start
LH: loop header
LB: loop body
LE: loop exit
PB: predicated region body
PF: predicated region fallthrough
CT: control target
= control target key end

     0   :  { %s1375_s15 = smov 32   ;;  %vm37_vm0 = vcmask 261120   ;;  %s1376_s23 = smov 64   ;;  %v1377_v27 = vmov 0   ;;  %s2075_s1 = inlined_call_operand.vmem [shape: f32[64,128], index: 1, kind: input, shape index: {}]   ;;  %s2076_s4 = inlined_call_operand.vmem [shape: f32[2,8,32], index: 4, kind: input, shape index: {}, may-alias: {3,4}]   ;;  %s2077_s3 = inlined_call_operand.vmem [shape: f32[2,8,32], index: 3, kind: input, shape index: {}, may-alias: {3,4}]   ;;  %s2078_s0 = inlined_call_operand.vmem [shape: f32[7,8,256], index: 0, kind: input, shape index: {}]   ;;  %s2079_s2 = inlined_call_operand.vmem [shape: f32[7,8,1], index: 2, kind: input, shape index: {}]   ;;  %s2080_s5 = inlined_call_operand.vmem [shape: f32[7,8,64], index: 5, kind: output, shape index: {0}]   ;;  %s2081_s6 = inlined_call_operand.vmem [shape: f32[2,8,32], index: 6, kind: output, shape index: {1}]  }
   0x1   :  { %v1417_v0 = vld [vmem:[%s2075_s1 + $0x18] sm:$0xff]  ;;  %v1427_v2 = vld [vmem:[%s2075_s1 + $0x10] sm:$0xff]  ;;  %v1439_v4 = vld [vmem:[%s2075_s1 + $0x8] sm:$0xff]  ;;  %1260 = vset.pattern.permute.xlu2 %v1377_v27  ;;  %1261 = vset.pattern.permute.xlu0 %v1377_v27  ;;  %s1378_s26 = smov 96  }
   0x2   :  { %v1422_v1 = vld [vmem:[%s2075_s1 + $0x38] sm:$0xff]  ;;  %53 = vmatpush.msra.mxu0 %v1417_v0  ;;  %v1434_v3 = vld [vmem:[%s2075_s1 + $0x30] sm:$0xff]  ;;  %v1444_v5 = vld [vmem:[%s2075_s1 + $0x28] sm:$0xff]  ;;  %228 = vmatpush.msra.mxu2 %v1417_v0 }
   0x3   :  { %138 = vmatpush.msra.mxu1 %v1422_v1  ;;  %310 = vmatpush.msra.mxu3 %v1422_v1  ;;  %v31_v6 = vld [vmem:[%s2076_s4] sm:$0xff]  ;;  %v1475_v10 = vld [vmem:[%s2077_s3 + $0x8] sm:$0xff]  ;;  %v1196_v62 = vld [vmem:[%s2079_s2 + $0x30] sm:$0xff] }
   0x4   :  { %54 = vmatpush.msra.mxu0 %v1427_v2  ;;  %v1456_v7 = vld [vmem:[%s2075_s1] sm:$0xff]  ;;  %83 = vrot.lane.b32.xlu1 %v31_v6, %s1375_s15  ;;  %v1190_v11 = vld [vmem:[%s2076_s4 + $0x8] sm:$0xff]  ;;  %vm190_vm10 = vcmp.gt.f32.partialorder %v1196_v62, 0.5 }
   0x5   :  { %139 = vmatpush.msra.mxu1 %v1434_v3  ;;  %v1461_v8 = vld [vmem:[%s2075_s1 + $0x20] sm:$0xff]  ;;  %311 = vmatpush.msra.mxu3 %v1434_v3  ;;  %v1193_v15 = vld [vmem:[%s2078_s0 + $0x68] sm:$0xff]  ;;  %v191_v63 = vsel %vm190_vm10, 1, %v1377_v27 }
   0x6   :  { %55 = vmatpush.msra.mxu0 %v1439_v4  ;;  %v1470_v9 = vld [vmem:[%s2077_s3] sm:$0xff]  ;;  %229 = vmatpush.msra.mxu2 %v1427_v2 }
   0x7   :  { %140 = vmatpush.msra.mxu1 %v1444_v5  ;;  %312 = vmatpush.msra.mxu3 %v1444_v5  ;;  %v36_v12 = vld [vmem:[%s2078_s0] sm:$0xff] }
   0x8   :  { %56 = vmatpush.msra.mxu0 %v1456_v7  ;;  %230 = vmatpush.msra.mxu2 %v1439_v4  ;;  %v103_v51 = vld [vmem:[%s2079_s2] sm:$0xff] }
   0x9   :  { %141 = vmatpush.msra.mxu1 %v1461_v8  ;;  %1191 = vmatmul.msk.f32.vlgmr.msra.gmra.mxu0 %vm37_vm0, %v1470_v9  ;;  %vm104_vm9 = vcmp.gt.f32.partialorder %v103_v51, 0.5 }
   0xa   :  { %1194 = vmatmul.msk.f32.vlgmr.msra.gmra.mxu1 %vm37_vm0, %v1475_v10  ;;  %313 = vmatpush.msra.mxu3 %v1461_v8  ;;  %v105_v52 = vsel %vm104_vm9, 1, %v1377_v27 }
   0xb   :  { %392 = vmatpush.msrb.mxu0 %v1417_v0  ;;  %474 = vmatpush.msrb.mxu1 %v1422_v1 }
   0xc   :  { %231 = vmatpush.msra.mxu2 %v1456_v7  ;;  %637 = vmatpush.msrb.mxu3 %v1422_v1 }
   0xd   :  { %168 = vrot.lane.b32.xlu1 %v1190_v11, %s1375_s15  ;;  %393 = vmatpush.msrb.mxu0 %v1427_v2 }
   0xe   :  { %475 = vmatpush.msrb.mxu1 %v1434_v3  ;;  %556 = vmatpush.msrb.mxu2 %v1417_v0 }
   0xf   :  { %394 = vmatpush.msrb.mxu0 %v1439_v4  ;;  %638 = vmatpush.msrb.mxu3 %v1434_v3 }
  0x10   :  { %476 = vmatpush.msrb.mxu1 %v1444_v5  ;;  %557 = vmatpush.msrb.mxu2 %v1427_v2 }
  0x11   :  { %395 = vmatpush.msrb.mxu0 %v1456_v7  ;;  %639 = vmatpush.msrb.mxu3 %v1444_v5 }
  0x12   :  { %477 = vmatpush.msrb.mxu1 %v1461_v8  ;;  %558 = vmatpush.msrb.mxu2 %v1439_v4 }
  0x13   :  { %640 = vmatpush.msrb.mxu3 %v1461_v8  ;;  %716 = vmatpush.msra.mxu0 %v1417_v0 }
  0x14   :  { %559 = vmatpush.msrb.mxu2 %v1456_v7  ;;  %795 = vmatpush.msra.mxu1 %v1422_v1 }
  0x15   :  { %717 = vmatpush.msra.mxu0 %v1427_v2  ;;  %1262 = vset.pattern.permute.xlu1 %v1377_v27 }
  0x16   :  { %796 = vmatpush.msra.mxu1 %v1434_v3 }
  0x17   :  { %718 = vmatpush.msra.mxu0 %v1439_v4 }
  0x18   :  { %797 = vmatpush.msra.mxu1 %v1444_v5 }
  0x19   :  { %719 = vmatpush.msra.mxu0 %v1456_v7 }
  0x1a   :  { %798 = vmatpush.msra.mxu1 %v1461_v8 }
  0x76   :  { %v1535_v53 = vpop.permute.xlu1 %83 }
  0x7f   :  { %v1541_v57 = vpop.permute.xlu1 %168 }
  0x86   :  { %v58_v13 = vpop.f32.mrf.mxu0 }
  0x87   :  { %v61_v14 = vadd.f32 %v58_v13, %v36_v12  ;;  %v143_v16 = vpop.f32.mrf.mxu1 }
  0x88   :  { %v146_v17 = vadd.f32 %v1193_v15, %v143_v16 }
  0x89   :  { %1263 = vtanh.f32 %v61_v14  ;;  %v1192_v20 = vmul.f32 -1.442695, %v61_v14 }
  0x8a   :  { %1265 = vtanh.f32 %v146_v17  ;;  %v1195_v21 = vmul.f32 -1.442695, %v146_v17 }
  0x8b   :  { %1267 = vpow2.f32 %v1192_v20 }
  0x8c   :  { %1269 = vpow2.f32 %v1195_v21 }
  0x8f   :  { %v1264_v18 = vpop.eup %1263 }
  0x90   :  { %88 = vrot.lane.b32.xlu0 %v1264_v18, %s1376_s23  ;;  %v1266_v19 = vpop.eup %1265 }
  0x91   :  { %v1268_v22 = vpop.eup %1267 }
  0x92   :  { %v65_v23 = vadd.f32 1.0, %v1268_v22  ;;  %v1270_v24 = vpop.eup %1269  ;;  %v1203_v22 = vld [vmem:[%s2078_s0 + $0x58] sm:$0xff] }
  0x93   :  { %v150_v25 = vadd.f32 1.0, %v1270_v24 }
  0x94   :  { %1271 = vrcp.f32 %v65_v23  ;;  %v77_v35 = vand.u32 2147483648, %v65_v23  ;;  %vm71_vm2 = vweird.f32 %v65_v23  ;;  %v75_v36 = vand.u32 2147483647, %v65_v23 }
  0x95   :  { %1273 = vrcp.f32 %v150_v25  ;;  %vm156_vm5 = vweird.f32 %v150_v25  ;;  %v162_v44 = vand.u32 2147483648, %v150_v25  ;;  %v160_v45 = vand.u32 2147483647, %v150_v25 }
  0x96   :  { %v78_v39 = vor.u32 1.1754944e-38, %v77_v35  ;;  %vm76_vm4 = vcmp.eq.f32.partialorder %v75_v36, 8.507059e+37 }
  0x97   :  { %v163_v47 = vor.u32 1.1754944e-38, %v162_v44  ;;  %vm161_vm8 = vcmp.eq.f32.partialorder %v160_v45, 8.507059e+37 }
  0x98   :  { %173 = vrot.lane.b32.xlu0 %v1266_v19, %s1376_s23 }
  0x9a   :  { %v1272_v26 = vpop.eup %1271 }
  0x9b   :  { %v67_v28 = vmul.f32 %v1272_v26, %v65_v23  ;;  %v1274_v30 = vpop.eup %1273  ;;  %vm72_vm1 = vweird.f32 %v1272_v26 }
  0x9c   :  { %v152_v32 = vmul.f32 %v1274_v30, %v150_v25  ;;  %vm73_vm3 = vmor %vm71_vm2, %vm72_vm1  ;;  %vm157_vm6 = vweird.f32 %v1274_v30 }
  0x9d   :  { %v68_v29 = vsub.f32 1.0, %v67_v28  ;;  %vm158_vm7 = vmor %vm156_vm5, %vm157_vm6 }
  0x9e   :  { %v153_v34 = vsub.f32 1.0, %v152_v32 }
  0x9f   :  { %v69_v31 = vmul.f32 %v1272_v26, %v68_v29 }
  0xa0   :  { %v154_v38 = vmul.f32 %v1274_v30, %v153_v34 }
  0xa1   :  { %v70_v33 = vadd.f32 %v1272_v26, %v69_v31 }
  0xa2   :  { %v155_v42 = vadd.f32 %v1274_v30, %v154_v38 }
  0xa3   :  { %v74_v37 = vsel %vm73_vm3, %v1272_v26, %v70_v33  ;;  %v1198_v26 = vld [vmem:[%s2078_s0 + $0x10] sm:$0xff] }
  0xa4   :  { %v79_v40 = vsel %vm76_vm4, %v78_v39, %v74_v37  ;;  %v159_v46 = vsel %vm158_vm7, %v1274_v30, %v155_v42 }
  0xa5   :  { %v164_v48 = vsel %vm161_vm8, %v163_v47, %v159_v46  ;;  %v86_v54 = vmul.f32 %v1535_v53, %v79_v40 }
  0xa6   :  { %v171_v58 = vmul.f32 %v1541_v57, %v164_v48 }
 0x102   :  { %v89_v41 = vpop.permute.xlu0 %88 }
 0x103   :  { %v91_v43 = vmul.f32 %v89_v41, %v79_v40 }
 0x105   :  { %93 = vrot.lane.b32.xlu2 %v91_v43, %s1375_s15 }
 0x10a   :  { %v174_v49 = vpop.permute.xlu0 %173 }
 0x10b   :  { %v176_v50 = vmul.f32 %v174_v49, %v164_v48  ;;  %v1201_v49 = vld [vmem:[%s2079_s2 + $0x8] sm:$0xff] }
 0x10c   :  { %vm276_vm2 = vcmp.gt.f32.partialorder %v1201_v49, 0.5 }
 0x10d   :  { %178 = vrot.lane.b32.xlu2 %v176_v50, %s1375_s15  ;;  %v1603_v51 = vsel %vm276_vm2, 1, %v1377_v27 }
 0x115   :  { %107 = vperm.xlu2 %1260, %v105_v52  }
 0x11d   :  { %196 = vrot.lane.b32.xlu2 %v1475_v10, %s1378_s26 }
 0x15f   :  { %v94_v55 = vpop.permute.xlu2 %93 }
 0x160   :  { %v1538_v56 = vadd.f32 %v94_v55, %v86_v54 }
 0x162   :  { %1275 = vtanh.f32 %v1538_v56 }
 0x167   :  { %v179_v59 = vpop.permute.xlu2 %178 }
 0x168   :  { %v1276_v60 = vpop.eup %1275  ;;  %v1544_v61 = vadd.f32 %v179_v59, %v171_v58 }
 0x169   :  { %99 = vrot.lane.b32.xlu0 %v1276_v60, %s1376_s23 }
 0x16a   :  { %1277 = vtanh.f32 %v1544_v61 }
 0x16f   :  { %v1555_v10 = vpop.permute.xlu2 %107 }
 0x170   :  { %v1278_v6 = vpop.eup %1277  ;;  %vm109_vm12 = vcmp.eq.s32.totalorder %v1555_v10, 1 }
 0x171   :  { %184 = vrot.lane.b32.xlu1 %v1278_v6, %s1376_s23  ;;  %193 = vperm.xlu0 %1261, %v191_v63  }
 0x177   :  { %v197_v12 = vpop.permute.xlu2 %196 }
 0x179   :  { %110 = vrot.lane.b32.xlu1 %v1470_v9, %s1378_s26 }
 0x1db   :  { %v100_v11 = vpop.permute.xlu0 %99 }
 0x1dc   :  { %v1570_v9 = vmul.f32 %v100_v11, %v79_v40 }
 0x1e3   :  { %v185_v13 = vpop.permute.xlu1 %184  ;;  %v1557_v14 = vpop.permute.xlu0 %193 }
 0x1e4   :  { %v187_v15 = vmul.f32 %v185_v13, %v164_v48  ;;  %vm195_vm11 = vcmp.eq.s32.totalorder %v1557_v14, 1  ;;  %v1206_v14 = vld [vmem:[%s2079_s2 + $0x28] sm:$0xff] }
 0x1e5   :  { %v1611_v13 = vsel %vm195_vm11, %v1544_v61, %v1541_v57  ;;  %vm358_vm7 = vcmp.gt.f32.partialorder %v1206_v14, 0.5 }
 0x1e6   :  { %v1562_v16 = vsel %vm195_vm11, %v187_v15, %v197_v12  ;;  %v1566_v17 = vsel %vm195_vm11, %v187_v15, 0.0 }
 0x1e7   :  { %294 = vrot.lane.b32.xlu2 %v1562_v16, %s1375_s15 }
 0x1eb   :  { %v111_v18 = vpop.permute.xlu1 %110 }
 0x1ec   :  { %v1576_v19 = vsel %vm109_vm12, %v1570_v9, %v111_v18 }
 0x1ed   :  { %212 = vrot.lane.b32.xlu1 %v1576_v19, %s1375_s15 }
 0x241   :  { %v295_v20 = vpop.permute.xlu2 %294 }
 0x242   :  { %1204 = vmatmul.msk.f32.vlgmr.msra.gmra.mxu3 %vm37_vm0, %v295_v20 }
 0x243   :  { %953 = vmatpush.msra.mxu3 %v1422_v1 }
 0x245   :  { %954 = vmatpush.msra.mxu3 %v1434_v3 }
 0x247   :  { %955 = vmatpush.msra.mxu3 %v1444_v5 }
 0x249   :  { %956 = vmatpush.msra.mxu3 %v1461_v8 }
 0x25f   :  { %v213_v21 = vpop.permute.xlu1 %212 }
 0x260   :  { %1199 = vmatmul.msk.f32.vlgmr.msra.gmra.mxu2 %vm37_vm0, %v213_v21  ;;  %v1621_v21 = vsel %vm109_vm12, %v1538_v56, %v1535_v53  ;;  %v1633_v53 = vsel %vm358_vm7, 1, %v1377_v27 }
 0x261   :  { %874 = vmatpush.msra.mxu2 %v1417_v0 }
 0x263   :  { %875 = vmatpush.msra.mxu2 %v1427_v2 }
 0x265   :  { %876 = vmatpush.msra.mxu2 %v1439_v4 }
 0x267   :  { %877 = vmatpush.msra.mxu2 %v1456_v7 }
 0x2c5   :  { %v315_v23 = vpop.f32.mrf.mxu3 }
 0x2c6   :  { %v318_v24 = vadd.f32 %v1203_v22, %v315_v23 }
 0x2c8   :  { %1279 = vtanh.f32 %v318_v24  ;;  %v1205_v31 = vmul.f32 -1.442695, %v318_v24 }
 0x2ce   :  { %v1280_v25 = vpop.eup %1279 }
 0x2cf   :  { %341 = vrot.lane.b32.xlu1 %v1280_v25, %s1376_s23 }
 0x2e3   :  { %v233_v28 = vpop.f32.mrf.mxu2 }
 0x2e4   :  { %v236_v29 = vadd.f32 %v1198_v26, %v233_v28 }
 0x2e6   :  { %1281 = vtanh.f32 %v236_v29  ;;  %v1200_v36 = vmul.f32 -1.442695, %v236_v29 }
 0x2e7   :  { %1283 = vpow2.f32 %v1205_v31 }
 0x2ec   :  { %v1282_v30 = vpop.eup %1281 }
 0x2ed   :  { %259 = vrot.lane.b32.xlu0 %v1282_v30, %s1376_s23  ;;  %v1284_v32 = vpop.eup %1283 }
 0x2ee   :  { %v322_v33 = vadd.f32 1.0, %v1284_v32 }
 0x2f0   :  { %1285 = vrcp.f32 %v322_v33  ;;  %v334_v40 = vand.u32 2147483648, %v322_v33  ;;  %vm328_vm14 = vweird.f32 %v322_v33  ;;  %v332_v42 = vand.u32 2147483647, %v322_v33 }
 0x2f1   :  { %1287 = vpow2.f32 %v1200_v36 }
 0x2f2   :  { %v335_v45 = vor.u32 1.1754944e-38, %v334_v40  ;;  %vm333_vm1 = vcmp.eq.f32.partialorder %v332_v42, 8.507059e+37 }
 0x2f6   :  { %v1286_v34 = vpop.eup %1285 }
 0x2f7   :  { %v324_v35 = vmul.f32 %v1286_v34, %v322_v33  ;;  %vm329_vm13 = vweird.f32 %v1286_v34  ;;  %v1288_v41 = vpop.eup %1287 }
 0x2f8   :  { %vm330_vm15 = vmor %vm328_vm14, %vm329_vm13  ;;  %v240_v44 = vadd.f32 1.0, %v1288_v41 }
 0x2f9   :  { %v325_v37 = vsub.f32 1.0, %v324_v35 }
 0x2fa   :  { %1289 = vrcp.f32 %v240_v44  ;;  %v252_v59 = vand.u32 2147483648, %v240_v44  ;;  %vm246_vm4 = vweird.f32 %v240_v44  ;;  %v250_v60 = vand.u32 2147483647, %v240_v44 }
 0x2fb   :  { %v326_v38 = vmul.f32 %v1286_v34, %v325_v37 }
 0x2fc   :  { %v253_v63 = vor.u32 1.1754944e-38, %v252_v59  ;;  %vm251_vm6 = vcmp.eq.f32.partialorder %v250_v60, 8.507059e+37 }
 0x2fd   :  { %v327_v39 = vadd.f32 %v1286_v34, %v326_v38 }
 0x2ff   :  { %v331_v43 = vsel %vm330_vm15, %v1286_v34, %v327_v39 }
 0x300   :  { %v336_v47 = vsel %vm333_vm1, %v335_v45, %v331_v43  ;;  %v1290_v50 = vpop.eup %1289 }
 0x301   :  { %v242_v52 = vmul.f32 %v1290_v50, %v240_v44  ;;  %vm247_vm3 = vweird.f32 %v1290_v50  ;;  %v339_v15 = vmul.f32 %v336_v47, %v1611_v13 }
 0x302   :  { %vm248_vm5 = vmor %vm246_vm4, %vm247_vm3 }
 0x303   :  { %v243_v54 = vsub.f32 1.0, %v242_v52 }
 0x305   :  { %v244_v55 = vmul.f32 %v1290_v50, %v243_v54 }
 0x307   :  { %v245_v58 = vadd.f32 %v1290_v50, %v244_v55 }
 0x309   :  { %v249_v62 = vsel %vm248_vm5, %v1290_v50, %v245_v58 }
 0x30a   :  { %v254_v6 = vsel %vm251_vm6, %v253_v63, %v249_v62 }
 0x30b   :  { %v257_v22 = vmul.f32 %v254_v6, %v1621_v21 }
 0x341   :  { %v342_v46 = vpop.permute.xlu1 %341 }
 0x342   :  { %v344_v48 = vmul.f32 %v342_v46, %v336_v47 }
 0x344   :  { %346 = vrot.lane.b32.xlu0 %v344_v48, %s1375_s15 }
 0x34c   :  { %279 = vperm.xlu0 %1261, %v1603_v51  }
 0x35f   :  { %v260_v11 = vpop.permute.xlu0 %259 }
 0x360   :  { %v262_v12 = vmul.f32 %v260_v11, %v254_v6 }
 0x362   :  { %264 = vrot.lane.b32.xlu2 %v262_v12, %s1375_s15 }
 0x3b6   :  { %v347_v18 = vpop.permute.xlu0 %346 }
 0x3b7   :  { %v1614_v20 = vadd.f32 %v347_v18, %v339_v15 }
 0x3b9   :  { %1291 = vtanh.f32 %v1614_v20 }
 0x3bc   :  { %v265_v23 = vpop.permute.xlu2 %264 }
 0x3bd   :  { %v1624_v24 = vadd.f32 %v265_v23, %v257_v22  ;;  %v1211_v22 = vld [vmem:[%s2079_s2 + $0x10] sm:$0xff] }
 0x3be   :  { %v1636_v56 = vpop.permute.xlu0 %279  ;;  %vm440_vm4 = vcmp.gt.f32.partialorder %v1211_v22, 0.5 }
 0x3bf   :  { %v1292_v57 = vpop.eup %1291  ;;  %1293 = vtanh.f32 %v1624_v24  ;;  %vm281_vm8 = vcmp.eq.s32.totalorder %v1636_v56, 1  ;;  %v1687_v23 = vsel %vm440_vm4, 1, %v1377_v27 }
 0x3c0   :  { %352 = vrot.lane.b32.xlu2 %v1292_v57, %s1376_s23  ;;  %v1694_v57 = vsel %vm281_vm8, %v1624_v24, %v1621_v21  ;;  %v1216_v24 = vld [vmem:[%s2079_s2 + $0x20] sm:$0xff] }
 0x3c1   :  { %vm522_vm5 = vcmp.gt.f32.partialorder %v1216_v24, 0.5 }
 0x3c5   :  { %v1294_v61 = vpop.eup %1293 }
 0x3c6   :  { %270 = vrot.lane.b32.xlu1 %v1294_v61, %s1376_s23 }
 0x3ce   :  { %361 = vperm.xlu1 %1262, %v1633_v53  }
 0x41a   :  { %v353_v29 = vpop.permute.xlu2 %352 }
 0x41b   :  { %v355_v30 = vmul.f32 %v353_v29, %v336_v47 }
 0x438   :  { %v271_v25 = vpop.permute.xlu1 %270 }
 0x439   :  { %v1638_v26 = vmul.f32 %v271_v25, %v254_v6 }
 0x43b   :  { %v1645_v28 = vsel %vm281_vm8, %v1638_v26, %v1576_v19 }
 0x43c   :  { %376 = vrot.lane.b32.xlu2 %v1645_v28, %s1375_s15 }
 0x440   :  { %v1649_v31 = vpop.permute.xlu1 %361 }
 0x441   :  { %vm363_vm9 = vcmp.eq.s32.totalorder %v1649_v31, 1 }
 0x442   :  { %v1655_v32 = vsel %vm363_vm9, %v355_v30, %v1562_v16  ;;  %v1659_v33 = vsel %vm363_vm9, %v355_v30, 0.0  ;;  %v1704_v29 = vsel %vm363_vm9, %v1614_v20, %v1611_v13 }
 0x443   :  { %458 = vrot.lane.b32.xlu0 %v1655_v32, %s1375_s15 }
 0x496   :  { %v377_v19 = vpop.permute.xlu2 %376 }
 0x497   :  { %1209 = vmatmul.msk.f32.vlgmr.msrb.gmra.mxu0 %vm37_vm0, %v377_v19 }
 0x498   :  { %1032 = vmatpush.msrb.mxu0 %v1417_v0  ;;  %v1208_v0 = vld [vmem:[%s2078_s0 + $0x20] sm:$0xff] }
 0x49a   :  { %1033 = vmatpush.msrb.mxu0 %v1427_v2 }
 0x49c   :  { %1034 = vmatpush.msrb.mxu0 %v1439_v4 }
 0x49e   :  { %1035 = vmatpush.msrb.mxu0 %v1456_v7 }
 0x4b5   :  { %v459_v16 = vpop.permute.xlu0 %458 }
 0x4b6   :  { %1214 = vmatmul.msk.f32.vlgmr.msrb.gmra.mxu1 %vm37_vm0, %v459_v16 }
 0x4b7   :  { %1110 = vmatpush.msrb.mxu1 %v1422_v1  ;;  %v1213_v1 = vld [vmem:[%s2078_s0 + $0x48] sm:$0xff] }
 0x4b9   :  { %1111 = vmatpush.msrb.mxu1 %v1434_v3 }
 0x4bb   :  { %1112 = vmatpush.msrb.mxu1 %v1444_v5 }
 0x4bd   :  { %1113 = vmatpush.msrb.mxu1 %v1461_v8 }
 0x514   :  { %v397_v2 = vpop.f32.mrf.mxu0 }
 0x515   :  { %v400_v34 = vadd.f32 %v1208_v0, %v397_v2  ;;  %v1715_v0 = vsel %vm522_vm5, 1, %v1377_v27 }
 0x517   :  { %1295 = vtanh.f32 %v400_v34  ;;  %v1210_v8 = vmul.f32 -1.442695, %v400_v34 }
 0x51d   :  { %v1296_v4 = vpop.eup %1295 }
 0x51e   :  { %423 = vrot.lane.b32.xlu1 %v1296_v4, %s1376_s23 }
 0x533   :  { %v479_v7 = vpop.f32.mrf.mxu1 }
 0x534   :  { %v482_v3 = vadd.f32 %v1213_v1, %v479_v7 }
 0x536   :  { %1297 = vtanh.f32 %v482_v3  ;;  %v1215_v35 = vmul.f32 -1.442695, %v482_v3 }
 0x537   :  { %1299 = vpow2.f32 %v1210_v8 }
 0x538   :  { %1301 = vpow2.f32 %v1215_v35  ;;  %v1218_v35 = vld [vmem:[%s2078_s0 + $0x30] sm:$0xff] }
 0x53c   :  { %v1298_v5 = vpop.eup %1297 }
 0x53d   :  { %505 = vrot.lane.b32.xlu2 %v1298_v5, %s1376_s23  ;;  %v1300_v36 = vpop.eup %1299 }
 0x53e   :  { %v404_v37 = vadd.f32 1.0, %v1300_v36  ;;  %v1302_v38 = vpop.eup %1301 }
 0x53f   :  { %v486_v39 = vadd.f32 1.0, %v1302_v38  ;;  %v1223_v38 = vld [vmem:[%s2078_s0 + $0x38] sm:$0xff] }
 0x540   :  { %1303 = vrcp.f32 %v404_v37  ;;  %v416_v48 = vand.u32 2147483648, %v404_v37  ;;  %vm410_vm11 = vweird.f32 %v404_v37  ;;  %v414_v49 = vand.u32 2147483647, %v404_v37 }
 0x541   :  { %1305 = vrcp.f32 %v486_v39  ;;  %v498_v62 = vand.u32 2147483648, %v486_v39  ;;  %vm492_vm1 = vweird.f32 %v486_v39  ;;  %v496_v63 = vand.u32 2147483647, %v486_v39 }
 0x542   :  { %v417_v54 = vor.u32 1.1754944e-38, %v416_v48  ;;  %vm415_vm14 = vcmp.eq.f32.partialorder %v414_v49, 8.507059e+37 }
 0x543   :  { %v499_v11 = vor.u32 1.1754944e-38, %v498_v62  ;;  %vm497_vm3 = vcmp.eq.f32.partialorder %v496_v63, 8.507059e+37 }
 0x546   :  { %v1304_v40 = vpop.eup %1303 }
 0x547   :  { %v406_v41 = vmul.f32 %v1304_v40, %v404_v37  ;;  %v1306_v42 = vpop.eup %1305  ;;  %vm411_vm10 = vweird.f32 %v1304_v40 }
 0x548   :  { %v488_v44 = vmul.f32 %v1306_v42, %v486_v39  ;;  %vm412_vm13 = vmor %vm410_vm11, %vm411_vm10  ;;  %vm493_vm15 = vweird.f32 %v1306_v42 }
 0x549   :  { %v407_v43 = vsub.f32 1.0, %v406_v41  ;;  %vm494_vm2 = vmor %vm492_vm1, %vm493_vm15 }
 0x54a   :  { %v489_v46 = vsub.f32 1.0, %v488_v44 }
 0x54b   :  { %v408_v45 = vmul.f32 %v1304_v40, %v407_v43 }
 0x54c   :  { %v490_v50 = vmul.f32 %v1306_v42, %v489_v46 }
 0x54d   :  { %v409_v47 = vadd.f32 %v1304_v40, %v408_v45 }
 0x54e   :  { %v491_v59 = vadd.f32 %v1306_v42, %v490_v50 }
 0x54f   :  { %v413_v52 = vsel %vm412_vm13, %v1304_v40, %v409_v47 }
 0x550   :  { %v418_v58 = vsel %vm415_vm14, %v417_v54, %v413_v52  ;;  %v495_v6 = vsel %vm494_vm2, %v1306_v42, %v491_v59 }
 0x551   :  { %v500_v15 = vsel %vm497_vm3, %v499_v11, %v495_v6  ;;  %v421_v61 = vmul.f32 %v418_v58, %v1694_v57 }
 0x552   :  { %v503_v30 = vmul.f32 %v500_v15, %v1704_v29 }
 0x590   :  { %v424_v55 = vpop.permute.xlu1 %423 }
 0x591   :  { %v426_v60 = vmul.f32 %v424_v55, %v418_v58 }
 0x593   :  { %428 = vrot.lane.b32.xlu0 %v426_v60, %s1375_s15 }
 0x597   :  { %v506_v12 = vpop.permute.xlu2 %505 }
 0x598   :  { %v508_v18 = vmul.f32 %v506_v12, %v500_v15 }
 0x59a   :  { %510 = vrot.lane.b32.xlu1 %v508_v18, %s1375_s15 }
 0x5a2   :  { %443 = vperm.xlu1 %1262, %v1687_v23  }
 0x605   :  { %v429_v14 = vpop.permute.xlu0 %428 }
 0x606   :  { %v1697_v25 = vadd.f32 %v429_v14, %v421_v61 }
 0x608   :  { %1307 = vtanh.f32 %v1697_v25 }
 0x60c   :  { %v511_v19 = vpop.permute.xlu1 %510 }
 0x60d   :  { %v1707_v16 = vadd.f32 %v511_v19, %v503_v30 }
 0x60e   :  { %v1308_v21 = vpop.eup %1307 }
 0x60f   :  { %1309 = vtanh.f32 %v1707_v16  ;;  %434 = vrot.lane.b32.xlu2 %v1308_v21, %s1376_s23 }
 0x614   :  { %v1719_v20 = vpop.permute.xlu1 %443 }
 0x615   :  { %v1310_v13 = vpop.eup %1309  ;;  %vm445_vm6 = vcmp.eq.s32.totalorder %v1719_v20, 1 }
 0x616   :  { %516 = vrot.lane.b32.xlu0 %v1310_v13, %s1376_s23 }
 0x617   :  { %525 = vperm.xlu2 %1260, %v1715_v0  }
 0x669   :  { %v435_v31 = vpop.permute.xlu2 %434 }
 0x66a   :  { %v1721_v2 = vmul.f32 %v435_v31, %v418_v58  ;;  %v1221_v31 = vld [vmem:[%s2079_s2 + $0x18] sm:$0xff] }
 0x66b   :  { %vm604_vm3 = vcmp.gt.f32.partialorder %v1221_v31, 0.5 }
 0x66c   :  { %v1728_v34 = vsel %vm445_vm6, %v1721_v2, %v1645_v28 }
 0x66d   :  { %540 = vrot.lane.b32.xlu0 %v1728_v34, %s1375_s15 }
 0x671   :  { %v1732_v4 = vpop.permute.xlu2 %525 }
 0x672   :  { %vm527_vm7 = vcmp.eq.s32.totalorder %v1732_v4, 1 }
 0x688   :  { %v517_v1 = vpop.permute.xlu0 %516 }
 0x689   :  { %v519_v7 = vmul.f32 %v517_v1, %v500_v15  ;;  %v605_v1 = vsel %vm604_vm3, 1, %v1377_v27 }
 0x68b   :  { %v1738_v3 = vsel %vm527_vm7, %v519_v7, %v1655_v32  ;;  %v1742_v5 = vsel %vm527_vm7, %v519_v7, 0.0  ;;  %v1766_v7 = vsel %vm445_vm6, %v1697_v25, %v1694_v57 }
 0x68c   :  { %621 = vrot.lane.b32.xlu1 %v1738_v3, %s1375_s15 }
 0x6df   :  { %v541_v28 = vpop.permute.xlu0 %540 }
 0x6e0   :  { %1219 = vmatmul.msk.f32.vlgmr.msrb.gmra.mxu2 %vm37_vm0, %v541_v28 }
 0x6fe   :  { %v622_v8 = vpop.permute.xlu1 %621 }
 0x6ff   :  { %1224 = vmatmul.msk.f32.vlgmr.msrb.gmra.mxu3 %vm37_vm0, %v622_v8 }
 0x763   :  { %v561_v36 = vpop.f32.mrf.mxu2 }
 0x764   :  { %v564_v32 = vadd.f32 %v1218_v35, %v561_v36 }
 0x766   :  { %1311 = vtanh.f32 %v564_v32  ;;  %v1220_v42 = vmul.f32 -1.442695, %v564_v32  ;;  %v1777_v32 = vsel %vm527_vm7, %v1707_v16, %v1704_v29 }
 0x76c   :  { %v1312_v37 = vpop.eup %1311 }
 0x76d   :  { %587 = vrot.lane.b32.xlu2 %v1312_v37, %s1376_s23 }
 0x782   :  { %v642_v39 = vpop.f32.mrf.mxu3 }
 0x783   :  { %v645_v40 = vadd.f32 %v1223_v38, %v642_v39 }
 0x785   :  { %1313 = vtanh.f32 %v645_v40  ;;  %v1225_v62 = vmul.f32 -1.442695, %v645_v40 }
 0x786   :  { %1315 = vpow2.f32 %v1220_v42 }
 0x78b   :  { %v1314_v41 = vpop.eup %1313 }
 0x78c   :  { %668 = vrot.lane.b32.xlu0 %v1314_v41, %s1376_s23  ;;  %v1316_v43 = vpop.eup %1315 }
 0x78d   :  { %v568_v44 = vadd.f32 1.0, %v1316_v43 }
 0x78f   :  { %1317 = vrcp.f32 %v568_v44  ;;  %v580_v50 = vand.u32 2147483648, %v568_v44  ;;  %vm574_vm10 = vweird.f32 %v568_v44  ;;  %v578_v52 = vand.u32 2147483647, %v568_v44 }
 0x790   :  { %1319 = vpow2.f32 %v1225_v62 }
 0x791   :  { %v581_v55 = vor.u32 1.1754944e-38, %v580_v50  ;;  %vm579_vm13 = vcmp.eq.f32.partialorder %v578_v52, 8.507059e+37 }
 0x795   :  { %v1318_v45 = vpop.eup %1317 }
 0x796   :  { %v570_v46 = vmul.f32 %v1318_v45, %v568_v44  ;;  %vm575_vm9 = vweird.f32 %v1318_v45  ;;  %v1320_v63 = vpop.eup %1319 }
 0x797   :  { %vm576_vm11 = vmor %vm574_vm10, %vm575_vm9  ;;  %v649_v6 = vadd.f32 1.0, %v1320_v63 }
 0x798   :  { %v571_v47 = vsub.f32 1.0, %v570_v46  ;;  %v1228_v46 = vld [vmem:[%s2078_s0 + $0x40] sm:$0xff] }
 0x799   :  { %1321 = vrcp.f32 %v649_v6  ;;  %v661_v61 = vand.u32 2147483648, %v649_v6  ;;  %vm655_vm15 = vweird.f32 %v649_v6  ;;  %v659_v14 = vand.u32 2147483647, %v649_v6 }
 0x79a   :  { %v572_v48 = vmul.f32 %v1318_v45, %v571_v47 }
 0x79b   :  { %v662_v19 = vor.u32 1.1754944e-38, %v661_v61  ;;  %vm660_vm2 = vcmp.eq.f32.partialorder %v659_v14, 8.507059e+37 }
 0x79c   :  { %v573_v49 = vadd.f32 %v1318_v45, %v572_v48  ;;  %v1233_v48 = vld [vmem:[%s2078_s0 + $0x28] sm:$0xff] }
 0x79e   :  { %v577_v54 = vsel %vm576_vm11, %v1318_v45, %v573_v49 }
 0x79f   :  { %v582_v59 = vsel %vm579_vm13, %v581_v55, %v577_v54  ;;  %v1322_v11 = vpop.eup %1321 }
 0x7a0   :  { %v651_v12 = vmul.f32 %v1322_v11, %v649_v6  ;;  %vm656_vm14 = vweird.f32 %v1322_v11  ;;  %v585_v28 = vmul.f32 %v582_v59, %v1766_v7 }
 0x7a1   :  { %vm657_vm1 = vmor %vm655_vm15, %vm656_vm14 }
 0x7a2   :  { %v652_v15 = vsub.f32 1.0, %v651_v12 }
 0x7a4   :  { %v653_v18 = vmul.f32 %v1322_v11, %v652_v15 }
 0x7a6   :  { %v654_v22 = vadd.f32 %v1322_v11, %v653_v18 }
 0x7a8   :  { %v658_v30 = vsel %vm657_vm1, %v1322_v11, %v654_v22 }
 0x7a9   :  { %v663_v21 = vsel %vm660_vm2, %v662_v19, %v658_v30 }
 0x7aa   :  { %v666_v57 = vmul.f32 %v663_v21, %v1777_v32 }
 0x7c7   :  { %v588_v58 = vpop.permute.xlu2 %587 }
 0x7c8   :  { %v590_v60 = vmul.f32 %v588_v58, %v582_v59 }
 0x7ca   :  { %592 = vrot.lane.b32.xlu1 %v590_v60, %s1375_s15 }
 0x7fe   :  { %v669_v24 = vpop.permute.xlu0 %668 }
 0x7ff   :  { %v671_v13 = vmul.f32 %v669_v24, %v663_v21 }
 0x801   :  { %673 = vrot.lane.b32.xlu2 %v671_v13, %s1375_s15 }
 0x809   :  { %607 = vperm.xlu2 %1260, %v605_v1  }
 0x83c   :  { %v593_v8 = vpop.permute.xlu1 %592 }
 0x83d   :  { %v1769_v35 = vadd.f32 %v593_v8, %v585_v28 }
 0x83f   :  { %1323 = vtanh.f32 %v1769_v35 }
 0x845   :  { %v1324_v36 = vpop.eup %1323 }
 0x846   :  { %598 = vrot.lane.b32.xlu0 %v1324_v36, %s1376_s23 }
 0x84e   :  { %687 = vperm.xlu0 %1261, %v605_v1  }
 0x85b   :  { %v674_v25 = vpop.permute.xlu2 %673 }
 0x85c   :  { %v1780_v37 = vadd.f32 %v674_v25, %v666_v57 }
 0x85e   :  { %1325 = vtanh.f32 %v1780_v37 }
 0x863   :  { %v1784_v39 = vpop.permute.xlu2 %607 }
 0x864   :  { %v1326_v38 = vpop.eup %1325  ;;  %vm609_vm4 = vcmp.eq.s32.totalorder %v1784_v39, 1 }
 0x865   :  { %679 = vrot.lane.b32.xlu1 %v1326_v38, %s1376_s23 }
 0x8b8   :  { %v599_v40 = vpop.permute.xlu0 %598 }
 0x8b9   :  { %v1786_v41 = vmul.f32 %v599_v40, %v582_v59 }
 0x8bb   :  { %v1793_v29 = vsel %vm609_vm4, %v1786_v41, %v1728_v34  ;;  %v612_v10 = vsel %vm609_vm4, %v1786_v41, 0.0 }
 0x8bc   :  { %700 = vrot.lane.b32.xlu1 %v1793_v29, %s1375_s15 }
 0x8c0   :  { %v1797_v16 = vpop.permute.xlu0 %687 }
 0x8c1   :  { %vm689_vm5 = vcmp.eq.s32.totalorder %v1797_v16, 1 }
 0x8d7   :  { %v680_v4 = vpop.permute.xlu1 %679 }
 0x8d8   :  { %v682_v42 = vmul.f32 %v680_v4, %v663_v21 }
 0x8da   :  { %v1803_v43 = vsel %vm689_vm5, %v682_v42, %v1738_v3  ;;  %v1807_v44 = vsel %vm689_vm5, %v682_v42, 0.0 }
 0x8db   :  { %779 = vrot.lane.b32.xlu2 %v1803_v43, %s1375_s15 }
 0x92e   :  { %v701_v34 = vpop.permute.xlu1 %700 }
 0x92f   :  { %1229 = vmatmul.msk.f32.vlgmr.msra.gmra.mxu0 %vm37_vm0, %v701_v34  ;;  %v1828_v34 = vsel %vm609_vm4, %v1769_v35, %v1766_v7 }
 0x935   :  { %v780_v45 = vpop.permute.xlu2 %779 }
 0x936   :  { %1234 = vmatmul.msk.f32.vlgmr.msra.gmra.mxu1 %vm37_vm0, %v780_v45 }
 0x9ac   :  { %v721_v47 = vpop.f32.mrf.mxu0 }
 0x9ad   :  { %v724_v3 = vadd.f32 %v1228_v46, %v721_v47 }
 0x9af   :  { %1327 = vtanh.f32 %v724_v3  ;;  %v1230_v55 = vmul.f32 -1.442695, %v724_v3 }
 0x9b3   :  { %v800_v49 = vpop.f32.mrf.mxu1 }
 0x9b4   :  { %v803_v50 = vadd.f32 %v1233_v48, %v800_v49 }
 0x9b5   :  { %v1328_v52 = vpop.eup %1327 }
 0x9b6   :  { %1329 = vtanh.f32 %v803_v50  ;;  %747 = vrot.lane.b32.xlu0 %v1328_v52, %s1376_s23  ;;  %v1235_v58 = vmul.f32 -1.442695, %v803_v50 }
 0x9b7   :  { %1331 = vpow2.f32 %v1230_v55 }
 0x9b8   :  { %1333 = vpow2.f32 %v1235_v58 }
 0x9bc   :  { %v1330_v54 = vpop.eup %1329 }
 0x9bd   :  { %826 = vrot.lane.b32.xlu1 %v1330_v54, %s1376_s23  ;;  %v1332_v59 = vpop.eup %1331 }
 0x9be   :  { %v728_v60 = vadd.f32 1.0, %v1332_v59  ;;  %v1334_v62 = vpop.eup %1333 }
 0x9bf   :  { %v807_v63 = vadd.f32 1.0, %v1334_v62 }
 0x9c0   :  { %1335 = vrcp.f32 %v728_v60  ;;  %v740_v30 = vand.u32 2147483648, %v728_v60  ;;  %vm734_vm9 = vweird.f32 %v728_v60  ;;  %v738_v19 = vand.u32 2147483647, %v728_v60 }
 0x9c1   :  { %1337 = vrcp.f32 %v807_v63  ;;  %v819_v36 = vand.u32 2147483648, %v807_v63  ;;  %vm813_vm14 = vweird.f32 %v807_v63  ;;  %v817_v57 = vand.u32 2147483647, %v807_v63 }
 0x9c2   :  { %v741_v13 = vor.u32 1.1754944e-38, %v740_v30  ;;  %vm739_vm11 = vcmp.eq.f32.partialorder %v738_v19, 8.507059e+37 }
 0x9c3   :  { %v820_v38 = vor.u32 1.1754944e-38, %v819_v36  ;;  %vm818_vm1 = vcmp.eq.f32.partialorder %v817_v57, 8.507059e+37 }
 0x9c6   :  { %v1336_v6 = vpop.eup %1335 }
 0x9c7   :  { %v730_v11 = vmul.f32 %v1336_v6, %v728_v60  ;;  %v1338_v12 = vpop.eup %1337  ;;  %vm735_vm7 = vweird.f32 %v1336_v6  ;;  %v1238_v60 = vld [vmem:[%s2078_s0 + $0x50] sm:$0xff] }
 0x9c8   :  { %v809_v18 = vmul.f32 %v1338_v12, %v807_v63  ;;  %vm736_vm10 = vmor %vm734_vm9, %vm735_vm7  ;;  %vm814_vm13 = vweird.f32 %v1338_v12 }
 0x9c9   :  { %v731_v15 = vsub.f32 1.0, %v730_v11  ;;  %vm815_vm15 = vmor %vm813_vm14, %vm814_vm13 }
 0x9ca   :  { %v810_v61 = vsub.f32 1.0, %v809_v18 }
 0x9cb   :  { %v732_v22 = vmul.f32 %v1336_v6, %v731_v15 }
 0x9cc   :  { %v811_v21 = vmul.f32 %v1338_v12, %v810_v61 }
 0x9cd   :  { %v733_v14 = vadd.f32 %v1336_v6, %v732_v22 }
 0x9ce   :  { %v812_v28 = vadd.f32 %v1338_v12, %v811_v21 }
 0x9cf   :  { %v737_v24 = vsel %vm736_vm10, %v1336_v6, %v733_v14  ;;  %v1243_v6 = vld [vmem:[%s2078_s0 + $0x18] sm:$0xff] }
 0x9d0   :  { %v742_v31 = vsel %vm739_vm11, %v741_v13, %v737_v24  ;;  %v816_v25 = vsel %vm815_vm15, %v1338_v12, %v812_v28 }
 0x9d1   :  { %v821_v4 = vsel %vm818_vm1, %v820_v38, %v816_v25  ;;  %v745_v45 = vmul.f32 %v742_v31, %v1828_v34 }
 0xa28   :  { %v748_v1 = vpop.permute.xlu0 %747 }
 0xa29   :  { %v750_v8 = vmul.f32 %v748_v1, %v742_v31 }
 0xa2b   :  { %752 = vrot.lane.b32.xlu2 %v750_v8, %s1375_s15 }
 0xa2f   :  { %v827_v40 = vpop.permute.xlu1 %826 }
 0xa30   :  { %v829_v42 = vmul.f32 %v827_v40, %v821_v4 }
 0xa32   :  { %831 = vrot.lane.b32.xlu0 %v829_v42, %s1375_s15 }
 0xa3a   :  { %766 = vperm.xlu0 %1261, %v1715_v0   ;;  %v1840_v0 = vsel %vm689_vm5, %v1780_v37, %v1777_v32 }
 0xa3b   :  { %v824_v7 = vmul.f32 %v821_v4, %v1840_v0 }
 0xa85   :  { %v753_v46 = vpop.permute.xlu2 %752 }
 0xa86   :  { %v1831_v47 = vadd.f32 %v753_v46, %v745_v45 }
 0xa88   :  { %1339 = vtanh.f32 %v1831_v47 }
 0xa8e   :  { %v1340_v3 = vpop.eup %1339 }
 0xa8f   :  { %758 = vrot.lane.b32.xlu1 %v1340_v3, %s1376_s23 }
 0xa97   :  { %845 = vperm.xlu1 %1262, %v1687_v23  }
 0xaa4   :  { %v832_v35 = vpop.permute.xlu0 %831 }
 0xaa5   :  { %v1843_v48 = vadd.f32 %v832_v35, %v824_v7 }
 0xaa7   :  { %1341 = vtanh.f32 %v1843_v48 }
 0xaac   :  { %v1847_v50 = vpop.permute.xlu0 %766 }
 0xaad   :  { %v1342_v49 = vpop.eup %1341  ;;  %vm768_vm2 = vcmp.eq.s32.totalorder %v1847_v50, 1 }
 0xaae   :  { %837 = vrot.lane.b32.xlu2 %v1342_v49, %s1376_s23 }
 0xb01   :  { %v759_v52 = vpop.permute.xlu1 %758 }
 0xb02   :  { %v1849_v23 = vmul.f32 %v759_v52, %v742_v31 }
 0xb04   :  { %v1856_v32 = vsel %vm768_vm2, %v1849_v23, %v1793_v29  ;;  %v771_v56 = vsel %vm768_vm2, %v1849_v23, 0.0 }
 0xb05   :  { %858 = vrot.lane.b32.xlu2 %v1856_v32, %s1375_s15 }
 0xb08   :  { %v838_v37 = vpop.permute.xlu2 %837 }
 0xb09   :  { %v840_v16 = vmul.f32 %v838_v37, %v821_v4  ;;  %v1860_v54 = vpop.permute.xlu1 %845 }
 0xb0a   :  { %vm847_vm3 = vcmp.eq.s32.totalorder %v1860_v54, 1 }
 0xb0b   :  { %v1866_v55 = vsel %vm847_vm3, %v840_v16, %v1803_v43  ;;  %v1870_v58 = vsel %vm847_vm3, %v840_v16, 0.0 }
 0xb0c   :  { %937 = vrot.lane.b32.xlu0 %v1866_v55, %s1375_s15 }
 0xb5f   :  { %v859_v29 = vpop.permute.xlu2 %858 }
 0xb60   :  { %1239 = vmatmul.msk.f32.vlgmr.msra.gmra.mxu2 %vm37_vm0, %v859_v29 }
 0xb7e   :  { %v938_v59 = vpop.permute.xlu0 %937 }
 0xb7f   :  { %1244 = vmatmul.msk.f32.vlgmr.msra.gmra.mxu3 %vm37_vm0, %v938_v59  ;;  %v1891_v59 = vsel %vm768_vm2, %v1831_v47, %v1828_v34 }
 0xbe3   :  { %v879_v62 = vpop.f32.mrf.mxu2 }
 0xbe4   :  { %v882_v43 = vadd.f32 %v1238_v60, %v879_v62 }
 0xbe6   :  { %1343 = vtanh.f32 %v882_v43  ;;  %v1240_v18 = vmul.f32 -1.442695, %v882_v43 }
 0xbec   :  { %v1344_v63 = vpop.eup %1343 }
 0xbed   :  { %905 = vrot.lane.b32.xlu1 %v1344_v63, %s1376_s23  ;;  %v1901_v63 = vsel %vm847_vm3, %v1843_v48, %v1840_v0 }
 0xc02   :  { %v958_v11 = vpop.f32.mrf.mxu3 }
 0xc03   :  { %v961_v12 = vadd.f32 %v1243_v6, %v958_v11 }
 0xc05   :  { %1345 = vtanh.f32 %v961_v12  ;;  %v1245_v22 = vmul.f32 -1.442695, %v961_v12 }
 0xc06   :  { %1347 = vpow2.f32 %v1240_v18 }
 0xc07   :  { %1349 = vpow2.f32 %v1245_v22 }
 0xc0b   :  { %v1346_v15 = vpop.eup %1345 }
 0xc0c   :  { %984 = vrot.lane.b32.xlu2 %v1346_v15, %s1376_s23  ;;  %v1348_v61 = vpop.eup %1347 }
 0xc0d   :  { %v886_v14 = vadd.f32 1.0, %v1348_v61  ;;  %v1350_v30 = vpop.eup %1349 }
 0xc0e   :  { %v965_v19 = vadd.f32 1.0, %v1350_v30  ;;  %v1248_v30 = vld [vmem:[%s2078_s0 + $0x60] sm:$0xff] }
 0xc0f   :  { %1351 = vrcp.f32 %v886_v14  ;;  %v898_v57 = vand.u32 2147483648, %v886_v14  ;;  %vm892_vm7 = vweird.f32 %v886_v14  ;;  %v896_v25 = vand.u32 2147483647, %v886_v14 }
 0xc10   :  { %1353 = vrcp.f32 %v965_v19  ;;  %v977_v7 = vand.u32 2147483648, %v965_v19  ;;  %vm971_vm13 = vweird.f32 %v965_v19  ;;  %v975_v35 = vand.u32 2147483647, %v965_v19 }
 0xc11   :  { %v899_v4 = vor.u32 1.1754944e-38, %v898_v57  ;;  %vm897_vm10 = vcmp.eq.f32.partialorder %v896_v25, 8.507059e+37 }
 0xc12   :  { %v978_v52 = vor.u32 1.1754944e-38, %v977_v7  ;;  %vm976_vm15 = vcmp.eq.f32.partialorder %v975_v35, 8.507059e+37 }
 0xc15   :  { %v1352_v21 = vpop.eup %1351 }
 0xc16   :  { %v888_v24 = vmul.f32 %v1352_v21, %v886_v14  ;;  %v1354_v13 = vpop.eup %1353  ;;  %vm893_vm5 = vweird.f32 %v1352_v21 }
 0xc17   :  { %v967_v1 = vmul.f32 %v1354_v13, %v965_v19  ;;  %vm894_vm9 = vmor %vm892_vm7, %vm893_vm5  ;;  %vm972_vm11 = vweird.f32 %v1354_v13 }
 0xc18   :  { %v889_v31 = vsub.f32 1.0, %v888_v24  ;;  %vm973_vm14 = vmor %vm971_vm13, %vm972_vm11  ;;  %v1092_v24 = vld [vmem:[%s2078_s0 + $0x8] sm:$0xff] }
 0xc19   :  { %v968_v8 = vsub.f32 1.0, %v967_v1 }
 0xc1a   :  { %v890_v28 = vmul.f32 %v1352_v21, %v889_v31 }
 0xc1b   :  { %v969_v38 = vmul.f32 %v1354_v13, %v968_v8 }
 0xc1c   :  { %v891_v36 = vadd.f32 %v1352_v21, %v890_v28 }
 0xc1d   :  { %v970_v46 = vadd.f32 %v1354_v13, %v969_v38 }
 0xc1e   :  { %v895_v40 = vsel %vm894_vm9, %v1352_v21, %v891_v36 }
 0xc1f   :  { %v900_v45 = vsel %vm897_vm10, %v899_v4, %v895_v40  ;;  %v974_v49 = vsel %vm973_vm14, %v1354_v13, %v970_v46 }
 0xc20   :  { %v979_v16 = vsel %vm976_vm15, %v978_v52, %v974_v49  ;;  %v903_v60 = vmul.f32 %v900_v45, %v1891_v59 }
 0xc5f   :  { %v906_v42 = vpop.permute.xlu1 %905 }
 0xc60   :  { %v908_v3 = vmul.f32 %v906_v42, %v900_v45 }
 0xc62   :  { %910 = vrot.lane.b32.xlu0 %v908_v3, %s1375_s15 }
 0xc66   :  { %v985_v37 = vpop.permute.xlu2 %984 }
 0xc67   :  { %v987_v29 = vmul.f32 %v985_v37, %v979_v16 }
 0xc69   :  { %989 = vrot.lane.b32.xlu1 %v987_v29, %s1375_s15 }
 0xc71   :  { %924 = vperm.xlu1 %1262, %v1633_v53   ;;  %v982_v53 = vmul.f32 %v979_v16, %v1901_v63 }
 0xcd4   :  { %v911_v62 = vpop.permute.xlu0 %910 }
 0xcd5   :  { %v1894_v43 = vadd.f32 %v911_v62, %v903_v60 }
 0xcd7   :  { %1355 = vtanh.f32 %v1894_v43 }
 0xcdb   :  { %v990_v6 = vpop.permute.xlu1 %989 }
 0xcdc   :  { %v1904_v11 = vadd.f32 %v990_v6, %v982_v53 }
 0xcdd   :  { %v1356_v34 = vpop.eup %1355 }
 0xcde   :  { %1357 = vtanh.f32 %v1904_v11  ;;  %916 = vrot.lane.b32.xlu2 %v1356_v34, %s1376_s23 }
 0xce3   :  { %v1910_v12 = vpop.permute.xlu1 %924 }
 0xce4   :  { %v1358_v47 = vpop.eup %1357  ;;  %vm926_vm1 = vcmp.eq.s32.totalorder %v1910_v12, 1 }
 0xce5   :  { %995 = vrot.lane.b32.xlu0 %v1358_v47, %s1376_s23 }
 0xce6   :  { %1003 = vperm.xlu2 %1260, %v1603_v51  }
 0xd38   :  { %v917_v54 = vpop.permute.xlu2 %916 }
 0xd39   :  { %v1912_v0 = vmul.f32 %v917_v54, %v900_v45 }
 0xd3b   :  { %v927_v48 = vsel %vm926_vm1, %v1912_v0, %v1856_v32 }
 0xd3c   :  { %1016 = vrot.lane.b32.xlu0 %v927_v48, %s1375_s15 }
 0xd40   :  { %v1920_v15 = vpop.permute.xlu2 %1003 }
 0xd41   :  { %vm1005_vm3 = vcmp.eq.s32.totalorder %v1920_v15, 1 }
 0xd57   :  { %v996_v18 = vpop.permute.xlu0 %995 }
 0xd58   :  { %v998_v22 = vmul.f32 %v996_v18, %v979_v16 }
 0xd5a   :  { %v1006_v51 = vsel %vm1005_vm3, %v998_v22, %v1866_v55  ;;  %v1928_v61 = vsel %vm1005_vm3, %v998_v22, 0.0 }
 0xd5b   :  { %1094 = vrot.lane.b32.xlu1 %v1006_v51, %s1375_s15 }
 0xdae   :  { %v1017_v14 = vpop.permute.xlu0 %1016 }
 0xdaf   :  { %1249 = vmatmul.msk.f32.vlgmr.msrb.gmra.mxu0 %vm37_vm0, %v1017_v14  ;;  %v1251_v14 = vld [vmem:[%s2079_s2 + $0x30] sm:$0xff] }
 0xdcd   :  { %v1095_v32 = vpop.permute.xlu1 %1094 }
 0xdce   :  { %1253 = vmatmul.msk.f32.vlgmr.msrb.gmra.mxu1 %vm37_vm0, %v1095_v32 }
 0xe2c   :  { %v1037_v19 = vpop.f32.mrf.mxu0 }
 0xe2d   :  { %v1040_v21 = vadd.f32 %v1248_v30, %v1037_v19  ;;  %v448_v30 = vsel %vm445_vm6, %v1721_v2, 0.0  ;;  %v929_v19 = vsel %vm926_vm1, %v1912_v0, 0.0 }
 0xe2f   :  { %1359 = vtanh.f32 %v1040_v21  ;;  %v1250_v28 = vmul.f32 -1.442695, %v1040_v21 }
 0xe35   :  { %v1360_v55 = vpop.eup %1359 }
 0xe36   :  { %1063 = vrot.lane.b32.xlu2 %v1360_v55, %s1376_s23 }
 0xe4b   :  { %v1115_v13 = vpop.f32.mrf.mxu1 }
 0xe4c   :  { %v1118_v31 = vadd.f32 %v1115_v13, %v1092_v24 }
 0xe4e   :  { %1361 = vtanh.f32 %v1118_v31  ;;  %v1254_v52 = vmul.f32 -1.442695, %v1118_v31 }
 0xe4f   :  { %1363 = vpow2.f32 %v1250_v28 }
 0xe54   :  { %v1362_v1 = vpop.eup %1361 }
 0xe55   :  { %1141 = vrot.lane.b32.xlu0 %v1362_v1, %s1376_s23  ;;  %v1364_v8 = vpop.eup %1363 }
 0xe56   :  { %v1044_v36 = vadd.f32 1.0, %v1364_v8 }
 0xe58   :  { %1365 = vrcp.f32 %v1044_v36  ;;  %v1056_v42 = vand.u32 2147483648, %v1044_v36  ;;  %vm1050_vm7 = vweird.f32 %v1044_v36  ;;  %v1054_v45 = vand.u32 2147483647, %v1044_v36 }
 0xe59   :  { %1367 = vpow2.f32 %v1254_v52 }
 0xe5a   :  { %v1057_v3 = vor.u32 1.1754944e-38, %v1056_v42  ;;  %vm1055_vm10 = vcmp.eq.f32.partialorder %v1054_v45, 8.507059e+37 }
 0xe5e   :  { %v1366_v57 = vpop.eup %1365 }
 0xe5f   :  { %v1046_v25 = vmul.f32 %v1366_v57, %v1044_v36  ;;  %vm1051_vm5 = vweird.f32 %v1366_v57  ;;  %v1368_v37 = vpop.eup %1367 }
 0xe60   :  { %vm1052_vm9 = vmor %vm1050_vm7, %vm1051_vm5  ;;  %v1122_v16 = vadd.f32 1.0, %v1368_v37  ;;  %vm1079_vm5 = vcmp.gt.f32.partialorder %v1251_v14, 0.5 }
 0xe61   :  { %v1047_v38 = vsub.f32 1.0, %v1046_v25  ;;  %v1080_v32 = vsel %vm1079_vm5, 1, %v1377_v27 }
 0xe62   :  { %1369 = vrcp.f32 %v1122_v16  ;;  %v1134_v34 = vand.u32 2147483648, %v1122_v16  ;;  %vm1128_vm13 = vweird.f32 %v1122_v16  ;;  %v1132_v47 = vand.u32 2147483647, %v1122_v16 }
 0xe63   :  { %v1048_v40 = vmul.f32 %v1366_v57, %v1047_v38 }
 0xe64   :  { %v1135_v48 = vor.u32 1.1754944e-38, %v1134_v34  ;;  %vm1133_vm15 = vcmp.eq.f32.partialorder %v1132_v47, 8.507059e+37 }
 0xe65   :  { %v1049_v4 = vadd.f32 %v1366_v57, %v1048_v40 }
 0xe67   :  { %v1053_v46 = vsel %vm1052_vm9, %v1366_v57, %v1049_v4 }
 0xe68   :  { %v1941_v35 = vsel %vm1055_vm10, %v1057_v3, %v1053_v46  ;;  %v1370_v29 = vpop.eup %1369 }
 0xe69   :  { %v1124_v60 = vmul.f32 %v1370_v29, %v1122_v16  ;;  %vm1129_vm11 = vweird.f32 %v1370_v29 }
 0xe6a   :  { %vm1130_vm14 = vmor %vm1128_vm13, %vm1129_vm11 }
 0xe6b   :  { %v1125_v62 = vsub.f32 1.0, %v1124_v60 }
 0xe6d   :  { %v1126_v53 = vmul.f32 %v1370_v29, %v1125_v62 }
 0xe6f   :  { %v1127_v6 = vadd.f32 %v1370_v29, %v1126_v53 }
 0xe71   :  { %v1131_v54 = vsel %vm1130_vm14, %v1370_v29, %v1127_v6 }
 0xe72   :  { %v1945_v18 = vsel %vm1133_vm15, %v1135_v48, %v1131_v54 }
 0xe90   :  { %v1064_v7 = vpop.permute.xlu2 %1063 }
 0xe91   :  { %v1066_v49 = vmul.f32 %v1064_v7, %v1941_v35 }
 0xe93   :  { %1068 = vrot.lane.b32.xlu1 %v1066_v49, %s1375_s15 }
 0xec7   :  { %v1142_v22 = vpop.permute.xlu0 %1141 }
 0xec8   :  { %v1144_v51 = vmul.f32 %v1142_v22, %v1945_v18 }
 0xeca   :  { %1146 = vrot.lane.b32.xlu2 %v1144_v51, %s1375_s15 }
 0xed2   :  { %1082 = vperm.xlu2 %1260, %v1080_v32  }
 0xeda   :  { %203 = vrot.lane.b32.xlu2 %v1566_v17, %s1376_s23  ;;  %v928_v17 = vsel %vm926_vm1, %v1894_v43, %v1891_v59  ;;  %v284_v59 = vsel %vm281_vm8, %v1638_v26, 0.0  ;;  %v1007_v43 = vsel %vm1005_vm3, %v1904_v11, %v1901_v63  ;;  %vm207_vm8 = vcmask 523520  }
 0xedb   :  { %v1061_v21 = vmul.f32 %v1941_v35, %v928_v17  ;;  %v1139_v12 = vmul.f32 %v1945_v18, %v1007_v43 }
 0xee2   :  { %450 = vrot.lane.b32.xlu2 %v448_v30, %s1375_s15 }
 0xeea   :  { %694 = vrot.lane.b32.xlu2 %v1807_v44, %s1376_s23  ;;  %v1156_v44 = vld [vmem:[%s2079_s2] sm:$0xff] }
 0xeeb   :  { %vm1157_vm6 = vcmp.gt.f32.partialorder %v1156_v44, 0.5 }
 0xeec   :  { %v1158_v0 = vsel %vm1157_vm6, 1, %v1377_v27 }
 0xef2   :  { %931 = vrot.lane.b32.xlu2 %v929_v19, %s1375_s15 }
 0xf05   :  { %v1069_v20 = vpop.permute.xlu1 %1068 }
 0xf06   :  { %v1071_v2 = vadd.f32 %v1069_v20, %v1061_v21 }
 0xf08   :  { %1371 = vtanh.f32 %v1071_v2 }
 0xf0e   :  { %v1372_v55 = vpop.eup %1371 }
 0xf0f   :  { %1074 = vrot.lane.b32.xlu0 %v1372_v55, %s1376_s23 }
 0xf17   :  { %1160 = vperm.xlu0 %1261, %v1158_v0  }
 0xf1f   :  { %286 = vrot.lane.b32.xlu0 %v284_v59, %s1375_s15 }
 0xf24   :  { %v1147_v24 = vpop.permute.xlu2 %1146 }
 0xf25   :  { %v1149_v13 = vadd.f32 %v1147_v24, %v1139_v12 }
 0xf27   :  { %1373 = vtanh.f32 %v1149_v13  ;;  %532 = vrot.lane.b32.xlu0 %v1742_v5, %s1376_s23  ;;  %v115_v5 = vsel %vm109_vm12, %v1570_v9, 0.0 }
 0xf2c   :  { %v1083_v27 = vpop.permute.xlu2 %1082 }
 0xf2d   :  { %v1374_v31 = vpop.eup %1373  ;;  %vm1084_vm1 = vcmp.eq.s32.totalorder %v1083_v27, 1 }
 0xf2e   :  { %1152 = vrot.lane.b32.xlu1 %v1374_v31, %s1376_s23  ;;  %v1085_v23 = vsel %vm1084_vm1, %v1071_v2, %v928_v17 }
 0xf2f   :  { %773 = vrot.lane.b32.xlu0 %v771_v56, %s1375_s15 }
 0xf34   :  { %v204_v26 = vpop.permute.xlu2 %203 }
 0xf35   :  { %1197 = vst.msk [vmem:[%s2080_s5 + $0x30] sm:$0xff] %vm207_vm8, %v204_v26 }
 0xf36   :  { %117 = vrot.lane.b32.xlu1 %v115_v5, %s1375_s15 }
 0xf37   :  { %1010 = vrot.lane.b32.xlu0 %v1928_v61, %s1376_s23 }
 0xf3c   :  { %v451_v50 = vpop.permute.xlu2 %450 }
 0xf3d   :  { %1212 = vst.msk [vmem:[%s2080_s5 + $0x10] sm:$0xff] %vm37_vm0, %v451_v50 }
 0xf3e   :  { %368 = vrot.lane.b32.xlu1 %v1659_v33, %s1376_s23 }
 0xf3f   :  { %1171 = vrot.lane.b32.xlu0 %v1085_v23, %s1378_s26 }
 0xf44   :  { %v695_v8 = vpop.permute.xlu2 %694 }
 0xf46   :  { %614 = vrot.lane.b32.xlu1 %v612_v10, %s1375_s15 }
 0xf4c   :  { %v932_v38 = vpop.permute.xlu2 %931 }
 0xf4e   :  { %852 = vrot.lane.b32.xlu1 %v1870_v58, %s1376_s23 }
 0xf81   :  { %v1075_v9 = vpop.permute.xlu0 %1074 }
 0xf82   :  { %v1077_v63 = vmul.f32 %v1075_v9, %v1941_v35 }
 0xf84   :  { %v1086_v11 = vsel %vm1084_vm1, %v1077_v63, 0.0 }
 0xf85   :  { %1088 = vrot.lane.b32.xlu1 %v1086_v11, %s1375_s15 }
 0xf89   :  { %v1161_v15 = vpop.permute.xlu0 %1160 }
 0xf8a   :  { %vm1162_vm12 = vcmp.eq.s32.totalorder %v1161_v15, 1 }
 0xf8b   :  { %v1163_v33 = vsel %vm1162_vm12, %v1149_v13, %v1007_v43 }
 0xf8d   :  { %1176 = vrot.lane.b32.xlu1 %v1163_v33, %s1378_s26 }
 0xf91   :  { %v287_v61 = vpop.permute.xlu0 %286 }
 0xf92   :  { %1202 = vst.msk [vmem:[%s2080_s5 + $0x8] sm:$0xff] %vm37_vm0, %v287_v61 }
 0xf99   :  { %v533_v39 = vpop.permute.xlu0 %532 }
 0xf9a   :  { %1217 = vst.msk [vmem:[%s2080_s5 + $0x20] sm:$0xff] %vm207_vm8, %v533_v39 }
 0xfa0   :  { %v1153_v41 = vpop.permute.xlu1 %1152 }
 0xfa1   :  { %v1155_v58 = vmul.f32 %v1153_v41, %v1945_v18  ;;  %v774_v1 = vpop.permute.xlu0 %773 }
 0xfa2   :  { %1232 = vst.msk [vmem:[%s2080_s5 + $0x20] sm:$0xff] %vm37_vm0, %v774_v1 }
 0xfa3   :  { %v1164_v28 = vsel %vm1162_vm12, %v1155_v58, 0.0 }
 0xfa4   :  { %1166 = vrot.lane.b32.xlu2 %v1164_v28, %s1376_s23 }
 0xfa8   :  { %v118_v36 = vpop.permute.xlu1 %117 }
 0xfa9   :  { %120 = vst.msk [vmem:[%s2080_s5] sm:$0xff] %vm37_vm0, %v118_v36  ;;  %v1011_v57 = vpop.permute.xlu0 %1010 }
 0xfaa   :  { %1247 = vst.msk [vmem:[%s2080_s5 + $0x8] sm:$0xff] %vm207_vm8, %v1011_v57 }
 0xfb0   :  { %v369_v25 = vpop.permute.xlu1 %368 }
 0xfb1   :  { %1207 = vst.msk [vmem:[%s2080_s5 + $0x28] sm:$0xff] %vm207_vm8, %v369_v25  ;;  %v1172_v40 = vpop.permute.xlu0 %1171 }
 0xfb2   :  { %1242 = vst.msk [vmem:[%s2080_s5 + $0x28] sm:$0xff] %vm37_vm0, %v932_v38 }
 0xfb3   :  { %1174 = vst.msk [vmem:[%s2081_s6] sm:$0xff] %vm37_vm0, %v1172_v40 }
 0xfb8   :  { %v615_v4 = vpop.permute.xlu1 %614 }
 0xfb9   :  { %1222 = vst.msk [vmem:[%s2080_s5 + $0x18] sm:$0xff] %vm37_vm0, %v615_v4 }
 0xfba   :  { %1227 = vst.msk [vmem:[%s2080_s5 + $0x18] sm:$0xff] %vm207_vm8, %v695_v8 }
 0xfc0   :  { %v853_v42 = vpop.permute.xlu1 %852 }
 0xfc1   :  { %1237 = vst.msk [vmem:[%s2080_s5 + $0x10] sm:$0xff] %vm207_vm8, %v853_v42 }
 0xff7   :  { %v1089_v45 = vpop.permute.xlu1 %1088 }
 0xff8   :  { %1252 = vst.msk [vmem:[%s2080_s5 + $0x30] sm:$0xff] %vm37_vm0, %v1089_v45 }
 0xffe   :  { %v1167_v46 = vpop.permute.xlu2 %1166 }
 0xfff   :  { %1169 = vst.msk [vmem:[%s2080_s5] sm:$0xff] %vm207_vm8, %v1167_v46  ;;  %v1177_v3 = vpop.permute.xlu1 %1176 }
0x1000   :  { %1255 = vst.msk [vmem:[%s2081_s6 + $0x8] sm:$0xff] %vm37_vm0, %v1177_v3 }

// kernel: dp_lstm_forward.14
= control target key start
LH: loop header
LB: loop body
LE: loop exit
PB: predicated region body
PF: predicated region fallthrough
CT: control target
= control target key end

     0   :  { %s1418_s15 = smov 32   ;;  %s2115_s0 = inlined_call_operand.vmem [shape: f32[7,8,256], index: 0, kind: input, shape index: {}]   ;;  %s2116_s1 = inlined_call_operand.vmem [shape: f32[64,128], index: 1, kind: input, shape index: {}]   ;;  %s2117_s2 = inlined_call_operand.vmem [shape: f32[7,8,1], index: 2, kind: input, shape index: {}]   ;;  %s2118_s3 = inlined_call_operand.vmem [shape: f32[2,8,32], index: 3, kind: input, shape index: {}, may-alias: {3,4}]   ;;  %s2119_s4 = inlined_call_operand.vmem [shape: f32[2,8,32], index: 4, kind: input, shape index: {}, may-alias: {3,4}]   ;;  %s2120_s5 = inlined_call_operand.vmem [shape: f32[7,8,64], index: 5, kind: output, shape index: {0}]   ;;  %s2121_s6 = inlined_call_operand.hbm [shape: f32[2,8,32], index: 6, kind: output, shape index: {1}]  }
   0x1   :  { %v1463_v0 = vld [vmem:[%s2116_s1 + $0x18] sm:$0xff]  ;;  %v1473_v2 = vld [vmem:[%s2116_s1 + $0x10] sm:$0xff]  ;;  %v1485_v4 = vld [vmem:[%s2116_s1 + $0x8] sm:$0xff] }
   0x2   :  { %v1468_v1 = vld [vmem:[%s2116_s1 + $0x38] sm:$0xff]  ;;  %54 = vmatpush.msra.mxu0 %v1463_v0  ;;  %v1480_v3 = vld [vmem:[%s2116_s1 + $0x30] sm:$0xff]  ;;  %v1490_v5 = vld [vmem:[%s2116_s1 + $0x28] sm:$0xff]  ;;  %229 = vmatpush.msra.mxu2 %v1463_v0 }
   0x3   :  { %139 = vmatpush.msra.mxu1 %v1468_v1  ;;  %311 = vmatpush.msra.mxu3 %v1468_v1  ;;  %v32_v6 = vld [vmem:[%s2119_s4] sm:$0xff] }
   0x4   :  { %55 = vmatpush.msra.mxu0 %v1473_v2  ;;  %v1502_v7 = vld [vmem:[%s2116_s1] sm:$0xff]  ;;  %84 = vrot.lane.b32.xlu1 %v32_v6, %s1418_s15 }
   0x5   :  { %140 = vmatpush.msra.mxu1 %v1480_v3  ;;  %v1507_v8 = vld [vmem:[%s2116_s1 + $0x20] sm:$0xff]  ;;  %312 = vmatpush.msra.mxu3 %v1480_v3 }
   0x6   :  { %12 = vsyncpa [#allocation3], 0  ;;  %56 = vmatpush.msra.mxu0 %v1485_v4  ;;  %v1516_v9 = vld [vmem:[%s2118_s3] sm:$0xff]  ;;  %vm38_vm0 = vcmask 261120   ;;  %v1521_v10 = vld [vmem:[%s2118_s3 + $0x8] sm:$0xff]  ;;  %230 = vmatpush.msra.mxu2 %v1473_v2  ;;  %s1419_s23 = smov 64  }
   0x7   :  { %141 = vmatpush.msra.mxu1 %v1490_v5  ;;  %313 = vmatpush.msra.mxu3 %v1490_v5  ;;  %v1205_v11 = vld [vmem:[%s2119_s4 + $0x8] sm:$0xff]  ;;  %v37_v12 = vld [vmem:[%s2115_s0] sm:$0xff]  ;;  %v1420_v27 = vmov 0   ;;  %s1421_s26 = smov 96   ;;  %v1211_v62 = vld [vmem:[%s2117_s2 + $0x30] sm:$0xff]  ;;  %s1422_s13 = smov [#allocation2]  }
   0x8   :  { %57 = vmatpush.msra.mxu0 %v1502_v7  ;;  %231 = vmatpush.msra.mxu2 %v1485_v4  ;;  %v1208_v15 = vld [vmem:[%s2115_s0 + $0x68] sm:$0xff]  ;;  %v104_v51 = vld [vmem:[%s2117_s2] sm:$0xff]  ;;  %vm191_vm10 = vcmp.gt.f32.partialorder %v1211_v62, 0.5  ;;  %s1188_s14 = sshll.u32 %s1422_s13, 4  ;;  %s1423_s19 = smov 128   ;;  %s1189_s14 = int_to_ptr.vmem [resolvable:$true] %s1188_s14 }
   0x9   :  { %142 = vmatpush.msra.mxu1 %v1507_v8  ;;  %1206 = vmatmul.msk.f32.vlgmr.msra.gmra.mxu0 %vm38_vm0, %v1516_v9  ;;  %vm105_vm9 = vcmp.gt.f32.partialorder %v104_v51, 0.5  ;;  %v192_v63 = vsel %vm191_vm10, 1, %v1420_v27  ;;  %s1424_s1 = smov 8  }
   0xa   :  { %1209 = vmatmul.msk.f32.vlgmr.msra.gmra.mxu1 %vm38_vm0, %v1521_v10  ;;  %314 = vmatpush.msra.mxu3 %v1507_v8  ;;  %v106_v52 = vsel %vm105_vm9, 1, %v1420_v27 }
   0xb   :  { %393 = vmatpush.msrb.mxu0 %v1463_v0  ;;  %475 = vmatpush.msrb.mxu1 %v1468_v1 }
   0xc   :  { %232 = vmatpush.msra.mxu2 %v1502_v7  ;;  %638 = vmatpush.msrb.mxu3 %v1468_v1 }
   0xd   :  { %169 = vrot.lane.b32.xlu1 %v1205_v11, %s1418_s15  ;;  %394 = vmatpush.msrb.mxu0 %v1473_v2 }
   0xe   :  { %476 = vmatpush.msrb.mxu1 %v1480_v3  ;;  %557 = vmatpush.msrb.mxu2 %v1463_v0 }
   0xf   :  { %395 = vmatpush.msrb.mxu0 %v1485_v4  ;;  %639 = vmatpush.msrb.mxu3 %v1480_v3 }
  0x10   :  { %477 = vmatpush.msrb.mxu1 %v1490_v5  ;;  %558 = vmatpush.msrb.mxu2 %v1473_v2 }
  0x11   :  { %396 = vmatpush.msrb.mxu0 %v1502_v7  ;;  %640 = vmatpush.msrb.mxu3 %v1490_v5 }
  0x12   :  { %478 = vmatpush.msrb.mxu1 %v1507_v8  ;;  %559 = vmatpush.msrb.mxu2 %v1485_v4 }
  0x13   :  { %641 = vmatpush.msrb.mxu3 %v1507_v8  ;;  %717 = vmatpush.msra.mxu0 %v1463_v0 }
  0x14   :  { %560 = vmatpush.msrb.mxu2 %v1502_v7  ;;  %796 = vmatpush.msra.mxu1 %v1468_v1 }
  0x15   :  { %718 = vmatpush.msra.mxu0 %v1473_v2  ;;  %1277 = vset.pattern.permute.xlu2 %v1420_v27 }
  0x16   :  { %797 = vmatpush.msra.mxu1 %v1480_v3  ;;  %1278 = vset.pattern.permute.xlu0 %v1420_v27 }
  0x17   :  { %719 = vmatpush.msra.mxu0 %v1485_v4  ;;  %1279 = vset.pattern.permute.xlu1 %v1420_v27 }
  0x18   :  { %798 = vmatpush.msra.mxu1 %v1490_v5 }
  0x19   :  { %720 = vmatpush.msra.mxu0 %v1502_v7 }
  0x1a   :  { %799 = vmatpush.msra.mxu1 %v1507_v8 }
  0x76   :  { %v1581_v53 = vpop.permute.xlu1 %84 }
  0x7f   :  { %v1587_v57 = vpop.permute.xlu1 %169 }
  0x86   :  { %v59_v13 = vpop.f32.mrf.mxu0 }
  0x87   :  { %v62_v14 = vadd.f32 %v59_v13, %v37_v12  ;;  %v144_v16 = vpop.f32.mrf.mxu1 }
  0x88   :  { %v147_v17 = vadd.f32 %v1208_v15, %v144_v16 }
  0x89   :  { %1280 = vtanh.f32 %v62_v14  ;;  %v1207_v20 = vmul.f32 -1.442695, %v62_v14 }
  0x8a   :  { %1282 = vtanh.f32 %v147_v17  ;;  %v1210_v21 = vmul.f32 -1.442695, %v147_v17 }
  0x8b   :  { %1284 = vpow2.f32 %v1207_v20 }
  0x8c   :  { %1286 = vpow2.f32 %v1210_v21 }
  0x8f   :  { %v1281_v18 = vpop.eup %1280 }
  0x90   :  { %89 = vrot.lane.b32.xlu0 %v1281_v18, %s1419_s23  ;;  %v1283_v19 = vpop.eup %1282 }
  0x91   :  { %v1285_v22 = vpop.eup %1284 }
  0x92   :  { %v66_v23 = vadd.f32 1.0, %v1285_v22  ;;  %v1287_v24 = vpop.eup %1286  ;;  %v1218_v22 = vld [vmem:[%s2115_s0 + $0x58] sm:$0xff] }
  0x93   :  { %v151_v25 = vadd.f32 1.0, %v1287_v24 }
  0x94   :  { %1288 = vrcp.f32 %v66_v23  ;;  %v78_v35 = vand.u32 2147483648, %v66_v23  ;;  %vm72_vm2 = vweird.f32 %v66_v23  ;;  %v76_v36 = vand.u32 2147483647, %v66_v23 }
  0x95   :  { %1290 = vrcp.f32 %v151_v25  ;;  %vm157_vm5 = vweird.f32 %v151_v25  ;;  %v163_v44 = vand.u32 2147483648, %v151_v25  ;;  %v161_v45 = vand.u32 2147483647, %v151_v25 }
  0x96   :  { %v79_v39 = vor.u32 1.1754944e-38, %v78_v35  ;;  %vm77_vm4 = vcmp.eq.f32.partialorder %v76_v36, 8.507059e+37 }
  0x97   :  { %v164_v47 = vor.u32 1.1754944e-38, %v163_v44  ;;  %vm162_vm8 = vcmp.eq.f32.partialorder %v161_v45, 8.507059e+37 }
  0x98   :  { %174 = vrot.lane.b32.xlu0 %v1283_v19, %s1419_s23 }
  0x9a   :  { %v1289_v26 = vpop.eup %1288 }
  0x9b   :  { %v68_v28 = vmul.f32 %v1289_v26, %v66_v23  ;;  %v1291_v30 = vpop.eup %1290  ;;  %vm73_vm1 = vweird.f32 %v1289_v26 }
  0x9c   :  { %v153_v32 = vmul.f32 %v1291_v30, %v151_v25  ;;  %vm74_vm3 = vmor %vm72_vm2, %vm73_vm1  ;;  %vm158_vm6 = vweird.f32 %v1291_v30 }
  0x9d   :  { %v69_v29 = vsub.f32 1.0, %v68_v28  ;;  %vm159_vm7 = vmor %vm157_vm5, %vm158_vm6 }
  0x9e   :  { %v154_v34 = vsub.f32 1.0, %v153_v32 }
  0x9f   :  { %v70_v31 = vmul.f32 %v1289_v26, %v69_v29 }
  0xa0   :  { %v155_v38 = vmul.f32 %v1291_v30, %v154_v34 }
  0xa1   :  { %v71_v33 = vadd.f32 %v1289_v26, %v70_v31 }
  0xa2   :  { %v156_v42 = vadd.f32 %v1291_v30, %v155_v38 }
  0xa3   :  { %v75_v37 = vsel %vm74_vm3, %v1289_v26, %v71_v33  ;;  %v1213_v26 = vld [vmem:[%s2115_s0 + $0x10] sm:$0xff] }
  0xa4   :  { %v80_v40 = vsel %vm77_vm4, %v79_v39, %v75_v37  ;;  %v160_v46 = vsel %vm159_vm7, %v1291_v30, %v156_v42 }
  0xa5   :  { %v165_v48 = vsel %vm162_vm8, %v164_v47, %v160_v46  ;;  %v87_v54 = vmul.f32 %v1581_v53, %v80_v40 }
  0xa6   :  { %v172_v58 = vmul.f32 %v1587_v57, %v165_v48 }
 0x102   :  { %v90_v41 = vpop.permute.xlu0 %89 }
 0x103   :  { %v92_v43 = vmul.f32 %v90_v41, %v80_v40 }
 0x105   :  { %94 = vrot.lane.b32.xlu2 %v92_v43, %s1418_s15 }
 0x10a   :  { %v175_v49 = vpop.permute.xlu0 %174 }
 0x10b   :  { %v177_v50 = vmul.f32 %v175_v49, %v165_v48  ;;  %v1216_v49 = vld [vmem:[%s2117_s2 + $0x8] sm:$0xff] }
 0x10c   :  { %vm277_vm2 = vcmp.gt.f32.partialorder %v1216_v49, 0.5 }
 0x10d   :  { %179 = vrot.lane.b32.xlu2 %v177_v50, %s1418_s15  ;;  %v1649_v51 = vsel %vm277_vm2, 1, %v1420_v27 }
 0x115   :  { %108 = vperm.xlu2 %1277, %v106_v52  }
 0x11d   :  { %197 = vrot.lane.b32.xlu2 %v1521_v10, %s1421_s26 }
 0x15f   :  { %v95_v55 = vpop.permute.xlu2 %94 }
 0x160   :  { %v1584_v56 = vadd.f32 %v95_v55, %v87_v54 }
 0x162   :  { %1292 = vtanh.f32 %v1584_v56 }
 0x167   :  { %v180_v59 = vpop.permute.xlu2 %179 }
 0x168   :  { %v1293_v60 = vpop.eup %1292  ;;  %v1590_v61 = vadd.f32 %v180_v59, %v172_v58 }
 0x169   :  { %100 = vrot.lane.b32.xlu0 %v1293_v60, %s1419_s23 }
 0x16a   :  { %1294 = vtanh.f32 %v1590_v61 }
 0x16f   :  { %v1601_v10 = vpop.permute.xlu2 %108 }
 0x170   :  { %v1295_v6 = vpop.eup %1294  ;;  %vm110_vm12 = vcmp.eq.s32.totalorder %v1601_v10, 1 }
 0x171   :  { %185 = vrot.lane.b32.xlu1 %v1295_v6, %s1419_s23  ;;  %194 = vperm.xlu0 %1278, %v192_v63  }
 0x177   :  { %v198_v12 = vpop.permute.xlu2 %197 }
 0x179   :  { %111 = vrot.lane.b32.xlu1 %v1516_v9, %s1421_s26 }
 0x1db   :  { %v101_v11 = vpop.permute.xlu0 %100 }
 0x1dc   :  { %v1616_v9 = vmul.f32 %v101_v11, %v80_v40 }
 0x1e3   :  { %v186_v13 = vpop.permute.xlu1 %185  ;;  %v1603_v14 = vpop.permute.xlu0 %194 }
 0x1e4   :  { %v188_v15 = vmul.f32 %v186_v13, %v165_v48  ;;  %vm196_vm11 = vcmp.eq.s32.totalorder %v1603_v14, 1  ;;  %v1221_v14 = vld [vmem:[%s2117_s2 + $0x28] sm:$0xff] }
 0x1e5   :  { %v1657_v13 = vsel %vm196_vm11, %v1590_v61, %v1587_v57  ;;  %vm359_vm7 = vcmp.gt.f32.partialorder %v1221_v14, 0.5 }
 0x1e6   :  { %v1608_v16 = vsel %vm196_vm11, %v188_v15, %v198_v12  ;;  %v1612_v17 = vsel %vm196_vm11, %v188_v15, 0.0 }
 0x1e7   :  { %295 = vrot.lane.b32.xlu2 %v1608_v16, %s1418_s15 }
 0x1eb   :  { %v112_v18 = vpop.permute.xlu1 %111 }
 0x1ec   :  { %v1622_v19 = vsel %vm110_vm12, %v1616_v9, %v112_v18 }
 0x1ed   :  { %213 = vrot.lane.b32.xlu1 %v1622_v19, %s1418_s15 }
 0x241   :  { %v296_v20 = vpop.permute.xlu2 %295 }
 0x242   :  { %1219 = vmatmul.msk.f32.vlgmr.msra.gmra.mxu3 %vm38_vm0, %v296_v20 }
 0x243   :  { %954 = vmatpush.msra.mxu3 %v1468_v1 }
 0x245   :  { %955 = vmatpush.msra.mxu3 %v1480_v3 }
 0x247   :  { %956 = vmatpush.msra.mxu3 %v1490_v5 }
 0x249   :  { %957 = vmatpush.msra.mxu3 %v1507_v8 }
 0x25f   :  { %v214_v21 = vpop.permute.xlu1 %213 }
 0x260   :  { %1214 = vmatmul.msk.f32.vlgmr.msra.gmra.mxu2 %vm38_vm0, %v214_v21  ;;  %v1667_v21 = vsel %vm110_vm12, %v1584_v56, %v1581_v53  ;;  %v1679_v53 = vsel %vm359_vm7, 1, %v1420_v27 }
 0x261   :  { %875 = vmatpush.msra.mxu2 %v1463_v0 }
 0x263   :  { %876 = vmatpush.msra.mxu2 %v1473_v2 }
 0x265   :  { %877 = vmatpush.msra.mxu2 %v1485_v4 }
 0x267   :  { %878 = vmatpush.msra.mxu2 %v1502_v7 }
 0x2c5   :  { %v316_v23 = vpop.f32.mrf.mxu3 }
 0x2c6   :  { %v319_v24 = vadd.f32 %v1218_v22, %v316_v23 }
 0x2c8   :  { %1296 = vtanh.f32 %v319_v24  ;;  %v1220_v31 = vmul.f32 -1.442695, %v319_v24 }
 0x2ce   :  { %v1297_v25 = vpop.eup %1296 }
 0x2cf   :  { %342 = vrot.lane.b32.xlu1 %v1297_v25, %s1419_s23 }
 0x2e3   :  { %v234_v28 = vpop.f32.mrf.mxu2 }
 0x2e4   :  { %v237_v29 = vadd.f32 %v1213_v26, %v234_v28 }
 0x2e6   :  { %1298 = vtanh.f32 %v237_v29  ;;  %v1215_v36 = vmul.f32 -1.442695, %v237_v29 }
 0x2e7   :  { %1300 = vpow2.f32 %v1220_v31 }
 0x2ec   :  { %v1299_v30 = vpop.eup %1298 }
 0x2ed   :  { %260 = vrot.lane.b32.xlu0 %v1299_v30, %s1419_s23  ;;  %v1301_v32 = vpop.eup %1300 }
 0x2ee   :  { %v323_v33 = vadd.f32 1.0, %v1301_v32 }
 0x2f0   :  { %1302 = vrcp.f32 %v323_v33  ;;  %v335_v40 = vand.u32 2147483648, %v323_v33  ;;  %vm329_vm14 = vweird.f32 %v323_v33  ;;  %v333_v42 = vand.u32 2147483647, %v323_v33 }
 0x2f1   :  { %1304 = vpow2.f32 %v1215_v36 }
 0x2f2   :  { %v336_v45 = vor.u32 1.1754944e-38, %v335_v40  ;;  %vm334_vm1 = vcmp.eq.f32.partialorder %v333_v42, 8.507059e+37 }
 0x2f6   :  { %v1303_v34 = vpop.eup %1302 }
 0x2f7   :  { %v325_v35 = vmul.f32 %v1303_v34, %v323_v33  ;;  %vm330_vm13 = vweird.f32 %v1303_v34  ;;  %v1305_v41 = vpop.eup %1304 }
 0x2f8   :  { %vm331_vm15 = vmor %vm329_vm14, %vm330_vm13  ;;  %v241_v44 = vadd.f32 1.0, %v1305_v41 }
 0x2f9   :  { %v326_v37 = vsub.f32 1.0, %v325_v35 }
 0x2fa   :  { %1306 = vrcp.f32 %v241_v44  ;;  %v253_v59 = vand.u32 2147483648, %v241_v44  ;;  %vm247_vm4 = vweird.f32 %v241_v44  ;;  %v251_v60 = vand.u32 2147483647, %v241_v44 }
 0x2fb   :  { %v327_v38 = vmul.f32 %v1303_v34, %v326_v37 }
 0x2fc   :  { %v254_v63 = vor.u32 1.1754944e-38, %v253_v59  ;;  %vm252_vm6 = vcmp.eq.f32.partialorder %v251_v60, 8.507059e+37 }
 0x2fd   :  { %v328_v39 = vadd.f32 %v1303_v34, %v327_v38 }
 0x2ff   :  { %v332_v43 = vsel %vm331_vm15, %v1303_v34, %v328_v39 }
 0x300   :  { %v337_v47 = vsel %vm334_vm1, %v336_v45, %v332_v43  ;;  %v1307_v50 = vpop.eup %1306 }
 0x301   :  { %v243_v52 = vmul.f32 %v1307_v50, %v241_v44  ;;  %vm248_vm3 = vweird.f32 %v1307_v50  ;;  %v340_v15 = vmul.f32 %v337_v47, %v1657_v13 }
 0x302   :  { %vm249_vm5 = vmor %vm247_vm4, %vm248_vm3 }
 0x303   :  { %v244_v54 = vsub.f32 1.0, %v243_v52 }
 0x305   :  { %v245_v55 = vmul.f32 %v1307_v50, %v244_v54 }
 0x307   :  { %v246_v58 = vadd.f32 %v1307_v50, %v245_v55 }
 0x309   :  { %v250_v62 = vsel %vm249_vm5, %v1307_v50, %v246_v58 }
 0x30a   :  { %v255_v6 = vsel %vm252_vm6, %v254_v63, %v250_v62 }
 0x30b   :  { %v258_v22 = vmul.f32 %v255_v6, %v1667_v21 }
 0x341   :  { %v343_v46 = vpop.permute.xlu1 %342 }
 0x342   :  { %v345_v48 = vmul.f32 %v343_v46, %v337_v47 }
 0x344   :  { %347 = vrot.lane.b32.xlu0 %v345_v48, %s1418_s15 }
 0x34c   :  { %280 = vperm.xlu0 %1278, %v1649_v51  }
 0x35f   :  { %v261_v11 = vpop.permute.xlu0 %260 }
 0x360   :  { %v263_v12 = vmul.f32 %v261_v11, %v255_v6 }
 0x362   :  { %265 = vrot.lane.b32.xlu2 %v263_v12, %s1418_s15 }
 0x3b6   :  { %v348_v18 = vpop.permute.xlu0 %347 }
 0x3b7   :  { %v1660_v20 = vadd.f32 %v348_v18, %v340_v15 }
 0x3b9   :  { %1308 = vtanh.f32 %v1660_v20 }
 0x3bc   :  { %v266_v23 = vpop.permute.xlu2 %265 }
 0x3bd   :  { %v1670_v24 = vadd.f32 %v266_v23, %v258_v22  ;;  %v1226_v22 = vld [vmem:[%s2117_s2 + $0x10] sm:$0xff] }
 0x3be   :  { %v1682_v56 = vpop.permute.xlu0 %280  ;;  %vm441_vm4 = vcmp.gt.f32.partialorder %v1226_v22, 0.5 }
 0x3bf   :  { %v1309_v57 = vpop.eup %1308  ;;  %1310 = vtanh.f32 %v1670_v24  ;;  %vm282_vm8 = vcmp.eq.s32.totalorder %v1682_v56, 1  ;;  %v1733_v23 = vsel %vm441_vm4, 1, %v1420_v27 }
 0x3c0   :  { %353 = vrot.lane.b32.xlu2 %v1309_v57, %s1419_s23  ;;  %v1740_v57 = vsel %vm282_vm8, %v1670_v24, %v1667_v21  ;;  %v1231_v24 = vld [vmem:[%s2117_s2 + $0x20] sm:$0xff] }
 0x3c1   :  { %vm523_vm5 = vcmp.gt.f32.partialorder %v1231_v24, 0.5 }
 0x3c5   :  { %v1311_v61 = vpop.eup %1310 }
 0x3c6   :  { %271 = vrot.lane.b32.xlu1 %v1311_v61, %s1419_s23 }
 0x3ce   :  { %362 = vperm.xlu1 %1279, %v1679_v53  }
 0x41a   :  { %v354_v29 = vpop.permute.xlu2 %353 }
 0x41b   :  { %v356_v30 = vmul.f32 %v354_v29, %v337_v47 }
 0x438   :  { %v272_v25 = vpop.permute.xlu1 %271 }
 0x439   :  { %v1684_v26 = vmul.f32 %v272_v25, %v255_v6 }
 0x43b   :  { %v1691_v28 = vsel %vm282_vm8, %v1684_v26, %v1622_v19 }
 0x43c   :  { %377 = vrot.lane.b32.xlu2 %v1691_v28, %s1418_s15 }
 0x440   :  { %v1695_v31 = vpop.permute.xlu1 %362 }
 0x441   :  { %vm364_vm9 = vcmp.eq.s32.totalorder %v1695_v31, 1 }
 0x442   :  { %v1701_v32 = vsel %vm364_vm9, %v356_v30, %v1608_v16  ;;  %v1705_v33 = vsel %vm364_vm9, %v356_v30, 0.0  ;;  %v1750_v29 = vsel %vm364_vm9, %v1660_v20, %v1657_v13 }
 0x443   :  { %459 = vrot.lane.b32.xlu0 %v1701_v32, %s1418_s15 }
 0x496   :  { %v378_v19 = vpop.permute.xlu2 %377 }
 0x497   :  { %1224 = vmatmul.msk.f32.vlgmr.msrb.gmra.mxu0 %vm38_vm0, %v378_v19 }
 0x498   :  { %1033 = vmatpush.msrb.mxu0 %v1463_v0  ;;  %v1223_v0 = vld [vmem:[%s2115_s0 + $0x20] sm:$0xff] }
 0x49a   :  { %1034 = vmatpush.msrb.mxu0 %v1473_v2 }
 0x49c   :  { %1035 = vmatpush.msrb.mxu0 %v1485_v4 }
 0x49e   :  { %1036 = vmatpush.msrb.mxu0 %v1502_v7 }
 0x4b5   :  { %v460_v16 = vpop.permute.xlu0 %459 }
 0x4b6   :  { %1229 = vmatmul.msk.f32.vlgmr.msrb.gmra.mxu1 %vm38_vm0, %v460_v16 }
 0x4b7   :  { %1111 = vmatpush.msrb.mxu1 %v1468_v1  ;;  %v1228_v1 = vld [vmem:[%s2115_s0 + $0x48] sm:$0xff] }
 0x4b9   :  { %1112 = vmatpush.msrb.mxu1 %v1480_v3 }
 0x4bb   :  { %1113 = vmatpush.msrb.mxu1 %v1490_v5 }
 0x4bd   :  { %1114 = vmatpush.msrb.mxu1 %v1507_v8 }
 0x514   :  { %v398_v2 = vpop.f32.mrf.mxu0 }
 0x515   :  { %v401_v34 = vadd.f32 %v1223_v0, %v398_v2  ;;  %v1761_v0 = vsel %vm523_vm5, 1, %v1420_v27 }
 0x517   :  { %1312 = vtanh.f32 %v401_v34  ;;  %v1225_v8 = vmul.f32 -1.442695, %v401_v34 }
 0x51d   :  { %v1313_v4 = vpop.eup %1312 }
 0x51e   :  { %424 = vrot.lane.b32.xlu1 %v1313_v4, %s1419_s23 }
 0x533   :  { %v480_v7 = vpop.f32.mrf.mxu1 }
 0x534   :  { %v483_v3 = vadd.f32 %v1228_v1, %v480_v7 }
 0x536   :  { %1314 = vtanh.f32 %v483_v3  ;;  %v1230_v35 = vmul.f32 -1.442695, %v483_v3 }
 0x537   :  { %1316 = vpow2.f32 %v1225_v8 }
 0x538   :  { %1318 = vpow2.f32 %v1230_v35  ;;  %v1233_v35 = vld [vmem:[%s2115_s0 + $0x30] sm:$0xff] }
 0x53c   :  { %v1315_v5 = vpop.eup %1314 }
 0x53d   :  { %506 = vrot.lane.b32.xlu2 %v1315_v5, %s1419_s23  ;;  %v1317_v36 = vpop.eup %1316 }
 0x53e   :  { %v405_v37 = vadd.f32 1.0, %v1317_v36  ;;  %v1319_v38 = vpop.eup %1318 }
 0x53f   :  { %v487_v39 = vadd.f32 1.0, %v1319_v38  ;;  %v1238_v38 = vld [vmem:[%s2115_s0 + $0x38] sm:$0xff] }
 0x540   :  { %1320 = vrcp.f32 %v405_v37  ;;  %v417_v48 = vand.u32 2147483648, %v405_v37  ;;  %vm411_vm11 = vweird.f32 %v405_v37  ;;  %v415_v49 = vand.u32 2147483647, %v405_v37 }
 0x541   :  { %1322 = vrcp.f32 %v487_v39  ;;  %v499_v62 = vand.u32 2147483648, %v487_v39  ;;  %vm493_vm1 = vweird.f32 %v487_v39  ;;  %v497_v63 = vand.u32 2147483647, %v487_v39 }
 0x542   :  { %v418_v54 = vor.u32 1.1754944e-38, %v417_v48  ;;  %vm416_vm14 = vcmp.eq.f32.partialorder %v415_v49, 8.507059e+37 }
 0x543   :  { %v500_v11 = vor.u32 1.1754944e-38, %v499_v62  ;;  %vm498_vm3 = vcmp.eq.f32.partialorder %v497_v63, 8.507059e+37 }
 0x546   :  { %v1321_v40 = vpop.eup %1320 }
 0x547   :  { %v407_v41 = vmul.f32 %v1321_v40, %v405_v37  ;;  %v1323_v42 = vpop.eup %1322  ;;  %vm412_vm10 = vweird.f32 %v1321_v40 }
 0x548   :  { %v489_v44 = vmul.f32 %v1323_v42, %v487_v39  ;;  %vm413_vm13 = vmor %vm411_vm11, %vm412_vm10  ;;  %vm494_vm15 = vweird.f32 %v1323_v42 }
 0x549   :  { %v408_v43 = vsub.f32 1.0, %v407_v41  ;;  %vm495_vm2 = vmor %vm493_vm1, %vm494_vm15 }
 0x54a   :  { %v490_v46 = vsub.f32 1.0, %v489_v44 }
 0x54b   :  { %v409_v45 = vmul.f32 %v1321_v40, %v408_v43 }
 0x54c   :  { %v491_v50 = vmul.f32 %v1323_v42, %v490_v46 }
 0x54d   :  { %v410_v47 = vadd.f32 %v1321_v40, %v409_v45 }
 0x54e   :  { %v492_v59 = vadd.f32 %v1323_v42, %v491_v50 }
 0x54f   :  { %v414_v52 = vsel %vm413_vm13, %v1321_v40, %v410_v47 }
 0x550   :  { %v419_v58 = vsel %vm416_vm14, %v418_v54, %v414_v52  ;;  %v496_v6 = vsel %vm495_vm2, %v1323_v42, %v492_v59 }
 0x551   :  { %v501_v15 = vsel %vm498_vm3, %v500_v11, %v496_v6  ;;  %v422_v61 = vmul.f32 %v419_v58, %v1740_v57 }
 0x552   :  { %v504_v30 = vmul.f32 %v501_v15, %v1750_v29 }
 0x590   :  { %v425_v55 = vpop.permute.xlu1 %424 }
 0x591   :  { %v427_v60 = vmul.f32 %v425_v55, %v419_v58 }
 0x593   :  { %429 = vrot.lane.b32.xlu0 %v427_v60, %s1418_s15 }
 0x597   :  { %v507_v12 = vpop.permute.xlu2 %506 }
 0x598   :  { %v509_v18 = vmul.f32 %v507_v12, %v501_v15 }
 0x59a   :  { %511 = vrot.lane.b32.xlu1 %v509_v18, %s1418_s15 }
 0x5a2   :  { %444 = vperm.xlu1 %1279, %v1733_v23  }
 0x605   :  { %v430_v14 = vpop.permute.xlu0 %429 }
 0x606   :  { %v1743_v25 = vadd.f32 %v430_v14, %v422_v61 }
 0x608   :  { %1324 = vtanh.f32 %v1743_v25 }
 0x60c   :  { %v512_v19 = vpop.permute.xlu1 %511 }
 0x60d   :  { %v1753_v16 = vadd.f32 %v512_v19, %v504_v30 }
 0x60e   :  { %v1325_v21 = vpop.eup %1324 }
 0x60f   :  { %1326 = vtanh.f32 %v1753_v16  ;;  %435 = vrot.lane.b32.xlu2 %v1325_v21, %s1419_s23 }
 0x614   :  { %v1765_v20 = vpop.permute.xlu1 %444 }
 0x615   :  { %v1327_v13 = vpop.eup %1326  ;;  %vm446_vm6 = vcmp.eq.s32.totalorder %v1765_v20, 1 }
 0x616   :  { %517 = vrot.lane.b32.xlu0 %v1327_v13, %s1419_s23 }
 0x617   :  { %526 = vperm.xlu2 %1277, %v1761_v0  }
 0x669   :  { %v436_v31 = vpop.permute.xlu2 %435 }
 0x66a   :  { %v1767_v2 = vmul.f32 %v436_v31, %v419_v58  ;;  %v1236_v31 = vld [vmem:[%s2117_s2 + $0x18] sm:$0xff] }
 0x66b   :  { %vm605_vm3 = vcmp.gt.f32.partialorder %v1236_v31, 0.5 }
 0x66c   :  { %v1774_v34 = vsel %vm446_vm6, %v1767_v2, %v1691_v28 }
 0x66d   :  { %541 = vrot.lane.b32.xlu0 %v1774_v34, %s1418_s15 }
 0x671   :  { %v1778_v4 = vpop.permute.xlu2 %526 }
 0x672   :  { %vm528_vm7 = vcmp.eq.s32.totalorder %v1778_v4, 1 }
 0x688   :  { %v518_v1 = vpop.permute.xlu0 %517 }
 0x689   :  { %v520_v7 = vmul.f32 %v518_v1, %v501_v15  ;;  %v606_v1 = vsel %vm605_vm3, 1, %v1420_v27 }
 0x68b   :  { %v1784_v3 = vsel %vm528_vm7, %v520_v7, %v1701_v32  ;;  %v1788_v5 = vsel %vm528_vm7, %v520_v7, 0.0  ;;  %v1812_v7 = vsel %vm446_vm6, %v1743_v25, %v1740_v57 }
 0x68c   :  { %622 = vrot.lane.b32.xlu1 %v1784_v3, %s1418_s15 }
 0x6df   :  { %v542_v28 = vpop.permute.xlu0 %541 }
 0x6e0   :  { %1234 = vmatmul.msk.f32.vlgmr.msrb.gmra.mxu2 %vm38_vm0, %v542_v28 }
 0x6fe   :  { %v623_v8 = vpop.permute.xlu1 %622 }
 0x6ff   :  { %1239 = vmatmul.msk.f32.vlgmr.msrb.gmra.mxu3 %vm38_vm0, %v623_v8 }
 0x763   :  { %v562_v36 = vpop.f32.mrf.mxu2 }
 0x764   :  { %v565_v32 = vadd.f32 %v1233_v35, %v562_v36 }
 0x766   :  { %1328 = vtanh.f32 %v565_v32  ;;  %v1235_v42 = vmul.f32 -1.442695, %v565_v32  ;;  %v1823_v32 = vsel %vm528_vm7, %v1753_v16, %v1750_v29 }
 0x76c   :  { %v1329_v37 = vpop.eup %1328 }
 0x76d   :  { %588 = vrot.lane.b32.xlu2 %v1329_v37, %s1419_s23 }
 0x782   :  { %v643_v39 = vpop.f32.mrf.mxu3 }
 0x783   :  { %v646_v40 = vadd.f32 %v1238_v38, %v643_v39 }
 0x785   :  { %1330 = vtanh.f32 %v646_v40  ;;  %v1240_v62 = vmul.f32 -1.442695, %v646_v40 }
 0x786   :  { %1332 = vpow2.f32 %v1235_v42 }
 0x78b   :  { %v1331_v41 = vpop.eup %1330 }
 0x78c   :  { %669 = vrot.lane.b32.xlu0 %v1331_v41, %s1419_s23  ;;  %v1333_v43 = vpop.eup %1332 }
 0x78d   :  { %v569_v44 = vadd.f32 1.0, %v1333_v43 }
 0x78f   :  { %1334 = vrcp.f32 %v569_v44  ;;  %v581_v50 = vand.u32 2147483648, %v569_v44  ;;  %vm575_vm10 = vweird.f32 %v569_v44  ;;  %v579_v52 = vand.u32 2147483647, %v569_v44 }
 0x790   :  { %1336 = vpow2.f32 %v1240_v62 }
 0x791   :  { %v582_v55 = vor.u32 1.1754944e-38, %v581_v50  ;;  %vm580_vm13 = vcmp.eq.f32.partialorder %v579_v52, 8.507059e+37 }
 0x795   :  { %v1335_v45 = vpop.eup %1334 }
 0x796   :  { %v571_v46 = vmul.f32 %v1335_v45, %v569_v44  ;;  %vm576_vm9 = vweird.f32 %v1335_v45  ;;  %v1337_v63 = vpop.eup %1336 }
 0x797   :  { %vm577_vm11 = vmor %vm575_vm10, %vm576_vm9  ;;  %v650_v6 = vadd.f32 1.0, %v1337_v63 }
 0x798   :  { %v572_v47 = vsub.f32 1.0, %v571_v46  ;;  %v1243_v46 = vld [vmem:[%s2115_s0 + $0x40] sm:$0xff] }
 0x799   :  { %1338 = vrcp.f32 %v650_v6  ;;  %v662_v61 = vand.u32 2147483648, %v650_v6  ;;  %vm656_vm15 = vweird.f32 %v650_v6  ;;  %v660_v14 = vand.u32 2147483647, %v650_v6 }
 0x79a   :  { %v573_v48 = vmul.f32 %v1335_v45, %v572_v47 }
 0x79b   :  { %v663_v19 = vor.u32 1.1754944e-38, %v662_v61  ;;  %vm661_vm2 = vcmp.eq.f32.partialorder %v660_v14, 8.507059e+37 }
 0x79c   :  { %v574_v49 = vadd.f32 %v1335_v45, %v573_v48  ;;  %v1248_v48 = vld [vmem:[%s2115_s0 + $0x28] sm:$0xff] }
 0x79e   :  { %v578_v54 = vsel %vm577_vm11, %v1335_v45, %v574_v49 }
 0x79f   :  { %v583_v59 = vsel %vm580_vm13, %v582_v55, %v578_v54  ;;  %v1339_v11 = vpop.eup %1338 }
 0x7a0   :  { %v652_v12 = vmul.f32 %v1339_v11, %v650_v6  ;;  %vm657_vm14 = vweird.f32 %v1339_v11  ;;  %v586_v28 = vmul.f32 %v583_v59, %v1812_v7 }
 0x7a1   :  { %vm658_vm1 = vmor %vm656_vm15, %vm657_vm14 }
 0x7a2   :  { %v653_v15 = vsub.f32 1.0, %v652_v12 }
 0x7a4   :  { %v654_v18 = vmul.f32 %v1339_v11, %v653_v15 }
 0x7a6   :  { %v655_v22 = vadd.f32 %v1339_v11, %v654_v18 }
 0x7a8   :  { %v659_v30 = vsel %vm658_vm1, %v1339_v11, %v655_v22 }
 0x7a9   :  { %v664_v21 = vsel %vm661_vm2, %v663_v19, %v659_v30 }
 0x7aa   :  { %v667_v57 = vmul.f32 %v664_v21, %v1823_v32 }
 0x7c7   :  { %v589_v58 = vpop.permute.xlu2 %588 }
 0x7c8   :  { %v591_v60 = vmul.f32 %v589_v58, %v583_v59 }
 0x7ca   :  { %593 = vrot.lane.b32.xlu1 %v591_v60, %s1418_s15 }
 0x7fe   :  { %v670_v24 = vpop.permute.xlu0 %669 }
 0x7ff   :  { %v672_v13 = vmul.f32 %v670_v24, %v664_v21 }
 0x801   :  { %674 = vrot.lane.b32.xlu2 %v672_v13, %s1418_s15 }
 0x809   :  { %608 = vperm.xlu2 %1277, %v606_v1  }
 0x83c   :  { %v594_v8 = vpop.permute.xlu1 %593 }
 0x83d   :  { %v1815_v35 = vadd.f32 %v594_v8, %v586_v28 }
 0x83f   :  { %1340 = vtanh.f32 %v1815_v35 }
 0x845   :  { %v1341_v36 = vpop.eup %1340 }
 0x846   :  { %599 = vrot.lane.b32.xlu0 %v1341_v36, %s1419_s23 }
 0x84e   :  { %688 = vperm.xlu0 %1278, %v606_v1  }
 0x85b   :  { %v675_v25 = vpop.permute.xlu2 %674 }
 0x85c   :  { %v1826_v37 = vadd.f32 %v675_v25, %v667_v57 }
 0x85e   :  { %1342 = vtanh.f32 %v1826_v37 }
 0x863   :  { %v1830_v39 = vpop.permute.xlu2 %608 }
 0x864   :  { %v1343_v38 = vpop.eup %1342  ;;  %vm610_vm4 = vcmp.eq.s32.totalorder %v1830_v39, 1 }
 0x865   :  { %680 = vrot.lane.b32.xlu1 %v1343_v38, %s1419_s23 }
 0x8b8   :  { %v600_v40 = vpop.permute.xlu0 %599 }
 0x8b9   :  { %v1832_v41 = vmul.f32 %v600_v40, %v583_v59 }
 0x8bb   :  { %v1839_v29 = vsel %vm610_vm4, %v1832_v41, %v1774_v34 }
 0x8bc   :  { %701 = vrot.lane.b32.xlu1 %v1839_v29, %s1418_s15 }
 0x8c0   :  { %v1843_v16 = vpop.permute.xlu0 %688 }
 0x8c1   :  { %vm690_vm5 = vcmp.eq.s32.totalorder %v1843_v16, 1 }
 0x8d7   :  { %v681_v4 = vpop.permute.xlu1 %680 }
 0x8d8   :  { %v683_v42 = vmul.f32 %v681_v4, %v664_v21 }
 0x8da   :  { %v1849_v43 = vsel %vm690_vm5, %v683_v42, %v1784_v3  ;;  %v1853_v44 = vsel %vm690_vm5, %v683_v42, 0.0 }
 0x8db   :  { %780 = vrot.lane.b32.xlu2 %v1849_v43, %s1418_s15 }
 0x92e   :  { %v702_v34 = vpop.permute.xlu1 %701 }
 0x92f   :  { %1244 = vmatmul.msk.f32.vlgmr.msra.gmra.mxu0 %vm38_vm0, %v702_v34  ;;  %v1874_v34 = vsel %vm610_vm4, %v1815_v35, %v1812_v7 }
 0x935   :  { %v781_v45 = vpop.permute.xlu2 %780 }
 0x936   :  { %1249 = vmatmul.msk.f32.vlgmr.msra.gmra.mxu1 %vm38_vm0, %v781_v45 }
 0x9ac   :  { %v722_v47 = vpop.f32.mrf.mxu0 }
 0x9ad   :  { %v725_v3 = vadd.f32 %v1243_v46, %v722_v47 }
 0x9af   :  { %1344 = vtanh.f32 %v725_v3  ;;  %v1245_v55 = vmul.f32 -1.442695, %v725_v3 }
 0x9b3   :  { %v801_v49 = vpop.f32.mrf.mxu1 }
 0x9b4   :  { %v804_v50 = vadd.f32 %v1248_v48, %v801_v49 }
 0x9b5   :  { %v1345_v52 = vpop.eup %1344 }
 0x9b6   :  { %1346 = vtanh.f32 %v804_v50  ;;  %748 = vrot.lane.b32.xlu0 %v1345_v52, %s1419_s23  ;;  %v1250_v58 = vmul.f32 -1.442695, %v804_v50 }
 0x9b7   :  { %1348 = vpow2.f32 %v1245_v55 }
 0x9b8   :  { %1350 = vpow2.f32 %v1250_v58 }
 0x9bc   :  { %v1347_v54 = vpop.eup %1346 }
 0x9bd   :  { %827 = vrot.lane.b32.xlu1 %v1347_v54, %s1419_s23  ;;  %v1349_v59 = vpop.eup %1348 }
 0x9be   :  { %v729_v60 = vadd.f32 1.0, %v1349_v59  ;;  %v1351_v62 = vpop.eup %1350 }
 0x9bf   :  { %v808_v63 = vadd.f32 1.0, %v1351_v62 }
 0x9c0   :  { %1352 = vrcp.f32 %v729_v60  ;;  %v741_v30 = vand.u32 2147483648, %v729_v60  ;;  %vm735_vm9 = vweird.f32 %v729_v60  ;;  %v739_v19 = vand.u32 2147483647, %v729_v60 }
 0x9c1   :  { %1354 = vrcp.f32 %v808_v63  ;;  %v820_v36 = vand.u32 2147483648, %v808_v63  ;;  %vm814_vm14 = vweird.f32 %v808_v63  ;;  %v818_v57 = vand.u32 2147483647, %v808_v63 }
 0x9c2   :  { %v742_v13 = vor.u32 1.1754944e-38, %v741_v30  ;;  %vm740_vm11 = vcmp.eq.f32.partialorder %v739_v19, 8.507059e+37 }
 0x9c3   :  { %v821_v38 = vor.u32 1.1754944e-38, %v820_v36  ;;  %vm819_vm1 = vcmp.eq.f32.partialorder %v818_v57, 8.507059e+37 }
 0x9c6   :  { %v1353_v6 = vpop.eup %1352 }
 0x9c7   :  { %v731_v11 = vmul.f32 %v1353_v6, %v729_v60  ;;  %v1355_v12 = vpop.eup %1354  ;;  %vm736_vm7 = vweird.f32 %v1353_v6  ;;  %v1253_v60 = vld [vmem:[%s2115_s0 + $0x50] sm:$0xff] }
 0x9c8   :  { %v810_v18 = vmul.f32 %v1355_v12, %v808_v63  ;;  %vm737_vm10 = vmor %vm735_vm9, %vm736_vm7  ;;  %vm815_vm13 = vweird.f32 %v1355_v12 }
 0x9c9   :  { %v732_v15 = vsub.f32 1.0, %v731_v11  ;;  %vm816_vm15 = vmor %vm814_vm14, %vm815_vm13 }
 0x9ca   :  { %v811_v61 = vsub.f32 1.0, %v810_v18 }
 0x9cb   :  { %v733_v22 = vmul.f32 %v1353_v6, %v732_v15 }
 0x9cc   :  { %v812_v21 = vmul.f32 %v1355_v12, %v811_v61 }
 0x9cd   :  { %v734_v14 = vadd.f32 %v1353_v6, %v733_v22 }
 0x9ce   :  { %v813_v28 = vadd.f32 %v1355_v12, %v812_v21 }
 0x9cf   :  { %v738_v24 = vsel %vm737_vm10, %v1353_v6, %v734_v14  ;;  %v1258_v6 = vld [vmem:[%s2115_s0 + $0x18] sm:$0xff] }
 0x9d0   :  { %v743_v31 = vsel %vm740_vm11, %v742_v13, %v738_v24  ;;  %v817_v25 = vsel %vm816_vm15, %v1355_v12, %v813_v28 }
 0x9d1   :  { %v822_v4 = vsel %vm819_vm1, %v821_v38, %v817_v25  ;;  %v746_v45 = vmul.f32 %v743_v31, %v1874_v34 }
 0xa28   :  { %v749_v1 = vpop.permute.xlu0 %748 }
 0xa29   :  { %v751_v8 = vmul.f32 %v749_v1, %v743_v31 }
 0xa2b   :  { %753 = vrot.lane.b32.xlu2 %v751_v8, %s1418_s15 }
 0xa2f   :  { %v828_v40 = vpop.permute.xlu1 %827 }
 0xa30   :  { %v830_v42 = vmul.f32 %v828_v40, %v822_v4 }
 0xa32   :  { %832 = vrot.lane.b32.xlu0 %v830_v42, %s1418_s15 }
 0xa3a   :  { %767 = vperm.xlu0 %1278, %v1761_v0   ;;  %v1886_v0 = vsel %vm690_vm5, %v1826_v37, %v1823_v32 }
 0xa3b   :  { %v825_v7 = vmul.f32 %v822_v4, %v1886_v0 }
 0xa85   :  { %v754_v46 = vpop.permute.xlu2 %753 }
 0xa86   :  { %v1877_v47 = vadd.f32 %v754_v46, %v746_v45 }
 0xa88   :  { %1356 = vtanh.f32 %v1877_v47 }
 0xa8e   :  { %v1357_v3 = vpop.eup %1356 }
 0xa8f   :  { %759 = vrot.lane.b32.xlu1 %v1357_v3, %s1419_s23 }
 0xa97   :  { %846 = vperm.xlu1 %1279, %v1733_v23  }
 0xaa4   :  { %v833_v35 = vpop.permute.xlu0 %832 }
 0xaa5   :  { %v1889_v48 = vadd.f32 %v833_v35, %v825_v7 }
 0xaa7   :  { %1358 = vtanh.f32 %v1889_v48 }
 0xaac   :  { %v1893_v50 = vpop.permute.xlu0 %767 }
 0xaad   :  { %v1359_v49 = vpop.eup %1358  ;;  %vm769_vm2 = vcmp.eq.s32.totalorder %v1893_v50, 1 }
 0xaae   :  { %838 = vrot.lane.b32.xlu2 %v1359_v49, %s1419_s23 }
 0xb01   :  { %v760_v52 = vpop.permute.xlu1 %759 }
 0xb02   :  { %v1895_v23 = vmul.f32 %v760_v52, %v743_v31 }
 0xb04   :  { %v1902_v32 = vsel %vm769_vm2, %v1895_v23, %v1839_v29 }
 0xb05   :  { %859 = vrot.lane.b32.xlu2 %v1902_v32, %s1418_s15 }
 0xb08   :  { %v839_v37 = vpop.permute.xlu2 %838 }
 0xb09   :  { %v841_v16 = vmul.f32 %v839_v37, %v822_v4  ;;  %v1906_v54 = vpop.permute.xlu1 %846 }
 0xb0a   :  { %vm848_vm3 = vcmp.eq.s32.totalorder %v1906_v54, 1 }
 0xb0b   :  { %v1912_v55 = vsel %vm848_vm3, %v841_v16, %v1849_v43  ;;  %v1916_v58 = vsel %vm848_vm3, %v841_v16, 0.0 }
 0xb0c   :  { %938 = vrot.lane.b32.xlu0 %v1912_v55, %s1418_s15 }
 0xb5f   :  { %v860_v29 = vpop.permute.xlu2 %859 }
 0xb60   :  { %1254 = vmatmul.msk.f32.vlgmr.msra.gmra.mxu2 %vm38_vm0, %v860_v29 }
 0xb7e   :  { %v939_v59 = vpop.permute.xlu0 %938 }
 0xb7f   :  { %1259 = vmatmul.msk.f32.vlgmr.msra.gmra.mxu3 %vm38_vm0, %v939_v59  ;;  %v1937_v59 = vsel %vm769_vm2, %v1877_v47, %v1874_v34 }
 0xbe3   :  { %v880_v62 = vpop.f32.mrf.mxu2 }
 0xbe4   :  { %v883_v43 = vadd.f32 %v1253_v60, %v880_v62 }
 0xbe6   :  { %1360 = vtanh.f32 %v883_v43  ;;  %v1255_v18 = vmul.f32 -1.442695, %v883_v43 }
 0xbec   :  { %v1361_v63 = vpop.eup %1360 }
 0xbed   :  { %906 = vrot.lane.b32.xlu1 %v1361_v63, %s1419_s23  ;;  %v1947_v63 = vsel %vm848_vm3, %v1889_v48, %v1886_v0 }
 0xc02   :  { %v959_v11 = vpop.f32.mrf.mxu3 }
 0xc03   :  { %v962_v12 = vadd.f32 %v1258_v6, %v959_v11 }
 0xc05   :  { %1362 = vtanh.f32 %v962_v12  ;;  %v1260_v22 = vmul.f32 -1.442695, %v962_v12 }
 0xc06   :  { %1364 = vpow2.f32 %v1255_v18 }
 0xc07   :  { %1366 = vpow2.f32 %v1260_v22 }
 0xc0b   :  { %v1363_v15 = vpop.eup %1362 }
 0xc0c   :  { %985 = vrot.lane.b32.xlu2 %v1363_v15, %s1419_s23  ;;  %v1365_v61 = vpop.eup %1364 }
 0xc0d   :  { %v887_v14 = vadd.f32 1.0, %v1365_v61  ;;  %v1367_v30 = vpop.eup %1366 }
 0xc0e   :  { %v966_v19 = vadd.f32 1.0, %v1367_v30  ;;  %v1263_v30 = vld [vmem:[%s2115_s0 + $0x60] sm:$0xff] }
 0xc0f   :  { %1368 = vrcp.f32 %v887_v14  ;;  %v899_v57 = vand.u32 2147483648, %v887_v14  ;;  %vm893_vm7 = vweird.f32 %v887_v14  ;;  %v897_v25 = vand.u32 2147483647, %v887_v14 }
 0xc10   :  { %1370 = vrcp.f32 %v966_v19  ;;  %v978_v7 = vand.u32 2147483648, %v966_v19  ;;  %vm972_vm13 = vweird.f32 %v966_v19  ;;  %v976_v35 = vand.u32 2147483647, %v966_v19 }
 0xc11   :  { %v900_v4 = vor.u32 1.1754944e-38, %v899_v57  ;;  %vm898_vm10 = vcmp.eq.f32.partialorder %v897_v25, 8.507059e+37 }
 0xc12   :  { %v979_v52 = vor.u32 1.1754944e-38, %v978_v7  ;;  %vm977_vm15 = vcmp.eq.f32.partialorder %v976_v35, 8.507059e+37 }
 0xc15   :  { %v1369_v21 = vpop.eup %1368 }
 0xc16   :  { %v889_v24 = vmul.f32 %v1369_v21, %v887_v14  ;;  %v1371_v13 = vpop.eup %1370  ;;  %vm894_vm5 = vweird.f32 %v1369_v21 }
 0xc17   :  { %v968_v1 = vmul.f32 %v1371_v13, %v966_v19  ;;  %vm895_vm9 = vmor %vm893_vm7, %vm894_vm5  ;;  %vm973_vm11 = vweird.f32 %v1371_v13 }
 0xc18   :  { %v890_v31 = vsub.f32 1.0, %v889_v24  ;;  %vm974_vm14 = vmor %vm972_vm13, %vm973_vm11  ;;  %v1093_v24 = vld [vmem:[%s2115_s0 + $0x8] sm:$0xff] }
 0xc19   :  { %v969_v8 = vsub.f32 1.0, %v968_v1 }
 0xc1a   :  { %v891_v28 = vmul.f32 %v1369_v21, %v890_v31 }
 0xc1b   :  { %v970_v38 = vmul.f32 %v1371_v13, %v969_v8 }
 0xc1c   :  { %v892_v36 = vadd.f32 %v1369_v21, %v891_v28 }
 0xc1d   :  { %v971_v46 = vadd.f32 %v1371_v13, %v970_v38 }
 0xc1e   :  { %v896_v40 = vsel %vm895_vm9, %v1369_v21, %v892_v36 }
 0xc1f   :  { %v901_v45 = vsel %vm898_vm10, %v900_v4, %v896_v40  ;;  %v975_v49 = vsel %vm974_vm14, %v1371_v13, %v971_v46 }
 0xc20   :  { %v980_v16 = vsel %vm977_vm15, %v979_v52, %v975_v49  ;;  %v904_v60 = vmul.f32 %v901_v45, %v1937_v59  ;;  %v1266_v52 = vld [vmem:[%s2117_s2 + $0x30] sm:$0xff] }
 0xc21   :  { %vm1080_vm11 = vcmp.gt.f32.partialorder %v1266_v52, 0.5 }
 0xc5f   :  { %v907_v42 = vpop.permute.xlu1 %906 }
 0xc60   :  { %v909_v3 = vmul.f32 %v907_v42, %v901_v45 }
 0xc62   :  { %911 = vrot.lane.b32.xlu0 %v909_v3, %s1418_s15 }
 0xc66   :  { %v986_v37 = vpop.permute.xlu2 %985 }
 0xc67   :  { %v988_v29 = vmul.f32 %v986_v37, %v980_v16  ;;  %v1081_v37 = vsel %vm1080_vm11, 1, %v1420_v27 }
 0xc69   :  { %990 = vrot.lane.b32.xlu1 %v988_v29, %s1418_s15  ;;  %v116_v29 = vsel %vm110_vm12, %v1616_v9, 0.0 }
 0xc71   :  { %925 = vperm.xlu1 %1279, %v1679_v53   ;;  %v983_v53 = vmul.f32 %v980_v16, %v1947_v63 }
 0xcd4   :  { %v912_v62 = vpop.permute.xlu0 %911 }
 0xcd5   :  { %v1940_v43 = vadd.f32 %v912_v62, %v904_v60 }
 0xcd7   :  { %1372 = vtanh.f32 %v1940_v43 }
 0xcdb   :  { %v991_v6 = vpop.permute.xlu1 %990 }
 0xcdc   :  { %v1950_v11 = vadd.f32 %v991_v6, %v983_v53  ;;  %v613_v6 = vsel %vm610_vm4, %v1832_v41, 0.0 }
 0xcdd   :  { %v1373_v34 = vpop.eup %1372 }
 0xcde   :  { %1374 = vtanh.f32 %v1950_v11  ;;  %917 = vrot.lane.b32.xlu2 %v1373_v34, %s1419_s23 }
 0xce3   :  { %v1956_v12 = vpop.permute.xlu1 %925 }
 0xce4   :  { %v1375_v47 = vpop.eup %1374  ;;  %vm927_vm1 = vcmp.eq.s32.totalorder %v1956_v12, 1 }
 0xce5   :  { %996 = vrot.lane.b32.xlu0 %v1375_v47, %s1419_s23 }
 0xce6   :  { %1004 = vperm.xlu2 %1277, %v1649_v51  }
 0xd38   :  { %v918_v54 = vpop.permute.xlu2 %917 }
 0xd39   :  { %v1958_v0 = vmul.f32 %v918_v54, %v901_v45 }
 0xd3b   :  { %v928_v48 = vsel %vm927_vm1, %v1958_v0, %v1902_v32 }
 0xd3c   :  { %1017 = vrot.lane.b32.xlu0 %v928_v48, %s1418_s15 }
 0xd40   :  { %v1966_v15 = vpop.permute.xlu2 %1004 }
 0xd41   :  { %vm1006_vm3 = vcmp.eq.s32.totalorder %v1966_v15, 1  ;;  %v772_v15 = vsel %vm769_vm2, %v1895_v23, 0.0 }
 0xd57   :  { %v997_v18 = vpop.permute.xlu0 %996 }
 0xd58   :  { %v999_v22 = vmul.f32 %v997_v18, %v980_v16 }
 0xd5a   :  { %v1007_v51 = vsel %vm1006_vm3, %v999_v22, %v1912_v55  ;;  %v1974_v61 = vsel %vm1006_vm3, %v999_v22, 0.0 }
 0xd5b   :  { %1095 = vrot.lane.b32.xlu1 %v1007_v51, %s1418_s15 }
 0xdae   :  { %v1018_v14 = vpop.permute.xlu0 %1017 }
 0xdaf   :  { %1264 = vmatmul.msk.f32.vlgmr.msrb.gmra.mxu0 %vm38_vm0, %v1018_v14 }
 0xdcd   :  { %v1096_v32 = vpop.permute.xlu1 %1095 }
 0xdce   :  { %1268 = vmatmul.msk.f32.vlgmr.msrb.gmra.mxu1 %vm38_vm0, %v1096_v32 }
 0xe2c   :  { %v1038_v19 = vpop.f32.mrf.mxu0 }
 0xe2d   :  { %v1041_v21 = vadd.f32 %v1263_v30, %v1038_v19 }
 0xe2f   :  { %1376 = vtanh.f32 %v1041_v21  ;;  %v1265_v28 = vmul.f32 -1.442695, %v1041_v21  ;;  %v1157_v21 = vld [vmem:[%s2117_s2] sm:$0xff] }
 0xe30   :  { %vm1158_vm15 = vcmp.gt.f32.partialorder %v1157_v21, 0.5 }
 0xe35   :  { %v1377_v55 = vpop.eup %1376 }
 0xe36   :  { %1064 = vrot.lane.b32.xlu2 %v1377_v55, %s1419_s23  ;;  %v1159_v55 = vsel %vm1158_vm15, 1, %v1420_v27  ;;  %v1008_v27 = vsel %vm1006_vm3, %v1950_v11, %v1947_v63 }
 0xe4b   :  { %v1116_v13 = vpop.f32.mrf.mxu1 }
 0xe4c   :  { %v1119_v31 = vadd.f32 %v1116_v13, %v1093_v24 }
 0xe4e   :  { %1378 = vtanh.f32 %v1119_v31  ;;  %v1269_v16 = vmul.f32 -1.442695, %v1119_v31 }
 0xe4f   :  { %1380 = vpow2.f32 %v1265_v28 }
 0xe54   :  { %v1379_v1 = vpop.eup %1378 }
 0xe55   :  { %1142 = vrot.lane.b32.xlu0 %v1379_v1, %s1419_s23  ;;  %v1381_v8 = vpop.eup %1380 }
 0xe56   :  { %v1045_v36 = vadd.f32 1.0, %v1381_v8 }
 0xe58   :  { %1382 = vrcp.f32 %v1045_v36  ;;  %v1057_v42 = vand.u32 2147483648, %v1045_v36  ;;  %vm1051_vm7 = vweird.f32 %v1045_v36  ;;  %v1055_v45 = vand.u32 2147483647, %v1045_v36 }
 0xe59   :  { %1384 = vpow2.f32 %v1269_v16 }
 0xe5a   :  { %v1058_v3 = vor.u32 1.1754944e-38, %v1057_v42  ;;  %vm1056_vm10 = vcmp.eq.f32.partialorder %v1055_v45, 8.507059e+37 }
 0xe5e   :  { %v1383_v57 = vpop.eup %1382 }
 0xe5f   :  { %v1047_v25 = vmul.f32 %v1383_v57, %v1045_v36  ;;  %vm1052_vm5 = vweird.f32 %v1383_v57  ;;  %v1385_v60 = vpop.eup %1384 }
 0xe60   :  { %vm1053_vm9 = vmor %vm1051_vm7, %vm1052_vm5  ;;  %v1123_v62 = vadd.f32 1.0, %v1385_v60 }
 0xe61   :  { %v1048_v38 = vsub.f32 1.0, %v1047_v25 }
 0xe62   :  { %1386 = vrcp.f32 %v1123_v62  ;;  %v1135_v54 = vand.u32 2147483648, %v1123_v62  ;;  %vm1129_vm13 = vweird.f32 %v1123_v62  ;;  %v1133_v48 = vand.u32 2147483647, %v1123_v62 }
 0xe63   :  { %v1049_v40 = vmul.f32 %v1383_v57, %v1048_v38 }
 0xe64   :  { %v1136_v41 = vor.u32 1.1754944e-38, %v1135_v54  ;;  %vm1134_vm14 = vcmp.eq.f32.partialorder %v1133_v48, 8.507059e+37 }
 0xe65   :  { %v1050_v4 = vadd.f32 %v1383_v57, %v1049_v40 }
 0xe67   :  { %v1054_v46 = vsel %vm1053_vm9, %v1383_v57, %v1050_v4 }
 0xe68   :  { %v1987_v35 = vsel %vm1056_vm10, %v1058_v3, %v1054_v46  ;;  %v1387_v53 = vpop.eup %1386 }
 0xe69   :  { %v1125_v34 = vmul.f32 %v1387_v53, %v1123_v62  ;;  %vm1130_vm12 = vweird.f32 %v1387_v53 }
 0xe6a   :  { %vm1131_vm4 = vmor %vm1129_vm13, %vm1130_vm12 }
 0xe6b   :  { %v1126_v47 = vsub.f32 1.0, %v1125_v34 }
 0xe6d   :  { %v1127_v10 = vmul.f32 %v1387_v53, %v1126_v47 }
 0xe6f   :  { %v1128_v9 = vadd.f32 %v1387_v53, %v1127_v10 }
 0xe71   :  { %v1132_v39 = vsel %vm1131_vm4, %v1387_v53, %v1128_v9 }
 0xe72   :  { %v1137_v18 = vsel %vm1134_vm14, %v1136_v41, %v1132_v39 }
 0xe73   :  { %v1140_v12 = vmul.f32 %v1137_v18, %v1008_v27 }
 0xe90   :  { %v1065_v7 = vpop.permute.xlu2 %1064 }
 0xe91   :  { %v1067_v49 = vmul.f32 %v1065_v7, %v1987_v35 }
 0xe93   :  { %1069 = vrot.lane.b32.xlu1 %v1067_v49, %s1418_s15 }
 0xe9b   :  { %1083 = vperm.xlu1 %1279, %v1081_v37  }
 0xea3   :  { %118 = vrot.lane.b32.xlu1 %v116_v29, %s1418_s15 }
 0xeab   :  { %369 = vrot.lane.b32.xlu1 %v1705_v33, %s1419_s23  ;;  %v930_v33 = vsel %vm927_vm1, %v1958_v0, 0.0 }
 0xeb3   :  { %615 = vrot.lane.b32.xlu1 %v613_v6, %s1418_s15 }
 0xebb   :  { %695 = vrot.lane.b32.xlu1 %v1853_v44, %s1419_s23  ;;  %v929_v44 = vsel %vm927_vm1, %v1940_v43, %v1937_v59  ;;  %vm208_vm1 = vcmask 523520   ;;  %v285_v43 = vsel %vm282_vm8, %v1684_v26, 0.0 }
 0xebc   :  { %v1062_v0 = vmul.f32 %v1987_v35, %v929_v44 }
 0xec3   :  { %932 = vrot.lane.b32.xlu1 %v930_v33, %s1418_s15 }
 0xec7   :  { %v1143_v22 = vpop.permute.xlu0 %1142 }
 0xec8   :  { %v1145_v51 = vmul.f32 %v1143_v22, %v1137_v18 }
 0xeca   :  { %1147 = vrot.lane.b32.xlu2 %v1145_v51, %s1418_s15 }
 0xf05   :  { %v1070_v14 = vpop.permute.xlu1 %1069 }
 0xf06   :  { %v1072_v32 = vadd.f32 %v1070_v14, %v1062_v0 }
 0xf08   :  { %1388 = vtanh.f32 %v1072_v32 }
 0xf0d   :  { %v1084_v30 = vpop.permute.xlu1 %1083 }
 0xf0e   :  { %v1389_v19 = vpop.eup %1388  ;;  %vm1085_vm8 = vcmp.eq.s32.totalorder %v1084_v30, 1 }
 0xf0f   :  { %1075 = vrot.lane.b32.xlu0 %v1389_v19, %s1419_s23  ;;  %v1086_v11 = vsel %vm1085_vm8, %v1072_v32, %v929_v44 }
 0xf15   :  { %v119_v24 = vpop.permute.xlu1 %118 }
 0xf16   :  { %121 = vst.msk [vmem:[%s2120_s5] sm:$0xff] %vm38_vm0, %v119_v24 }
 0xf17   :  { %1161 = vperm.xlu0 %1278, %v1159_v55  }
 0xf1d   :  { %v370_v59 = vpop.permute.xlu1 %369 }
 0xf1e   :  { %1222 = vst.msk [vmem:[%s2120_s5 + $0x28] sm:$0xff] %vm208_vm1, %v370_v59 }
 0xf1f   :  { %287 = vrot.lane.b32.xlu0 %v285_v43, %s1418_s15 }
 0xf24   :  { %v1148_v13 = vpop.permute.xlu2 %1147 }
 0xf25   :  { %v1150_v31 = vadd.f32 %v1148_v13, %v1140_v12  ;;  %v616_v1 = vpop.permute.xlu1 %615 }
 0xf26   :  { %1237 = vst.msk [vmem:[%s2120_s5 + $0x18] sm:$0xff] %vm38_vm0, %v616_v1 }
 0xf27   :  { %1390 = vtanh.f32 %v1150_v31  ;;  %533 = vrot.lane.b32.xlu0 %v1788_v5, %s1419_s23  ;;  %v449_v5 = vsel %vm446_vm6, %v1767_v2, 0.0 }
 0xf2d   :  { %v1391_v56 = vpop.eup %1390  ;;  %v696_v26 = vpop.permute.xlu1 %695 }
 0xf2e   :  { %1242 = vst.msk [vmem:[%s2120_s5 + $0x18] sm:$0xff] %vm208_vm1, %v696_v26  ;;  %1153 = vrot.lane.b32.xlu2 %v1391_v56, %s1419_s23 }
 0xf35   :  { %v933_v63 = vpop.permute.xlu1 %932 }
 0xf36   :  { %1257 = vst.msk [vmem:[%s2120_s5 + $0x28] sm:$0xff] %vm38_vm0, %v933_v63  ;;  %204 = vrot.lane.b32.xlu2 %v1612_v17, %s1419_s23 }
 0xf3e   :  { %451 = vrot.lane.b32.xlu2 %v449_v5, %s1418_s15 }
 0xf46   :  { %1172 = vrot.lane.b32.xlu2 %v1086_v11, %s1421_s26 }
 0xf4e   :  { %774 = vrot.lane.b32.xlu2 %v772_v15, %s1418_s15 }
 0xf56   :  { %1011 = vrot.lane.b32.xlu2 %v1974_v61, %s1419_s23 }
 0xf81   :  { %v1076_v17 = vpop.permute.xlu0 %1075 }
 0xf82   :  { %v1078_v23 = vmul.f32 %v1076_v17, %v1987_v35 }
 0xf84   :  { %v1087_v38 = vsel %vm1085_vm8, %v1078_v23, 0.0 }
 0xf88   :  { %v1154_v28 = vpop.permute.xlu2 %1153 }
 0xf89   :  { %v1156_v20 = vmul.f32 %v1154_v28, %v1137_v18  ;;  %v1162_v2 = vpop.permute.xlu0 %1161 }
 0xf8a   :  { %vm1163_vm6 = vcmp.eq.s32.totalorder %v1162_v2, 1 }
 0xf8b   :  { %v1165_v8 = vsel %vm1163_vm6, %v1156_v20, 0.0  ;;  %v1164_v36 = vsel %vm1163_vm6, %v1150_v31, %v1008_v27 }
 0xf8c   :  { %1167 = vrot.lane.b32.xlu1 %v1165_v8, %s1419_s23  ;;  %1177 = vrot.lane.b32.xlu0 %v1164_v36, %s1421_s26 }
 0xf90   :  { %v205_v57 = vpop.permute.xlu2 %204 }
 0xf91   :  { %1212 = vst.msk [vmem:[%s2120_s5 + $0x30] sm:$0xff] %vm208_vm1, %v205_v57  ;;  %v288_v50 = vpop.permute.xlu0 %287 }
 0xf92   :  { %1217 = vst.msk [vmem:[%s2120_s5 + $0x8] sm:$0xff] %vm38_vm0, %v288_v50 }
 0xf94   :  { %853 = vrot.lane.b32.xlu0 %v1916_v58, %s1419_s23 }
 0xf98   :  { %v452_v61 = vpop.permute.xlu2 %451 }
 0xf99   :  { %1227 = vst.msk [vmem:[%s2120_s5 + $0x10] sm:$0xff] %vm38_vm0, %v452_v61  ;;  %v534_v25 = vpop.permute.xlu0 %533 }
 0xf9a   :  { %1232 = vst.msk [vmem:[%s2120_s5 + $0x20] sm:$0xff] %vm208_vm1, %v534_v25 }
 0xf9c   :  { %1089 = vrot.lane.b32.xlu0 %v1087_v38, %s1418_s15  ;;  %s1190_s15 = sshll.u32 %s2121_s6, 4  ;;  %s1191_s15 = int_to_ptr.hbm [resolvable:$true] %s1190_s15 }
 0xfa0   :  { %v1173_v40 = vpop.permute.xlu2 %1172 }
 0xfa1   :  { %1175 = vst.msk [vmem:[#allocation2] sm:$0xff] %vm38_vm0, %v1173_v40 }
 0xfa8   :  { %v775_v58 = vpop.permute.xlu2 %774 }
 0xfa9   :  { %1247 = vst.msk [vmem:[%s2120_s5 + $0x20] sm:$0xff] %vm38_vm0, %v775_v58 }
 0xfb0   :  { %v1012_v4 = vpop.permute.xlu2 %1011 }
 0xfb1   :  { %1262 = vst.msk [vmem:[%s2120_s5 + $0x8] sm:$0xff] %vm208_vm1, %v1012_v4 }
 0xffe   :  { %v1168_v42 = vpop.permute.xlu1 %1167  ;;  %v1178_v45 = vpop.permute.xlu0 %1177 }
 0xfff   :  { %1170 = vst.msk [vmem:[%s2120_s5] sm:$0xff] %vm208_vm1, %v1168_v42 }
0x1000   :  { %1181 = vst.msk [vmem:[#allocation2 + $0x8] sm:$0xff] %vm38_vm0, %v1178_v45 }
0x1001   :  { %1196 = dma.vmem_to_hbm [thread:$0]  %s1189_s14, 256, %s1191_s15, [#allocation3], %s1423_s19, %s1423_s19, %s1424_s1  }
0x1006   :  { %v854_v46 = vpop.permute.xlu0 %853 }
0x1007   :  { %1252 = vst.msk [vmem:[%s2120_s5 + $0x10] sm:$0xff] %vm208_vm1, %v854_v46 }
0x100e   :  { %v1090_v3 = vpop.permute.xlu0 %1089 }
0x100f   :  { %1267 = vst.msk [vmem:[%s2120_s5 + $0x30] sm:$0xff] %vm38_vm0, %v1090_v3 }
0x1010   :  { %1416 = dma.done.wait [#allocation3], 256  }
0x1011   :  { %1417 = vsyncadd [#allocation3], 4294967040 }
0x1012   :  { %1203 = vsyncpa [#allocation3], 1 }

// kernel: dp_lstm_forward.17
= control target key start
LH: loop header
LB: loop body
LE: loop exit
PB: predicated region body
PF: predicated region fallthrough
CT: control target
= control target key end

     0   :  { %vm33_vm0 = vcmask 523264   ;;  %vm128_vm1 = vcmask 785408   ;;  %s296_s1 = inlined_call_operand.vmem [shape: f32[64,96], index: 1, kind: input, shape index: {}]   ;;  %s297_s2 = inlined_call_operand.vmem [shape: f32[1,96], index: 2, kind: input, shape index: {}]   ;;  %s298_s0 = inlined_call_operand.vmem [shape: f32[56,64], index: 0, kind: input, shape index: {}]   ;;  %s299_s3 = inlined_call_operand.vmem [shape: f32[56,96], index: 3, kind: output, shape index: {}]  }
   0x1   :  { %v28_v0 = vld [vmem:[%s296_s1 + $0x38] sm:$0xff]  ;;  %v27_v1 = vld [vmem:[%s296_s1 + $0x30] sm:$0xff]  ;;  %v26_v2 = vld [vmem:[%s296_s1 + $0x28] sm:$0xff] }
   0x2   :  { %154 = vmatpush.msra.mxu1 %v28_v0  ;;  %155 = vmatpush.msra.mxu2 %v28_v0  ;;  %v25_v3 = vld [vmem:[%s296_s1 + $0x20] sm:$0xff]  ;;  %v24_v4 = vld [vmem:[%s296_s1 + $0x18] sm:$0xff]  ;;  %v23_v5 = vld [vmem:[%s296_s1 + $0x10] sm:$0xff] }
   0x3   :  { %156 = vmatpush.msra.mxu3 %v28_v0  ;;  %63 = vmatpush.msra.mxu0 %v28_v0  ;;  %v22_v6 = vld [vmem:[%s296_s1 + $0x8] sm:$0xff]  ;;  %v21_v7 = vld [vmem:[%s296_s1] sm:$0xff]  ;;  %v17_v9 = vld [vmem:[%s298_s0 + $0x18] sm:$0xff] }
   0x4   :  { %157 = vmatpush.msra.mxu1 %v27_v1  ;;  %158 = vmatpush.msra.mxu2 %v27_v1  ;;  %v15_v8 = vld [vmem:[%s298_s0 + $0x8] sm:$0xff]  ;;  %v14_v11 = vld [vmem:[%s298_s0] sm:$0xff]  ;;  %v16_v12 = vld [vmem:[%s298_s0 + $0x10] sm:$0xff] }
   0x5   :  { %159 = vmatpush.msra.mxu3 %v27_v1  ;;  %64 = vmatpush.msra.mxu0 %v27_v1  ;;  %v19_v10 = vld [vmem:[%s298_s0 + $0x28] sm:$0xff]  ;;  %v18_v13 = vld [vmem:[%s298_s0 + $0x20] sm:$0xff]  ;;  %v20_v14 = vld [vmem:[%s298_s0 + $0x30] sm:$0xff] }
   0x6   :  { %160 = vmatpush.msra.mxu1 %v26_v2  ;;  %161 = vmatpush.msra.mxu2 %v26_v2  ;;  %v178_v15 = vld [vmem:[%s297_s2] ss:$0 sm:$0xff] }
   0x7   :  { %162 = vmatpush.msra.mxu3 %v26_v2  ;;  %65 = vmatpush.msra.mxu0 %v26_v2 }
   0x8   :  { %163 = vmatpush.msra.mxu1 %v25_v3  ;;  %164 = vmatpush.msra.mxu2 %v25_v3 }
   0x9   :  { %165 = vmatpush.msra.mxu3 %v25_v3  ;;  %66 = vmatpush.msra.mxu0 %v25_v3 }
   0xa   :  { %166 = vmatpush.msra.mxu1 %v24_v4  ;;  %167 = vmatpush.msra.mxu2 %v24_v4 }
   0xb   :  { %168 = vmatpush.msra.mxu3 %v24_v4  ;;  %67 = vmatpush.msra.mxu0 %v24_v4 }
   0xc   :  { %169 = vmatpush.msra.mxu1 %v23_v5  ;;  %170 = vmatpush.msra.mxu2 %v23_v5 }
   0xd   :  { %171 = vmatpush.msra.mxu3 %v23_v5  ;;  %68 = vmatpush.msra.mxu0 %v23_v5 }
   0xe   :  { %172 = vmatpush.msra.mxu1 %v22_v6  ;;  %173 = vmatpush.msra.mxu2 %v22_v6 }
   0xf   :  { %174 = vmatpush.msra.mxu3 %v22_v6  ;;  %69 = vmatpush.msra.mxu0 %v22_v6 }
  0x10   :  { %175 = vmatpush.msra.mxu1 %v21_v7  ;;  %176 = vmatpush.msra.mxu2 %v21_v7 }
  0x11   :  { %177 = vmatpush.msra.mxu3 %v21_v7  ;;  %141 = vmatmul.msk.f32.vlgmr.msra.gmra.mxu1 %vm33_vm0, %v15_v8 }
  0x12   :  { %143 = vmatmul.msk.f32.vlgmr.msra.gmra.mxu2 %vm33_vm0, %v17_v9  ;;  %145 = vmatmul.msk.f32.vlgmr.msra.gmra.mxu3 %vm33_vm0, %v19_v10 }
  0x13   :  { %70 = vmatpush.msra.mxu0 %v21_v7 }
  0x14   :  { %140 = vmatmul.msk.f32.vlgmr.msra.gmra.mxu0 %vm33_vm0, %v14_v11 }
  0x19   :  { %142 = vmatmul.msk.f32.gmra.mxu1 %vm33_vm0, %v16_v12 }
  0x1a   :  { %144 = vmatmul.msk.f32.gmra.mxu2 %vm33_vm0, %v18_v13  ;;  %146 = vmatmul.msk.f32.gmra.mxu3 %vm33_vm0, %v20_v14 }
  0x8e   :  { %v75_v16 = vpop.f32.mrf.mxu1 }
  0x8f   :  { %v76_v17 = vadd.f32 %v178_v15, %v75_v16 }
  0x91   :  { %v102_v18 = vmul.f32 1.442695, %v76_v17  ;;  %v72_v19 = vpop.f32.mrf.mxu0  ;;  %vm94_vm2 = vcmp.gt.f32.partialorder %v76_v17, 0.0 }
  0x92   :  { %v73_v20 = vadd.f32 %v178_v15, %v72_v19 }
  0x93   :  { %179 = vpow2.f32 %v102_v18 }
  0x94   :  { %v100_v21 = vmul.f32 1.442695, %v73_v20  ;;  %vm93_vm3 = vcmp.gt.f32.partialorder %v73_v20, 0.0 }
  0x95   :  { %v81_v22 = vpop.f32.mrf.mxu2  ;;  %v87_v23 = vpop.f32.mrf.mxu3 }
  0x96   :  { %181 = vpow2.f32 %v100_v21  ;;  %v82_v24 = vadd.f32 %v178_v15, %v81_v22  ;;  %v88_v25 = vadd.f32 %v178_v15, %v87_v23  ;;  %v78_v26 = vpop.f32.mrf.mxu1 }
  0x97   :  { %v79_v27 = vadd.f32 %v178_v15, %v78_v26 }
  0x98   :  { %v106_v28 = vmul.f32 1.442695, %v82_v24  ;;  %v110_v29 = vmul.f32 1.442695, %v88_v25  ;;  %vm96_vm4 = vcmp.gt.f32.partialorder %v82_v24, 0.0  ;;  %vm98_vm5 = vcmp.gt.f32.partialorder %v88_v25, 0.0 }
  0x99   :  { %v180_v30 = vpop.eup %179  ;;  %v104_v31 = vmul.f32 1.442695, %v79_v27  ;;  %vm95_vm6 = vcmp.gt.f32.partialorder %v79_v27, 0.0 }
  0x9a   :  { %v148_v32 = vadd.f32 -1.0, %v180_v30  ;;  %183 = vpow2.f32 %v106_v28 }
  0x9b   :  { %185 = vpow2.f32 %v110_v29 }
  0x9c   :  { %v182_v33 = vpop.eup %181  ;;  %v122_v34 = vsel %vm94_vm2, %v76_v17, %v148_v32  ;;  %187 = vpow2.f32 %v104_v31 }
  0x9d   :  { %130 = vst.msk [vmem:[%s299_s3 + $0x8] sm:$0xff] %vm128_vm1, %v122_v34  ;;  %v147_v35 = vadd.f32 -1.0, %v182_v33  ;;  %v84_v36 = vpop.f32.mrf.mxu2  ;;  %v90_v37 = vpop.f32.mrf.mxu3 }
  0x9e   :  { %v85_v38 = vadd.f32 %v178_v15, %v84_v36  ;;  %v91_v39 = vadd.f32 %v178_v15, %v90_v37 }
  0x9f   :  { %v121_v40 = vsel %vm93_vm3, %v73_v20, %v147_v35 }
  0xa0   :  { %v184_v41 = vpop.eup %183  ;;  %129 = vst.msk [vmem:[%s299_s3] sm:$0xff] %vm128_vm1, %v121_v40  ;;  %v108_v42 = vmul.f32 1.442695, %v85_v38  ;;  %v112_v45 = vmul.f32 1.442695, %v91_v39  ;;  %vm97_vm7 = vcmp.gt.f32.partialorder %v85_v38, 0.0 }
  0xa1   :  { %v186_v43 = vpop.eup %185  ;;  %v150_v44 = vadd.f32 -1.0, %v184_v41  ;;  %vm99_vm8 = vcmp.gt.f32.partialorder %v91_v39, 0.0 }
  0xa2   :  { %v188_v46 = vpop.eup %187  ;;  %v152_v47 = vadd.f32 -1.0, %v186_v43  ;;  %189 = vpow2.f32 %v108_v42 }
  0xa3   :  { %v124_v48 = vsel %vm96_vm4, %v82_v24, %v150_v44  ;;  %v149_v49 = vadd.f32 -1.0, %v188_v46  ;;  %191 = vpow2.f32 %v112_v45 }
  0xa4   :  { %132 = vst.msk [vmem:[%s299_s3 + $0x18] sm:$0xff] %vm128_vm1, %v124_v48  ;;  %v126_v50 = vsel %vm98_vm5, %v88_v25, %v152_v47 }
  0xa5   :  { %134 = vst.msk [vmem:[%s299_s3 + $0x28] sm:$0xff] %vm128_vm1, %v126_v50  ;;  %v123_v51 = vsel %vm95_vm6, %v79_v27, %v149_v49 }
  0xa6   :  { %131 = vst.msk [vmem:[%s299_s3 + $0x10] sm:$0xff] %vm128_vm1, %v123_v51 }
  0xa8   :  { %v190_v52 = vpop.eup %189 }
  0xa9   :  { %v192_v53 = vpop.eup %191  ;;  %v151_v54 = vadd.f32 -1.0, %v190_v52 }
  0xaa   :  { %v153_v55 = vadd.f32 -1.0, %v192_v53 }
  0xab   :  { %v125_v56 = vsel %vm97_vm7, %v85_v38, %v151_v54 }
  0xac   :  { %133 = vst.msk [vmem:[%s299_s3 + $0x20] sm:$0xff] %vm128_vm1, %v125_v56  ;;  %v127_v57 = vsel %vm99_vm8, %v91_v39, %v153_v55 }
  0xad   :  { %135 = vst.msk [vmem:[%s299_s3 + $0x30] sm:$0xff] %vm128_vm1, %v127_v57 }

// kernel: dp_lstm_forward.18
= control target key start
LH: loop header
LB: loop body
LE: loop exit
PB: predicated region body
PF: predicated region fallthrough
CT: control target
= control target key end

     0   :  { %vm28_vm0 = vcmask 261120   ;;  %s188_s1 = inlined_call_operand.vmem [shape: f32[32,128], index: 1, kind: input, shape index: {}]   ;;  %s189_s0 = inlined_call_operand.vmem [shape: f32[48,32], index: 0, kind: input, shape index: {}]   ;;  %s190_s2 = inlined_call_operand.vmem [shape: f32[1,128], index: 2, kind: input, shape index: {}]   ;;  %s191_s3 = inlined_call_operand.vmem [shape: f32[48,128], index: 3, kind: output, shape index: {}]  }
   0x1   :  { %v23_v0 = vld [vmem:[%s188_s1 + $0x18] sm:$0xff]  ;;  %v22_v1 = vld [vmem:[%s188_s1 + $0x10] sm:$0xff]  ;;  %v21_v2 = vld [vmem:[%s188_s1 + $0x8] sm:$0xff] }
   0x2   :  { %100 = vmatpush.msra.mxu3 %v23_v0  ;;  %98 = vmatpush.msra.mxu1 %v23_v0  ;;  %v20_v3 = vld [vmem:[%s188_s1] sm:$0xff]  ;;  %v15_v5 = vld [vmem:[%s189_s0 + $0x8] sm:$0xff]  ;;  %v17_v6 = vld [vmem:[%s189_s0 + $0x18] sm:$0xff] }
   0x3   :  { %99 = vmatpush.msra.mxu2 %v23_v0  ;;  %59 = vmatpush.msra.mxu0 %v23_v0  ;;  %v18_v4 = vld [vmem:[%s189_s0 + $0x20] sm:$0xff]  ;;  %v19_v8 = vld [vmem:[%s189_s0 + $0x28] sm:$0xff]  ;;  %v16_v9 = vld [vmem:[%s189_s0 + $0x10] sm:$0xff] }
   0x4   :  { %103 = vmatpush.msra.mxu3 %v22_v1  ;;  %101 = vmatpush.msra.mxu1 %v22_v1  ;;  %v14_v7 = vld [vmem:[%s189_s0] sm:$0xff] }
   0x5   :  { %102 = vmatpush.msra.mxu2 %v22_v1  ;;  %60 = vmatpush.msra.mxu0 %v22_v1  ;;  %v110_v10 = vld [vmem:[%s190_s2] ss:$0 sm:$0xff] }
   0x6   :  { %106 = vmatpush.msra.mxu3 %v21_v2  ;;  %104 = vmatpush.msra.mxu1 %v21_v2 }
   0x7   :  { %105 = vmatpush.msra.mxu2 %v21_v2  ;;  %61 = vmatpush.msra.mxu0 %v21_v2 }
   0x8   :  { %109 = vmatpush.msra.mxu3 %v20_v3  ;;  %107 = vmatpush.msra.mxu1 %v20_v3 }
   0x9   :  { %96 = vmatmul.msk.f32.vlgmr.msra.gmra.mxu3 %vm28_vm0, %v18_v4  ;;  %93 = vmatmul.msk.f32.vlgmr.msra.gmra.mxu1 %vm28_vm0, %v15_v5 }
   0xa   :  { %108 = vmatpush.msra.mxu2 %v20_v3  ;;  %62 = vmatpush.msra.mxu0 %v20_v3 }
   0xb   :  { %95 = vmatmul.msk.f32.vlgmr.msra.gmra.mxu2 %vm28_vm0, %v17_v6  ;;  %92 = vmatmul.msk.f32.vlgmr.msra.gmra.mxu0 %vm28_vm0, %v14_v7 }
  0x11   :  { %97 = vmatmul.msk.f32.gmra.mxu3 %vm28_vm0, %v19_v8  ;;  %94 = vmatmul.msk.f32.gmra.mxu1 %vm28_vm0, %v16_v9 }
  0x86   :  { %v67_v11 = vpop.f32.mrf.mxu1 }
  0x87   :  { %v68_v12 = vadd.f32 %v110_v10, %v67_v11 }
  0x88   :  { %v64_v13 = vpop.f32.mrf.mxu0 }
  0x89   :  { %83 = vst [vmem:[%s191_s3 + $0x8] sm:$0xff] %v68_v12  ;;  %v65_v14 = vadd.f32 %v110_v10, %v64_v13 }
  0x8b   :  { %82 = vst [vmem:[%s191_s3] sm:$0xff] %v65_v14 }
  0x8c   :  { %v76_v15 = vpop.f32.mrf.mxu3 }
  0x8d   :  { %v77_v16 = vadd.f32 %v110_v10, %v76_v15 }
  0x8e   :  { %v70_v17 = vpop.f32.mrf.mxu1  ;;  %v73_v18 = vpop.f32.mrf.mxu2 }
  0x8f   :  { %86 = vst [vmem:[%s191_s3 + $0x20] sm:$0xff] %v77_v16  ;;  %v71_v19 = vadd.f32 %v110_v10, %v70_v17  ;;  %v74_v20 = vadd.f32 %v110_v10, %v73_v18 }
  0x91   :  { %84 = vst [vmem:[%s191_s3 + $0x10] sm:$0xff] %v71_v19 }
  0x92   :  { %85 = vst [vmem:[%s191_s3 + $0x18] sm:$0xff] %v74_v20 }
  0x94   :  { %v79_v21 = vpop.f32.mrf.mxu3 }
  0x95   :  { %v80_v22 = vadd.f32 %v110_v10, %v79_v21 }
  0x97   :  { %87 = vst [vmem:[%s191_s3 + $0x28] sm:$0xff] %v80_v22 }

// kernel: dp_lstm_forward.22
= control target key start
LH: loop header
LB: loop body
LE: loop exit
PB: predicated region body
PF: predicated region fallthrough
CT: control target
= control target key end

     0   :  { %vm28_vm0 = vcmask 261120   ;;  %vm112_vm1 = vcmask 523264   ;;  %s243_s1 = inlined_call_operand.vmem [shape: f32[32,64], index: 1, kind: input, shape index: {}]   ;;  %s244_s0 = inlined_call_operand.vmem [shape: f32[48,32], index: 0, kind: input, shape index: {}]   ;;  %s245_s2 = inlined_call_operand.vmem [shape: f32[1,64], index: 2, kind: input, shape index: {}]   ;;  %s246_s3 = inlined_call_operand.vmem [shape: f32[48,64], index: 3, kind: output, shape index: {}]  }
   0x1   :  { %v23_v0 = vld [vmem:[%s243_s1 + $0x18] sm:$0xff]  ;;  %v22_v1 = vld [vmem:[%s243_s1 + $0x10] sm:$0xff]  ;;  %v21_v2 = vld [vmem:[%s243_s1 + $0x8] sm:$0xff] }
   0x2   :  { %135 = vmatpush.msra.mxu1 %v23_v0  ;;  %136 = vmatpush.msra.mxu2 %v23_v0  ;;  %v20_v3 = vld [vmem:[%s243_s1] sm:$0xff]  ;;  %v15_v4 = vld [vmem:[%s244_s0 + $0x8] sm:$0xff]  ;;  %v17_v5 = vld [vmem:[%s244_s0 + $0x18] sm:$0xff] }
   0x3   :  { %137 = vmatpush.msra.mxu3 %v23_v0  ;;  %59 = vmatpush.msra.mxu0 %v23_v0  ;;  %v18_v6 = vld [vmem:[%s244_s0 + $0x20] sm:$0xff]  ;;  %v16_v8 = vld [vmem:[%s244_s0 + $0x10] sm:$0xff]  ;;  %v19_v9 = vld [vmem:[%s244_s0 + $0x28] sm:$0xff] }
   0x4   :  { %138 = vmatpush.msra.mxu1 %v22_v1  ;;  %139 = vmatpush.msra.mxu2 %v22_v1  ;;  %v14_v7 = vld [vmem:[%s244_s0] sm:$0xff] }
   0x5   :  { %140 = vmatpush.msra.mxu3 %v22_v1  ;;  %60 = vmatpush.msra.mxu0 %v22_v1  ;;  %v147_v10 = vld [vmem:[%s245_s2] ss:$0 sm:$0xff] }
   0x6   :  { %141 = vmatpush.msra.mxu1 %v21_v2  ;;  %142 = vmatpush.msra.mxu2 %v21_v2 }
   0x7   :  { %143 = vmatpush.msra.mxu3 %v21_v2  ;;  %61 = vmatpush.msra.mxu0 %v21_v2 }
   0x8   :  { %144 = vmatpush.msra.mxu1 %v20_v3  ;;  %145 = vmatpush.msra.mxu2 %v20_v3 }
   0x9   :  { %146 = vmatpush.msra.mxu3 %v20_v3  ;;  %124 = vmatmul.msk.f32.vlgmr.msra.gmra.mxu1 %vm28_vm0, %v15_v4 }
   0xa   :  { %126 = vmatmul.msk.f32.vlgmr.msra.gmra.mxu2 %vm28_vm0, %v17_v5  ;;  %127 = vmatmul.msk.f32.vlgmr.msra.gmra.mxu3 %vm28_vm0, %v18_v6 }
   0xb   :  { %62 = vmatpush.msra.mxu0 %v20_v3 }
   0xc   :  { %123 = vmatmul.msk.f32.vlgmr.msra.gmra.mxu0 %vm28_vm0, %v14_v7 }
  0x11   :  { %125 = vmatmul.msk.f32.gmra.mxu1 %vm28_vm0, %v16_v8 }
  0x12   :  { %128 = vmatmul.msk.f32.gmra.mxu3 %vm28_vm0, %v19_v9 }
  0x86   :  { %v67_v11 = vpop.f32.mrf.mxu1 }
  0x87   :  { %v68_v12 = vadd.f32 %v147_v10, %v67_v11 }
  0x89   :  { %v90_v13 = vmul.f32 1.442695, %v68_v12  ;;  %v64_v14 = vpop.f32.mrf.mxu0  ;;  %vm83_vm2 = vcmp.gt.f32.partialorder %v68_v12, 0.0 }
  0x8a   :  { %v65_v15 = vadd.f32 %v147_v10, %v64_v14 }
  0x8b   :  { %148 = vpow2.f32 %v90_v13 }
  0x8c   :  { %v88_v16 = vmul.f32 1.442695, %v65_v15  ;;  %vm82_vm3 = vcmp.gt.f32.partialorder %v65_v15, 0.0 }
  0x8d   :  { %v73_v17 = vpop.f32.mrf.mxu2  ;;  %v76_v18 = vpop.f32.mrf.mxu3 }
  0x8e   :  { %150 = vpow2.f32 %v88_v16  ;;  %v74_v19 = vadd.f32 %v147_v10, %v73_v17  ;;  %v77_v20 = vadd.f32 %v147_v10, %v76_v18  ;;  %v70_v21 = vpop.f32.mrf.mxu1 }
  0x8f   :  { %v71_v22 = vadd.f32 %v147_v10, %v70_v21 }
  0x90   :  { %v94_v23 = vmul.f32 1.442695, %v74_v19  ;;  %v96_v24 = vmul.f32 1.442695, %v77_v20  ;;  %vm85_vm4 = vcmp.gt.f32.partialorder %v74_v19, 0.0  ;;  %vm86_vm5 = vcmp.gt.f32.partialorder %v77_v20, 0.0 }
  0x91   :  { %v149_v25 = vpop.eup %148  ;;  %v92_v26 = vmul.f32 1.442695, %v71_v22  ;;  %vm84_vm6 = vcmp.gt.f32.partialorder %v71_v22, 0.0 }
  0x92   :  { %v130_v27 = vadd.f32 -1.0, %v149_v25  ;;  %152 = vpow2.f32 %v94_v23 }
  0x93   :  { %154 = vpow2.f32 %v96_v24 }
  0x94   :  { %v151_v28 = vpop.eup %150  ;;  %v107_v29 = vsel %vm83_vm2, %v68_v12, %v130_v27  ;;  %156 = vpow2.f32 %v92_v26 }
  0x95   :  { %114 = vst.msk [vmem:[%s246_s3 + $0x8] sm:$0xff] %vm112_vm1, %v107_v29  ;;  %v129_v30 = vadd.f32 -1.0, %v151_v28  ;;  %v79_v31 = vpop.f32.mrf.mxu3 }
  0x96   :  { %v80_v32 = vadd.f32 %v147_v10, %v79_v31 }
  0x97   :  { %v106_v33 = vsel %vm82_vm3, %v65_v15, %v129_v30 }
  0x98   :  { %v153_v34 = vpop.eup %152  ;;  %113 = vst.msk [vmem:[%s246_s3] sm:$0xff] %vm112_vm1, %v106_v33  ;;  %v98_v35 = vmul.f32 1.442695, %v80_v32  ;;  %vm87_vm7 = vcmp.gt.f32.partialorder %v80_v32, 0.0 }
  0x99   :  { %v155_v36 = vpop.eup %154  ;;  %v132_v37 = vadd.f32 -1.0, %v153_v34 }
  0x9a   :  { %v157_v38 = vpop.eup %156  ;;  %v133_v39 = vadd.f32 -1.0, %v155_v36  ;;  %158 = vpow2.f32 %v98_v35 }
  0x9b   :  { %v109_v40 = vsel %vm85_vm4, %v74_v19, %v132_v37  ;;  %v131_v41 = vadd.f32 -1.0, %v157_v38 }
  0x9c   :  { %116 = vst.msk [vmem:[%s246_s3 + $0x18] sm:$0xff] %vm112_vm1, %v109_v40  ;;  %v110_v42 = vsel %vm86_vm5, %v77_v20, %v133_v39 }
  0x9d   :  { %117 = vst.msk [vmem:[%s246_s3 + $0x20] sm:$0xff] %vm112_vm1, %v110_v42  ;;  %v108_v43 = vsel %vm84_vm6, %v71_v22, %v131_v41 }
  0x9e   :  { %115 = vst.msk [vmem:[%s246_s3 + $0x10] sm:$0xff] %vm112_vm1, %v108_v43 }
  0xa0   :  { %v159_v44 = vpop.eup %158 }
  0xa1   :  { %v134_v45 = vadd.f32 -1.0, %v159_v44 }
  0xa3   :  { %v111_v46 = vsel %vm87_vm7, %v80_v32, %v134_v45 }
  0xa4   :  { %118 = vst.msk [vmem:[%s246_s3 + $0x28] sm:$0xff] %vm112_vm1, %v111_v46 }

// kernel: dp_lstm_forward.23
= control target key start
LH: loop header
LB: loop body
LE: loop exit
PB: predicated region body
PF: predicated region fallthrough
CT: control target
= control target key end

     0   :  { %vm24_vm0 = vcmask 261120   ;;  %vm54_vm1 = vcmask 269312   ;;  %s115_s1 = inlined_call_operand.vmem [shape: f32[32,33], index: 1, kind: input, shape index: {}]   ;;  %s116_s2 = inlined_call_operand.vmem [shape: f32[1,33], index: 2, kind: input, shape index: {}]   ;;  %s117_s0 = inlined_call_operand.vmem [shape: f32[16,32], index: 0, kind: input, shape index: {}]   ;;  %s118_s3 = inlined_call_operand.vmem [shape: f32[16,33], index: 3, kind: output, shape index: {}]  }
   0x1   :  { %v19_v0 = vld [vmem:[%s115_s1 + $0x18] sm:$0xff]  ;;  %v18_v1 = vld [vmem:[%s115_s1 + $0x10] sm:$0xff]  ;;  %v17_v2 = vld [vmem:[%s115_s1 + $0x8] sm:$0xff] }
   0x2   :  { %43 = vmatpush.msra.mxu0 %v19_v0  ;;  %63 = vmatpush.msra.mxu1 %v19_v0  ;;  %v16_v3 = vld [vmem:[%s115_s1] sm:$0xff]  ;;  %v15_v5 = vld [vmem:[%s117_s0 + $0x8] sm:$0xff] }
   0x3   :  { %v14_v4 = vld [vmem:[%s117_s0] sm:$0xff] }
   0x4   :  { %44 = vmatpush.msra.mxu0 %v18_v1  ;;  %64 = vmatpush.msra.mxu1 %v18_v1  ;;  %v67_v6 = vld [vmem:[%s116_s2] ss:$0 sm:$0xff] }
   0x6   :  { %45 = vmatpush.msra.mxu0 %v17_v2  ;;  %65 = vmatpush.msra.mxu1 %v17_v2 }
   0x8   :  { %46 = vmatpush.msra.mxu0 %v16_v3  ;;  %66 = vmatpush.msra.mxu1 %v16_v3 }
   0x9   :  { %61 = vmatmul.msk.f32.vlgmr.msra.gmra.mxu0 %vm24_vm0, %v14_v4  ;;  %62 = vmatmul.msk.f32.vlgmr.msra.gmra.mxu1 %vm24_vm0, %v15_v5 }
  0x86   :  { %v48_v7 = vpop.f32.mrf.mxu0  ;;  %v51_v8 = vpop.f32.mrf.mxu1 }
  0x87   :  { %v49_v9 = vadd.f32 %v67_v6, %v48_v7  ;;  %v52_v10 = vadd.f32 %v67_v6, %v51_v8 }
  0x89   :  { %55 = vst.msk [vmem:[%s118_s3] sm:$0xff] %vm54_vm1, %v49_v9 }
  0x8a   :  { %56 = vst.msk [vmem:[%s118_s3 + $0x8] sm:$0xff] %vm54_vm1, %v52_v10 }

// kernel: dp_lstm_forward.19
= control target key start
LH: loop header
LB: loop body
LE: loop exit
PB: predicated region body
PF: predicated region fallthrough
CT: control target
= control target key end

     0   :  { %s883_s0 = inlined_call_operand.vmem [shape: f32[6,8,128], index: 0, kind: input, shape index: {}]   ;;  %s884_s1 = inlined_call_operand.vmem [shape: f32[32,128], index: 1, kind: input, shape index: {}]   ;;  %s885_s2 = inlined_call_operand.vmem [shape: f32[6,8,1], index: 2, kind: input, shape index: {}]   ;;  %s886_s3 = inlined_call_operand.vmem [shape: f32[1,8,32], index: 3, kind: input, shape index: {}, may-alias: {3,4}]   ;;  %s887_s4 = inlined_call_operand.vmem [shape: f32[1,8,32], index: 4, kind: input, shape index: {}, may-alias: {3,4}]   ;;  %s888_s5 = inlined_call_operand.vmem [shape: f32[6,8,32], index: 5, kind: output, shape index: {0}]   ;;  %s889_s6 = inlined_call_operand.hbm [shape: f32[1,8,32], index: 6, kind: output, shape index: {1}]  }
   0x1   :  { %v26_v0 = vld [vmem:[%s884_s1 + $0x18] sm:$0xff]  ;;  %v25_v1 = vld [vmem:[%s884_s1 + $0x10] sm:$0xff]  ;;  %v24_v2 = vld [vmem:[%s884_s1 + $0x8] sm:$0xff] }
   0x2   :  { %46 = vmatpush.msra.mxu0 %v26_v0  ;;  %133 = vmatpush.msra.mxu1 %v26_v0 }
   0x3   :  { %215 = vmatpush.msra.mxu2 %v26_v0  ;;  %297 = vmatpush.msra.mxu3 %v26_v0 }
   0x4   :  { %12 = vsyncpa [#allocation3], 0  ;;  %47 = vmatpush.msra.mxu0 %v25_v1  ;;  %134 = vmatpush.msra.mxu1 %v25_v1  ;;  %v23_v3 = vld [vmem:[%s884_s1] sm:$0xff]  ;;  %vm30_vm0 = vcmask 261120   ;;  %s657_s7 = smov 64   ;;  %s658_s10 = smov 32  }
   0x5   :  { %216 = vmatpush.msra.mxu2 %v25_v1  ;;  %298 = vmatpush.msra.mxu3 %v25_v1  ;;  %v27_v4 = vld [vmem:[%s886_s3] sm:$0xff]  ;;  %v659_v15 = vmov 0   ;;  %v550_v39 = vld [vmem:[%s883_s0 + $0x8] sm:$0xff]  ;;  %s661_s11 = smov [#allocation2]   ;;  %s537_s13 = sshll.u32 %s889_s6, 4  ;;  %s538_s13 = int_to_ptr.hbm [resolvable:$true] %s537_s13 }
   0x6   :  { %48 = vmatpush.msra.mxu0 %v24_v2  ;;  %135 = vmatpush.msra.mxu1 %v24_v2  ;;  %v29_v5 = vld [vmem:[%s883_s0] sm:$0xff]  ;;  %v553_v43 = vld [vmem:[%s885_s2 + $0x8] sm:$0xff] }
   0x7   :  { %217 = vmatpush.msra.mxu2 %v24_v2  ;;  %299 = vmatpush.msra.mxu3 %v24_v2  ;;  %v28_v9 = vld [vmem:[%s887_s4] sm:$0xff]  ;;  %s660_s4 = smov 96   ;;  %vm181_vm7 = vcmp.gt.f32.partialorder %v553_v43, 0.5 }
   0x8   :  { %49 = vmatpush.msra.mxu0 %v23_v3  ;;  %136 = vmatpush.msra.mxu1 %v23_v3  ;;  %v96_v13 = vld [vmem:[%s885_s2] sm:$0xff]  ;;  %v182_v44 = vsel %vm181_vm7, 1, %v659_v15 }
   0x9   :  { %548 = vmatmul.msk.f32.vlgmr.msra.gmra.mxu0 %vm30_vm0, %v27_v4  ;;  %218 = vmatpush.msra.mxu2 %v23_v3  ;;  %vm97_vm1 = vcmp.gt.f32.partialorder %v96_v13, 0.5  ;;  %v558_v13 = vld [vmem:[%s885_s2 + $0x10] sm:$0xff] }
   0xa   :  { %300 = vmatpush.msra.mxu3 %v23_v3  ;;  %379 = vmatpush.msrb.mxu0 %v26_v0  ;;  %v98_v16 = vsel %vm97_vm1, 1, %v659_v15  ;;  %vm263_vm13 = vcmp.gt.f32.partialorder %v558_v13, 0.5  ;;  %v568_v13 = vld [vmem:[%s885_s2 + $0x20] sm:$0xff] }
   0xb   :  { %461 = vmatpush.msrb.mxu1 %v26_v0  ;;  %580 = vset.pattern.permute.xlu2 %v659_v15 }
   0xc   :  { %380 = vmatpush.msrb.mxu0 %v25_v1  ;;  %581 = vset.pattern.permute.xlu1 %v659_v15 }
   0xd   :  { %462 = vmatpush.msrb.mxu1 %v25_v1  ;;  %582 = vset.pattern.permute.xlu0 %v659_v15 }
   0xe   :  { %381 = vmatpush.msrb.mxu0 %v24_v2  ;;  %100 = vperm.xlu2 %580, %v98_v16   ;;  %v563_v16 = vld [vmem:[%s885_s2 + $0x18] sm:$0xff] }
   0xf   :  { %463 = vmatpush.msrb.mxu1 %v24_v2  ;;  %vm345_vm14 = vcmp.gt.f32.partialorder %v563_v16, 0.5 }
  0x10   :  { %382 = vmatpush.msrb.mxu0 %v23_v3 }
  0x11   :  { %464 = vmatpush.msrb.mxu1 %v23_v3 }
  0x16   :  { %103 = vrot.lane.b32.xlu2 %v27_v4, %s660_s4 }
  0x68   :  { %v731_v33 = vpop.permute.xlu2 %100 }
  0x69   :  { %vm102_vm6 = vcmp.eq.s32.totalorder %v731_v33, 1 }
  0x70   :  { %v104_v35 = vpop.permute.xlu2 %103 }
  0x86   :  { %v51_v6 = vpop.f32.mrf.mxu0 }
  0x87   :  { %v54_v7 = vadd.f32 %v51_v6, %v29_v5  ;;  %v555_v6 = vld [vmem:[%s883_s0 + $0x10] sm:$0xff] }
  0x89   :  { %583 = vtanh.f32 %v54_v7  ;;  %v549_v10 = vmul.f32 -1.442695, %v54_v7 }
  0x8b   :  { %585 = vpow2.f32 %v549_v10 }
  0x8f   :  { %v584_v8 = vpop.eup %583 }
  0x90   :  { %81 = vrot.lane.b32.xlu0 %v584_v8, %s657_s7 }
  0x91   :  { %v586_v11 = vpop.eup %585 }
  0x92   :  { %v58_v12 = vadd.f32 1.0, %v586_v11 }
  0x94   :  { %587 = vrcp.f32 %v58_v12  ;;  %v70_v21 = vand.u32 2147483648, %v58_v12  ;;  %vm64_vm3 = vweird.f32 %v58_v12  ;;  %v68_v22 = vand.u32 2147483647, %v58_v12 }
  0x96   :  { %v71_v24 = vor.u32 1.1754944e-38, %v70_v21  ;;  %vm69_vm5 = vcmp.eq.f32.partialorder %v68_v22, 8.507059e+37 }
  0x98   :  { %76 = vrot.lane.b32.xlu0 %v28_v9, %s658_s10 }
  0x9a   :  { %v588_v14 = vpop.eup %587 }
  0x9b   :  { %v60_v17 = vmul.f32 %v588_v14, %v58_v12  ;;  %vm65_vm2 = vweird.f32 %v588_v14 }
  0x9c   :  { %vm66_vm4 = vmor %vm64_vm3, %vm65_vm2 }
  0x9d   :  { %v61_v18 = vsub.f32 1.0, %v60_v17  ;;  %v346_v17 = vsel %vm345_vm14, 1, %v659_v15 }
  0x9f   :  { %v62_v19 = vmul.f32 %v588_v14, %v61_v18 }
  0xa1   :  { %v63_v20 = vadd.f32 %v588_v14, %v62_v19 }
  0xa3   :  { %v67_v23 = vsel %vm66_vm4, %v588_v14, %v63_v20  ;;  %v264_v14 = vsel %vm263_vm13, 1, %v659_v15 }
  0xa4   :  { %v72_v26 = vsel %vm69_vm5, %v71_v24, %v67_v23 }
 0x102   :  { %v82_v25 = vpop.permute.xlu0 %81 }
 0x103   :  { %v84_v27 = vmul.f32 %v82_v25, %v72_v26 }
 0x105   :  { %86 = vrot.lane.b32.xlu1 %v84_v27, %s658_s10 }
 0x10a   :  { %v77_v28 = vpop.permute.xlu0 %76 }
 0x10b   :  { %v79_v29 = vmul.f32 %v77_v28, %v72_v26 }
 0x177   :  { %v87_v30 = vpop.permute.xlu1 %86 }
 0x178   :  { %v89_v31 = vadd.f32 %v87_v30, %v79_v29 }
 0x17a   :  { %589 = vtanh.f32 %v89_v31  ;;  %v107_v60 = vsel %vm102_vm6, %v89_v31, %v77_v28 }
 0x180   :  { %v590_v32 = vpop.eup %589 }
 0x181   :  { %92 = vrot.lane.b32.xlu1 %v590_v32, %s657_s7 }
 0x1f3   :  { %v93_v34 = vpop.permute.xlu1 %92 }
 0x1f4   :  { %v733_v36 = vmul.f32 %v93_v34, %v72_v26 }
 0x1f6   :  { %v106_v37 = vsel %vm102_vm6, %v733_v36, %v104_v35 }
 0x1f7   :  { %117 = vrot.lane.b32.xlu0 %v106_v37, %s658_s10 }
 0x269   :  { %v118_v38 = vpop.permute.xlu0 %117 }
 0x26a   :  { %551 = vmatmul.msk.f32.vlgmr.msra.gmra.mxu1 %vm30_vm0, %v118_v38 }
 0x2e7   :  { %v138_v40 = vpop.f32.mrf.mxu1 }
 0x2e8   :  { %v141_v41 = vadd.f32 %v550_v39, %v138_v40 }
 0x2ea   :  { %591 = vtanh.f32 %v141_v41  ;;  %v552_v45 = vmul.f32 -1.442695, %v141_v41 }
 0x2ec   :  { %593 = vpow2.f32 %v552_v45 }
 0x2f0   :  { %v592_v42 = vpop.eup %591 }
 0x2f1   :  { %164 = vrot.lane.b32.xlu1 %v592_v42, %s657_s7  ;;  %v560_v42 = vld [vmem:[%s883_s0 + $0x18] sm:$0xff] }
 0x2f2   :  { %v594_v46 = vpop.eup %593 }
 0x2f3   :  { %v145_v47 = vadd.f32 1.0, %v594_v46 }
 0x2f5   :  { %595 = vrcp.f32 %v145_v47  ;;  %v157_v53 = vand.u32 2147483648, %v145_v47  ;;  %vm151_vm9 = vweird.f32 %v145_v47  ;;  %v155_v54 = vand.u32 2147483647, %v145_v47 }
 0x2f7   :  { %v158_v56 = vor.u32 1.1754944e-38, %v157_v53  ;;  %vm156_vm11 = vcmp.eq.f32.partialorder %v155_v54, 8.507059e+37 }
 0x2f9   :  { %184 = vperm.xlu1 %581, %v182_v44  }
 0x2fb   :  { %v596_v48 = vpop.eup %595 }
 0x2fc   :  { %v147_v49 = vmul.f32 %v596_v48, %v145_v47  ;;  %vm152_vm8 = vweird.f32 %v596_v48 }
 0x2fd   :  { %vm153_vm10 = vmor %vm151_vm9, %vm152_vm8 }
 0x2fe   :  { %v148_v50 = vsub.f32 1.0, %v147_v49 }
 0x300   :  { %v149_v51 = vmul.f32 %v596_v48, %v148_v50 }
 0x302   :  { %v150_v52 = vadd.f32 %v596_v48, %v149_v51 }
 0x304   :  { %v154_v55 = vsel %vm153_vm10, %v596_v48, %v150_v52 }
 0x305   :  { %v159_v58 = vsel %vm156_vm11, %v158_v56, %v154_v55  ;;  %vm427_vm11 = vcmp.gt.f32.partialorder %v568_v13, 0.5 }
 0x306   :  { %v162_v61 = vmul.f32 %v159_v58, %v107_v60 }
 0x363   :  { %v165_v57 = vpop.permute.xlu1 %164 }
 0x364   :  { %v167_v59 = vmul.f32 %v165_v57, %v159_v58 }
 0x366   :  { %169 = vrot.lane.b32.xlu2 %v167_v59, %s658_s10 }
 0x36b   :  { %v753_v1 = vpop.permute.xlu1 %184 }
 0x36c   :  { %vm186_vm12 = vcmp.eq.s32.totalorder %v753_v1, 1 }
 0x3c0   :  { %v170_v62 = vpop.permute.xlu2 %169 }
 0x3c1   :  { %v172_v63 = vadd.f32 %v170_v62, %v162_v61 }
 0x3c3   :  { %597 = vtanh.f32 %v172_v63  ;;  %v188_v30 = vsel %vm186_vm12, %v172_v63, %v107_v60 }
 0x3c9   :  { %v598_v0 = vpop.eup %597 }
 0x3ca   :  { %175 = vrot.lane.b32.xlu0 %v598_v0, %s657_s7 }
 0x43c   :  { %v176_v2 = vpop.permute.xlu0 %175 }
 0x43d   :  { %v755_v3 = vmul.f32 %v176_v2, %v159_v58 }
 0x43f   :  { %v187_v4 = vsel %vm186_vm12, %v755_v3, %v106_v37 }
 0x440   :  { %199 = vrot.lane.b32.xlu2 %v187_v4, %s658_s10 }
 0x49a   :  { %v200_v5 = vpop.permute.xlu2 %199 }
 0x49b   :  { %556 = vmatmul.msk.f32.vlgmr.msra.gmra.mxu2 %vm30_vm0, %v200_v5 }
 0x51e   :  { %v220_v7 = vpop.f32.mrf.mxu2 }
 0x51f   :  { %v223_v8 = vadd.f32 %v555_v6, %v220_v7 }
 0x521   :  { %599 = vtanh.f32 %v223_v8  ;;  %v557_v10 = vmul.f32 -1.442695, %v223_v8 }
 0x523   :  { %601 = vpow2.f32 %v557_v10 }
 0x527   :  { %v600_v9 = vpop.eup %599 }
 0x528   :  { %246 = vrot.lane.b32.xlu0 %v600_v9, %s657_s7  ;;  %v565_v9 = vld [vmem:[%s883_s0 + $0x20] sm:$0xff] }
 0x529   :  { %v602_v11 = vpop.eup %601 }
 0x52a   :  { %v227_v12 = vadd.f32 1.0, %v602_v11 }
 0x52c   :  { %603 = vrcp.f32 %v227_v12  ;;  %v239_v23 = vand.u32 2147483648, %v227_v12  ;;  %vm233_vm1 = vweird.f32 %v227_v12  ;;  %v237_v24 = vand.u32 2147483647, %v227_v12 }
 0x52e   :  { %v240_v26 = vor.u32 1.1754944e-38, %v239_v23  ;;  %vm238_vm3 = vcmp.eq.f32.partialorder %v237_v24, 8.507059e+37 }
 0x530   :  { %266 = vperm.xlu0 %582, %v264_v14   ;;  %v428_v14 = vsel %vm427_vm11, 1, %v659_v15 }
 0x532   :  { %v604_v18 = vpop.eup %603 }
 0x533   :  { %v229_v19 = vmul.f32 %v604_v18, %v227_v12  ;;  %vm234_vm15 = vweird.f32 %v604_v18 }
 0x534   :  { %vm235_vm2 = vmor %vm233_vm1, %vm234_vm15 }
 0x535   :  { %v230_v20 = vsub.f32 1.0, %v229_v19 }
 0x537   :  { %v231_v21 = vmul.f32 %v604_v18, %v230_v20 }
 0x538   :  { %348 = vperm.xlu0 %582, %v346_v17  }
 0x539   :  { %v232_v22 = vadd.f32 %v604_v18, %v231_v21 }
 0x53b   :  { %v236_v25 = vsel %vm235_vm2, %v604_v18, %v232_v22 }
 0x53c   :  { %v241_v28 = vsel %vm238_vm3, %v240_v26, %v236_v25 }
 0x53d   :  { %v244_v31 = vmul.f32 %v241_v28, %v188_v30 }
 0x59a   :  { %v247_v27 = vpop.permute.xlu0 %246 }
 0x59b   :  { %v249_v29 = vmul.f32 %v247_v27, %v241_v28 }
 0x59d   :  { %251 = vrot.lane.b32.xlu1 %v249_v29, %s658_s10 }
 0x5a2   :  { %v779_v37 = vpop.permute.xlu0 %266 }
 0x5a3   :  { %vm268_vm4 = vcmp.eq.s32.totalorder %v779_v37, 1 }
 0x60f   :  { %v252_v32 = vpop.permute.xlu1 %251 }
 0x610   :  { %v254_v34 = vadd.f32 %v252_v32, %v244_v31 }
 0x612   :  { %605 = vtanh.f32 %v254_v34  ;;  %v270_v61 = vsel %vm268_vm4, %v254_v34, %v188_v30 }
 0x618   :  { %v606_v35 = vpop.eup %605 }
 0x619   :  { %257 = vrot.lane.b32.xlu2 %v606_v35, %s657_s7 }
 0x673   :  { %v258_v38 = vpop.permute.xlu2 %257 }
 0x674   :  { %v781_v39 = vmul.f32 %v258_v38, %v241_v28 }
 0x676   :  { %v269_v40 = vsel %vm268_vm4, %v781_v39, %v187_v4  ;;  %v797_v4 = vpop.permute.xlu0 %348 }
 0x677   :  { %281 = vrot.lane.b32.xlu1 %v269_v40, %s658_s10  ;;  %vm350_vm10 = vcmp.eq.s32.totalorder %v797_v4, 1 }
 0x6e9   :  { %v282_v41 = vpop.permute.xlu1 %281 }
 0x6ea   :  { %561 = vmatmul.msk.f32.vlgmr.msra.gmra.mxu3 %vm30_vm0, %v282_v41 }
 0x76d   :  { %v302_v43 = vpop.f32.mrf.mxu3 }
 0x76e   :  { %v305_v44 = vadd.f32 %v560_v42, %v302_v43 }
 0x770   :  { %607 = vtanh.f32 %v305_v44  ;;  %v562_v46 = vmul.f32 -1.442695, %v305_v44 }
 0x772   :  { %609 = vpow2.f32 %v562_v46 }
 0x776   :  { %v608_v45 = vpop.eup %607 }
 0x777   :  { %328 = vrot.lane.b32.xlu2 %v608_v45, %s657_s7  ;;  %v570_v45 = vld [vmem:[%s883_s0 + $0x28] sm:$0xff] }
 0x778   :  { %v610_v47 = vpop.eup %609 }
 0x779   :  { %v309_v48 = vadd.f32 1.0, %v610_v47 }
 0x77b   :  { %611 = vrcp.f32 %v309_v48  ;;  %v321_v54 = vand.u32 2147483648, %v309_v48  ;;  %vm315_vm7 = vweird.f32 %v309_v48  ;;  %v319_v55 = vand.u32 2147483647, %v309_v48 }
 0x77d   :  { %v322_v57 = vor.u32 1.1754944e-38, %v321_v54  ;;  %vm320_vm9 = vcmp.eq.f32.partialorder %v319_v55, 8.507059e+37 }
 0x781   :  { %v612_v49 = vpop.eup %611 }
 0x782   :  { %v311_v50 = vmul.f32 %v612_v49, %v309_v48  ;;  %vm316_vm5 = vweird.f32 %v612_v49 }
 0x783   :  { %vm317_vm8 = vmor %vm315_vm7, %vm316_vm5 }
 0x784   :  { %v312_v51 = vsub.f32 1.0, %v311_v50 }
 0x786   :  { %v313_v52 = vmul.f32 %v612_v49, %v312_v51  ;;  %v189_v51 = vsel %vm186_vm12, %v755_v3, 0.0 }
 0x788   :  { %v314_v53 = vadd.f32 %v612_v49, %v313_v52 }
 0x78a   :  { %v318_v56 = vsel %vm317_vm8, %v612_v49, %v314_v53  ;;  %v573_v49 = vld [vmem:[%s885_s2 + $0x28] sm:$0xff] }
 0x78b   :  { %v323_v59 = vsel %vm320_vm9, %v322_v57, %v318_v56  ;;  %vm509_vm3 = vcmp.gt.f32.partialorder %v573_v49, 0.5 }
 0x78c   :  { %v326_v62 = vmul.f32 %v323_v59, %v270_v61  ;;  %v510_v50 = vsel %vm509_vm3, 1, %v659_v15 }
 0x7d1   :  { %v329_v58 = vpop.permute.xlu2 %328 }
 0x7d2   :  { %v331_v60 = vmul.f32 %v329_v58, %v323_v59 }
 0x7d4   :  { %333 = vrot.lane.b32.xlu1 %v331_v60, %s658_s10 }
 0x846   :  { %v334_v63 = vpop.permute.xlu1 %333 }
 0x847   :  { %v336_v0 = vadd.f32 %v334_v63, %v326_v62 }
 0x849   :  { %613 = vtanh.f32 %v336_v0  ;;  %v352_v31 = vsel %vm350_vm10, %v336_v0, %v270_v61 }
 0x84f   :  { %v614_v2 = vpop.eup %613 }
 0x850   :  { %339 = vrot.lane.b32.xlu2 %v614_v2, %s657_s7 }
 0x8aa   :  { %v340_v5 = vpop.permute.xlu2 %339 }
 0x8ab   :  { %v799_v6 = vmul.f32 %v340_v5, %v323_v59 }
 0x8ad   :  { %v351_v7 = vsel %vm350_vm10, %v799_v6, %v269_v40 }
 0x8ae   :  { %363 = vrot.lane.b32.xlu1 %v351_v7, %s658_s10 }
 0x920   :  { %v364_v8 = vpop.permute.xlu1 %363 }
 0x921   :  { %566 = vmatmul.msk.f32.vlgmr.msrb.gmra.mxu0 %vm30_vm0, %v364_v8 }
 0x99e   :  { %v384_v10 = vpop.f32.mrf.mxu0 }
 0x99f   :  { %v387_v11 = vadd.f32 %v565_v9, %v384_v10 }
 0x9a1   :  { %615 = vtanh.f32 %v387_v11  ;;  %v567_v16 = vmul.f32 -1.442695, %v387_v11 }
 0x9a3   :  { %617 = vpow2.f32 %v567_v16  ;;  %v108_v16 = vsel %vm102_vm6, %v733_v36, 0.0 }
 0x9a7   :  { %v616_v12 = vpop.eup %615 }
 0x9a8   :  { %410 = vrot.lane.b32.xlu2 %v616_v12, %s657_s7 }
 0x9a9   :  { %v618_v17 = vpop.eup %617 }
 0x9aa   :  { %v391_v18 = vadd.f32 1.0, %v618_v17  ;;  %v353_v17 = vsel %vm350_vm10, %v799_v6, 0.0 }
 0x9ac   :  { %619 = vrcp.f32 %v391_v18  ;;  %v403_v24 = vand.u32 2147483648, %v391_v18  ;;  %vm397_vm14 = vweird.f32 %v391_v18  ;;  %v401_v25 = vand.u32 2147483647, %v391_v18 }
 0x9ae   :  { %v404_v27 = vor.u32 1.1754944e-38, %v403_v24  ;;  %vm402_vm1 = vcmp.eq.f32.partialorder %v401_v25, 8.507059e+37 }
 0x9b0   :  { %430 = vperm.xlu2 %580, %v428_v14   ;;  %v271_v14 = vsel %vm268_vm4, %v781_v39, 0.0 }
 0x9b2   :  { %v620_v19 = vpop.eup %619 }
 0x9b3   :  { %v393_v20 = vmul.f32 %v620_v19, %v391_v18  ;;  %vm398_vm13 = vweird.f32 %v620_v19 }
 0x9b4   :  { %vm399_vm15 = vmor %vm397_vm14, %vm398_vm13 }
 0x9b5   :  { %v394_v21 = vsub.f32 1.0, %v393_v20 }
 0x9b7   :  { %v395_v22 = vmul.f32 %v620_v19, %v394_v21 }
 0x9b9   :  { %v396_v23 = vadd.f32 %v620_v19, %v395_v22 }
 0x9bb   :  { %v400_v26 = vsel %vm399_vm15, %v620_v19, %v396_v23 }
 0x9bc   :  { %v405_v29 = vsel %vm402_vm1, %v404_v27, %v400_v26 }
 0x9bd   :  { %v408_v32 = vmul.f32 %v405_v29, %v352_v31 }
 0xa02   :  { %v411_v28 = vpop.permute.xlu2 %410 }
 0xa03   :  { %v413_v30 = vmul.f32 %v411_v28, %v405_v29 }
 0xa05   :  { %415 = vrot.lane.b32.xlu0 %v413_v30, %s658_s10 }
 0xa0a   :  { %v431_v40 = vpop.permute.xlu2 %430 }
 0xa0b   :  { %vm432_vm2 = vcmp.eq.s32.totalorder %v431_v40, 1 }
 0xa77   :  { %v416_v34 = vpop.permute.xlu0 %415 }
 0xa78   :  { %v418_v35 = vadd.f32 %v416_v34, %v408_v32 }
 0xa7a   :  { %621 = vtanh.f32 %v418_v35  ;;  %v434_v8 = vsel %vm432_vm2, %v418_v35, %v352_v31 }
 0xa80   :  { %v622_v38 = vpop.eup %621 }
 0xa81   :  { %421 = vrot.lane.b32.xlu1 %v622_v38, %s657_s7 }
 0xaf3   :  { %v422_v41 = vpop.permute.xlu1 %421 }
 0xaf4   :  { %v424_v42 = vmul.f32 %v422_v41, %v405_v29 }
 0xaf6   :  { %v433_v43 = vsel %vm432_vm2, %v424_v42, %v351_v7  ;;  %v435_v52 = vsel %vm432_vm2, %v424_v42, 0.0 }
 0xaf7   :  { %445 = vrot.lane.b32.xlu0 %v433_v43, %s658_s10 }
 0xb69   :  { %v446_v44 = vpop.permute.xlu0 %445 }
 0xb6a   :  { %571 = vmatmul.msk.f32.vlgmr.msrb.gmra.mxu1 %vm30_vm0, %v446_v44 }
 0xbe7   :  { %v466_v46 = vpop.f32.mrf.mxu1 }
 0xbe8   :  { %v469_v47 = vadd.f32 %v570_v45, %v466_v46 }
 0xbea   :  { %623 = vtanh.f32 %v469_v47  ;;  %v572_v53 = vmul.f32 -1.442695, %v469_v47 }
 0xbec   :  { %625 = vpow2.f32 %v572_v53 }
 0xbf0   :  { %v624_v48 = vpop.eup %623 }
 0xbf1   :  { %492 = vrot.lane.b32.xlu1 %v624_v48, %s657_s7 }
 0xbf2   :  { %v626_v54 = vpop.eup %625 }
 0xbf3   :  { %v473_v55 = vadd.f32 1.0, %v626_v54 }
 0xbf5   :  { %627 = vrcp.f32 %v473_v55  ;;  %v485_v60 = vand.u32 2147483648, %v473_v55  ;;  %vm479_vm7 = vweird.f32 %v473_v55  ;;  %v483_v1 = vand.u32 2147483647, %v473_v55 }
 0xbf7   :  { %v486_v61 = vor.u32 1.1754944e-38, %v485_v60  ;;  %vm484_vm8 = vcmp.eq.f32.partialorder %v483_v1, 8.507059e+37 }
 0xbf9   :  { %512 = vperm.xlu1 %581, %v510_v50  }
 0xbfb   :  { %v628_v56 = vpop.eup %627 }
 0xbfc   :  { %v475_v57 = vmul.f32 %v628_v56, %v473_v55  ;;  %vm480_vm5 = vweird.f32 %v628_v56 }
 0xbfd   :  { %vm481_vm12 = vmor %vm479_vm7, %vm480_vm5 }
 0xbfe   :  { %v476_v58 = vsub.f32 1.0, %v475_v57 }
 0xc00   :  { %v477_v15 = vmul.f32 %v628_v56, %v476_v58 }
 0xc01   :  { %191 = vrot.lane.b32.xlu1 %v189_v51, %s658_s10 }
 0xc02   :  { %v478_v59 = vadd.f32 %v628_v56, %v477_v15 }
 0xc04   :  { %v482_v3 = vsel %vm481_vm12, %v628_v56, %v478_v59 }
 0xc05   :  { %v487_v63 = vsel %vm484_vm8, %v486_v61, %v482_v3 }
 0xc06   :  { %v490_v9 = vmul.f32 %v487_v63, %v434_v8 }
 0xc09   :  { %437 = vrot.lane.b32.xlu1 %v435_v52, %s658_s10 }
 0xc63   :  { %v493_v62 = vpop.permute.xlu1 %492 }
 0xc64   :  { %v495_v0 = vmul.f32 %v493_v62, %v487_v63 }
 0xc66   :  { %497 = vrot.lane.b32.xlu2 %v495_v0, %s658_s10 }
 0xc6b   :  { %v513_v2 = vpop.permute.xlu1 %512 }
 0xc6c   :  { %vm514_vm9 = vcmp.eq.s32.totalorder %v513_v2, 1 }
 0xc73   :  { %v192_v5 = vpop.permute.xlu1 %191 }
 0xc74   :  { %554 = vst.msk [vmem:[%s888_s5 + $0x8] sm:$0xff] %vm30_vm0, %v192_v5 }
 0xc7b   :  { %v438_v7 = vpop.permute.xlu1 %437 }
 0xc7c   :  { %569 = vst.msk [vmem:[%s888_s5 + $0x20] sm:$0xff] %vm30_vm0, %v438_v7 }
 0xcc0   :  { %v498_v10 = vpop.permute.xlu2 %497 }
 0xcc1   :  { %v500_v11 = vadd.f32 %v498_v10, %v490_v9 }
 0xcc3   :  { %629 = vtanh.f32 %v500_v11  ;;  %v515_v12 = vsel %vm514_vm9, %v500_v11, %v434_v8 }
 0xcc4   :  { %524 = vrot.lane.b32.xlu2 %v515_v12, %s660_s4 }
 0xcc9   :  { %v630_v13 = vpop.eup %629 }
 0xcca   :  { %503 = vrot.lane.b32.xlu0 %v630_v13, %s657_s7  ;;  %s535_s7 = sshll.u32 %s661_s11, 4  ;;  %s536_s7 = int_to_ptr.vmem [resolvable:$true] %s535_s7 }
 0xccc   :  { %273 = vrot.lane.b32.xlu2 %v271_v14, %s658_s10 }
 0xcd2   :  { %110 = vrot.lane.b32.xlu0 %v108_v16, %s658_s10 }
 0xcda   :  { %355 = vrot.lane.b32.xlu0 %v353_v17, %s658_s10 }
 0xd1e   :  { %v525_v37 = vpop.permute.xlu2 %524 }
 0xd1f   :  { %527 = vst.msk [vmem:[#allocation2] sm:$0xff] %vm30_vm0, %v525_v37 }
 0xd20   :  { %540 = dma.vmem_to_hbm [thread:$0]  %s536_s7, 128, %s538_s13, [#allocation3]  }
 0xd26   :  { %v274_v33 = vpop.permute.xlu2 %273 }
 0xd27   :  { %559 = vst.msk [vmem:[%s888_s5 + $0x10] sm:$0xff] %vm30_vm0, %v274_v33 }
 0xd3c   :  { %v504_v36 = vpop.permute.xlu0 %503 }
 0xd3d   :  { %v506_v39 = vmul.f32 %v504_v36, %v487_v63 }
 0xd3f   :  { %v516_v4 = vsel %vm514_vm9, %v506_v39, 0.0 }
 0xd40   :  { %518 = vrot.lane.b32.xlu2 %v516_v4, %s658_s10 }
 0xd44   :  { %v111_v6 = vpop.permute.xlu0 %110 }
 0xd45   :  { %113 = vst.msk [vmem:[%s888_s5] sm:$0xff] %vm30_vm0, %v111_v6 }
 0xd4c   :  { %v356_v18 = vpop.permute.xlu0 %355 }
 0xd4d   :  { %564 = vst.msk [vmem:[%s888_s5 + $0x18] sm:$0xff] %vm30_vm0, %v356_v18 }
 0xd9a   :  { %v519_v19 = vpop.permute.xlu2 %518 }
 0xd9b   :  { %574 = vst.msk [vmem:[%s888_s5 + $0x28] sm:$0xff] %vm30_vm0, %v519_v19 }
 0xd9c   :  { %655 = dma.done.wait [#allocation3], 128  }
 0xd9d   :  { %656 = vsyncadd [#allocation3], 4294967168 }
 0xd9e   :  { %547 = vsyncpa [#allocation3], 1 }

// kernel: dp_lstm_forward.24
= control target key start
LH: loop header
LB: loop body
LE: loop exit
PB: predicated region body
PF: predicated region fallthrough
CT: control target
= control target key end

     0   :  { %vm39_vm0 = vcmask 261120   ;;  %v144_v0 = vmov 0   ;;  %vm126_vm1 = vcmask 54272   ;;  %s226_s4 = inlined_call_operand.vmem [shape: f32[2,6,1], index: 4, kind: input, shape index: {}]   ;;  %s227_s2 = inlined_call_operand.vmem [shape: f32[2,6,1], index: 2, kind: input, shape index: {}]   ;;  %s228_s1 = inlined_call_operand.vmem [shape: f32[2,7,32], index: 1, kind: input, shape index: {}]   ;;  %s229_s0 = inlined_call_operand.vmem [shape: f32[2,6,32], index: 0, kind: input, shape index: {}]   ;;  %s230_s5 = inlined_call_operand.vmem [shape: f32[2,1,7], index: 5, kind: input, shape index: {}]   ;;  %s231_s3 = inlined_call_operand.vmem [shape: f32[2,1,7], index: 3, kind: input, shape index: {}]   ;;  %s232_s6 = inlined_call_operand.vmem [shape: f32[2,6,7], index: 6, kind: output, shape index: {}]  }
   0x1   :  { %139 = vset.pattern.permute.xlu1 %v144_v0  ;;  %138 = vset.pattern.permute.xlu0 %v144_v0  ;;  %v102_v1 = vld [vmem:[%s226_s4] sm:$0x3f]  ;;  %v26_v4 = vld [vmem:[%s228_s1 + $0x8] sm:$0x7f] }
   0x2   :  { %v27_v2 = vld [vmem:[%s227_s2] sm:$0x3f]  ;;  %108 = vperm.xlu1 %139, %v102_v1   ;;  %135 = vmatpush.xpose.msk.msra.mxu1 %vm39_vm0, %v26_v4  ;;  %v24_v6 = vld [vmem:[%s229_s0 + $0x8] sm:$0x3f] }
   0x3   :  { %v25_v3 = vld [vmem:[%s228_s1] sm:$0x7f]  ;;  %31 = vperm.xlu0 %138, %v27_v2   ;;  %v103_v7 = vld [vmem:[%s226_s4 + $0x8] sm:$0x3f] }
   0x4   :  { %133 = vmatpush.xpose.msk.msra.mxu0 %vm39_vm0, %v25_v3  ;;  %v23_v5 = vld [vmem:[%s229_s0] sm:$0x3f]  ;;  %v28_v8 = vld [vmem:[%s227_s2 + $0x8] sm:$0x3f] }
   0x5   :  { %136 = vmatmul.msk.f32.vlgmr.msra.gmra.mxu1 %vm39_vm0, %v24_v6  ;;  %v140_v11 = vld [vmem:[%s230_s5] ss:$0 sm:$0xff]  ;;  %v141_v12 = vld [vmem:[%s230_s5 + $0x1] ss:$0 sm:$0xff] }
   0x6   :  { %v142_v15 = vld [vmem:[%s231_s3] ss:$0 sm:$0xff]  ;;  %v143_v16 = vld [vmem:[%s231_s3 + $0x1] ss:$0 sm:$0xff] }
   0x7   :  { %134 = vmatmul.msk.f32.vlgmr.msra.gmra.mxu0 %vm39_vm0, %v23_v5 }
   0xa   :  { %113 = vperm.xlu1 %139, %v103_v7  }
   0xb   :  { %36 = vperm.xlu0 %138, %v28_v8  }
  0x74   :  { %v109_v9 = vpop.permute.xlu1 %108 }
  0x75   :  { %v32_v10 = vpop.permute.xlu0 %31  ;;  %v122_v21 = vmul.f32 %v140_v11, %v109_v9 }
  0x7c   :  { %v114_v13 = vpop.permute.xlu1 %113 }
  0x7d   :  { %v37_v14 = vpop.permute.xlu0 %36  ;;  %v123_v22 = vmul.f32 %v141_v12, %v114_v13 }
  0x82   :  { %v89_v18 = vpop.f32.mrf.mxu1 }
  0x83   :  { %v90_v20 = vadd.f32 %v89_v18, %v37_v14 }
  0x84   :  { %v63_v17 = vpop.f32.mrf.mxu0 }
  0x85   :  { %v64_v19 = vadd.f32 %v63_v17, %v32_v10  ;;  %v101_v24 = vadd.f32 %v143_v16, %v90_v20 }
  0x87   :  { %v100_v23 = vadd.f32 %v142_v15, %v64_v19  ;;  %v125_v26 = vmul.f32 %v123_v22, %v101_v24 }
  0x89   :  { %v124_v25 = vmul.f32 %v122_v21, %v100_v23  ;;  %128 = vst.msk [vmem:[%s232_s6 + $0x8] sm:$0x3f] %vm126_vm1, %v125_v26 }
  0x8b   :  { %127 = vst.msk [vmem:[%s232_s6] sm:$0x3f] %vm126_vm1, %v124_v25 }

// kernel: dp_lstm_forward.25
= control target key start
LH: loop header
LB: loop body
LE: loop exit
PB: predicated region body
PF: predicated region fallthrough
CT: control target
= control target key end

     0   :  { %vm70_vm0 = vcmask 261120   ;;  %s850_s29 = smov 32   ;;  %s851_s22 = smov 96   ;;  %vm329_vm1 = vcmask 523264   ;;  %vm332_vm2 = vcmask 785408   ;;  %vm809_vm3 = vcmask 310272   ;;  %s1622_s2 = inlined_call_operand.vmem [shape: f32[32,1216], index: 2, kind: input, shape index: {}]   ;;  %s1623_s0 = inlined_call_operand.vmem [shape: f32[16,32], index: 0, kind: input, shape index: {}]   ;;  %s1624_s1 = inlined_call_operand.vmem [shape: f32[16,32], index: 1, kind: input, shape index: {}]   ;;  %s1625_s3 = inlined_call_operand.vmem [shape: f32[1216,38], index: 3, kind: input, shape index: {}]   ;;  %s1626_s4 = inlined_call_operand.vmem [shape: f32[32,38], index: 4, kind: input, shape index: {}]   ;;  %s1627_s5 = inlined_call_operand.vmem [shape: f32[32,38], index: 5, kind: input, shape index: {}]   ;;  %s1628_s6 = inlined_call_operand.vmem [shape: f32[1,38], index: 6, kind: input, shape index: {}]   ;;  %s1629_s7 = inlined_call_operand.vmem [shape: f32[16,38], index: 7, kind: output, shape index: {}]  }
   0x1   :  { %v60_v0 = vld [vmem:[%s1622_s2 + $0xf0] sm:$0xff]  ;;  %v61_v1 = vld [vmem:[%s1622_s2 + $0xf8] sm:$0xff]  ;;  %v63_v2 = vld [vmem:[%s1622_s2 + $0x108] sm:$0xff]  ;;  %s852_s9 = smov 64  }
   0x2   :  { %89 = vmatpush.msra.mxu0 %v60_v0  ;;  %842 = vmatpush.msra.mxu2 %v60_v0  ;;  %v50_v3 = vld [vmem:[%s1622_s2 + $0xa0] sm:$0xff]  ;;  %v51_v4 = vld [vmem:[%s1622_s2 + $0xa8] sm:$0xff]  ;;  %v53_v5 = vld [vmem:[%s1622_s2 + $0xb8] sm:$0xff] }
   0x3   :  { %112 = vmatpush.msra.mxu1 %v61_v1  ;;  %158 = vmatpush.msra.mxu3 %v63_v2  ;;  %v40_v6 = vld [vmem:[%s1622_s2 + $0x50] sm:$0xff]  ;;  %v41_v7 = vld [vmem:[%s1622_s2 + $0x58] sm:$0xff]  ;;  %v43_v8 = vld [vmem:[%s1622_s2 + $0x68] sm:$0xff] }
   0x4   :  { %90 = vmatpush.msra.mxu0 %v50_v3  ;;  %843 = vmatpush.msra.mxu2 %v50_v3  ;;  %v923_v9 = vld [vmem:[%s1623_s0] sm:$0xff]  ;;  %v31_v11 = vld [vmem:[%s1622_s2 + $0x8] sm:$0xff]  ;;  %v33_v12 = vld [vmem:[%s1622_s2 + $0x18] sm:$0xff] }
   0x5   :  { %113 = vmatpush.msra.mxu1 %v51_v4  ;;  %159 = vmatpush.msra.mxu3 %v53_v5  ;;  %v30_v10 = vld [vmem:[%s1622_s2] sm:$0xff]  ;;  %v944_v14 = vld [vmem:[%s1624_s1 + $0x8] sm:$0xff]  ;;  %v64_v16 = vld [vmem:[%s1622_s2 + $0x110] sm:$0xff] }
   0x6   :  { %91 = vmatpush.msra.mxu0 %v40_v6  ;;  %844 = vmatpush.msra.mxu2 %v40_v6  ;;  %v937_v13 = vld [vmem:[%s1624_s1] sm:$0xff]  ;;  %v52_v17 = vld [vmem:[%s1622_s2 + $0xb0] sm:$0xff]  ;;  %v65_v18 = vld [vmem:[%s1622_s2 + $0x118] sm:$0xff] }
   0x7   :  { %114 = vmatpush.msra.mxu1 %v41_v7  ;;  %160 = vmatpush.msra.mxu3 %v43_v8  ;;  %v62_v15 = vld [vmem:[%s1622_s2 + $0x100] sm:$0xff]  ;;  %v67_v20 = vld [vmem:[%s1622_s2 + $0x128] sm:$0xff]  ;;  %v44_v22 = vld [vmem:[%s1622_s2 + $0x70] sm:$0xff] }
   0x8   :  { %309 = vrot.lane.b32.xlu0 %v923_v9, %s850_s29  ;;  %92 = vmatpush.msra.mxu0 %v30_v10  ;;  %v54_v19 = vld [vmem:[%s1622_s2 + $0xc0] sm:$0xff]  ;;  %v55_v23 = vld [vmem:[%s1622_s2 + $0xc8] sm:$0xff]  ;;  %v32_v24 = vld [vmem:[%s1622_s2 + $0x10] sm:$0xff] }
   0x9   :  { %845 = vmatpush.msra.mxu2 %v30_v10  ;;  %115 = vmatpush.msra.mxu1 %v31_v11  ;;  %v42_v21 = vld [vmem:[%s1622_s2 + $0x60] sm:$0xff]  ;;  %v57_v25 = vld [vmem:[%s1622_s2 + $0xd8] sm:$0xff]  ;;  %v47_v29 = vld [vmem:[%s1622_s2 + $0x88] sm:$0xff] }
   0xa   :  { %161 = vmatpush.msra.mxu3 %v33_v12  ;;  %816 = vmatmul.msk.f32.vlgmr.msra.gmra.mxu0 %vm70_vm0, %v937_v13  ;;  %v34_v26 = vld [vmem:[%s1622_s2 + $0x20] sm:$0xff]  ;;  %v45_v28 = vld [vmem:[%s1622_s2 + $0x78] sm:$0xff]  ;;  %v56_v30 = vld [vmem:[%s1622_s2 + $0xd0] sm:$0xff] }
   0xb   :  { %817 = vmatmul.msk.f32.vlgmr.msra.gmra.mxu2 %vm70_vm0, %v944_v14  ;;  %818 = vmatmul.msk.f32.vlgmr.msra.gmra.mxu1 %vm70_vm0, %v937_v13  ;;  %v66_v27 = vld [vmem:[%s1622_s2 + $0x120] sm:$0xff]  ;;  %v1015_v31 = vld [vmem:[%s1623_s0 + $0x8] sm:$0xff]  ;;  %v37_v33 = vld [vmem:[%s1622_s2 + $0x38] sm:$0xff] }
   0xc   :  { %135 = vmatpush.msrb.mxu2 %v62_v15  ;;  %822 = vmatmul.msk.f32.vlgmr.msra.gmra.mxu3 %vm70_vm0, %v937_v13  ;;  %v35_v32 = vld [vmem:[%s1622_s2 + $0x28] sm:$0xff]  ;;  %v46_v34 = vld [vmem:[%s1622_s2 + $0x80] sm:$0xff]  ;;  %v68_v35 = vld [vmem:[%s1622_s2 + $0x130] sm:$0xff] }
   0xd   :  { %181 = vmatpush.msrb.mxu0 %v64_v16  ;;  %321 = vrot.lane.b32.xlu1 %v923_v9, %s851_s22  ;;  %v69_v36 = vld [vmem:[%s1622_s2 + $0x138] sm:$0xff]  ;;  %v58_v37 = vld [vmem:[%s1622_s2 + $0xe0] sm:$0xff]  ;;  %v36_v38 = vld [vmem:[%s1622_s2 + $0x30] sm:$0xff] }
   0xe   :  { %136 = vmatpush.msrb.mxu2 %v52_v17  ;;  %204 = vmatpush.msrb.mxu1 %v65_v18  ;;  %v48_v39 = vld [vmem:[%s1622_s2 + $0x90] sm:$0xff]  ;;  %v59_v40 = vld [vmem:[%s1622_s2 + $0xe8] sm:$0xff]  ;;  %v370_v41 = vld [vmem:[%s1625_s3 + $0x78] sm:$0xff] }
   0xf   :  { %182 = vmatpush.msrb.mxu0 %v54_v19  ;;  %250 = vmatpush.msrb.mxu3 %v67_v20  ;;  %v510_v42 = vld [vmem:[%s1626_s4 + $0x18] sm:$0xff]  ;;  %v38_v43 = vld [vmem:[%s1622_s2 + $0x40] sm:$0xff]  ;;  %v369_v45 = vld [vmem:[%s1625_s3 + $0x70] sm:$0xff] }
  0x10   :  { %137 = vmatpush.msrb.mxu2 %v42_v21  ;;  %315 = vrot.lane.b32.xlu0 %v923_v9, %s852_s9  ;;  %v49_v44 = vld [vmem:[%s1622_s2 + $0x98] sm:$0xff]  ;;  %v39_v47 = vld [vmem:[%s1622_s2 + $0x48] sm:$0xff]  ;;  %v367_v49 = vld [vmem:[%s1625_s3 + $0x60] sm:$0xff] }
  0x11   :  { %183 = vmatpush.msrb.mxu0 %v44_v22  ;;  %205 = vmatpush.msrb.mxu1 %v55_v23  ;;  %v386_v46 = vld [vmem:[%s1625_s3 + $0xf8] sm:$0xff]  ;;  %v368_v48 = vld [vmem:[%s1625_s3 + $0x68] sm:$0xff]  ;;  %v509_v50 = vld [vmem:[%s1626_s4 + $0x10] sm:$0xff] }
  0x12   :  { %138 = vmatpush.msrb.mxu2 %v32_v24  ;;  %251 = vmatpush.msrb.mxu3 %v57_v25  ;;  %v385_v51 = vld [vmem:[%s1625_s3 + $0xf0] sm:$0xff]  ;;  %v366_v52 = vld [vmem:[%s1625_s3 + $0x58] sm:$0xff]  ;;  %v508_v54 = vld [vmem:[%s1626_s4 + $0x8] sm:$0xff] }
  0x13   :  { %184 = vmatpush.msrb.mxu0 %v34_v26  ;;  %819 = vmatmul.msk.f32.gmra.mxu1 %vm70_vm0, %v944_v14  ;;  %v402_v53 = vld [vmem:[%s1625_s3 + $0x178] sm:$0xff]  ;;  %v384_v55 = vld [vmem:[%s1625_s3 + $0xe8] sm:$0xff]  ;;  %v365_v56 = vld [vmem:[%s1625_s3 + $0x50] sm:$0xff] }
  0x14   :  { %820 = vmatmul.msk.f32.vlgmr.msrb.gmra.mxu2 %vm70_vm0, %v937_v13  ;;  %823 = vmatmul.msk.f32.gmra.mxu3 %vm70_vm0, %v944_v14  ;;  %v401_v57 = vld [vmem:[%s1625_s3 + $0x170] sm:$0xff]  ;;  %v507_v58 = vld [vmem:[%s1626_s4] sm:$0xff]  ;;  %v364_v60 = vld [vmem:[%s1625_s3 + $0x48] sm:$0xff] }
  0x15   :  { %824 = vmatmul.msk.f32.vlgmr.msrb.gmra.mxu0 %vm70_vm0, %v937_v13  ;;  %227 = vmatpush.msra.mxu2 %v66_v27  ;;  %v383_v59 = vld [vmem:[%s1625_s3 + $0xe0] sm:$0xff]  ;;  %v382_v61 = vld [vmem:[%s1625_s3 + $0xd8] sm:$0xff]  ;;  %v381_v0 = vld [vmem:[%s1625_s3 + $0xd0] sm:$0xff] }
  0x16   :  { %206 = vmatpush.msrb.mxu1 %v45_v28  ;;  %252 = vmatpush.msrb.mxu3 %v47_v29  ;;  %v363_v62 = vld [vmem:[%s1625_s3 + $0x40] sm:$0xff]  ;;  %v418_v63 = vld [vmem:[%s1625_s3 + $0x1f8] sm:$0xff]  ;;  %v400_v2 = vld [vmem:[%s1625_s3 + $0x168] sm:$0xff] }
  0x17   :  { %228 = vmatpush.msra.mxu2 %v56_v30  ;;  %311 = vrot.lane.b32.xlu1 %v1015_v31, %s850_s29  ;;  %v362_v1 = vld [vmem:[%s1625_s3 + $0x38] sm:$0xff]  ;;  %v417_v3 = vld [vmem:[%s1625_s3 + $0x1f0] sm:$0xff]  ;;  %v380_v4 = vld [vmem:[%s1625_s3 + $0xc8] sm:$0xff] }
  0x18   :  { %207 = vmatpush.msrb.mxu1 %v35_v32  ;;  %253 = vmatpush.msrb.mxu3 %v37_v33  ;;  %v361_v5 = vld [vmem:[%s1625_s3 + $0x30] sm:$0xff]  ;;  %v399_v6 = vld [vmem:[%s1625_s3 + $0x160] sm:$0xff]  ;;  %v416_v7 = vld [vmem:[%s1625_s3 + $0x1e8] sm:$0xff] }
  0x19   :  { %229 = vmatpush.msra.mxu2 %v46_v34  ;;  %273 = vmatpush.msra.mxu0 %v68_v35  ;;  %v379_v8 = vld [vmem:[%s1625_s3 + $0xc0] sm:$0xff]  ;;  %v360_v10 = vld [vmem:[%s1625_s3 + $0x28] sm:$0xff]  ;;  %v378_v12 = vld [vmem:[%s1625_s3 + $0xb8] sm:$0xff] }
  0x1a   :  { %296 = vmatpush.msra.mxu1 %v69_v36  ;;  %317 = vrot.lane.b32.xlu2 %v1015_v31, %s852_s9  ;;  %v415_v11 = vld [vmem:[%s1625_s3 + $0x1e0] sm:$0xff]  ;;  %v398_v16 = vld [vmem:[%s1625_s3 + $0x158] sm:$0xff]  ;;  %v377_v18 = vld [vmem:[%s1625_s3 + $0xb0] sm:$0xff] }
  0x1b   :  { %826 = vmatmul.msk.f32.vlgmr.msrb.gmra.mxu1 %vm70_vm0, %v937_v13  ;;  %274 = vmatpush.msra.mxu0 %v58_v37  ;;  %v359_v15 = vld [vmem:[%s1625_s3 + $0x20] sm:$0xff]  ;;  %v414_v17 = vld [vmem:[%s1625_s3 + $0x1d8] sm:$0xff]  ;;  %v397_v20 = vld [vmem:[%s1625_s3 + $0x150] sm:$0xff] }
  0x1c   :  { %821 = vmatmul.msk.f32.gmra.mxu2 %vm70_vm0, %v944_v14  ;;  %830 = vmatmul.msk.f32.vlgmr.msrb.gmra.mxu3 %vm70_vm0, %v937_v13  ;;  %v358_v19 = vld [vmem:[%s1625_s3 + $0x18] sm:$0xff]  ;;  %v413_v21 = vld [vmem:[%s1625_s3 + $0x1d0] sm:$0xff]  ;;  %v376_v22 = vld [vmem:[%s1625_s3 + $0xa8] sm:$0xff] }
  0x1d   :  { %825 = vmatmul.msk.f32.gmra.mxu0 %vm70_vm0, %v944_v14  ;;  %230 = vmatpush.msra.mxu2 %v36_v38  ;;  %v357_v23 = vld [vmem:[%s1625_s3 + $0x10] sm:$0xff]  ;;  %v396_v24 = vld [vmem:[%s1625_s3 + $0x148] sm:$0xff]  ;;  %v375_v26 = vld [vmem:[%s1625_s3 + $0xa0] sm:$0xff] }
  0x1e   :  { %275 = vmatpush.msra.mxu0 %v48_v39  ;;  %297 = vmatpush.msra.mxu1 %v59_v40  ;;  %v412_v25 = vld [vmem:[%s1625_s3 + $0x1c8] sm:$0xff]  ;;  %v395_v28 = vld [vmem:[%s1625_s3 + $0x140] sm:$0xff]  ;;  %v374_v30 = vld [vmem:[%s1625_s3 + $0x98] sm:$0xff] }
  0x1f   :  { %544 = vmatpush.msra.mxu3 %v370_v41  ;;  %527 = vmatpush.msrb.mxu2 %v510_v42  ;;  %v356_v27 = vld [vmem:[%s1625_s3 + $0x8] sm:$0xff]  ;;  %v411_v29 = vld [vmem:[%s1625_s3 + $0x1c0] sm:$0xff]  ;;  %v394_v33 = vld [vmem:[%s1625_s3 + $0x138] sm:$0xff] }
  0x20   :  { %276 = vmatpush.msra.mxu0 %v38_v43  ;;  %298 = vmatpush.msra.mxu1 %v49_v44  ;;  %v355_v32 = vld [vmem:[%s1625_s3] sm:$0xff]  ;;  %v434_v34 = vld [vmem:[%s1625_s3 + $0x278] sm:$0xff]  ;;  %v373_v36 = vld [vmem:[%s1625_s3 + $0x90] sm:$0xff] }
  0x21   :  { %545 = vmatpush.msra.mxu3 %v369_v45  ;;  %528 = vmatpush.msrb.mxu2 %v509_v50  ;;  %v410_v35 = vld [vmem:[%s1625_s3 + $0x1b8] sm:$0xff]  ;;  %v433_v37 = vld [vmem:[%s1625_s3 + $0x270] sm:$0xff]  ;;  %v372_v39 = vld [vmem:[%s1625_s3 + $0x88] sm:$0xff] }
  0x22   :  { %567 = vmatpush.msrb.mxu0 %v386_v46  ;;  %299 = vmatpush.msra.mxu1 %v39_v47  ;;  %v409_v38 = vld [vmem:[%s1625_s3 + $0x1b0] sm:$0xff]  ;;  %v432_v40 = vld [vmem:[%s1625_s3 + $0x268] sm:$0xff]  ;;  %v371_v42 = vld [vmem:[%s1625_s3 + $0x80] sm:$0xff] }
  0x23   :  { %323 = vrot.lane.b32.xlu2 %v1015_v31, %s851_s22  ;;  %827 = vmatmul.msk.f32.gmra.mxu1 %vm70_vm0, %v944_v14  ;;  %v408_v41 = vld [vmem:[%s1625_s3 + $0x1a8] sm:$0xff]  ;;  %v431_v43 = vld [vmem:[%s1625_s3 + $0x260] sm:$0xff]  ;;  %v430_v45 = vld [vmem:[%s1625_s3 + $0x258] sm:$0xff] }
  0x24   :  { %546 = vmatpush.msra.mxu3 %v368_v48  ;;  %828 = vmatmul.msk.f32.vlgmr.msra.gmra.mxu2 %vm70_vm0, %v937_v13  ;;  %v407_v44 = vld [vmem:[%s1625_s3 + $0x1a0] sm:$0xff]  ;;  %v406_v46 = vld [vmem:[%s1625_s3 + $0x198] sm:$0xff]  ;;  %v429_v47 = vld [vmem:[%s1625_s3 + $0x250] sm:$0xff] }
  0x25   :  { %831 = vmatmul.msk.f32.gmra.mxu3 %vm70_vm0, %v944_v14  ;;  %832 = vmatmul.msk.f32.vlgmr.msra.gmra.mxu0 %vm70_vm0, %v937_v13  ;;  %v428_v48 = vld [vmem:[%s1625_s3 + $0x248] sm:$0xff]  ;;  %v450_v50 = vld [vmem:[%s1625_s3 + $0x2f8] sm:$0xff] }
  0x26   :  { %547 = vmatpush.msra.mxu3 %v367_v49  ;;  %568 = vmatpush.msrb.mxu0 %v385_v51  ;;  %v427_v49 = vld [vmem:[%s1625_s3 + $0x240] sm:$0xff]  ;;  %v393_v51 = vld [vmem:[%s1625_s3 + $0x130] sm:$0xff] }
  0x27   :  { %590 = vmatpush.msrb.mxu1 %v402_v53  ;;  %529 = vmatpush.msrb.mxu2 %v508_v54  ;;  %v426_v53 = vld [vmem:[%s1625_s3 + $0x238] sm:$0xff]  ;;  %v449_v54 = vld [vmem:[%s1625_s3 + $0x2f0] sm:$0xff] }
  0x28   :  { %548 = vmatpush.msra.mxu3 %v366_v52  ;;  %569 = vmatpush.msrb.mxu0 %v384_v55  ;;  %v405_v52 = vld [vmem:[%s1625_s3 + $0x190] sm:$0xff]  ;;  %v392_v55 = vld [vmem:[%s1625_s3 + $0x128] sm:$0xff] }
  0x29   :  { %591 = vmatpush.msrb.mxu1 %v401_v57  ;;  %530 = vmatpush.msrb.mxu2 %v507_v58  ;;  %v425_v57 = vld [vmem:[%s1625_s3 + $0x230] sm:$0xff]  ;;  %v448_v58 = vld [vmem:[%s1625_s3 + $0x2e8] sm:$0xff] }
  0x2a   :  { %549 = vmatpush.msra.mxu3 %v365_v56  ;;  %570 = vmatpush.msrb.mxu0 %v383_v59  ;;  %v404_v56 = vld [vmem:[%s1625_s3 + $0x188] sm:$0xff]  ;;  %v391_v59 = vld [vmem:[%s1625_s3 + $0x120] sm:$0xff] }
  0x2b   :  { %834 = vmatmul.msk.f32.vlgmr.msra.gmra.mxu1 %vm70_vm0, %v937_v13  ;;  %613 = vmatpush.msra.mxu2 %v418_v63  ;;  %v482_v63 = vld [vmem:[%s1625_s3 + $0x3f8] sm:$0xff] }
  0x2c   :  { %550 = vmatpush.msra.mxu3 %v364_v60  ;;  %829 = vmatmul.msk.f32.gmra.mxu2 %vm70_vm0, %v944_v14  ;;  %v403_v60 = vld [vmem:[%s1625_s3 + $0x180] sm:$0xff] }
  0x2d   :  { %571 = vmatpush.msrb.mxu0 %v382_v61  ;;  %592 = vmatpush.msrb.mxu1 %v400_v2  ;;  %v424_v61 = vld [vmem:[%s1625_s3 + $0x228] sm:$0xff]  ;;  %v446_v2 = vld [vmem:[%s1625_s3 + $0x2d8] sm:$0xff] }
  0x2e   :  { %833 = vmatmul.msk.f32.gmra.mxu0 %vm70_vm0, %v944_v14  ;;  %551 = vmatpush.msra.mxu3 %v363_v62  ;;  %v447_v62 = vld [vmem:[%s1625_s3 + $0x2e0] sm:$0xff] }
  0x2f   :  { %572 = vmatpush.msrb.mxu0 %v381_v0  ;;  %614 = vmatpush.msra.mxu2 %v417_v3  ;;  %v390_v0 = vld [vmem:[%s1625_s3 + $0x118] sm:$0xff]  ;;  %v481_v3 = vld [vmem:[%s1625_s3 + $0x3f0] sm:$0xff] }
  0x30   :  { %552 = vmatpush.msra.mxu3 %v362_v1  ;;  %593 = vmatpush.msrb.mxu1 %v399_v6  ;;  %v423_v1 = vld [vmem:[%s1625_s3 + $0x220] sm:$0xff]  ;;  %v445_v6 = vld [vmem:[%s1625_s3 + $0x2d0] sm:$0xff] }
  0x31   :  { %573 = vmatpush.msrb.mxu0 %v380_v4  ;;  %615 = vmatpush.msra.mxu2 %v416_v7  ;;  %v389_v4 = vld [vmem:[%s1625_s3 + $0x110] sm:$0xff]  ;;  %v480_v7 = vld [vmem:[%s1625_s3 + $0x3e8] sm:$0xff] }
  0x32   :  { %553 = vmatpush.msra.mxu3 %v361_v5  ;;  %594 = vmatpush.msrb.mxu1 %v398_v16  ;;  %v422_v5 = vld [vmem:[%s1625_s3 + $0x218] sm:$0xff]  ;;  %v420_v16 = vld [vmem:[%s1625_s3 + $0x208] sm:$0xff] }
  0x33   :  { %574 = vmatpush.msrb.mxu0 %v379_v8  ;;  %835 = vmatmul.msk.f32.gmra.mxu1 %vm70_vm0, %v944_v14  ;;  %v388_v8 = vld [vmem:[%s1625_s3 + $0x108] sm:$0xff] }
  0x34   :  { %554 = vmatpush.msra.mxu3 %v360_v10  ;;  %616 = vmatpush.msra.mxu2 %v415_v11  ;;  %v421_v10 = vld [vmem:[%s1625_s3 + $0x210] sm:$0xff]  ;;  %v444_v11 = vld [vmem:[%s1625_s3 + $0x2c8] sm:$0xff] }
  0x35   :  { %575 = vmatpush.msrb.mxu0 %v378_v12  ;;  %595 = vmatpush.msrb.mxu1 %v397_v20  ;;  %v479_v12 = vld [vmem:[%s1625_s3 + $0x3e0] sm:$0xff] }
  0x36   :  { %555 = vmatpush.msra.mxu3 %v359_v15  ;;  %617 = vmatpush.msra.mxu2 %v414_v17  ;;  %v387_v15 = vld [vmem:[%s1625_s3 + $0x100] sm:$0xff] }
  0x37   :  { %576 = vmatpush.msrb.mxu0 %v377_v18  ;;  %596 = vmatpush.msrb.mxu1 %v396_v24  ;;  %v443_v17 = vld [vmem:[%s1625_s3 + $0x2c0] sm:$0xff]  ;;  %v466_v18 = vld [vmem:[%s1625_s3 + $0x378] sm:$0xff]  ;;  %v441_v24 = vld [vmem:[%s1625_s3 + $0x2b0] sm:$0xff] }
  0x38   :  { %556 = vmatpush.msra.mxu3 %v358_v19  ;;  %618 = vmatpush.msra.mxu2 %v413_v21  ;;  %v478_v19 = vld [vmem:[%s1625_s3 + $0x3d8] sm:$0xff]  ;;  %v419_v20 = vld [vmem:[%s1625_s3 + $0x200] sm:$0xff] }
  0x39   :  { %577 = vmatpush.msrb.mxu0 %v376_v22  ;;  %597 = vmatpush.msrb.mxu1 %v395_v28  ;;  %v442_v21 = vld [vmem:[%s1625_s3 + $0x2b8] sm:$0xff]  ;;  %v465_v22 = vld [vmem:[%s1625_s3 + $0x370] sm:$0xff]  ;;  %v463_v28 = vld [vmem:[%s1625_s3 + $0x360] sm:$0xff] }
  0x3a   :  { %557 = vmatpush.msra.mxu3 %v357_v23  ;;  %619 = vmatpush.msra.mxu2 %v412_v25  ;;  %v477_v23 = vld [vmem:[%s1625_s3 + $0x3d0] sm:$0xff]  ;;  %v464_v25 = vld [vmem:[%s1625_s3 + $0x368] sm:$0xff] }
  0x3b   :  { %578 = vmatpush.msrb.mxu0 %v375_v26  ;;  %598 = vmatpush.msrb.mxu1 %v394_v33  ;;  %v476_v26 = vld [vmem:[%s1625_s3 + $0x3c8] sm:$0xff]  ;;  %v474_v33 = vld [vmem:[%s1625_s3 + $0x3b8] sm:$0xff] }
  0x3c   :  { %558 = vmatpush.msra.mxu3 %v356_v27  ;;  %620 = vmatpush.msra.mxu2 %v411_v29  ;;  %v440_v27 = vld [vmem:[%s1625_s3 + $0x2a8] sm:$0xff]  ;;  %v475_v29 = vld [vmem:[%s1625_s3 + $0x3c0] sm:$0xff] }
  0x3d   :  { %579 = vmatpush.msrb.mxu0 %v374_v30  ;;  %836 = vmatmul.msk.f32.vlgmr.msrb.gmra.mxu2 %vm70_vm0, %v923_v9  ;;  %v439_v30 = vld [vmem:[%s1625_s3 + $0x2a0] sm:$0xff] }
  0x3e   :  { %559 = vmatpush.msra.mxu3 %v355_v32  ;;  %621 = vmatpush.msra.mxu2 %v410_v35  ;;  %v462_v32 = vld [vmem:[%s1625_s3 + $0x358] sm:$0xff]  ;;  %v461_v35 = vld [vmem:[%s1625_s3 + $0x350] sm:$0xff] }
  0x3f   :  { %580 = vmatpush.msrb.mxu0 %v373_v36  ;;  %599 = vmatpush.msrb.mxu1 %v393_v51  ;;  %v473_v36 = vld [vmem:[%s1625_s3 + $0x3b0] sm:$0xff]  ;;  %v468_v51 = vld [vmem:[%s1625_s3 + $0x388] sm:$0xff] }
  0x40   :  { %636 = vmatpush.msrb.mxu3 %v434_v34  ;;  %622 = vmatpush.msra.mxu2 %v409_v38  ;;  %v438_v34 = vld [vmem:[%s1625_s3 + $0x298] sm:$0xff]  ;;  %v460_v38 = vld [vmem:[%s1625_s3 + $0x348] sm:$0xff] }
  0x41   :  { %581 = vmatpush.msrb.mxu0 %v372_v39  ;;  %600 = vmatpush.msrb.mxu1 %v392_v55  ;;  %v472_v39 = vld [vmem:[%s1625_s3 + $0x3a8] sm:$0xff]  ;;  %v467_v55 = vld [vmem:[%s1625_s3 + $0x380] sm:$0xff] }
  0x42   :  { %637 = vmatpush.msrb.mxu3 %v433_v37  ;;  %623 = vmatpush.msra.mxu2 %v408_v41  ;;  %v437_v37 = vld [vmem:[%s1625_s3 + $0x290] sm:$0xff]  ;;  %v459_v41 = vld [vmem:[%s1625_s3 + $0x340] sm:$0xff] }
  0x43   :  { %582 = vmatpush.msrb.mxu0 %v371_v42  ;;  %601 = vmatpush.msrb.mxu1 %v391_v59  ;;  %v471_v42 = vld [vmem:[%s1625_s3 + $0x3a0] sm:$0xff] }
  0x44   :  { %638 = vmatpush.msrb.mxu3 %v432_v40  ;;  %624 = vmatpush.msra.mxu2 %v407_v44  ;;  %v436_v40 = vld [vmem:[%s1625_s3 + $0x288] sm:$0xff]  ;;  %v435_v44 = vld [vmem:[%s1625_s3 + $0x280] sm:$0xff] }
  0x45   :  { %837 = vmatmul.msk.f32.gmra.mxu2 %vm70_vm0, %v1015_v31  ;;  %659 = vmatpush.msra.mxu0 %v450_v50  ;;  %v456_v50 = vld [vmem:[%s1625_s3 + $0x328] sm:$0xff] }
  0x46   :  { %639 = vmatpush.msrb.mxu3 %v431_v43  ;;  %625 = vmatpush.msra.mxu2 %v406_v46  ;;  %v470_v46 = vld [vmem:[%s1625_s3 + $0x398] sm:$0xff] }
  0x47   :  { %660 = vmatpush.msra.mxu0 %v449_v54  ;;  %602 = vmatpush.msrb.mxu1 %v390_v0  ;;  %v455_v54 = vld [vmem:[%s1625_s3 + $0x320] sm:$0xff]  ;;  %v498_v0 = vld [vmem:[%s1625_s3 + $0x478] sm:$0xff] }
  0x48   :  { %640 = vmatpush.msrb.mxu3 %v430_v45  ;;  %626 = vmatpush.msra.mxu2 %v405_v52  ;;  %v458_v45 = vld [vmem:[%s1625_s3 + $0x338] sm:$0xff] }
  0x49   :  { %661 = vmatpush.msra.mxu0 %v448_v58  ;;  %603 = vmatpush.msrb.mxu1 %v389_v4  ;;  %v453_v58 = vld [vmem:[%s1625_s3 + $0x310] sm:$0xff]  ;;  %v451_v4 = vld [vmem:[%s1625_s3 + $0x300] sm:$0xff] }
  0x4a   :  { %641 = vmatpush.msrb.mxu3 %v429_v47  ;;  %627 = vmatpush.msra.mxu2 %v404_v56  ;;  %v457_v47 = vld [vmem:[%s1625_s3 + $0x330] sm:$0xff] }
  0x4b   :  { %662 = vmatpush.msra.mxu0 %v447_v62  ;;  %604 = vmatpush.msrb.mxu1 %v388_v8 }
  0x4c   :  { %642 = vmatpush.msrb.mxu3 %v428_v48  ;;  %628 = vmatpush.msra.mxu2 %v403_v60  ;;  %v469_v48 = vld [vmem:[%s1625_s3 + $0x390] sm:$0xff] }
  0x4d   :  { %663 = vmatpush.msra.mxu0 %v446_v2  ;;  %605 = vmatpush.msrb.mxu1 %v387_v15 }
  0x4e   :  { %643 = vmatpush.msrb.mxu3 %v427_v49  ;;  %705 = vmatpush.msrb.mxu2 %v482_v63 }
  0x4f   :  { %664 = vmatpush.msra.mxu0 %v445_v6  ;;  %682 = vmatpush.msra.mxu1 %v466_v18 }
  0x50   :  { %644 = vmatpush.msrb.mxu3 %v426_v53  ;;  %706 = vmatpush.msrb.mxu2 %v481_v3  ;;  %v506_v3 = vld [vmem:[%s1625_s3 + $0x4b8] sm:$0xff] }
  0x51   :  { %665 = vmatpush.msra.mxu0 %v444_v11  ;;  %683 = vmatpush.msra.mxu1 %v465_v22 }
  0x52   :  { %645 = vmatpush.msrb.mxu3 %v425_v57  ;;  %707 = vmatpush.msrb.mxu2 %v480_v7  ;;  %v454_v57 = vld [vmem:[%s1625_s3 + $0x318] sm:$0xff]  ;;  %v497_v7 = vld [vmem:[%s1625_s3 + $0x470] sm:$0xff] }
  0x53   :  { %666 = vmatpush.msra.mxu0 %v443_v17  ;;  %684 = vmatpush.msra.mxu1 %v464_v25  ;;  %v493_v25 = vld [vmem:[%s1625_s3 + $0x450] sm:$0xff] }
  0x54   :  { %646 = vmatpush.msrb.mxu3 %v424_v61  ;;  %708 = vmatpush.msrb.mxu2 %v479_v12  ;;  %v452_v61 = vld [vmem:[%s1625_s3 + $0x308] sm:$0xff] }
  0x55   :  { %667 = vmatpush.msra.mxu0 %v442_v21  ;;  %685 = vmatpush.msra.mxu1 %v463_v28  ;;  %v504_v12 = vld [vmem:[%s1625_s3 + $0x4a8] sm:$0xff]  ;;  %v494_v21 = vld [vmem:[%s1625_s3 + $0x458] sm:$0xff]  ;;  %v501_v28 = vld [vmem:[%s1625_s3 + $0x490] sm:$0xff] }
  0x56   :  { %647 = vmatpush.msrb.mxu3 %v423_v1  ;;  %709 = vmatpush.msrb.mxu2 %v478_v19 }
  0x57   :  { %668 = vmatpush.msra.mxu0 %v441_v24  ;;  %686 = vmatpush.msra.mxu1 %v462_v32 }
  0x58   :  { %648 = vmatpush.msrb.mxu3 %v422_v5  ;;  %710 = vmatpush.msrb.mxu2 %v477_v23  ;;  %v503_v23 = vld [vmem:[%s1625_s3 + $0x4a0] sm:$0xff] }
  0x59   :  { %669 = vmatpush.msra.mxu0 %v440_v27  ;;  %687 = vmatpush.msra.mxu1 %v461_v35  ;;  %v492_v27 = vld [vmem:[%s1625_s3 + $0x448] sm:$0xff] }
  0x5a   :  { %649 = vmatpush.msrb.mxu3 %v421_v10  ;;  %711 = vmatpush.msrb.mxu2 %v476_v26  ;;  %v505_v10 = vld [vmem:[%s1625_s3 + $0x4b0] sm:$0xff]  ;;  %v502_v26 = vld [vmem:[%s1625_s3 + $0x498] sm:$0xff] }
  0x5b   :  { %670 = vmatpush.msra.mxu0 %v439_v30  ;;  %688 = vmatpush.msra.mxu1 %v460_v38  ;;  %v490_v38 = vld [vmem:[%s1625_s3 + $0x438] sm:$0xff] }
  0x5c   :  { %650 = vmatpush.msrb.mxu3 %v420_v16  ;;  %712 = vmatpush.msrb.mxu2 %v475_v29  ;;  %v495_v16 = vld [vmem:[%s1625_s3 + $0x460] sm:$0xff] }
  0x5d   :  { %671 = vmatpush.msra.mxu0 %v438_v34  ;;  %689 = vmatpush.msra.mxu1 %v459_v41  ;;  %v491_v29 = vld [vmem:[%s1625_s3 + $0x440] sm:$0xff] }
  0x5e   :  { %651 = vmatpush.msrb.mxu3 %v419_v20  ;;  %713 = vmatpush.msrb.mxu2 %v474_v33 }
  0x5f   :  { %672 = vmatpush.msra.mxu0 %v437_v37  ;;  %690 = vmatpush.msra.mxu1 %v458_v45  ;;  %v488_v45 = vld [vmem:[%s1625_s3 + $0x428] sm:$0xff] }
  0x60   :  { %714 = vmatpush.msrb.mxu2 %v473_v36 }
  0x61   :  { %673 = vmatpush.msra.mxu0 %v436_v40  ;;  %691 = vmatpush.msra.mxu1 %v457_v47  ;;  %v777_v40 = vld [vmem:[%s1627_s5 + $0x18] sm:$0xff] }
  0x62   :  { %715 = vmatpush.msrb.mxu2 %v472_v39  ;;  %v500_v39 = vld [vmem:[%s1625_s3 + $0x488] sm:$0xff] }
  0x63   :  { %674 = vmatpush.msra.mxu0 %v435_v44  ;;  %692 = vmatpush.msra.mxu1 %v456_v50  ;;  %v776_v44 = vld [vmem:[%s1627_s5 + $0x10] sm:$0xff] }
  0x64   :  { %716 = vmatpush.msrb.mxu2 %v471_v42  ;;  %v489_v42 = vld [vmem:[%s1625_s3 + $0x430] sm:$0xff] }
  0x65   :  { %693 = vmatpush.msra.mxu1 %v455_v54 }
  0x66   :  { %717 = vmatpush.msrb.mxu2 %v470_v46  ;;  %v775_v46 = vld [vmem:[%s1627_s5 + $0x8] sm:$0xff] }
  0x67   :  { %694 = vmatpush.msra.mxu1 %v454_v57  ;;  %v486_v57 = vld [vmem:[%s1625_s3 + $0x418] sm:$0xff] }
  0x68   :  { %718 = vmatpush.msrb.mxu2 %v469_v48 }
  0x69   :  { %695 = vmatpush.msra.mxu1 %v453_v58 }
  0x6a   :  { %719 = vmatpush.msrb.mxu2 %v468_v51 }
  0x6b   :  { %696 = vmatpush.msra.mxu1 %v452_v61 }
  0x6c   :  { %720 = vmatpush.msrb.mxu2 %v467_v55  ;;  %v774_v55 = vld [vmem:[%s1627_s5] sm:$0xff] }
  0x6d   :  { %697 = vmatpush.msra.mxu1 %v451_v4 }
  0x74   :  { %v318_v52 = vpop.permute.xlu2 %317 }
  0x7a   :  { %v310_v43 = vpop.permute.xlu0 %309 }
  0x7b   :  { %v1469_v53 = vsel %vm70_vm0, %v923_v9, %v310_v43  ;;  %v499_v43 = vld [vmem:[%s1625_s3 + $0x480] sm:$0xff] }
  0x7d   :  { %v324_v6 = vpop.permute.xlu2 %323 }
  0x7f   :  { %v322_v49 = vpop.permute.xlu1 %321 }
  0x82   :  { %v316_v56 = vpop.permute.xlu0 %315 }
  0x83   :  { %v330_v9 = vsel %vm329_vm1, %v1469_v53, %v316_v56 }
  0x84   :  { %v1486_v59 = vsel %vm332_vm2, %v330_v9, %v322_v49  ;;  %v485_v9 = vld [vmem:[%s1625_s3 + $0x410] sm:$0xff] }
  0x87   :  { %v94_v60 = vpop.f32.mrf.mxu0 }
  0x88   :  { %v335_v62 = vmul.f32 %v1486_v59, %v94_v60  ;;  %v117_v63 = vpop.f32.mrf.mxu1  ;;  %v484_v60 = vld [vmem:[%s1625_s3 + $0x408] sm:$0xff] }
  0x89   :  { %v336_v1 = vmul.f32 %v1486_v59, %v117_v63  ;;  %v312_v2 = vpop.permute.xlu1 %311 }
  0x8a   :  { %v1504_v5 = vsel %vm70_vm0, %v1015_v31, %v312_v2  ;;  %560 = vmatmul.f32.vlgmr.msra.gmra.mxu3 %v335_v62  ;;  %v496_v31 = vld [vmem:[%s1625_s3 + $0x468] sm:$0xff]  ;;  %v483_v2 = vld [vmem:[%s1625_s3 + $0x400] sm:$0xff] }
  0x8b   :  { %583 = vmatmul.f32.vlgmr.msrb.gmra.mxu0 %v336_v1  ;;  %v331_v8 = vsel %vm329_vm1, %v1504_v5, %v318_v52  ;;  %728 = vmatpush.msra.mxu3 %v498_v0  ;;  %v487_v52 = vld [vmem:[%s1625_s3 + $0x420] sm:$0xff] }
  0x8c   :  { %759 = vmatpush.msrb.mxu0 %v506_v3  ;;  %v1518_v11 = vsel %vm332_vm2, %v331_v8, %v324_v6 }
  0x8d   :  { %729 = vmatpush.msra.mxu3 %v497_v7 }
  0x8e   :  { %v97_v15 = vpop.f32.mrf.mxu2  ;;  %760 = vmatpush.msrb.mxu0 %v505_v10 }
  0x8f   :  { %v163_v17 = vpop.f32.mrf.mxu3  ;;  %730 = vmatpush.msra.mxu3 %v496_v31  ;;  %v345_v18 = vmul.f32 %v1518_v11, %v97_v15 }
  0x90   :  { %v338_v19 = vmul.f32 %v1486_v59, %v163_v17  ;;  %v120_v20 = vpop.f32.mrf.mxu1  ;;  %761 = vmatpush.msrb.mxu0 %v504_v12 }
  0x91   :  { %v346_v22 = vmul.f32 %v1518_v11, %v120_v20  ;;  %731 = vmatpush.msra.mxu3 %v495_v16 }
  0x92   :  { %v186_v24 = vpop.f32.mrf.mxu0  ;;  %629 = vmatmul.f32.vlgmr.msra.gmra.mxu2 %v338_v19  ;;  %563 = vmatmul.f32.gmra.mxu3 %v345_v18 }
  0x93   :  { %586 = vmatmul.f32.gmra.mxu0 %v346_v22  ;;  %732 = vmatpush.msra.mxu3 %v494_v21  ;;  %v339_v36 = vmul.f32 %v1486_v59, %v186_v24 }
  0x94   :  { %762 = vmatpush.msrb.mxu0 %v503_v23 }
  0x95   :  { %733 = vmatpush.msra.mxu3 %v493_v25 }
  0x96   :  { %763 = vmatpush.msrb.mxu0 %v502_v26 }
  0x97   :  { %v140_v30 = vpop.f32.mrf.mxu2  ;;  %v166_v32 = vpop.f32.mrf.mxu3  ;;  %734 = vmatpush.msra.mxu3 %v492_v27 }
  0x98   :  { %v337_v33 = vmul.f32 %v1486_v59, %v140_v30  ;;  %v348_v34 = vmul.f32 %v1518_v11, %v166_v32  ;;  %v209_v35 = vpop.f32.mrf.mxu1  ;;  %764 = vmatpush.msrb.mxu0 %v501_v28 }
  0x99   :  { %v340_v37 = vmul.f32 %v1486_v59, %v209_v35  ;;  %735 = vmatpush.msra.mxu3 %v491_v29 }
  0x9a   :  { %606 = vmatmul.f32.vlgmr.msrb.gmra.mxu1 %v337_v33  ;;  %632 = vmatmul.f32.gmra.mxu2 %v348_v34  ;;  %v189_v41 = vpop.f32.mrf.mxu0 }
  0x9b   :  { %652 = vmatmul.f32.vlgmr.msrb.gmra.mxu3 %v339_v36  ;;  %675 = vmatmul.f32.vlgmr.msra.gmra.mxu0 %v340_v37  ;;  %v349_v56 = vmul.f32 %v1518_v11, %v189_v41 }
  0x9c   :  { %736 = vmatpush.msra.mxu3 %v490_v38  ;;  %765 = vmatpush.msrb.mxu0 %v500_v39 }
  0x9d   :  { %790 = vmatpush.msrb.mxu1 %v777_v40 }
  0x9e   :  { %737 = vmatpush.msra.mxu3 %v489_v42  ;;  %766 = vmatpush.msrb.mxu0 %v499_v43 }
  0x9f   :  { %v143_v47 = vpop.f32.mrf.mxu2  ;;  %v255_v48 = vpop.f32.mrf.mxu3  ;;  %791 = vmatpush.msrb.mxu1 %v776_v44 }
  0xa0   :  { %v347_v49 = vmul.f32 %v1518_v11, %v143_v47  ;;  %v342_v50 = vmul.f32 %v1486_v59, %v255_v48  ;;  %v212_v51 = vpop.f32.mrf.mxu1  ;;  %738 = vmatpush.msra.mxu3 %v488_v45  ;;  %v849_v47 = vld [vmem:[%s1628_s6] ss:$0 sm:$0xff] }
  0xa1   :  { %v350_v54 = vmul.f32 %v1518_v11, %v212_v51  ;;  %792 = vmatpush.msrb.mxu1 %v775_v46 }
  0xa2   :  { %609 = vmatmul.f32.gmra.mxu1 %v347_v49  ;;  %721 = vmatmul.f32.vlgmr.msrb.gmra.mxu2 %v342_v50  ;;  %v278_v58 = vpop.f32.mrf.mxu0 }
  0xa3   :  { %739 = vmatpush.msra.mxu3 %v487_v52  ;;  %678 = vmatmul.f32.gmra.mxu0 %v350_v54  ;;  %v343_v4 = vmul.f32 %v1486_v59, %v278_v58 }
  0xa4   :  { %655 = vmatmul.f32.gmra.mxu3 %v349_v56  ;;  %793 = vmatpush.msrb.mxu1 %v774_v55 }
  0xa5   :  { %740 = vmatpush.msra.mxu3 %v486_v57 }
  0xa7   :  { %v232_v61 = vpop.f32.mrf.mxu2  ;;  %741 = vmatpush.msra.mxu3 %v485_v9 }
  0xa8   :  { %v258_v62 = vpop.f32.mrf.mxu3  ;;  %v341_v63 = vmul.f32 %v1486_v59, %v232_v61  ;;  %v301_v1 = vpop.f32.mrf.mxu1 }
  0xa9   :  { %v352_v0 = vmul.f32 %v1518_v11, %v258_v62  ;;  %v344_v3 = vmul.f32 %v1469_v53, %v301_v1  ;;  %742 = vmatpush.msra.mxu3 %v484_v60 }
  0xaa   :  { %698 = vmatmul.f32.vlgmr.msra.gmra.mxu1 %v341_v63 }
  0xab   :  { %724 = vmatmul.f32.gmra.mxu2 %v352_v0  ;;  %743 = vmatpush.msra.mxu3 %v483_v2  ;;  %v281_v6 = vpop.f32.mrf.mxu0 }
  0xac   :  { %838 = vmatmul.msk.f32.vlgmr.msrb.gmra.mxu0 %vm329_vm1, %v344_v3  ;;  %744 = vmatmul.f32.vlgmr.msra.gmra.mxu3 %v343_v4  ;;  %v353_v12 = vmul.f32 %v1518_v11, %v281_v6 }
  0xaf   :  { %v235_v7 = vpop.f32.mrf.mxu2 }
  0xb0   :  { %v351_v8 = vmul.f32 %v1518_v11, %v235_v7  ;;  %v304_v10 = vpop.f32.mrf.mxu1 }
  0xb1   :  { %v354_v31 = vmul.f32 %v1504_v5, %v304_v10 }
  0xb2   :  { %701 = vmatmul.f32.gmra.mxu1 %v351_v8 }
  0xb4   :  { %839 = vmatmul.msk.f32.gmra.mxu0 %vm329_vm1, %v354_v31  ;;  %747 = vmatmul.f32.gmra.mxu3 %v353_v12 }
  0xba   :  { %840 = vmatmul.msk.f32.vlgmr.msrb.gmra.mxu1 %vm70_vm0, %v937_v13 }
  0xc0   :  { %v532_v53 = vpop.f32.mrf.mxu2 }
  0xc2   :  { %841 = vmatmul.msk.f32.gmra.mxu1 %vm70_vm0, %v944_v14 }
  0xc8   :  { %v535_v16 = vpop.f32.mrf.mxu2 }
 0x108   :  { %v584_v59 = vpop.f32.mrf.mxu0 }
 0x10d   :  { %v561_v15 = vpop.f32.mrf.mxu3 }
 0x10e   :  { %v562_v20 = vadd.f32 %v561_v15, %v532_v53 }
 0x110   :  { %v587_v17 = vpop.f32.mrf.mxu0  ;;  %v585_v11 = vadd.f32 %v584_v59, %v562_v20 }
 0x115   :  { %v564_v18 = vpop.f32.mrf.mxu3  ;;  %v630_v5 = vpop.f32.mrf.mxu2 }
 0x116   :  { %v565_v25 = vadd.f32 %v564_v18, %v535_v16 }
 0x117   :  { %v607_v19 = vpop.f32.mrf.mxu1 }
 0x118   :  { %v676_v22 = vpop.f32.mrf.mxu0  ;;  %v608_v24 = vadd.f32 %v607_v19, %v585_v11  ;;  %v588_v27 = vadd.f32 %v587_v17, %v565_v25 }
 0x11a   :  { %v631_v13 = vadd.f32 %v630_v5, %v608_v24 }
 0x11d   :  { %v633_v26 = vpop.f32.mrf.mxu2 }
 0x11e   :  { %v653_v21 = vpop.f32.mrf.mxu3 }
 0x11f   :  { %v610_v23 = vpop.f32.mrf.mxu1  ;;  %v654_v28 = vadd.f32 %v653_v21, %v631_v13 }
 0x120   :  { %v611_v30 = vadd.f32 %v610_v23, %v588_v27  ;;  %v679_v32 = vpop.f32.mrf.mxu0 }
 0x121   :  { %v677_v33 = vadd.f32 %v676_v22, %v654_v28 }
 0x122   :  { %v634_v35 = vadd.f32 %v633_v26, %v611_v30 }
 0x125   :  { %v722_v34 = vpop.f32.mrf.mxu2 }
 0x127   :  { %v656_v14 = vpop.f32.mrf.mxu3  ;;  %v699_v29 = vpop.f32.mrf.mxu1 }
 0x128   :  { %v700_v36 = vadd.f32 %v699_v29, %v677_v33  ;;  %v657_v37 = vadd.f32 %v656_v14, %v634_v35 }
 0x129   :  { %v768_v43 = vpop.f32.mrf.mxu0 }
 0x12a   :  { %v723_v40 = vadd.f32 %v722_v34, %v700_v36  ;;  %v680_v41 = vadd.f32 %v679_v32, %v657_v37 }
 0x12e   :  { %v725_v45 = vpop.f32.mrf.mxu2 }
 0x12f   :  { %v702_v38 = vpop.f32.mrf.mxu1  ;;  %v745_v39 = vpop.f32.mrf.mxu3 }
 0x130   :  { %v746_v42 = vadd.f32 %v745_v39, %v723_v40  ;;  %v703_v44 = vadd.f32 %v702_v38, %v680_v41 }
 0x131   :  { %v771_v55 = vpop.f32.mrf.mxu0 }
 0x132   :  { %v769_v46 = vadd.f32 %v768_v43, %v746_v42  ;;  %v726_v50 = vadd.f32 %v725_v45, %v703_v44 }
 0x137   :  { %v748_v48 = vpop.f32.mrf.mxu3  ;;  %v795_v49 = vpop.f32.mrf.mxu1 }
 0x138   :  { %v801_v51 = vadd.f32 %v795_v49, %v769_v46  ;;  %v749_v52 = vadd.f32 %v748_v48, %v726_v50 }
 0x13a   :  { %v807_v54 = vadd.f32 %v849_v47, %v801_v51  ;;  %v772_v56 = vadd.f32 %v771_v55, %v749_v52 }
 0x13c   :  { %810 = vst.msk [vmem:[%s1629_s7] sm:$0xff] %vm809_vm3, %v807_v54 }
 0x13f   :  { %v798_v57 = vpop.f32.mrf.mxu1 }
 0x140   :  { %v802_v9 = vadd.f32 %v798_v57, %v772_v56 }
 0x142   :  { %v808_v58 = vadd.f32 %v849_v47, %v802_v9 }
 0x144   :  { %811 = vst.msk [vmem:[%s1629_s7 + $0x8] sm:$0xff] %vm809_vm3, %v808_v58 }

</bundles_post_ra>
